<compile_context>
chip_gen: v5e
topology: v5e:2x2
jax: 0.10.0
libtpu: 0.0.40
codegen_flags: <defaults>
</compile_context>

<pallas_src>
import functools

import jax
import jax.numpy as jnp
from jax import lax
from jax.experimental import pallas as pl
from jax.experimental.pallas import tpu as pltpu

LANE = 128  # channel / output lane padding


# ---------------------------------------------------------------------------
# Fused whole-network kernel (one image per grid step)
# ---------------------------------------------------------------------------
def _simple_cnn_kernel(patches_ref,            # (896, 80)  conv1 im2col, rows = (blk, ph, pw)
                       w1_ref, b1_ref,         # (80, 128), (1, 128)
                       w2_ref, b2_ref,         # (3200, 128) rows = kh*640+kw*128+ic, (1, 128)
                       w1f_ref, b1f_ref,       # (3200, 128) rows = ph*640+pw*128+c,  (1, 128)
                       w2f_ref, b2f_ref,       # (128, 128), (1, 128)
                       w3f_ref, b3f_ref,       # (128, 128), (1, 128)
                       o_ref,                  # (8, 128) logits broadcast over sublanes
                       s1_ref):                # VMEM scratch (14, 24, 128): pooled conv1 act
    f32 = jnp.float32

    # ---- conv1: one dense-K GEMM per pool-window member, fused bias+ReLU+2x2 max ----
    b1 = b1_ref[...]                                         # (1, 128)
    w1 = w1_ref[...]                                         # (80, 128)
    p1 = None
    for blk in range(4):                                     # blk = 2*i + j of the 2x2 window
        lhs = patches_ref[pl.ds(blk * 224, 224), :]          # (224, 80), rows = ph*16 + pw
        o = jnp.dot(lhs, w1, preferred_element_type=f32)     # (224, 128)
        o = jnp.maximum(o + b1, 0.0)
        p1 = o if p1 is None else jnp.maximum(p1, o)
    # p1: (224, 128), rows = ph*16 + pw  ->  pooled conv1 activation (14, 16, 128)
    p1 = p1.reshape(14, 16, 128)
    s1_ref[:, pl.ds(0, 16), :] = p1                          # real columns (pw < 14 valid)
    s1_ref[:, pl.ds(16, 8), :] = jnp.zeros((14, 8, 128), f32)  # zero pad for conv2 window

    # ---- conv2: 5 GEMMs (one per kh), kw & input channels folded into the lanes ----
    acc = jnp.zeros((160, 128), f32)                         # rows = oh2*16 + ow2
    for kh in range(5):
        pieces = [
            s1_ref[pl.ds(kh, 10), pl.ds(kw, 16), :].reshape(160, 128)
            for kw in range(5)
        ]
        lhs = jnp.concatenate(pieces, axis=1)                # (160, 640), lane = kw*128 + ic
        acc = acc + jnp.dot(lhs, w2_ref[pl.ds(kh * 640, 640), :],
                            preferred_element_type=f32)
    m2 = jnp.maximum(acc + b2_ref[...], 0.0)                 # (160, 128), ReLU'd conv2

    # ---- conv2 2x2 max-pool fused with fc1 (5 accumulated (1,640)@(640,128) dots) ----
    fc1 = b1f_ref[...]                                       # (1, 128)
    for ph2 in range(5):
        v = jnp.maximum(m2[32 * ph2:32 * ph2 + 16, :],
                        m2[32 * ph2 + 16:32 * ph2 + 32, :])  # vertical max, rows = ow2
        row = jnp.concatenate(
            [jnp.maximum(v[2 * p:2 * p + 1, :], v[2 * p + 1:2 * p + 2, :])
             for p in range(5)],
            axis=1)                                          # (1, 640), lane = pw2*128 + c
        fc1 = fc1 + jnp.dot(row, w1f_ref[pl.ds(ph2 * 640, 640), :],
                            preferred_element_type=f32)

    # ---- fc2 / fc3 head ----
    h = jnp.maximum(fc1, 0.0)
    h = jnp.maximum(jnp.dot(h, w2f_ref[...], preferred_element_type=f32) + b2f_ref[...], 0.0)
    logits = jnp.dot(h, w3f_ref[...], preferred_element_type=f32) + b3f_ref[...]
    o_ref[...] = jnp.broadcast_to(logits, (8, 128))          # lane-dense (8,128) store


def fused_simple_cnn(patches, packed):
    """patches: (B, 896, 80) conv1 im2col; returns (B, 8, 128) padded logits tile."""
    B = patches.shape[0]
    full2d = lambda shape: pl.BlockSpec(shape, lambda b: (0, 0))
    return pl.pallas_call(
        _simple_cnn_kernel,
        out_shape=jax.ShapeDtypeStruct((B, 8, 128), jnp.float32),
        grid=(B,),
        in_specs=[
            pl.BlockSpec((None, 896, 80), lambda b: (b, 0, 0)),   # per-image patch slab
            full2d((80, 128)), full2d((1, 128)),                  # conv1 w, b
            full2d((3200, 128)), full2d((1, 128)),                # conv2 w, b
            full2d((3200, 128)), full2d((1, 128)),                # fc1 w, b
            full2d((128, 128)), full2d((1, 128)),                 # fc2 w, b
            full2d((128, 128)), full2d((1, 128)),                 # fc3 w, b
        ],
        out_specs=pl.BlockSpec((None, 8, 128), lambda b: (b, 0, 0)),
        scratch_shapes=[pltpu.VMEM((14, 24, 128), jnp.float32)],
        compiler_params=pltpu.CompilerParams(
            dimension_semantics=("parallel",),
            vmem_limit_bytes=32 * 1024 * 1024,
        ),
    )(patches,
      packed["conv1_w"], packed["conv1_b"],
      packed["conv2_w"], packed["conv2_b"],
      packed["fc1_w"], packed["fc1_b"],
      packed["fc2_w"], packed["fc2_b"],
      packed["fc3_w"], packed["fc3_b"])


# ---------------------------------------------------------------------------
# Wrapper-side layout plumbing (data movement only, no arithmetic)
# ---------------------------------------------------------------------------
def build_conv1_patches(x_nchw):
    """(B,3,32,32) NCHW -> (B, 896, 80) im2col slab, rows ordered (pool-member, ph, pw)."""
    B = x_nchw.shape[0]
    x = jnp.transpose(x_nchw, (0, 2, 3, 1))                 # (B, 32, 32, 3) NHWC
    x = jnp.pad(x, ((0, 0), (0, 0), (0, 4), (0, 0)))        # pad W 32->36 for dummy cols
    taps = [x[:, kh:kh + 28, kw:kw + 32, :] for kh in range(5) for kw in range(5)]
    p = jnp.stack(taps, axis=3)                             # (B, 28, 32, 25, 3)
    p = p.reshape(B, 28, 32, 75)                            # patch vector order (kh, kw, ic)
    p = p.reshape(B, 14, 2, 16, 2, 75)                      # oh = 2*ph+i, ow = 2*pw+j
    p = jnp.transpose(p, (0, 2, 4, 1, 3, 5))                # (B, i, j, ph, pw, 75)
    p = p.reshape(B, 896, 75)                               # row = (2i+j)*224 + ph*16 + pw
    return jnp.pad(p, ((0, 0), (0, 0), (0, 5)))             # K 75 -> 80 (sublane-friendly)


def pack_params(p):
    """One-time packing: all transposes / permutations / zero-pads hoisted out of the fwd."""
    def pad_to(a, shape):
        return jnp.pad(a, [(0, t - s) for s, t in zip(a.shape, shape)])

    # conv1: torch (6,3,5,5) -> rows (kh,kw,ic) padded 75->80, cols oc padded 6->128
    w1 = jnp.transpose(p["conv1_w"], (2, 3, 1, 0)).reshape(75, 6)
    w1 = pad_to(w1, (80, LANE))
    b1 = pad_to(p["conv1_b"].reshape(1, 6), (1, LANE))

    # conv2: torch (16,6,5,5) -> (kh,kw,ic,oc) padded -> (3200,128), row = kh*640+kw*128+ic
    w2 = jnp.transpose(p["conv2_w"], (2, 3, 1, 0))          # (5,5,6,16)
    w2 = pad_to(w2, (5, 5, LANE, LANE)).reshape(5 * 5 * LANE, LANE)
    b2 = pad_to(p["conv2_b"].reshape(1, 16), (1, LANE))

    # fc1: torch (120, 400) with input index c*25 + ph*5 + pw (NCHW flatten). Permute so
    # row = ph*640 + pw*128 + c matches the kernel's pooled-row lane layout exactly.
    f1 = p["fc1_w"].reshape(120, 16, 5, 5)                  # (u, c, ph, pw)
    f1 = jnp.transpose(f1, (2, 3, 1, 0))                    # (ph, pw, c, u)
    f1 = pad_to(f1, (5, 5, LANE, LANE)).reshape(5 * 5 * LANE, LANE)
    fb1 = pad_to(p["fc1_b"].reshape(1, 120), (1, LANE))

    f2 = pad_to(p["fc2_w"].T, (LANE, LANE))                 # (120,84) -> (128,128)
    fb2 = pad_to(p["fc2_b"].reshape(1, 84), (1, LANE))
    f3 = pad_to(p["fc3_w"].T, (LANE, LANE))                 # (84,10) -> (128,128)
    fb3 = pad_to(p["fc3_b"].reshape(1, 10), (1, LANE))

    return {"conv1_w": w1, "conv1_b": b1, "conv2_w": w2, "conv2_b": b2,
            "fc1_w": f1, "fc1_b": fb1, "fc2_w": f2, "fc2_b": fb2,
            "fc3_w": f3, "fc3_b": fb3}


# ---------------------------------------------------------------------------
# SimpleCNN forward
# ---------------------------------------------------------------------------
def simple_cnn_forward(packed, x_nchw):
    patches = build_conv1_patches(x_nchw)                   # (B, 896, 80)
    out = fused_simple_cnn(patches, packed)                 # (B, 8, 128)
    return out[:, 0, :10]


def init_params(key):
    """Deterministic init mimicking PyTorch's default U(-1/sqrt(fan_in), 1/sqrt(fan_in))."""
    keys = jax.random.split(key, 10)

    def u(k, shape, fan_in):
        bound = 1.0 / jnp.sqrt(jnp.float32(fan_in))
        return jax.random.uniform(k, shape, jnp.float32, -bound, bound)

    return {
        "conv1_w": u(keys[0], (6, 3, 5, 5), 3 * 5 * 5),
        "conv1_b": u(keys[1], (6,), 3 * 5 * 5),
        "conv2_w": u(keys[2], (16, 6, 5, 5), 6 * 5 * 5),
        "conv2_b": u(keys[3], (16,), 6 * 5 * 5),
        "fc1_w":   u(keys[4], (120, 400), 400),
        "fc1_b":   u(keys[5], (120,), 400),
        "fc2_w":   u(keys[6], (84, 120), 120),
        "fc2_b":   u(keys[7], (84,), 120),
        "fc3_w":   u(keys[8], (10, 84), 84),
        "fc3_b":   u(keys[9], (10,), 84),
    }


def reference_forward(params, x):
    """Pure-JAX/XLA reference with PyTorch semantics (correctness check)."""
    dn = ("NCHW", "OIHW", "NCHW")
    y = lax.conv_general_dilated(x, params["conv1_w"], (1, 1), "VALID", dimension_numbers=dn)
    y = jax.nn.relu(y + params["conv1_b"][None, :, None, None])
    y = lax.reduce_window(y, -jnp.inf, lax.max, (1, 1, 2, 2), (1, 1, 2, 2), "VALID")
    y = lax.conv_general_dilated(y, params["conv2_w"], (1, 1), "VALID", dimension_numbers=dn)
    y = jax.nn.relu(y + params["conv2_b"][None, :, None, None])
    y = lax.reduce_window(y, -jnp.inf, lax.max, (1, 1, 2, 2), (1, 1, 2, 2), "VALID")
    y = y.reshape(y.shape[0], -1)
    y = jax.nn.relu(y @ params["fc1_w"].T + params["fc1_b"])
    y = jax.nn.relu(y @ params["fc2_w"].T + params["fc2_b"])
    return y @ params["fc3_w"].T + params["fc3_b"]


if __name__ == "__main__":
    key = jax.random.PRNGKey(0)
    pkey, xkey = jax.random.split(key)
    params = init_params(pkey)
    packed = pack_params(params)          # one-time packing, outside the jitted forward

    # CIFAR10-shaped input (32x32 is required by the 16*5*5 flatten), small batch.
    x = jax.random.normal(xkey, (2, 3, 32, 32), jnp.float32)

    fwd = jax.jit(simple_cnn_forward)
    out = fwd(packed, x)
    jax.block_until_ready(out)

    assert out.shape == (2, 10), out.shape
    assert out.dtype == jnp.float32

    ref = reference_forward(params, x)
    assert jnp.allclose(out, ref, atol=2e-2, rtol=2e-2), float(jnp.max(jnp.abs(out - ref)))

    print("KERNEL_OK")
</pallas_src>

<mosaic_0001>
module attributes {stable_mosaic.version = 11 : i64} {
  func.func @_simple_cnn_kernel(%arg0: i32, %arg1: memref<1x896x80xf32, #tpu.memory_space<vmem>>, %arg2: memref<80x128xf32, #tpu.memory_space<vmem>>, %arg3: memref<1x128xf32, #tpu.memory_space<vmem>>, %arg4: memref<3200x128xf32, #tpu.memory_space<vmem>>, %arg5: memref<1x128xf32, #tpu.memory_space<vmem>>, %arg6: memref<3200x128xf32, #tpu.memory_space<vmem>>, %arg7: memref<1x128xf32, #tpu.memory_space<vmem>>, %arg8: memref<128x128xf32, #tpu.memory_space<vmem>>, %arg9: memref<1x128xf32, #tpu.memory_space<vmem>>, %arg10: memref<128x128xf32, #tpu.memory_space<vmem>>, %arg11: memref<1x128xf32, #tpu.memory_space<vmem>>, %arg12: memref<1x8x128xf32, #tpu.memory_space<vmem>>, %arg13: memref<14x24x128xf32, #tpu.memory_space<vmem>>) attributes {dimension_semantics = [#tpu.dimension_semantics<parallel>], iteration_bounds = array<i64: 2>, scalar_prefetch = 0 : i64, scratch_operands = 1 : i64, tpu.core_type = #tpu.core_type<tc>, window_params = [{transform_indices = @transform_0, window_bounds = array<i64: 1, 896, 80>}, {pipeline_mode = #tpu.pipeline_mode<synchronous>, transform_indices = @transform_1, window_bounds = array<i64: 80, 128>}, {pipeline_mode = #tpu.pipeline_mode<synchronous>, transform_indices = @transform_2, window_bounds = array<i64: 1, 128>}, {pipeline_mode = #tpu.pipeline_mode<synchronous>, transform_indices = @transform_3, window_bounds = array<i64: 3200, 128>}, {pipeline_mode = #tpu.pipeline_mode<synchronous>, transform_indices = @transform_4, window_bounds = array<i64: 1, 128>}, {pipeline_mode = #tpu.pipeline_mode<synchronous>, transform_indices = @transform_5, window_bounds = array<i64: 3200, 128>}, {pipeline_mode = #tpu.pipeline_mode<synchronous>, transform_indices = @transform_6, window_bounds = array<i64: 1, 128>}, {pipeline_mode = #tpu.pipeline_mode<synchronous>, transform_indices = @transform_7, window_bounds = array<i64: 128, 128>}, {pipeline_mode = #tpu.pipeline_mode<synchronous>, transform_indices = @transform_8, window_bounds = array<i64: 1, 128>}, {pipeline_mode = #tpu.pipeline_mode<synchronous>, transform_indices = @transform_9, window_bounds = array<i64: 128, 128>}, {pipeline_mode = #tpu.pipeline_mode<synchronous>, transform_indices = @transform_10, window_bounds = array<i64: 1, 128>}, {transform_indices = @transform_11, window_bounds = array<i64: 1, 8, 128>}]} {
    %c0 = arith.constant 0 : index
    %c0_0 = arith.constant 0 : index
    %0 = vector.load %arg3[%c0, %c0_0] : memref<1x128xf32, #tpu.memory_space<vmem>>, vector<1x128xf32>
    %c0_1 = arith.constant 0 : index
    %c0_2 = arith.constant 0 : index
    %1 = vector.load %arg2[%c0_1, %c0_2] : memref<80x128xf32, #tpu.memory_space<vmem>>, vector<80x128xf32>
    %c0_3 = arith.constant 0 : index
    %c0_4 = arith.constant 0 : index
    %c0_5 = arith.constant 0 : index
    %2 = vector.load %arg1[%c0_3, %c0_4, %c0_5] : memref<1x896x80xf32, #tpu.memory_space<vmem>>, vector<1x224x80xf32>
    %3 = vector.shape_cast %2 : vector<1x224x80xf32> to vector<224x80xf32>
    %cst = arith.constant dense<0.000000e+00> : vector<224x128xf32>
    %4 = tpu.matmul %3, %1, %cst {dimension_numbers = #tpu.dot_dimension_numbers<[1], [0], [0], [1], [0, 0, 1, 1], [], []>} : vector<224x80xf32>, vector<80x128xf32>, vector<224x128xf32> -> vector<224x128xf32>
    %5 = vector.broadcast %0 : vector<1x128xf32> to vector<224x128xf32>
    %6 = arith.addf %4, %5 : vector<224x128xf32>
    %cst_6 = arith.constant 0.000000e+00 : f32
    %7 = vector.broadcast %cst_6 : f32 to vector<224x128xf32>
    %8 = arith.maximumf %6, %7 : vector<224x128xf32>
    %c0_7 = arith.constant 0 : index
    %c224 = arith.constant 224 : index
    %c0_8 = arith.constant 0 : index
    %9 = vector.load %arg1[%c0_7, %c224, %c0_8] : memref<1x896x80xf32, #tpu.memory_space<vmem>>, vector<1x224x80xf32>
    %10 = vector.shape_cast %9 : vector<1x224x80xf32> to vector<224x80xf32>
    %cst_9 = arith.constant dense<0.000000e+00> : vector<224x128xf32>
    %11 = tpu.matmul %10, %1, %cst_9 {dimension_numbers = #tpu.dot_dimension_numbers<[1], [0], [0], [1], [0, 0, 1, 1], [], []>} : vector<224x80xf32>, vector<80x128xf32>, vector<224x128xf32> -> vector<224x128xf32>
    %12 = vector.broadcast %0 : vector<1x128xf32> to vector<224x128xf32>
    %13 = arith.addf %11, %12 : vector<224x128xf32>
    %cst_10 = arith.constant 0.000000e+00 : f32
    %14 = vector.broadcast %cst_10 : f32 to vector<224x128xf32>
    %15 = arith.maximumf %13, %14 : vector<224x128xf32>
    %16 = arith.maximumf %8, %15 : vector<224x128xf32>
    %c0_11 = arith.constant 0 : index
    %c448 = arith.constant 448 : index
    %c0_12 = arith.constant 0 : index
    %17 = vector.load %arg1[%c0_11, %c448, %c0_12] : memref<1x896x80xf32, #tpu.memory_space<vmem>>, vector<1x224x80xf32>
    %18 = vector.shape_cast %17 : vector<1x224x80xf32> to vector<224x80xf32>
    %cst_13 = arith.constant dense<0.000000e+00> : vector<224x128xf32>
    %19 = tpu.matmul %18, %1, %cst_13 {dimension_numbers = #tpu.dot_dimension_numbers<[1], [0], [0], [1], [0, 0, 1, 1], [], []>} : vector<224x80xf32>, vector<80x128xf32>, vector<224x128xf32> -> vector<224x128xf32>
    %20 = vector.broadcast %0 : vector<1x128xf32> to vector<224x128xf32>
    %21 = arith.addf %19, %20 : vector<224x128xf32>
    %cst_14 = arith.constant 0.000000e+00 : f32
    %22 = vector.broadcast %cst_14 : f32 to vector<224x128xf32>
    %23 = arith.maximumf %21, %22 : vector<224x128xf32>
    %24 = arith.maximumf %16, %23 : vector<224x128xf32>
    %c0_15 = arith.constant 0 : index
    %c672 = arith.constant 672 : index
    %c0_16 = arith.constant 0 : index
    %25 = vector.load %arg1[%c0_15, %c672, %c0_16] : memref<1x896x80xf32, #tpu.memory_space<vmem>>, vector<1x224x80xf32>
    %26 = vector.shape_cast %25 : vector<1x224x80xf32> to vector<224x80xf32>
    %cst_17 = arith.constant dense<0.000000e+00> : vector<224x128xf32>
    %27 = tpu.matmul %26, %1, %cst_17 {dimension_numbers = #tpu.dot_dimension_numbers<[1], [0], [0], [1], [0, 0, 1, 1], [], []>} : vector<224x80xf32>, vector<80x128xf32>, vector<224x128xf32> -> vector<224x128xf32>
    %28 = vector.broadcast %0 : vector<1x128xf32> to vector<224x128xf32>
    %29 = arith.addf %27, %28 : vector<224x128xf32>
    %cst_18 = arith.constant 0.000000e+00 : f32
    %30 = vector.broadcast %cst_18 : f32 to vector<224x128xf32>
    %31 = arith.maximumf %29, %30 : vector<224x128xf32>
    %32 = arith.maximumf %24, %31 : vector<224x128xf32>
    %33 = vector.shape_cast %32 : vector<224x128xf32> to vector<14x16x128xf32>
    %c0_19 = arith.constant 0 : index
    %c0_20 = arith.constant 0 : index
    %c0_21 = arith.constant 0 : index
    %34 = vector.load %arg13[%c0_19, %c0_20, %c0_21] : memref<14x24x128xf32, #tpu.memory_space<vmem>>, vector<14x16x128xf32>
    tpu.vector_store %arg13[%c0_19, %c0_20, %c0_21], %33 {strides = array<i32>} : memref<14x24x128xf32, #tpu.memory_space<vmem>>, vector<14x16x128xf32>,
    %cst_22 = arith.constant 0.000000e+00 : f32
    %35 = vector.broadcast %cst_22 : f32 to vector<14x8x128xf32>
    %c0_23 = arith.constant 0 : index
    %c16 = arith.constant 16 : index
    %c0_24 = arith.constant 0 : index
    %36 = vector.load %arg13[%c0_23, %c16, %c0_24] : memref<14x24x128xf32, #tpu.memory_space<vmem>>, vector<14x8x128xf32>
    tpu.vector_store %arg13[%c0_23, %c16, %c0_24], %35 {strides = array<i32>} : memref<14x24x128xf32, #tpu.memory_space<vmem>>, vector<14x8x128xf32>,
    %cst_25 = arith.constant 0.000000e+00 : f32
    %37 = vector.broadcast %cst_25 : f32 to vector<160x128xf32>
    %c0_26 = arith.constant 0 : index
    %c0_27 = arith.constant 0 : index
    %c0_28 = arith.constant 0 : index
    %38 = vector.load %arg13[%c0_26, %c0_27, %c0_28] : memref<14x24x128xf32, #tpu.memory_space<vmem>>, vector<10x16x128xf32>
    %39 = vector.shape_cast %38 : vector<10x16x128xf32> to vector<160x128xf32>
    %c0_29 = arith.constant 0 : index
    %c1 = arith.constant 1 : index
    %c0_30 = arith.constant 0 : index
    %40 = vector.load %arg13[%c0_29, %c1, %c0_30] : memref<14x24x128xf32, #tpu.memory_space<vmem>>, vector<10x16x128xf32>
    %41 = vector.shape_cast %40 : vector<10x16x128xf32> to vector<160x128xf32>
    %c0_31 = arith.constant 0 : index
    %c2 = arith.constant 2 : index
    %c0_32 = arith.constant 0 : index
    %42 = vector.load %arg13[%c0_31, %c2, %c0_32] : memref<14x24x128xf32, #tpu.memory_space<vmem>>, vector<10x16x128xf32>
    %43 = vector.shape_cast %42 : vector<10x16x128xf32> to vector<160x128xf32>
    %c0_33 = arith.constant 0 : index
    %c3 = arith.constant 3 : index
    %c0_34 = arith.constant 0 : index
    %44 = vector.load %arg13[%c0_33, %c3, %c0_34] : memref<14x24x128xf32, #tpu.memory_space<vmem>>, vector<10x16x128xf32>
    %45 = vector.shape_cast %44 : vector<10x16x128xf32> to vector<160x128xf32>
    %c0_35 = arith.constant 0 : index
    %c4 = arith.constant 4 : index
    %c0_36 = arith.constant 0 : index
    %46 = vector.load %arg13[%c0_35, %c4, %c0_36] : memref<14x24x128xf32, #tpu.memory_space<vmem>>, vector<10x16x128xf32>
    %47 = vector.shape_cast %46 : vector<10x16x128xf32> to vector<160x128xf32>
    %48 = tpu.concatenate %39, %41, %43, %45, %47 in 1 : vector<160x128xf32>, vector<160x128xf32>, vector<160x128xf32>, vector<160x128xf32>, vector<160x128xf32> -> vector<160x640xf32>
    %c0_37 = arith.constant 0 : index
    %c0_38 = arith.constant 0 : index
    %49 = vector.load %arg4[%c0_37, %c0_38] : memref<3200x128xf32, #tpu.memory_space<vmem>>, vector<640x128xf32>
    %cst_39 = arith.constant dense<0.000000e+00> : vector<160x128xf32>
    %50 = tpu.matmul %48, %49, %cst_39 {dimension_numbers = #tpu.dot_dimension_numbers<[1], [0], [0], [1], [0, 0, 1, 1], [], []>} : vector<160x640xf32>, vector<640x128xf32>, vector<160x128xf32> -> vector<160x128xf32>
    %51 = arith.addf %37, %50 : vector<160x128xf32>
    %c1_40 = arith.constant 1 : index
    %c0_41 = arith.constant 0 : index
    %c0_42 = arith.constant 0 : index
    %52 = vector.load %arg13[%c1_40, %c0_41, %c0_42] : memref<14x24x128xf32, #tpu.memory_space<vmem>>, vector<10x16x128xf32>
    %53 = vector.shape_cast %52 : vector<10x16x128xf32> to vector<160x128xf32>
    %c1_43 = arith.constant 1 : index
    %c1_44 = arith.constant 1 : index
    %c0_45 = arith.constant 0 : index
    %54 = vector.load %arg13[%c1_43, %c1_44, %c0_45] : memref<14x24x128xf32, #tpu.memory_space<vmem>>, vector<10x16x128xf32>
    %55 = vector.shape_cast %54 : vector<10x16x128xf32> to vector<160x128xf32>
    %c1_46 = arith.constant 1 : index
    %c2_47 = arith.constant 2 : index
    %c0_48 = arith.constant 0 : index
    %56 = vector.load %arg13[%c1_46, %c2_47, %c0_48] : memref<14x24x128xf32, #tpu.memory_space<vmem>>, vector<10x16x128xf32>
    %57 = vector.shape_cast %56 : vector<10x16x128xf32> to vector<160x128xf32>
    %c1_49 = arith.constant 1 : index
    %c3_50 = arith.constant 3 : index
    %c0_51 = arith.constant 0 : index
    %58 = vector.load %arg13[%c1_49, %c3_50, %c0_51] : memref<14x24x128xf32, #tpu.memory_space<vmem>>, vector<10x16x128xf32>
    %59 = vector.shape_cast %58 : vector<10x16x128xf32> to vector<160x128xf32>
    %c1_52 = arith.constant 1 : index
    %c4_53 = arith.constant 4 : index
    %c0_54 = arith.constant 0 : index
    %60 = vector.load %arg13[%c1_52, %c4_53, %c0_54] : memref<14x24x128xf32, #tpu.memory_space<vmem>>, vector<10x16x128xf32>
    %61 = vector.shape_cast %60 : vector<10x16x128xf32> to vector<160x128xf32>
    %62 = tpu.concatenate %53, %55, %57, %59, %61 in 1 : vector<160x128xf32>, vector<160x128xf32>, vector<160x128xf32>, vector<160x128xf32>, vector<160x128xf32> -> vector<160x640xf32>
    %c640 = arith.constant 640 : index
    %c0_55 = arith.constant 0 : index
    %63 = vector.load %arg4[%c640, %c0_55] : memref<3200x128xf32, #tpu.memory_space<vmem>>, vector<640x128xf32>
    %cst_56 = arith.constant dense<0.000000e+00> : vector<160x128xf32>
    %64 = tpu.matmul %62, %63, %cst_56 {dimension_numbers = #tpu.dot_dimension_numbers<[1], [0], [0], [1], [0, 0, 1, 1], [], []>} : vector<160x640xf32>, vector<640x128xf32>, vector<160x128xf32> -> vector<160x128xf32>
    %65 = arith.addf %51, %64 : vector<160x128xf32>
    %c2_57 = arith.constant 2 : index
    %c0_58 = arith.constant 0 : index
    %c0_59 = arith.constant 0 : index
    %66 = vector.load %arg13[%c2_57, %c0_58, %c0_59] : memref<14x24x128xf32, #tpu.memory_space<vmem>>, vector<10x16x128xf32>
    %67 = vector.shape_cast %66 : vector<10x16x128xf32> to vector<160x128xf32>
    %c2_60 = arith.constant 2 : index
    %c1_61 = arith.constant 1 : index
    %c0_62 = arith.constant 0 : index
    %68 = vector.load %arg13[%c2_60, %c1_61, %c0_62] : memref<14x24x128xf32, #tpu.memory_space<vmem>>, vector<10x16x128xf32>
    %69 = vector.shape_cast %68 : vector<10x16x128xf32> to vector<160x128xf32>
    %c2_63 = arith.constant 2 : index
    %c2_64 = arith.constant 2 : index
    %c0_65 = arith.constant 0 : index
    %70 = vector.load %arg13[%c2_63, %c2_64, %c0_65] : memref<14x24x128xf32, #tpu.memory_space<vmem>>, vector<10x16x128xf32>
    %71 = vector.shape_cast %70 : vector<10x16x128xf32> to vector<160x128xf32>
    %c2_66 = arith.constant 2 : index
    %c3_67 = arith.constant 3 : index
    %c0_68 = arith.constant 0 : index
    %72 = vector.load %arg13[%c2_66, %c3_67, %c0_68] : memref<14x24x128xf32, #tpu.memory_space<vmem>>, vector<10x16x128xf32>
    %73 = vector.shape_cast %72 : vector<10x16x128xf32> to vector<160x128xf32>
    %c2_69 = arith.constant 2 : index
    %c4_70 = arith.constant 4 : index
    %c0_71 = arith.constant 0 : index
    %74 = vector.load %arg13[%c2_69, %c4_70, %c0_71] : memref<14x24x128xf32, #tpu.memory_space<vmem>>, vector<10x16x128xf32>
    %75 = vector.shape_cast %74 : vector<10x16x128xf32> to vector<160x128xf32>
    %76 = tpu.concatenate %67, %69, %71, %73, %75 in 1 : vector<160x128xf32>, vector<160x128xf32>, vector<160x128xf32>, vector<160x128xf32>, vector<160x128xf32> -> vector<160x640xf32>
    %c1280 = arith.constant 1280 : index
    %c0_72 = arith.constant 0 : index
    %77 = vector.load %arg4[%c1280, %c0_72] : memref<3200x128xf32, #tpu.memory_space<vmem>>, vector<640x128xf32>
    %cst_73 = arith.constant dense<0.000000e+00> : vector<160x128xf32>
    %78 = tpu.matmul %76, %77, %cst_73 {dimension_numbers = #tpu.dot_dimension_numbers<[1], [0], [0], [1], [0, 0, 1, 1], [], []>} : vector<160x640xf32>, vector<640x128xf32>, vector<160x128xf32> -> vector<160x128xf32>
    %79 = arith.addf %65, %78 : vector<160x128xf32>
    %c3_74 = arith.constant 3 : index
    %c0_75 = arith.constant 0 : index
    %c0_76 = arith.constant 0 : index
    %80 = vector.load %arg13[%c3_74, %c0_75, %c0_76] : memref<14x24x128xf32, #tpu.memory_space<vmem>>, vector<10x16x128xf32>
    %81 = vector.shape_cast %80 : vector<10x16x128xf32> to vector<160x128xf32>
    %c3_77 = arith.constant 3 : index
    %c1_78 = arith.constant 1 : index
    %c0_79 = arith.constant 0 : index
    %82 = vector.load %arg13[%c3_77, %c1_78, %c0_79] : memref<14x24x128xf32, #tpu.memory_space<vmem>>, vector<10x16x128xf32>
    %83 = vector.shape_cast %82 : vector<10x16x128xf32> to vector<160x128xf32>
    %c3_80 = arith.constant 3 : index
    %c2_81 = arith.constant 2 : index
    %c0_82 = arith.constant 0 : index
    %84 = vector.load %arg13[%c3_80, %c2_81, %c0_82] : memref<14x24x128xf32, #tpu.memory_space<vmem>>, vector<10x16x128xf32>
    %85 = vector.shape_cast %84 : vector<10x16x128xf32> to vector<160x128xf32>
    %c3_83 = arith.constant 3 : index
    %c3_84 = arith.constant 3 : index
    %c0_85 = arith.constant 0 : index
    %86 = vector.load %arg13[%c3_83, %c3_84, %c0_85] : memref<14x24x128xf32, #tpu.memory_space<vmem>>, vector<10x16x128xf32>
    %87 = vector.shape_cast %86 : vector<10x16x128xf32> to vector<160x128xf32>
    %c3_86 = arith.constant 3 : index
    %c4_87 = arith.constant 4 : index
    %c0_88 = arith.constant 0 : index
    %88 = vector.load %arg13[%c3_86, %c4_87, %c0_88] : memref<14x24x128xf32, #tpu.memory_space<vmem>>, vector<10x16x128xf32>
    %89 = vector.shape_cast %88 : vector<10x16x128xf32> to vector<160x128xf32>
    %90 = tpu.concatenate %81, %83, %85, %87, %89 in 1 : vector<160x128xf32>, vector<160x128xf32>, vector<160x128xf32>, vector<160x128xf32>, vector<160x128xf32> -> vector<160x640xf32>
    %c1920 = arith.constant 1920 : index
    %c0_89 = arith.constant 0 : index
    %91 = vector.load %arg4[%c1920, %c0_89] : memref<3200x128xf32, #tpu.memory_space<vmem>>, vector<640x128xf32>
    %cst_90 = arith.constant dense<0.000000e+00> : vector<160x128xf32>
    %92 = tpu.matmul %90, %91, %cst_90 {dimension_numbers = #tpu.dot_dimension_numbers<[1], [0], [0], [1], [0, 0, 1, 1], [], []>} : vector<160x640xf32>, vector<640x128xf32>, vector<160x128xf32> -> vector<160x128xf32>
    %93 = arith.addf %79, %92 : vector<160x128xf32>
    %c4_91 = arith.constant 4 : index
    %c0_92 = arith.constant 0 : index
    %c0_93 = arith.constant 0 : index
    %94 = vector.load %arg13[%c4_91, %c0_92, %c0_93] : memref<14x24x128xf32, #tpu.memory_space<vmem>>, vector<10x16x128xf32>
    %95 = vector.shape_cast %94 : vector<10x16x128xf32> to vector<160x128xf32>
    %c4_94 = arith.constant 4 : index
    %c1_95 = arith.constant 1 : index
    %c0_96 = arith.constant 0 : index
    %96 = vector.load %arg13[%c4_94, %c1_95, %c0_96] : memref<14x24x128xf32, #tpu.memory_space<vmem>>, vector<10x16x128xf32>
    %97 = vector.shape_cast %96 : vector<10x16x128xf32> to vector<160x128xf32>
    %c4_97 = arith.constant 4 : index
    %c2_98 = arith.constant 2 : index
    %c0_99 = arith.constant 0 : index
    %98 = vector.load %arg13[%c4_97, %c2_98, %c0_99] : memref<14x24x128xf32, #tpu.memory_space<vmem>>, vector<10x16x128xf32>
    %99 = vector.shape_cast %98 : vector<10x16x128xf32> to vector<160x128xf32>
    %c4_100 = arith.constant 4 : index
    %c3_101 = arith.constant 3 : index
    %c0_102 = arith.constant 0 : index
    %100 = vector.load %arg13[%c4_100, %c3_101, %c0_102] : memref<14x24x128xf32, #tpu.memory_space<vmem>>, vector<10x16x128xf32>
    %101 = vector.shape_cast %100 : vector<10x16x128xf32> to vector<160x128xf32>
    %c4_103 = arith.constant 4 : index
    %c4_104 = arith.constant 4 : index
    %c0_105 = arith.constant 0 : index
    %102 = vector.load %arg13[%c4_103, %c4_104, %c0_105] : memref<14x24x128xf32, #tpu.memory_space<vmem>>, vector<10x16x128xf32>
    %103 = vector.shape_cast %102 : vector<10x16x128xf32> to vector<160x128xf32>
    %104 = tpu.concatenate %95, %97, %99, %101, %103 in 1 : vector<160x128xf32>, vector<160x128xf32>, vector<160x128xf32>, vector<160x128xf32>, vector<160x128xf32> -> vector<160x640xf32>
    %c2560 = arith.constant 2560 : index
    %c0_106 = arith.constant 0 : index
    %105 = vector.load %arg4[%c2560, %c0_106] : memref<3200x128xf32, #tpu.memory_space<vmem>>, vector<640x128xf32>
    %cst_107 = arith.constant dense<0.000000e+00> : vector<160x128xf32>
    %106 = tpu.matmul %104, %105, %cst_107 {dimension_numbers = #tpu.dot_dimension_numbers<[1], [0], [0], [1], [0, 0, 1, 1], [], []>} : vector<160x640xf32>, vector<640x128xf32>, vector<160x128xf32> -> vector<160x128xf32>
    %107 = arith.addf %93, %106 : vector<160x128xf32>
    %c0_108 = arith.constant 0 : index
    %c0_109 = arith.constant 0 : index
    %108 = vector.load %arg5[%c0_108, %c0_109] : memref<1x128xf32, #tpu.memory_space<vmem>>, vector<1x128xf32>
    %109 = vector.broadcast %108 : vector<1x128xf32> to vector<160x128xf32>
    %110 = arith.addf %107, %109 : vector<160x128xf32>
    %cst_110 = arith.constant 0.000000e+00 : f32
    %111 = vector.broadcast %cst_110 : f32 to vector<160x128xf32>
    %112 = arith.maximumf %110, %111 : vector<160x128xf32>
    %c0_111 = arith.constant 0 : index
    %c0_112 = arith.constant 0 : index
    %113 = vector.load %arg7[%c0_111, %c0_112] : memref<1x128xf32, #tpu.memory_space<vmem>>, vector<1x128xf32>
    %114 = vector.extract_strided_slice %112 {offsets = [0, 0], sizes = [16, 128], strides = [1, 1]} : vector<160x128xf32> to vector<16x128xf32>
    %115 = vector.extract_strided_slice %112 {offsets = [16, 0], sizes = [16, 128], strides = [1, 1]} : vector<160x128xf32> to vector<16x128xf32>
    %116 = arith.maximumf %114, %115 : vector<16x128xf32>
    %117 = vector.extract_strided_slice %116 {offsets = [0, 0], sizes = [1, 128], strides = [1, 1]} : vector<16x128xf32> to vector<1x128xf32>
    %118 = vector.extract_strided_slice %116 {offsets = [1, 0], sizes = [1, 128], strides = [1, 1]} : vector<16x128xf32> to vector<1x128xf32>
    %119 = arith.maximumf %117, %118 : vector<1x128xf32>
    %120 = vector.extract_strided_slice %116 {offsets = [2, 0], sizes = [1, 128], strides = [1, 1]} : vector<16x128xf32> to vector<1x128xf32>
    %121 = vector.extract_strided_slice %116 {offsets = [3, 0], sizes = [1, 128], strides = [1, 1]} : vector<16x128xf32> to vector<1x128xf32>
    %122 = arith.maximumf %120, %121 : vector<1x128xf32>
    %123 = vector.extract_strided_slice %116 {offsets = [4, 0], sizes = [1, 128], strides = [1, 1]} : vector<16x128xf32> to vector<1x128xf32>
    %124 = vector.extract_strided_slice %116 {offsets = [5, 0], sizes = [1, 128], strides = [1, 1]} : vector<16x128xf32> to vector<1x128xf32>
    %125 = arith.maximumf %123, %124 : vector<1x128xf32>
    %126 = vector.extract_strided_slice %116 {offsets = [6, 0], sizes = [1, 128], strides = [1, 1]} : vector<16x128xf32> to vector<1x128xf32>
    %127 = vector.extract_strided_slice %116 {offsets = [7, 0], sizes = [1, 128], strides = [1, 1]} : vector<16x128xf32> to vector<1x128xf32>
    %128 = arith.maximumf %126, %127 : vector<1x128xf32>
    %129 = vector.extract_strided_slice %116 {offsets = [8, 0], sizes = [1, 128], strides = [1, 1]} : vector<16x128xf32> to vector<1x128xf32>
    %130 = vector.extract_strided_slice %116 {offsets = [9, 0], sizes = [1, 128], strides = [1, 1]} : vector<16x128xf32> to vector<1x128xf32>
    %131 = arith.maximumf %129, %130 : vector<1x128xf32>
    %132 = tpu.concatenate %119, %122, %125, %128, %131 in 1 : vector<1x128xf32>, vector<1x128xf32>, vector<1x128xf32>, vector<1x128xf32>, vector<1x128xf32> -> vector<1x640xf32>
    %c0_113 = arith.constant 0 : index
    %c0_114 = arith.constant 0 : index
    %133 = vector.load %arg6[%c0_113, %c0_114] : memref<3200x128xf32, #tpu.memory_space<vmem>>, vector<640x128xf32>
    %cst_115 = arith.constant dense<0.000000e+00> : vector<1x128xf32>
    %134 = tpu.matmul %132, %133, %cst_115 {dimension_numbers = #tpu.dot_dimension_numbers<[1], [0], [0], [1], [0, 0, 1, 1], [], []>} : vector<1x640xf32>, vector<640x128xf32>, vector<1x128xf32> -> vector<1x128xf32>
    %135 = arith.addf %113, %134 : vector<1x128xf32>
    %136 = vector.extract_strided_slice %112 {offsets = [32, 0], sizes = [16, 128], strides = [1, 1]} : vector<160x128xf32> to vector<16x128xf32>
    %137 = vector.extract_strided_slice %112 {offsets = [48, 0], sizes = [16, 128], strides = [1, 1]} : vector<160x128xf32> to vector<16x128xf32>
    %138 = arith.maximumf %136, %137 : vector<16x128xf32>
    %139 = vector.extract_strided_slice %138 {offsets = [0, 0], sizes = [1, 128], strides = [1, 1]} : vector<16x128xf32> to vector<1x128xf32>
    %140 = vector.extract_strided_slice %138 {offsets = [1, 0], sizes = [1, 128], strides = [1, 1]} : vector<16x128xf32> to vector<1x128xf32>
    %141 = arith.maximumf %139, %140 : vector<1x128xf32>
    %142 = vector.extract_strided_slice %138 {offsets = [2, 0], sizes = [1, 128], strides = [1, 1]} : vector<16x128xf32> to vector<1x128xf32>
    %143 = vector.extract_strided_slice %138 {offsets = [3, 0], sizes = [1, 128], strides = [1, 1]} : vector<16x128xf32> to vector<1x128xf32>
    %144 = arith.maximumf %142, %143 : vector<1x128xf32>
    %145 = vector.extract_strided_slice %138 {offsets = [4, 0], sizes = [1, 128], strides = [1, 1]} : vector<16x128xf32> to vector<1x128xf32>
    %146 = vector.extract_strided_slice %138 {offsets = [5, 0], sizes = [1, 128], strides = [1, 1]} : vector<16x128xf32> to vector<1x128xf32>
    %147 = arith.maximumf %145, %146 : vector<1x128xf32>
    %148 = vector.extract_strided_slice %138 {offsets = [6, 0], sizes = [1, 128], strides = [1, 1]} : vector<16x128xf32> to vector<1x128xf32>
    %149 = vector.extract_strided_slice %138 {offsets = [7, 0], sizes = [1, 128], strides = [1, 1]} : vector<16x128xf32> to vector<1x128xf32>
    %150 = arith.maximumf %148, %149 : vector<1x128xf32>
    %151 = vector.extract_strided_slice %138 {offsets = [8, 0], sizes = [1, 128], strides = [1, 1]} : vector<16x128xf32> to vector<1x128xf32>
    %152 = vector.extract_strided_slice %138 {offsets = [9, 0], sizes = [1, 128], strides = [1, 1]} : vector<16x128xf32> to vector<1x128xf32>
    %153 = arith.maximumf %151, %152 : vector<1x128xf32>
    %154 = tpu.concatenate %141, %144, %147, %150, %153 in 1 : vector<1x128xf32>, vector<1x128xf32>, vector<1x128xf32>, vector<1x128xf32>, vector<1x128xf32> -> vector<1x640xf32>
    %c640_116 = arith.constant 640 : index
    %c0_117 = arith.constant 0 : index
    %155 = vector.load %arg6[%c640_116, %c0_117] : memref<3200x128xf32, #tpu.memory_space<vmem>>, vector<640x128xf32>
    %cst_118 = arith.constant dense<0.000000e+00> : vector<1x128xf32>
    %156 = tpu.matmul %154, %155, %cst_118 {dimension_numbers = #tpu.dot_dimension_numbers<[1], [0], [0], [1], [0, 0, 1, 1], [], []>} : vector<1x640xf32>, vector<640x128xf32>, vector<1x128xf32> -> vector<1x128xf32>
    %157 = arith.addf %135, %156 : vector<1x128xf32>
    %158 = vector.extract_strided_slice %112 {offsets = [64, 0], sizes = [16, 128], strides = [1, 1]} : vector<160x128xf32> to vector<16x128xf32>
    %159 = vector.extract_strided_slice %112 {offsets = [80, 0], sizes = [16, 128], strides = [1, 1]} : vector<160x128xf32> to vector<16x128xf32>
    %160 = arith.maximumf %158, %159 : vector<16x128xf32>
    %161 = vector.extract_strided_slice %160 {offsets = [0, 0], sizes = [1, 128], strides = [1, 1]} : vector<16x128xf32> to vector<1x128xf32>
    %162 = vector.extract_strided_slice %160 {offsets = [1, 0], sizes = [1, 128], strides = [1, 1]} : vector<16x128xf32> to vector<1x128xf32>
    %163 = arith.maximumf %161, %162 : vector<1x128xf32>
    %164 = vector.extract_strided_slice %160 {offsets = [2, 0], sizes = [1, 128], strides = [1, 1]} : vector<16x128xf32> to vector<1x128xf32>
    %165 = vector.extract_strided_slice %160 {offsets = [3, 0], sizes = [1, 128], strides = [1, 1]} : vector<16x128xf32> to vector<1x128xf32>
    %166 = arith.maximumf %164, %165 : vector<1x128xf32>
    %167 = vector.extract_strided_slice %160 {offsets = [4, 0], sizes = [1, 128], strides = [1, 1]} : vector<16x128xf32> to vector<1x128xf32>
    %168 = vector.extract_strided_slice %160 {offsets = [5, 0], sizes = [1, 128], strides = [1, 1]} : vector<16x128xf32> to vector<1x128xf32>
    %169 = arith.maximumf %167, %168 : vector<1x128xf32>
    %170 = vector.extract_strided_slice %160 {offsets = [6, 0], sizes = [1, 128], strides = [1, 1]} : vector<16x128xf32> to vector<1x128xf32>
    %171 = vector.extract_strided_slice %160 {offsets = [7, 0], sizes = [1, 128], strides = [1, 1]} : vector<16x128xf32> to vector<1x128xf32>
    %172 = arith.maximumf %170, %171 : vector<1x128xf32>
    %173 = vector.extract_strided_slice %160 {offsets = [8, 0], sizes = [1, 128], strides = [1, 1]} : vector<16x128xf32> to vector<1x128xf32>
    %174 = vector.extract_strided_slice %160 {offsets = [9, 0], sizes = [1, 128], strides = [1, 1]} : vector<16x128xf32> to vector<1x128xf32>
    %175 = arith.maximumf %173, %174 : vector<1x128xf32>
    %176 = tpu.concatenate %163, %166, %169, %172, %175 in 1 : vector<1x128xf32>, vector<1x128xf32>, vector<1x128xf32>, vector<1x128xf32>, vector<1x128xf32> -> vector<1x640xf32>
    %c1280_119 = arith.constant 1280 : index
    %c0_120 = arith.constant 0 : index
    %177 = vector.load %arg6[%c1280_119, %c0_120] : memref<3200x128xf32, #tpu.memory_space<vmem>>, vector<640x128xf32>
    %cst_121 = arith.constant dense<0.000000e+00> : vector<1x128xf32>
    %178 = tpu.matmul %176, %177, %cst_121 {dimension_numbers = #tpu.dot_dimension_numbers<[1], [0], [0], [1], [0, 0, 1, 1], [], []>} : vector<1x640xf32>, vector<640x128xf32>, vector<1x128xf32> -> vector<1x128xf32>
    %179 = arith.addf %157, %178 : vector<1x128xf32>
    %180 = vector.extract_strided_slice %112 {offsets = [96, 0], sizes = [16, 128], strides = [1, 1]} : vector<160x128xf32> to vector<16x128xf32>
    %181 = vector.extract_strided_slice %112 {offsets = [112, 0], sizes = [16, 128], strides = [1, 1]} : vector<160x128xf32> to vector<16x128xf32>
    %182 = arith.maximumf %180, %181 : vector<16x128xf32>
    %183 = vector.extract_strided_slice %182 {offsets = [0, 0], sizes = [1, 128], strides = [1, 1]} : vector<16x128xf32> to vector<1x128xf32>
    %184 = vector.extract_strided_slice %182 {offsets = [1, 0], sizes = [1, 128], strides = [1, 1]} : vector<16x128xf32> to vector<1x128xf32>
    %185 = arith.maximumf %183, %184 : vector<1x128xf32>
    %186 = vector.extract_strided_slice %182 {offsets = [2, 0], sizes = [1, 128], strides = [1, 1]} : vector<16x128xf32> to vector<1x128xf32>
    %187 = vector.extract_strided_slice %182 {offsets = [3, 0], sizes = [1, 128], strides = [1, 1]} : vector<16x128xf32> to vector<1x128xf32>
    %188 = arith.maximumf %186, %187 : vector<1x128xf32>
    %189 = vector.extract_strided_slice %182 {offsets = [4, 0], sizes = [1, 128], strides = [1, 1]} : vector<16x128xf32> to vector<1x128xf32>
    %190 = vector.extract_strided_slice %182 {offsets = [5, 0], sizes = [1, 128], strides = [1, 1]} : vector<16x128xf32> to vector<1x128xf32>
    %191 = arith.maximumf %189, %190 : vector<1x128xf32>
    %192 = vector.extract_strided_slice %182 {offsets = [6, 0], sizes = [1, 128], strides = [1, 1]} : vector<16x128xf32> to vector<1x128xf32>
    %193 = vector.extract_strided_slice %182 {offsets = [7, 0], sizes = [1, 128], strides = [1, 1]} : vector<16x128xf32> to vector<1x128xf32>
    %194 = arith.maximumf %192, %193 : vector<1x128xf32>
    %195 = vector.extract_strided_slice %182 {offsets = [8, 0], sizes = [1, 128], strides = [1, 1]} : vector<16x128xf32> to vector<1x128xf32>
    %196 = vector.extract_strided_slice %182 {offsets = [9, 0], sizes = [1, 128], strides = [1, 1]} : vector<16x128xf32> to vector<1x128xf32>
    %197 = arith.maximumf %195, %196 : vector<1x128xf32>
    %198 = tpu.concatenate %185, %188, %191, %194, %197 in 1 : vector<1x128xf32>, vector<1x128xf32>, vector<1x128xf32>, vector<1x128xf32>, vector<1x128xf32> -> vector<1x640xf32>
    %c1920_122 = arith.constant 1920 : index
    %c0_123 = arith.constant 0 : index
    %199 = vector.load %arg6[%c1920_122, %c0_123] : memref<3200x128xf32, #tpu.memory_space<vmem>>, vector<640x128xf32>
    %cst_124 = arith.constant dense<0.000000e+00> : vector<1x128xf32>
    %200 = tpu.matmul %198, %199, %cst_124 {dimension_numbers = #tpu.dot_dimension_numbers<[1], [0], [0], [1], [0, 0, 1, 1], [], []>} : vector<1x640xf32>, vector<640x128xf32>, vector<1x128xf32> -> vector<1x128xf32>
    %201 = arith.addf %179, %200 : vector<1x128xf32>
    %202 = vector.extract_strided_slice %112 {offsets = [128, 0], sizes = [16, 128], strides = [1, 1]} : vector<160x128xf32> to vector<16x128xf32>
    %203 = vector.extract_strided_slice %112 {offsets = [144, 0], sizes = [16, 128], strides = [1, 1]} : vector<160x128xf32> to vector<16x128xf32>
    %204 = arith.maximumf %202, %203 : vector<16x128xf32>
    %205 = vector.extract_strided_slice %204 {offsets = [0, 0], sizes = [1, 128], strides = [1, 1]} : vector<16x128xf32> to vector<1x128xf32>
    %206 = vector.extract_strided_slice %204 {offsets = [1, 0], sizes = [1, 128], strides = [1, 1]} : vector<16x128xf32> to vector<1x128xf32>
    %207 = arith.maximumf %205, %206 : vector<1x128xf32>
    %208 = vector.extract_strided_slice %204 {offsets = [2, 0], sizes = [1, 128], strides = [1, 1]} : vector<16x128xf32> to vector<1x128xf32>
    %209 = vector.extract_strided_slice %204 {offsets = [3, 0], sizes = [1, 128], strides = [1, 1]} : vector<16x128xf32> to vector<1x128xf32>
    %210 = arith.maximumf %208, %209 : vector<1x128xf32>
    %211 = vector.extract_strided_slice %204 {offsets = [4, 0], sizes = [1, 128], strides = [1, 1]} : vector<16x128xf32> to vector<1x128xf32>
    %212 = vector.extract_strided_slice %204 {offsets = [5, 0], sizes = [1, 128], strides = [1, 1]} : vector<16x128xf32> to vector<1x128xf32>
    %213 = arith.maximumf %211, %212 : vector<1x128xf32>
    %214 = vector.extract_strided_slice %204 {offsets = [6, 0], sizes = [1, 128], strides = [1, 1]} : vector<16x128xf32> to vector<1x128xf32>
    %215 = vector.extract_strided_slice %204 {offsets = [7, 0], sizes = [1, 128], strides = [1, 1]} : vector<16x128xf32> to vector<1x128xf32>
    %216 = arith.maximumf %214, %215 : vector<1x128xf32>
    %217 = vector.extract_strided_slice %204 {offsets = [8, 0], sizes = [1, 128], strides = [1, 1]} : vector<16x128xf32> to vector<1x128xf32>
    %218 = vector.extract_strided_slice %204 {offsets = [9, 0], sizes = [1, 128], strides = [1, 1]} : vector<16x128xf32> to vector<1x128xf32>
    %219 = arith.maximumf %217, %218 : vector<1x128xf32>
    %220 = tpu.concatenate %207, %210, %213, %216, %219 in 1 : vector<1x128xf32>, vector<1x128xf32>, vector<1x128xf32>, vector<1x128xf32>, vector<1x128xf32> -> vector<1x640xf32>
    %c2560_125 = arith.constant 2560 : index
    %c0_126 = arith.constant 0 : index
    %221 = vector.load %arg6[%c2560_125, %c0_126] : memref<3200x128xf32, #tpu.memory_space<vmem>>, vector<640x128xf32>
    %cst_127 = arith.constant dense<0.000000e+00> : vector<1x128xf32>
    %222 = tpu.matmul %220, %221, %cst_127 {dimension_numbers = #tpu.dot_dimension_numbers<[1], [0], [0], [1], [0, 0, 1, 1], [], []>} : vector<1x640xf32>, vector<640x128xf32>, vector<1x128xf32> -> vector<1x128xf32>
    %223 = arith.addf %201, %222 : vector<1x128xf32>
    %cst_128 = arith.constant 0.000000e+00 : f32
    %224 = vector.broadcast %cst_128 : f32 to vector<1x128xf32>
    %225 = arith.maximumf %223, %224 : vector<1x128xf32>
    %c0_129 = arith.constant 0 : index
    %c0_130 = arith.constant 0 : index
    %226 = vector.load %arg8[%c0_129, %c0_130] : memref<128x128xf32, #tpu.memory_space<vmem>>, vector<128x128xf32>
    %cst_131 = arith.constant dense<0.000000e+00> : vector<1x128xf32>
    %227 = tpu.matmul %225, %226, %cst_131 {dimension_numbers = #tpu.dot_dimension_numbers<[1], [0], [0], [1], [0, 0, 1, 1], [], []>} : vector<1x128xf32>, vector<128x128xf32>, vector<1x128xf32> -> vector<1x128xf32>
    %c0_132 = arith.constant 0 : index
    %c0_133 = arith.constant 0 : index
    %228 = vector.load %arg9[%c0_132, %c0_133] : memref<1x128xf32, #tpu.memory_space<vmem>>, vector<1x128xf32>
    %229 = arith.addf %227, %228 : vector<1x128xf32>
    %cst_134 = arith.constant 0.000000e+00 : f32
    %230 = vector.broadcast %cst_134 : f32 to vector<1x128xf32>
    %231 = arith.maximumf %229, %230 : vector<1x128xf32>
    %c0_135 = arith.constant 0 : index
    %c0_136 = arith.constant 0 : index
    %232 = vector.load %arg10[%c0_135, %c0_136] : memref<128x128xf32, #tpu.memory_space<vmem>>, vector<128x128xf32>
    %cst_137 = arith.constant dense<0.000000e+00> : vector<1x128xf32>
    %233 = tpu.matmul %231, %232, %cst_137 {dimension_numbers = #tpu.dot_dimension_numbers<[1], [0], [0], [1], [0, 0, 1, 1], [], []>} : vector<1x128xf32>, vector<128x128xf32>, vector<1x128xf32> -> vector<1x128xf32>
    %c0_138 = arith.constant 0 : index
    %c0_139 = arith.constant 0 : index
    %234 = vector.load %arg11[%c0_138, %c0_139] : memref<1x128xf32, #tpu.memory_space<vmem>>, vector<1x128xf32>
    %235 = arith.addf %233, %234 : vector<1x128xf32>
    %236 = vector.shape_cast %235 : vector<1x128xf32> to vector<1x128xf32>
    %237 = vector.broadcast %236 : vector<1x128xf32> to vector<8x128xf32>
    %c0_140 = arith.constant 0 : index
    %c0_141 = arith.constant 0 : index
    %c0_142 = arith.constant 0 : index
    %238 = vector.load %arg12[%c0_140, %c0_141, %c0_142] : memref<1x8x128xf32, #tpu.memory_space<vmem>>, vector<1x8x128xf32>
    %239 = vector.shape_cast %238 : vector<1x8x128xf32> to vector<8x128xf32>
    %240 = vector.shape_cast %237 : vector<8x128xf32> to vector<1x8x128xf32>
    tpu.vector_store %arg12[%c0_140, %c0_141, %c0_142], %240 {strides = array<i32>} : memref<1x8x128xf32, #tpu.memory_space<vmem>>, vector<1x8x128xf32>,
    return
  }
  func.func @transform_0(%arg0: i32) -> (i32, i32, i32) {
    %c0_i32 = arith.constant 0 : i32
    %c0_i32_0 = arith.constant 0 : i32
    %c0_i32_1 = arith.constant 0 : i32
    return %arg0, %c0_i32, %c0_i32_0 : i32, i32, i32
  }
  func.func @transform_1(%arg0: i32) -> (i32, i32) {
    %c0_i32 = arith.constant 0 : i32
    %c0_i32_0 = arith.constant 0 : i32
    %c0_i32_1 = arith.constant 0 : i32
    return %c0_i32, %c0_i32_0 : i32, i32
  }
  func.func @transform_2(%arg0: i32) -> (i32, i32) {
    %c0_i32 = arith.constant 0 : i32
    %c0_i32_0 = arith.constant 0 : i32
    %c0_i32_1 = arith.constant 0 : i32
    return %c0_i32, %c0_i32_0 : i32, i32
  }
  func.func @transform_3(%arg0: i32) -> (i32, i32) {
    %c0_i32 = arith.constant 0 : i32
    %c0_i32_0 = arith.constant 0 : i32
    %c0_i32_1 = arith.constant 0 : i32
    return %c0_i32, %c0_i32_0 : i32, i32
  }
  func.func @transform_4(%arg0: i32) -> (i32, i32) {
    %c0_i32 = arith.constant 0 : i32
    %c0_i32_0 = arith.constant 0 : i32
    %c0_i32_1 = arith.constant 0 : i32
    return %c0_i32, %c0_i32_0 : i32, i32
  }
  func.func @transform_5(%arg0: i32) -> (i32, i32) {
    %c0_i32 = arith.constant 0 : i32
    %c0_i32_0 = arith.constant 0 : i32
    %c0_i32_1 = arith.constant 0 : i32
    return %c0_i32, %c0_i32_0 : i32, i32
  }
  func.func @transform_6(%arg0: i32) -> (i32, i32) {
    %c0_i32 = arith.constant 0 : i32
    %c0_i32_0 = arith.constant 0 : i32
    %c0_i32_1 = arith.constant 0 : i32
    return %c0_i32, %c0_i32_0 : i32, i32
  }
  func.func @transform_7(%arg0: i32) -> (i32, i32) {
    %c0_i32 = arith.constant 0 : i32
    %c0_i32_0 = arith.constant 0 : i32
    %c0_i32_1 = arith.constant 0 : i32
    return %c0_i32, %c0_i32_0 : i32, i32
  }
  func.func @transform_8(%arg0: i32) -> (i32, i32) {
    %c0_i32 = arith.constant 0 : i32
    %c0_i32_0 = arith.constant 0 : i32
    %c0_i32_1 = arith.constant 0 : i32
    return %c0_i32, %c0_i32_0 : i32, i32
  }
  func.func @transform_9(%arg0: i32) -> (i32, i32) {
    %c0_i32 = arith.constant 0 : i32
    %c0_i32_0 = arith.constant 0 : i32
    %c0_i32_1 = arith.constant 0 : i32
    return %c0_i32, %c0_i32_0 : i32, i32
  }
  func.func @transform_10(%arg0: i32) -> (i32, i32) {
    %c0_i32 = arith.constant 0 : i32
    %c0_i32_0 = arith.constant 0 : i32
    %c0_i32_1 = arith.constant 0 : i32
    return %c0_i32, %c0_i32_0 : i32, i32
  }
  func.func @transform_11(%arg0: i32) -> (i32, i32, i32) {
    %c0_i32 = arith.constant 0 : i32
    %c0_i32_0 = arith.constant 0 : i32
    %c0_i32_1 = arith.constant 0 : i32
    return %arg0, %c0_i32, %c0_i32_0 : i32, i32, i32
  }
}

</mosaic_0001>

<bundles_post_ra>
// kernel: simple_cnn_forward.1
= control target key start
LH: loop header
LB: loop body
LE: loop exit
PB: predicated region body
PF: predicated region fallthrough
CT: control target
= control target key end

     0   :  { %s5756_s17 = smov 0   ;;  %s10029_s0 = inlined_call_operand.vmem [shape: f32[2,896,80], index: 0, kind: input, shape index: {}]   ;;  %s10030_s1 = inlined_call_operand.vmem [shape: f32[80,128], index: 1, kind: input, shape index: {}]   ;;  %s10031_s2 = inlined_call_operand.vmem [shape: f32[1,128], index: 2, kind: input, shape index: {}]   ;;  %s10032_s3 = inlined_call_operand.vmem [shape: f32[3200,128], index: 3, kind: input, shape index: {}]   ;;  %s10033_s4 = inlined_call_operand.vmem [shape: f32[1,128], index: 4, kind: input, shape index: {}]   ;;  %s10034_s5 = inlined_call_operand.vmem [shape: f32[3200,128], index: 5, kind: input, shape index: {}]   ;;  %s10035_s6 = inlined_call_operand.vmem [shape: f32[1,128], index: 6, kind: input, shape index: {}]   ;;  %s10036_s7 = inlined_call_operand.vmem [shape: f32[128,128], index: 7, kind: input, shape index: {}]   ;;  %s10037_s8 = inlined_call_operand.vmem [shape: f32[1,128], index: 8, kind: input, shape index: {}]   ;;  %s10038_s9 = inlined_call_operand.vmem [shape: f32[128,128], index: 9, kind: input, shape index: {}]   ;;  %s10039_s10 = inlined_call_operand.vmem [shape: f32[1,128], index: 10, kind: input, shape index: {}]   ;;  %s10040_s11 = inlined_call_operand.vmem [shape: f32[2,8,128], index: 11, kind: output, shape index: {}]  }
   0x1 LB: > { %s5545_s18 = sadd.s32 4294967295, %s5693_s17   ;;  %p5549_p0 = scmp.ge.s32.totalorder %s5693_s17, 1  ;;  %s5693_s17 = sphi %s5756_s17, %s21_s17  }
   0x2   : > { %p337_p1 = scmp.lt.s32.totalorder %s5693_s17, 3 }
   0x4   : > { %p338_p2 = pnand %p5549_p0, %p337_p1 }
   0x6   : > { %341 = sbr.rel (%p338_p2) target bundleno = 1974 (0x7b6), region = 64 }
   0xb   : > { %v395_v0 = vld [vmem:[%s10030_s1 + $0x48] sm:$0xff]  ;;  %v394_v1 = vld [vmem:[%s10030_s1 + $0x40] sm:$0xff]  ;;  %v393_v2 = vld [vmem:[%s10030_s1 + $0x38] sm:$0xff]  ;;  %p376_p3 = scmp.lt.s32.totalorder %s5545_s18, 1  ;;  %vm427_vm0 = vcmask 654336  }
   0xc   : > { %518 = vmatpush.msra.mxu0 %v395_v0  ;;  %759 = vmatpush.msra.mxu1 %v395_v0  ;;  %v392_v3 = vld [vmem:[%s10030_s1 + $0x30] sm:$0xff]  ;;  %v391_v4 = vld [vmem:[%s10030_s1 + $0x28] sm:$0xff]  ;;  %v390_v5 = vld [vmem:[%s10030_s1 + $0x20] sm:$0xff] }
   0xd   : > { %1028 = vmatpush.msra.mxu2 %v395_v0  ;;  %1297 = vmatpush.msra.mxu3 %v395_v0  ;;  %s10287_s18 = smov (!%p376_p3, %s5545_s18), 1  ;;  %v389_v6 = vld [vmem:[%s10030_s1 + $0x18] sm:$0xff]  ;;  %v388_v7 = vld [vmem:[%s10030_s1 + $0x10] sm:$0xff]  ;;  %v387_v8 = vld [vmem:[%s10030_s1 + $0x8] sm:$0xff] }
   0xe   : > { %519 = vmatpush.msra.mxu0 %v394_v1  ;;  %760 = vmatpush.msra.mxu1 %v394_v1  ;;  %s5666_s14 = smul.u32 896, %s10287_s18  ;;  %v386_v9 = vld [vmem:[%s10030_s1] sm:$0xff]  ;;  %v1786_v18 = vld [vmem:[%s10032_s3 + $0x2f8] sm:$0xff]  ;;  %v1785_v27 = vld [vmem:[%s10032_s3 + $0x2f0] sm:$0xff]  ;;  %s5551_s28 = sshll.u32 %s10287_s18, 3 }
   0xf   : > { %1029 = vmatpush.msra.mxu2 %v394_v1  ;;  %1298 = vmatpush.msra.mxu3 %v394_v1  ;;  %v1784_v36 = vld [vmem:[%s10032_s3 + $0x2e8] sm:$0xff]  ;;  %v1783_v41 = vld [vmem:[%s10032_s3 + $0x2e0] sm:$0xff]  ;;  %v1782_v50 = vld [vmem:[%s10032_s3 + $0x2d8] sm:$0xff]  ;;  %s384_s12 = scalar_lea.vmem %s10040_s11, %s5551_s28 }
  0x10   : > { %520 = vmatpush.msra.mxu0 %v393_v2  ;;  %761 = vmatpush.msra.mxu1 %v393_v2  ;;  %s5797_s23 = scalar_lea.vmem %s10029_s0, %s5666_s14  ;;  %v1781_v59 = vld [vmem:[%s10032_s3 + $0x2d0] sm:$0xff] }
  0x11   : > { %1030 = vmatpush.msra.mxu2 %v393_v2  ;;  %1299 = vmatpush.msra.mxu3 %v393_v2  ;;  %v396_v10 = vld [vmem:[%s5797_s23] sm:$0xff]  ;;  %v397_v14 = vld [vmem:[%s5797_s23 + $0x8] sm:$0xff]  ;;  %v398_v19 = vld [vmem:[%s5797_s23 + $0x10] sm:$0xff] }
  0x12   : > { %521 = vmatpush.msra.mxu0 %v392_v3  ;;  %762 = vmatpush.msra.mxu1 %v392_v3  ;;  %v641_v11 = vld [vmem:[%s5797_s23 + $0xe0] sm:$0xff]  ;;  %v642_v15 = vld [vmem:[%s5797_s23 + $0xe8] sm:$0xff]  ;;  %v643_v20 = vld [vmem:[%s5797_s23 + $0xf0] sm:$0xff] }
  0x13   : > { %1031 = vmatpush.msra.mxu2 %v392_v3  ;;  %1300 = vmatpush.msra.mxu3 %v392_v3  ;;  %v910_v12 = vld [vmem:[%s5797_s23 + $0x1c0] sm:$0xff]  ;;  %v911_v16 = vld [vmem:[%s5797_s23 + $0x1c8] sm:$0xff]  ;;  %v912_v21 = vld [vmem:[%s5797_s23 + $0x1d0] sm:$0xff] }
  0x14   : > { %522 = vmatpush.msra.mxu0 %v391_v4  ;;  %763 = vmatpush.msra.mxu1 %v391_v4  ;;  %v1179_v13 = vld [vmem:[%s5797_s23 + $0x2a0] sm:$0xff]  ;;  %v1180_v17 = vld [vmem:[%s5797_s23 + $0x2a8] sm:$0xff]  ;;  %v1181_v22 = vld [vmem:[%s5797_s23 + $0x2b0] sm:$0xff] }
  0x15   : > { %1032 = vmatpush.msra.mxu2 %v391_v4  ;;  %1301 = vmatpush.msra.mxu3 %v391_v4  ;;  %v399_v23 = vld [vmem:[%s5797_s23 + $0x18] sm:$0xff]  ;;  %v400_v28 = vld [vmem:[%s5797_s23 + $0x20] sm:$0xff]  ;;  %v401_v32 = vld [vmem:[%s5797_s23 + $0x28] sm:$0xff] }
  0x16   : > { %523 = vmatpush.msra.mxu0 %v390_v5  ;;  %764 = vmatpush.msra.mxu1 %v390_v5  ;;  %v644_v24 = vld [vmem:[%s5797_s23 + $0xf8] sm:$0xff]  ;;  %v645_v29 = vld [vmem:[%s5797_s23 + $0x100] sm:$0xff]  ;;  %v646_v33 = vld [vmem:[%s5797_s23 + $0x108] sm:$0xff] }
  0x17   : > { %1033 = vmatpush.msra.mxu2 %v390_v5  ;;  %1302 = vmatpush.msra.mxu3 %v390_v5  ;;  %v913_v25 = vld [vmem:[%s5797_s23 + $0x1d8] sm:$0xff]  ;;  %v914_v30 = vld [vmem:[%s5797_s23 + $0x1e0] sm:$0xff]  ;;  %v915_v34 = vld [vmem:[%s5797_s23 + $0x1e8] sm:$0xff] }
  0x18   : > { %524 = vmatpush.msra.mxu0 %v389_v6  ;;  %765 = vmatpush.msra.mxu1 %v389_v6  ;;  %v1182_v26 = vld [vmem:[%s5797_s23 + $0x2b8] sm:$0xff]  ;;  %v1183_v31 = vld [vmem:[%s5797_s23 + $0x2c0] sm:$0xff]  ;;  %v1184_v35 = vld [vmem:[%s5797_s23 + $0x2c8] sm:$0xff] }
  0x19   : > { %1034 = vmatpush.msra.mxu2 %v389_v6  ;;  %1303 = vmatpush.msra.mxu3 %v389_v6  ;;  %v402_v37 = vld [vmem:[%s5797_s23 + $0x30] sm:$0xff]  ;;  %v403_v42 = vld [vmem:[%s5797_s23 + $0x38] sm:$0xff]  ;;  %v404_v46 = vld [vmem:[%s5797_s23 + $0x40] sm:$0xff] }
  0x1a   : > { %525 = vmatpush.msra.mxu0 %v388_v7  ;;  %766 = vmatpush.msra.mxu1 %v388_v7  ;;  %v647_v38 = vld [vmem:[%s5797_s23 + $0x110] sm:$0xff]  ;;  %v648_v43 = vld [vmem:[%s5797_s23 + $0x118] sm:$0xff]  ;;  %v649_v47 = vld [vmem:[%s5797_s23 + $0x120] sm:$0xff] }
  0x1b   : > { %1035 = vmatpush.msra.mxu2 %v388_v7  ;;  %1304 = vmatpush.msra.mxu3 %v388_v7  ;;  %v916_v39 = vld [vmem:[%s5797_s23 + $0x1f0] sm:$0xff]  ;;  %v917_v44 = vld [vmem:[%s5797_s23 + $0x1f8] sm:$0xff]  ;;  %v918_v48 = vld [vmem:[%s5797_s23 + $0x200] sm:$0xff] }
  0x1c   : > { %526 = vmatpush.msra.mxu0 %v387_v8  ;;  %767 = vmatpush.msra.mxu1 %v387_v8  ;;  %v1185_v40 = vld [vmem:[%s5797_s23 + $0x2d0] sm:$0xff]  ;;  %v1186_v45 = vld [vmem:[%s5797_s23 + $0x2d8] sm:$0xff]  ;;  %v1187_v49 = vld [vmem:[%s5797_s23 + $0x2e0] sm:$0xff] }
  0x1d   : > { %1036 = vmatpush.msra.mxu2 %v387_v8  ;;  %1305 = vmatpush.msra.mxu3 %v387_v8  ;;  %v405_v51 = vld [vmem:[%s5797_s23 + $0x48] sm:$0xff]  ;;  %v406_v55 = vld [vmem:[%s5797_s23 + $0x50] sm:$0xff]  ;;  %v407_v60 = vld [vmem:[%s5797_s23 + $0x58] sm:$0xff] }
  0x1e   : > { %527 = vmatpush.msra.mxu0 %v386_v9  ;;  %768 = vmatpush.msra.mxu1 %v386_v9  ;;  %v650_v52 = vld [vmem:[%s5797_s23 + $0x128] sm:$0xff]  ;;  %v651_v56 = vld [vmem:[%s5797_s23 + $0x130] sm:$0xff]  ;;  %v652_v61 = vld [vmem:[%s5797_s23 + $0x138] sm:$0xff] }
  0x1f   : > { %1037 = vmatpush.msra.mxu2 %v386_v9  ;;  %1306 = vmatpush.msra.mxu3 %v386_v9  ;;  %v919_v53 = vld [vmem:[%s5797_s23 + $0x208] sm:$0xff]  ;;  %v920_v57 = vld [vmem:[%s5797_s23 + $0x210] sm:$0xff]  ;;  %v921_v62 = vld [vmem:[%s5797_s23 + $0x218] sm:$0xff] }
  0x20   : > { %5552 = vmatmul.msk.f32.vlgmr.msra.gmra.mxu0 %vm427_vm0, %v396_v10  ;;  %5580 = vmatmul.msk.f32.vlgmr.msra.gmra.mxu1 %vm427_vm0, %v641_v11  ;;  %v1188_v54 = vld [vmem:[%s5797_s23 + $0x2e8] sm:$0xff]  ;;  %v1189_v58 = vld [vmem:[%s5797_s23 + $0x2f0] sm:$0xff]  ;;  %v1190_v63 = vld [vmem:[%s5797_s23 + $0x2f8] sm:$0xff] }
  0x21   : > { %5608 = vmatmul.msk.f32.vlgmr.msra.gmra.mxu2 %vm427_vm0, %v910_v12  ;;  %5636 = vmatmul.msk.f32.vlgmr.msra.gmra.mxu3 %vm427_vm0, %v1179_v13  ;;  %v408_v0 = vld [vmem:[%s5797_s23 + $0x60] sm:$0xff]  ;;  %v1780_v4 = vld [vmem:[%s10032_s3 + $0x2c8] sm:$0xff]  ;;  %v410_v9 = vld [vmem:[%s5797_s23 + $0x70] sm:$0xff] }
  0x22   : > { %1851 = vmatpush.msrb.mxu0 %v1786_v18  ;;  %v653_v1 = vld [vmem:[%s5797_s23 + $0x140] sm:$0xff]  ;;  %v409_v5 = vld [vmem:[%s5797_s23 + $0x68] sm:$0xff]  ;;  %v655_v10 = vld [vmem:[%s5797_s23 + $0x150] sm:$0xff] }
  0x23   : > { %v922_v2 = vld [vmem:[%s5797_s23 + $0x220] sm:$0xff]  ;;  %v654_v6 = vld [vmem:[%s5797_s23 + $0x148] sm:$0xff]  ;;  %v924_v11 = vld [vmem:[%s5797_s23 + $0x230] sm:$0xff] }
  0x24   : > { %1852 = vmatpush.msrb.mxu0 %v1785_v27  ;;  %v1191_v3 = vld [vmem:[%s5797_s23 + $0x300] sm:$0xff]  ;;  %v923_v7 = vld [vmem:[%s5797_s23 + $0x228] sm:$0xff]  ;;  %v1193_v12 = vld [vmem:[%s5797_s23 + $0x310] sm:$0xff] }
  0x25   : > { %v1192_v8 = vld [vmem:[%s5797_s23 + $0x308] sm:$0xff]  ;;  %v411_v13 = vld [vmem:[%s5797_s23 + $0x78] sm:$0xff]  ;;  %v1195_v27 = vld [vmem:[%s5797_s23 + $0x320] sm:$0xff] }
  0x26   : > { %1853 = vmatpush.msrb.mxu0 %v1784_v36  ;;  %v1194_v18 = vld [vmem:[%s5797_s23 + $0x318] sm:$0xff]  ;;  %v413_v36 = vld [vmem:[%s5797_s23 + $0x88] sm:$0xff] }
  0x28   : > { %5553 = vmatmul.msk.f32.gmra.mxu0 %vm427_vm0, %v397_v14  ;;  %5581 = vmatmul.msk.f32.gmra.mxu1 %vm427_vm0, %v642_v15  ;;  %v656_v14 = vld [vmem:[%s5797_s23 + $0x158] sm:$0xff]  ;;  %v1779_v15 = vld [vmem:[%s10032_s3 + $0x2c0] sm:$0xff] }
  0x29   : > { %5609 = vmatmul.msk.f32.gmra.mxu2 %vm427_vm0, %v911_v16  ;;  %5637 = vmatmul.msk.f32.gmra.mxu3 %vm427_vm0, %v1180_v17  ;;  %v5695_v16 = vmov 0.0   ;;  %v925_v17 = vld [vmem:[%s5797_s23 + $0x238] sm:$0xff] }
  0x2a   : > { %1854 = vmatpush.msrb.mxu0 %v1783_v41  ;;  %1477 = vst [vmem:[#allocation2 + $0x28] sm:$0xff] %v5695_v16  ;;  %v1196_v41 = vld [vmem:[%s5797_s23 + $0x328] sm:$0xff] }
  0x2b   : > { %1476 = vst [vmem:[#allocation2 + $0x10] sm:$0xff] %v5695_v16 }
  0x2c   : > { %1855 = vmatpush.msrb.mxu0 %v1782_v50  ;;  %1478 = vst [vmem:[#allocation2 + $0x40] sm:$0xff] %v5695_v16 }
  0x2d   : > { %1479 = vst [vmem:[#allocation2 + $0x58] sm:$0xff] %v5695_v16 }
  0x2e   : > { %1856 = vmatpush.msrb.mxu0 %v1781_v59  ;;  %1480 = vst [vmem:[#allocation2 + $0x70] sm:$0xff] %v5695_v16 }
  0x2f   : > { %1481 = vst [vmem:[#allocation2 + $0x88] sm:$0xff] %v5695_v16 }
  0x30   : > { %5554 = vmatmul.msk.f32.gmra.mxu0 %vm427_vm0, %v398_v19  ;;  %5582 = vmatmul.msk.f32.gmra.mxu1 %vm427_vm0, %v643_v20  ;;  %v5957_v19 = vld [vmem:[%s10031_s2] ss:$0 sm:$0xff]  ;;  %1482 = vst [vmem:[#allocation2 + $0xa0] sm:$0xff] %v5695_v16 }
  0x31   : > { %5610 = vmatmul.msk.f32.gmra.mxu2 %vm427_vm0, %v912_v21  ;;  %5638 = vmatmul.msk.f32.gmra.mxu3 %vm427_vm0, %v1181_v22  ;;  %1483 = vst [vmem:[#allocation2 + $0xb8] sm:$0xff] %v5695_v16  ;;  %v412_v22 = vld [vmem:[%s5797_s23 + $0x80] sm:$0xff] }
  0x32   : > { %1857 = vmatpush.msrb.mxu0 %v1780_v4  ;;  %1484 = vst [vmem:[#allocation2 + $0xd0] sm:$0xff] %v5695_v16 }
  0x33   : > { %1485 = vst [vmem:[#allocation2 + $0xe8] sm:$0xff] %v5695_v16 }
  0x34   : > { %1858 = vmatpush.msrb.mxu0 %v1779_v15  ;;  %1486 = vst [vmem:[#allocation2 + $0x100] sm:$0xff] %v5695_v16  ;;  %v929_v15 = vld [vmem:[%s5797_s23 + $0x258] sm:$0xff] }
  0x35   : > { %1487 = vst [vmem:[#allocation2 + $0x118] sm:$0xff] %v5695_v16 }
  0x36   : > { %1488 = vst [vmem:[#allocation2 + $0x130] sm:$0xff] %v5695_v16 }
  0x37   : > { %1489 = vst [vmem:[#allocation2 + $0x148] sm:$0xff] %v5695_v16  ;;  %v1198_v16 = vld [vmem:[%s5797_s23 + $0x338] sm:$0xff] }
  0x38   : > { %5555 = vmatmul.msk.f32.gmra.mxu0 %vm427_vm0, %v399_v23  ;;  %5583 = vmatmul.msk.f32.gmra.mxu1 %vm427_vm0, %v644_v24  ;;  %v657_v23 = vld [vmem:[%s5797_s23 + $0x160] sm:$0xff] }
  0x39   : > { %5611 = vmatmul.msk.f32.gmra.mxu2 %vm427_vm0, %v913_v25  ;;  %5639 = vmatmul.msk.f32.gmra.mxu3 %vm427_vm0, %v1182_v26  ;;  %v926_v26 = vld [vmem:[%s5797_s23 + $0x240] sm:$0xff] }
  0x40   : > { %5556 = vmatmul.msk.f32.gmra.mxu0 %vm427_vm0, %v400_v28  ;;  %5584 = vmatmul.msk.f32.gmra.mxu1 %vm427_vm0, %v645_v29 }
  0x41   : > { %5612 = vmatmul.msk.f32.gmra.mxu2 %vm427_vm0, %v914_v30  ;;  %5640 = vmatmul.msk.f32.gmra.mxu3 %vm427_vm0, %v1183_v31 }
  0x48   : > { %5557 = vmatmul.msk.f32.gmra.mxu0 %vm427_vm0, %v401_v32  ;;  %5585 = vmatmul.msk.f32.gmra.mxu1 %vm427_vm0, %v646_v33 }
  0x49   : > { %5613 = vmatmul.msk.f32.gmra.mxu2 %vm427_vm0, %v915_v34  ;;  %5641 = vmatmul.msk.f32.gmra.mxu3 %vm427_vm0, %v1184_v35 }
  0x50   : > { %5558 = vmatmul.msk.f32.gmra.mxu0 %vm427_vm0, %v402_v37  ;;  %5586 = vmatmul.msk.f32.gmra.mxu1 %vm427_vm0, %v647_v38  ;;  %v658_v37 = vld [vmem:[%s5797_s23 + $0x168] sm:$0xff]  ;;  %v1778_v38 = vld [vmem:[%s10032_s3 + $0x2b8] sm:$0xff] }
  0x51   : > { %5614 = vmatmul.msk.f32.gmra.mxu2 %vm427_vm0, %v916_v39  ;;  %5642 = vmatmul.msk.f32.gmra.mxu3 %vm427_vm0, %v1185_v40  ;;  %v927_v40 = vld [vmem:[%s5797_s23 + $0x248] sm:$0xff] }
  0x52   : > { %1859 = vmatpush.msrb.mxu0 %v1778_v38  ;;  %v1199_v38 = vld [vmem:[%s5797_s23 + $0x340] sm:$0xff] }
  0x58   : > { %5559 = vmatmul.msk.f32.gmra.mxu0 %vm427_vm0, %v403_v42  ;;  %5587 = vmatmul.msk.f32.gmra.mxu1 %vm427_vm0, %v648_v43 }
  0x59   : > { %5615 = vmatmul.msk.f32.gmra.mxu2 %vm427_vm0, %v917_v44  ;;  %5643 = vmatmul.msk.f32.gmra.mxu3 %vm427_vm0, %v1186_v45 }
  0x60   : > { %5560 = vmatmul.msk.f32.gmra.mxu0 %vm427_vm0, %v404_v46  ;;  %5588 = vmatmul.msk.f32.gmra.mxu1 %vm427_vm0, %v649_v47 }
  0x61   : > { %5616 = vmatmul.msk.f32.gmra.mxu2 %vm427_vm0, %v918_v48  ;;  %5644 = vmatmul.msk.f32.gmra.mxu3 %vm427_vm0, %v1187_v49 }
  0x68   : > { %5561 = vmatmul.msk.f32.gmra.mxu0 %vm427_vm0, %v405_v51  ;;  %5589 = vmatmul.msk.f32.gmra.mxu1 %vm427_vm0, %v650_v52 }
  0x69   : > { %5617 = vmatmul.msk.f32.gmra.mxu2 %vm427_vm0, %v919_v53  ;;  %5645 = vmatmul.msk.f32.gmra.mxu3 %vm427_vm0, %v1188_v54 }
  0x70   : > { %5562 = vmatmul.msk.f32.gmra.mxu0 %vm427_vm0, %v406_v55  ;;  %5590 = vmatmul.msk.f32.gmra.mxu1 %vm427_vm0, %v651_v56  ;;  %v414_v56 = vld [vmem:[%s5797_s23 + $0x90] sm:$0xff] }
  0x71   : > { %5618 = vmatmul.msk.f32.gmra.mxu2 %vm427_vm0, %v920_v57  ;;  %5646 = vmatmul.msk.f32.gmra.mxu3 %vm427_vm0, %v1189_v58  ;;  %v659_v57 = vld [vmem:[%s5797_s23 + $0x170] sm:$0xff] }
  0x72   : > { %v1777_v58 = vld [vmem:[%s10032_s3 + $0x2b0] sm:$0xff] }
  0x73   : > { %1860 = vmatpush.msrb.mxu0 %v1777_v58 }
  0x78   : > { %5563 = vmatmul.msk.f32.gmra.mxu0 %vm427_vm0, %v407_v60  ;;  %5591 = vmatmul.msk.f32.gmra.mxu1 %vm427_vm0, %v652_v61  ;;  %v928_v61 = vld [vmem:[%s5797_s23 + $0x250] sm:$0xff] }
  0x79   : > { %5619 = vmatmul.msk.f32.gmra.mxu2 %vm427_vm0, %v921_v62  ;;  %5647 = vmatmul.msk.f32.gmra.mxu3 %vm427_vm0, %v1190_v63  ;;  %v1197_v62 = vld [vmem:[%s5797_s23 + $0x330] sm:$0xff] }
  0x80   : > { %5564 = vmatmul.msk.f32.gmra.mxu0 %vm427_vm0, %v408_v0  ;;  %5592 = vmatmul.msk.f32.gmra.mxu1 %vm427_vm0, %v653_v1 }
  0x81   : > { %5620 = vmatmul.msk.f32.gmra.mxu2 %vm427_vm0, %v922_v2  ;;  %5648 = vmatmul.msk.f32.gmra.mxu3 %vm427_vm0, %v1191_v3 }
  0x88   : > { %5565 = vmatmul.msk.f32.gmra.mxu0 %vm427_vm0, %v409_v5  ;;  %5593 = vmatmul.msk.f32.gmra.mxu1 %vm427_vm0, %v654_v6 }
  0x89   : > { %5621 = vmatmul.msk.f32.gmra.mxu2 %vm427_vm0, %v923_v7  ;;  %5649 = vmatmul.msk.f32.gmra.mxu3 %vm427_vm0, %v1192_v8 }
  0x90   : > { %5566 = vmatmul.msk.f32.gmra.mxu0 %vm427_vm0, %v410_v9  ;;  %5594 = vmatmul.msk.f32.gmra.mxu1 %vm427_vm0, %v655_v10 }
  0x91   : > { %5622 = vmatmul.msk.f32.gmra.mxu2 %vm427_vm0, %v924_v11  ;;  %5650 = vmatmul.msk.f32.gmra.mxu3 %vm427_vm0, %v1193_v12  ;;  %v415_v12 = vld [vmem:[%s5797_s23 + $0x98] sm:$0xff] }
  0x98   : > { %5567 = vmatmul.msk.f32.gmra.mxu0 %vm427_vm0, %v411_v13  ;;  %5595 = vmatmul.msk.f32.gmra.mxu1 %vm427_vm0, %v656_v14  ;;  %v660_v13 = vld [vmem:[%s5797_s23 + $0x178] sm:$0xff] }
  0x99   : > { %5623 = vmatmul.msk.f32.gmra.mxu2 %vm427_vm0, %v925_v17  ;;  %5651 = vmatmul.msk.f32.gmra.mxu3 %vm427_vm0, %v1194_v18 }
  0x9d   : > { %v529_v20 = vpop.f32.mrf.mxu0  ;;  %v770_v21 = vpop.f32.mrf.mxu1 }
  0x9e   : > { %v530_v24 = vadd.f32 %v5957_v19, %v529_v20  ;;  %v771_v25 = vadd.f32 %v5957_v19, %v770_v21 }
  0xa0   : > { %5568 = vmatmul.msk.f32.gmra.mxu0 %vm427_vm0, %v412_v22  ;;  %5596 = vmatmul.msk.f32.gmra.mxu1 %vm427_vm0, %v657_v23  ;;  %v613_v28 = vmax.f32 %v530_v24, 0.0  ;;  %v854_v29 = vmax.f32 %v771_v25, 0.0 }
  0xa1   : > { %5624 = vmatmul.msk.f32.gmra.mxu2 %vm427_vm0, %v926_v26  ;;  %5652 = vmatmul.msk.f32.gmra.mxu3 %vm427_vm0, %v1195_v27 }
  0xa2   : > { %v882_v39 = vmax.f32 %v613_v28, %v854_v29 }
  0xa4   : > { %v1039_v30 = vpop.f32.mrf.mxu2  ;;  %v1308_v31 = vpop.f32.mrf.mxu3 }
  0xa5   : > { %v1040_v32 = vadd.f32 %v5957_v19, %v1039_v30  ;;  %v1309_v33 = vadd.f32 %v5957_v19, %v1308_v31  ;;  %v532_v34 = vpop.f32.mrf.mxu0  ;;  %v773_v35 = vpop.f32.mrf.mxu1 }
  0xa6   : > { %v533_v44 = vadd.f32 %v5957_v19, %v532_v34  ;;  %v774_v45 = vadd.f32 %v5957_v19, %v773_v35  ;;  %v1776_v34 = vld [vmem:[%s10032_s3 + $0x2a8] sm:$0xff] }
  0xa7   : > { %v1123_v42 = vmax.f32 %v1040_v32, 0.0  ;;  %v1392_v43 = vmax.f32 %v1309_v33, 0.0  ;;  %v416_v32 = vld [vmem:[%s5797_s23 + $0xa0] sm:$0xff]  ;;  %1861 = vmatpush.msrb.mxu0 %v1776_v34 }
  0xa8   : > { %5569 = vmatmul.msk.f32.gmra.mxu0 %vm427_vm0, %v413_v36  ;;  %5597 = vmatmul.msk.f32.gmra.mxu1 %vm427_vm0, %v658_v37  ;;  %v614_v48 = vmax.f32 %v533_v44, 0.0  ;;  %v855_v49 = vmax.f32 %v774_v45, 0.0  ;;  %v661_v33 = vld [vmem:[%s5797_s23 + $0x180] sm:$0xff]  ;;  %v1818_v44 = vld [vmem:[%s10032_s3 + $0x3f8] sm:$0xff] }
  0xa9   : > { %v1151_v46 = vmax.f32 %v882_v39, %v1123_v42  ;;  %5625 = vmatmul.msk.f32.gmra.mxu2 %vm427_vm0, %v927_v40  ;;  %5653 = vmatmul.msk.f32.gmra.mxu3 %vm427_vm0, %v1196_v41  ;;  %v930_v37 = vld [vmem:[%s5797_s23 + $0x260] sm:$0xff] }
  0xaa   : > { %v883_v63 = vmax.f32 %v614_v48, %v855_v49  ;;  %2005 = vmatpush.msrb.mxu2 %v1818_v44  ;;  %v1801_v49 = vld [vmem:[%s10032_s3 + $0x370] sm:$0xff] }
  0xab   : > { %v1420_v47 = vmax.f32 %v1151_v46, %v1392_v43  ;;  %v1802_v43 = vld [vmem:[%s10032_s3 + $0x378] sm:$0xff] }
  0xac   : > { %v1042_v50 = vpop.f32.mrf.mxu2  ;;  %v1311_v51 = vpop.f32.mrf.mxu3  ;;  %1928 = vmatpush.msrb.mxu1 %v1802_v43 }
  0xad   : > { %1448 = vst [vmem:[#allocation2] sm:$0xff] %v1420_v47  ;;  %v1043_v52 = vadd.f32 %v5957_v19, %v1042_v50  ;;  %v1312_v53 = vadd.f32 %v5957_v19, %v1311_v51  ;;  %v535_v54 = vpop.f32.mrf.mxu0  ;;  %v776_v55 = vpop.f32.mrf.mxu1  ;;  %v1834_v47 = vld [vmem:[%s10032_s3 + $0x478] sm:$0xff]  ;;  %v1817_v50 = vld [vmem:[%s10032_s3 + $0x3f0] sm:$0xff] }
  0xae   : > { %v536_v59 = vadd.f32 %v5957_v19, %v535_v54  ;;  %v777_v60 = vadd.f32 %v5957_v19, %v776_v55  ;;  %2082 = vmatpush.msrb.mxu3 %v1834_v47  ;;  %v1833_v51 = vld [vmem:[%s10032_s3 + $0x470] sm:$0xff]  ;;  %v417_v54 = vld [vmem:[%s5797_s23 + $0xa8] sm:$0xff]  ;;  %1929 = vmatpush.msrb.mxu1 %v1801_v49  ;;  %v1794_v47 = vld [vmem:[%s10032_s3 + $0x338] sm:$0xff] }
  0xaf   : > { %v1124_v0 = vmax.f32 %v1043_v52, 0.0  ;;  %v1393_v1 = vmax.f32 %v1312_v53, 0.0  ;;  %v662_v55 = vld [vmem:[%s5797_s23 + $0x188] sm:$0xff]  ;;  %2006 = vmatpush.msrb.mxu2 %v1817_v50  ;;  %v1810_v49 = vld [vmem:[%s10032_s3 + $0x3b8] sm:$0xff] }
  0xb0   : > { %5570 = vmatmul.msk.f32.gmra.mxu0 %vm427_vm0, %v414_v56  ;;  %5598 = vmatmul.msk.f32.gmra.mxu1 %vm427_vm0, %v659_v57  ;;  %v615_v3 = vmax.f32 %v536_v59, 0.0  ;;  %v856_v4 = vmax.f32 %v777_v60, 0.0  ;;  %v1800_v60 = vld [vmem:[%s10032_s3 + $0x368] sm:$0xff] }
  0xb1   : > { %v1152_v2 = vmax.f32 %v883_v63, %v1124_v0  ;;  %5626 = vmatmul.msk.f32.gmra.mxu2 %vm427_vm0, %v928_v61  ;;  %5654 = vmatmul.msk.f32.gmra.mxu3 %vm427_vm0, %v1197_v62  ;;  %v1816_v61 = vld [vmem:[%s10032_s3 + $0x3e8] sm:$0xff] }
  0xb2   : > { %v884_v14 = vmax.f32 %v615_v3, %v856_v4  ;;  %2083 = vmatpush.msrb.mxu3 %v1833_v51  ;;  %v1832_v62 = vld [vmem:[%s10032_s3 + $0x468] sm:$0xff]  ;;  %1930 = vmatpush.msrb.mxu1 %v1800_v60  ;;  %v933_v60 = vld [vmem:[%s5797_s23 + $0x278] sm:$0xff] }
  0xb3   : > { %v1421_v5 = vmax.f32 %v1152_v2, %v1393_v1  ;;  %v931_v0 = vld [vmem:[%s5797_s23 + $0x268] sm:$0xff]  ;;  %2007 = vmatpush.msrb.mxu2 %v1816_v61  ;;  %v1202_v61 = vld [vmem:[%s5797_s23 + $0x358] sm:$0xff] }
  0xb4   : > { %v1045_v6 = vpop.f32.mrf.mxu2  ;;  %v1314_v7 = vpop.f32.mrf.mxu3  ;;  %v1200_v1 = vld [vmem:[%s5797_s23 + $0x348] sm:$0xff]  ;;  %2084 = vmatpush.msrb.mxu3 %v1832_v62 }
  0xb5   : > { %1449 = vst [vmem:[#allocation2 + $0x8] sm:$0xff] %v1421_v5  ;;  %v1046_v8 = vadd.f32 %v5957_v19, %v1045_v6  ;;  %v1315_v9 = vadd.f32 %v5957_v19, %v1314_v7  ;;  %v538_v10 = vpop.f32.mrf.mxu0  ;;  %v779_v11 = vpop.f32.mrf.mxu1  ;;  %v1799_v6 = vld [vmem:[%s10032_s3 + $0x360] sm:$0xff] }
  0xb6   : > { %v539_v20 = vadd.f32 %v5957_v19, %v538_v10  ;;  %v780_v21 = vadd.f32 %v5957_v19, %v779_v11  ;;  %v1815_v7 = vld [vmem:[%s10032_s3 + $0x3e0] sm:$0xff]  ;;  %v1798_v10 = vld [vmem:[%s10032_s3 + $0x358] sm:$0xff]  ;;  %1931 = vmatpush.msrb.mxu1 %v1799_v6 }
  0xb7   : > { %v1125_v17 = vmax.f32 %v1046_v8, 0.0  ;;  %v1394_v18 = vmax.f32 %v1315_v9, 0.0  ;;  %v1831_v8 = vld [vmem:[%s10032_s3 + $0x460] sm:$0xff]  ;;  %v1814_v11 = vld [vmem:[%s10032_s3 + $0x3d8] sm:$0xff]  ;;  %2008 = vmatpush.msrb.mxu2 %v1815_v7  ;;  %v1792_v7 = vld [vmem:[%s10032_s3 + $0x328] sm:$0xff] }
  0xb8   : > { %5571 = vmatmul.msk.f32.gmra.mxu0 %vm427_vm0, %v415_v12  ;;  %5599 = vmatmul.msk.f32.gmra.mxu1 %vm427_vm0, %v660_v13  ;;  %v616_v24 = vmax.f32 %v539_v20, 0.0  ;;  %v857_v25 = vmax.f32 %v780_v21, 0.0  ;;  %v1830_v12 = vld [vmem:[%s10032_s3 + $0x458] sm:$0xff]  ;;  %v1813_v20 = vld [vmem:[%s10032_s3 + $0x3d0] sm:$0xff] }
  0xb9   : > { %v1153_v22 = vmax.f32 %v884_v14, %v1125_v17  ;;  %5627 = vmatmul.msk.f32.gmra.mxu2 %vm427_vm0, %v929_v15  ;;  %5655 = vmatmul.msk.f32.gmra.mxu3 %vm427_vm0, %v1198_v16  ;;  %v1797_v16 = vld [vmem:[%s10032_s3 + $0x350] sm:$0xff]  ;;  %v1774_v6 = vld [vmem:[%s10032_s3 + $0x298] sm:$0xff] }
  0xba   : > { %v885_v39 = vmax.f32 %v616_v24, %v857_v25  ;;  %2085 = vmatpush.msrb.mxu3 %v1831_v8  ;;  %1932 = vmatpush.msrb.mxu1 %v1798_v10  ;;  %v1829_v21 = vld [vmem:[%s10032_s3 + $0x450] sm:$0xff]  ;;  %v1808_v8 = vld [vmem:[%s10032_s3 + $0x3a8] sm:$0xff] }
  0xbb   : > { %v6011_v23 = vmax.f32 %v1153_v22, %v1394_v18  ;;  %2009 = vmatpush.msrb.mxu2 %v1814_v11 }
  0xbc   : > { %v1048_v26 = vpop.f32.mrf.mxu2  ;;  %v1317_v27 = vpop.f32.mrf.mxu3  ;;  %2086 = vmatpush.msrb.mxu3 %v1830_v12  ;;  %1933 = vmatpush.msrb.mxu1 %v1797_v16  ;;  %v1773_v16 = vld [vmem:[%s10032_s3 + $0x290] sm:$0xff] }
  0xbd   : > { %1450 = vst [vmem:[#allocation2 + $0x18] sm:$0xff] %v6011_v23  ;;  %v1049_v28 = vadd.f32 %v5957_v19, %v1048_v26  ;;  %v1318_v29 = vadd.f32 %v5957_v19, %v1317_v27  ;;  %v541_v30 = vpop.f32.mrf.mxu0  ;;  %v782_v31 = vpop.f32.mrf.mxu1  ;;  %v418_v27 = vld [vmem:[%s5797_s23 + $0xb0] sm:$0xff]  ;;  %2010 = vmatpush.msrb.mxu2 %v1813_v20  ;;  %v1823_v20 = vld [vmem:[%s10032_s3 + $0x420] sm:$0xff] }
  0xbe   : > { %v542_v35 = vadd.f32 %v5957_v19, %v541_v30  ;;  %v783_v36 = vadd.f32 %v5957_v19, %v782_v31  ;;  %2087 = vmatpush.msrb.mxu3 %v1829_v21 }
  0xbf   : > { %v1126_v40 = vmax.f32 %v1049_v28, 0.0  ;;  %v1395_v41 = vmax.f32 %v1318_v29, 0.0  ;;  %v663_v28 = vld [vmem:[%s5797_s23 + $0x190] sm:$0xff]  ;;  %v1775_v29 = vld [vmem:[%s10032_s3 + $0x2a0] sm:$0xff] }
  0xc0   : > { %5572 = vmatmul.msk.f32.gmra.mxu0 %vm427_vm0, %v416_v32  ;;  %5600 = vmatmul.msk.f32.gmra.mxu1 %vm427_vm0, %v661_v33  ;;  %v617_v45 = vmax.f32 %v542_v35, 0.0  ;;  %v858_v46 = vmax.f32 %v783_v36, 0.0  ;;  %v932_v32 = vld [vmem:[%s5797_s23 + $0x270] sm:$0xff] }
  0xc1   : > { %v1154_v42 = vmax.f32 %v885_v39, %v1126_v40  ;;  %5628 = vmatmul.msk.f32.gmra.mxu2 %vm427_vm0, %v930_v37  ;;  %5656 = vmatmul.msk.f32.gmra.mxu3 %vm427_vm0, %v1199_v38  ;;  %v1201_v33 = vld [vmem:[%s5797_s23 + $0x350] sm:$0xff]  ;;  %v1796_v37 = vld [vmem:[%s10032_s3 + $0x348] sm:$0xff] }
  0xc2   : > { %v886_v63 = vmax.f32 %v617_v45, %v858_v46  ;;  %1862 = vmatpush.msrb.mxu0 %v1775_v29  ;;  %v1812_v38 = vld [vmem:[%s10032_s3 + $0x3c8] sm:$0xff]  ;;  %1934 = vmatpush.msrb.mxu1 %v1796_v37  ;;  %v1827_v45 = vld [vmem:[%s10032_s3 + $0x440] sm:$0xff]  ;;  %v1806_v37 = vld [vmem:[%s10032_s3 + $0x398] sm:$0xff] }
  0xc3   : > { %v6038_v48 = vmax.f32 %v1154_v42, %v1395_v41  ;;  %v1828_v39 = vld [vmem:[%s10032_s3 + $0x448] sm:$0xff]  ;;  %v1795_v41 = vld [vmem:[%s10032_s3 + $0x340] sm:$0xff]  ;;  %2011 = vmatpush.msrb.mxu2 %v1812_v38  ;;  %v1822_v38 = vld [vmem:[%s10032_s3 + $0x418] sm:$0xff] }
  0xc4   : > { %v1051_v52 = vpop.f32.mrf.mxu2  ;;  %v1320_v53 = vpop.f32.mrf.mxu3  ;;  %v1811_v42 = vld [vmem:[%s10032_s3 + $0x3c0] sm:$0xff]  ;;  %2088 = vmatpush.msrb.mxu3 %v1828_v39  ;;  %1935 = vmatpush.msrb.mxu1 %v1795_v41  ;;  %v1789_v41 = vld [vmem:[%s10032_s3 + $0x310] sm:$0xff] }
  0xc5   : > { %1451 = vst [vmem:[#allocation2 + $0x20] sm:$0xff] %v6038_v48  ;;  %v1052_v56 = vadd.f32 %v5957_v19, %v1051_v52  ;;  %v1321_v57 = vadd.f32 %v5957_v19, %v1320_v53  ;;  %v544_v58 = vpop.f32.mrf.mxu0  ;;  %v785_v59 = vpop.f32.mrf.mxu1  ;;  %2012 = vmatpush.msrb.mxu2 %v1811_v42  ;;  %v1826_v52 = vld [vmem:[%s10032_s3 + $0x438] sm:$0xff]  ;;  %1863 = vmatpush.msrb.mxu0 %v1774_v6  ;;  %v1771_v39 = vld [vmem:[%s10032_s3 + $0x280] sm:$0xff]  ;;  %v1805_v42 = vld [vmem:[%s10032_s3 + $0x390] sm:$0xff] }
  0xc6   : > { %v545_v4 = vadd.f32 %v5957_v19, %v544_v58  ;;  %v786_v5 = vadd.f32 %v5957_v19, %v785_v59  ;;  %v664_v58 = vld [vmem:[%s5797_s23 + $0x198] sm:$0xff]  ;;  %2089 = vmatpush.msrb.mxu3 %v1827_v45  ;;  %1936 = vmatpush.msrb.mxu1 %v1794_v47  ;;  %v1821_v45 = vld [vmem:[%s10032_s3 + $0x410] sm:$0xff] }
  0xc7   : > { %v1127_v2 = vmax.f32 %v1052_v56, 0.0  ;;  %v1396_v3 = vmax.f32 %v1321_v57, 0.0  ;;  %v419_v57 = vld [vmem:[%s5797_s23 + $0xb8] sm:$0xff]  ;;  %2013 = vmatpush.msrb.mxu2 %v1810_v49  ;;  %1864 = vmatpush.msrb.mxu0 %v1773_v16  ;;  %v1788_v49 = vld [vmem:[%s10032_s3 + $0x308] sm:$0xff] }
  0xc8   : > { %5573 = vmatmul.msk.f32.gmra.mxu0 %vm427_vm0, %v417_v54  ;;  %5601 = vmatmul.msk.f32.gmra.mxu1 %vm427_vm0, %v662_v55  ;;  %v618_v14 = vmax.f32 %v545_v4, 0.0  ;;  %v859_v15 = vmax.f32 %v786_v5, 0.0  ;;  %v1825_v4 = vld [vmem:[%s10032_s3 + $0x430] sm:$0xff] }
  0xc9   : > { %v1155_v9 = vmax.f32 %v886_v63, %v1127_v2  ;;  %5629 = vmatmul.msk.f32.gmra.mxu2 %vm427_vm0, %v931_v0  ;;  %5657 = vmatmul.msk.f32.gmra.mxu3 %vm427_vm0, %v1200_v1  ;;  %v1793_v2 = vld [vmem:[%s10032_s3 + $0x330] sm:$0xff] }
  0xca   : > { %v887_v34 = vmax.f32 %v618_v14, %v859_v15  ;;  %2090 = vmatpush.msrb.mxu3 %v1826_v52  ;;  %1937 = vmatpush.msrb.mxu1 %v1793_v2  ;;  %v1791_v14 = vld [vmem:[%s10032_s3 + $0x320] sm:$0xff] }
  0xcb   : > { %v6089_v13 = vmax.f32 %v1155_v9, %v1396_v3  ;;  %v1809_v3 = vld [vmem:[%s10032_s3 + $0x3b0] sm:$0xff]  ;;  %v1824_v9 = vld [vmem:[%s10032_s3 + $0x428] sm:$0xff]  ;;  %v1807_v15 = vld [vmem:[%s10032_s3 + $0x3a0] sm:$0xff] }
  0xcc   : > { %v1054_v17 = vpop.f32.mrf.mxu2  ;;  %v1323_v18 = vpop.f32.mrf.mxu3  ;;  %2014 = vmatpush.msrb.mxu2 %v1809_v3  ;;  %2091 = vmatpush.msrb.mxu3 %v1825_v4  ;;  %v1787_v3 = vld [vmem:[%s10032_s3 + $0x300] sm:$0xff] }
  0xcd   : > { %1452 = vst [vmem:[#allocation2 + $0x30] sm:$0xff] %v6089_v13  ;;  %v1055_v22 = vadd.f32 %v5957_v19, %v1054_v17  ;;  %v1324_v24 = vadd.f32 %v5957_v19, %v1323_v18  ;;  %v547_v25 = vpop.f32.mrf.mxu0  ;;  %v788_v26 = vpop.f32.mrf.mxu1  ;;  %1938 = vmatpush.msrb.mxu1 %v1792_v7  ;;  %v1803_v4 = vld [vmem:[%s10032_s3 + $0x380] sm:$0xff] }
  0xce   : > { %v548_v30 = vadd.f32 %v5957_v19, %v547_v25  ;;  %v789_v31 = vadd.f32 %v5957_v19, %v788_v26  ;;  %2015 = vmatpush.msrb.mxu2 %v1808_v8  ;;  %v420_v26 = vld [vmem:[%s5797_s23 + $0xc0] sm:$0xff]  ;;  %2092 = vmatpush.msrb.mxu3 %v1824_v9 }
  0xcf   : > { %v1128_v35 = vmax.f32 %v1055_v22, 0.0  ;;  %v1397_v36 = vmax.f32 %v1324_v24, 0.0  ;;  %1939 = vmatpush.msrb.mxu1 %v1791_v14 }
  0xd0   : > { %5574 = vmatmul.msk.f32.gmra.mxu0 %vm427_vm0, %v418_v27  ;;  %5602 = vmatmul.msk.f32.gmra.mxu1 %vm427_vm0, %v663_v28  ;;  %v619_v43 = vmax.f32 %v548_v30, 0.0  ;;  %v860_v44 = vmax.f32 %v789_v31, 0.0  ;;  %v665_v27 = vld [vmem:[%s5797_s23 + $0x1a0] sm:$0xff]  ;;  %v1772_v28 = vld [vmem:[%s10032_s3 + $0x288] sm:$0xff] }
  0xd1   : > { %v1156_v40 = vmax.f32 %v887_v34, %v1128_v35  ;;  %5630 = vmatmul.msk.f32.gmra.mxu2 %vm427_vm0, %v932_v32  ;;  %5658 = vmatmul.msk.f32.gmra.mxu3 %vm427_vm0, %v1201_v33  ;;  %v934_v31 = vld [vmem:[%s5797_s23 + $0x280] sm:$0xff] }
  0xd2   : > { %v888_v59 = vmax.f32 %v619_v43, %v860_v44  ;;  %v1203_v32 = vld [vmem:[%s5797_s23 + $0x360] sm:$0xff]  ;;  %2016 = vmatpush.msrb.mxu2 %v1807_v15  ;;  %2093 = vmatpush.msrb.mxu3 %v1823_v20  ;;  %v667_v20 = vld [vmem:[%s5797_s23 + $0x1b0] sm:$0xff] }
  0xd3   : > { %v6134_v46 = vmax.f32 %v1156_v40, %v1397_v36  ;;  %v1790_v36 = vld [vmem:[%s10032_s3 + $0x318] sm:$0xff]  ;;  %1865 = vmatpush.msrb.mxu0 %v1772_v28 }
  0xd4   : > { %v1057_v50 = vpop.f32.mrf.mxu2  ;;  %v1326_v51 = vpop.f32.mrf.mxu3  ;;  %1940 = vmatpush.msrb.mxu1 %v1790_v36  ;;  %2017 = vmatpush.msrb.mxu2 %v1806_v37 }
  0xd5   : > { %1453 = vst [vmem:[#allocation2 + $0x38] sm:$0xff] %v6134_v46  ;;  %v1058_v53 = vadd.f32 %v5957_v19, %v1057_v50  ;;  %v1327_v54 = vadd.f32 %v5957_v19, %v1326_v51  ;;  %v550_v55 = vpop.f32.mrf.mxu0  ;;  %v791_v56 = vpop.f32.mrf.mxu1  ;;  %2094 = vmatpush.msrb.mxu3 %v1822_v38  ;;  %v1804_v50 = vld [vmem:[%s10032_s3 + $0x388] sm:$0xff]  ;;  %1866 = vmatpush.msrb.mxu0 %v1771_v39  ;;  %v423_v39 = vld [vmem:[%s5797_s23 + $0xd8] sm:$0xff] }
  0xd6   : > { %v551_v0 = vadd.f32 %v5957_v19, %v550_v55  ;;  %v792_v1 = vadd.f32 %v5957_v19, %v791_v56  ;;  %1941 = vmatpush.msrb.mxu1 %v1789_v41  ;;  %2018 = vmatpush.msrb.mxu2 %v1805_v42  ;;  %v937_v42 = vld [vmem:[%s5797_s23 + $0x298] sm:$0xff] }
  0xd7   : > { %v1129_v62 = vmax.f32 %v1058_v53, 0.0  ;;  %v1398_v63 = vmax.f32 %v1327_v54, 0.0  ;;  %v1820_v53 = vld [vmem:[%s10032_s3 + $0x408] sm:$0xff]  ;;  %2095 = vmatpush.msrb.mxu3 %v1821_v45 }
  0xd8   : > { %5575 = vmatmul.msk.f32.gmra.mxu0 %vm427_vm0, %v419_v57  ;;  %5603 = vmatmul.msk.f32.gmra.mxu1 %vm427_vm0, %v664_v58  ;;  %v620_v11 = vmax.f32 %v551_v0, 0.0  ;;  %v861_v12 = vmax.f32 %v792_v1, 0.0  ;;  %v421_v58 = vld [vmem:[%s5797_s23 + $0xc8] sm:$0xff] }
  0xd9   : > { %v1157_v5 = vmax.f32 %v888_v59, %v1129_v62  ;;  %5631 = vmatmul.msk.f32.gmra.mxu2 %vm427_vm0, %v933_v60  ;;  %5659 = vmatmul.msk.f32.gmra.mxu3 %vm427_vm0, %v1202_v61  ;;  %v666_v59 = vld [vmem:[%s5797_s23 + $0x1a8] sm:$0xff] }
  0xda   : > { %v889_v33 = vmax.f32 %v620_v11, %v861_v12  ;;  %v935_v61 = vld [vmem:[%s5797_s23 + $0x288] sm:$0xff]  ;;  %1942 = vmatpush.msrb.mxu1 %v1788_v49  ;;  %2019 = vmatpush.msrb.mxu2 %v1804_v50 }
  0xdb   : > { %v6179_v10 = vmax.f32 %v1157_v5, %v1398_v63  ;;  %v1204_v62 = vld [vmem:[%s5797_s23 + $0x368] sm:$0xff]  ;;  %2096 = vmatpush.msrb.mxu3 %v1820_v53  ;;  %v1819_v5 = vld [vmem:[%s10032_s3 + $0x400] sm:$0xff] }
  0xdc   : > { %v1060_v17 = vpop.f32.mrf.mxu2  ;;  %v1329_v18 = vpop.f32.mrf.mxu3  ;;  %1943 = vmatpush.msrb.mxu1 %v1787_v3  ;;  %2020 = vmatpush.msrb.mxu2 %v1803_v4  ;;  %v1711_v3 = vld [vmem:[#allocation2 + $0x1a] sm:$0xff] }
  0xdd   : > { %1454 = vst [vmem:[#allocation2 + $0x48] sm:$0xff] %v6179_v10  ;;  %v1061_v21 = vadd.f32 %v5957_v19, %v1060_v17  ;;  %v1330_v22 = vadd.f32 %v5957_v19, %v1329_v18  ;;  %v553_v24 = vpop.f32.mrf.mxu0  ;;  %v794_v25 = vpop.f32.mrf.mxu1  ;;  %2097 = vmatpush.msrb.mxu3 %v1819_v5  ;;  %v422_v18 = vld [vmem:[%s5797_s23 + $0xd0] sm:$0xff]  ;;  %v1731_v4 = vld [vmem:[#allocation2 + $0x1b] sm:$0xff] }
  0xde   : > { %v554_v29 = vadd.f32 %v5957_v19, %v553_v24  ;;  %v795_v30 = vadd.f32 %v5957_v19, %v794_v25  ;;  %v936_v24 = vld [vmem:[%s5797_s23 + $0x290] sm:$0xff] }
  0xdf   : > { %v1130_v34 = vmax.f32 %v1061_v21, 0.0  ;;  %v1399_v35 = vmax.f32 %v1330_v22, 0.0  ;;  %v1205_v25 = vld [vmem:[%s5797_s23 + $0x370] sm:$0xff] }
  0xe0   : > { %5576 = vmatmul.msk.f32.gmra.mxu0 %vm427_vm0, %v420_v26  ;;  %5604 = vmatmul.msk.f32.gmra.mxu1 %vm427_vm0, %v665_v27  ;;  %v621_v43 = vmax.f32 %v554_v29, 0.0  ;;  %v862_v44 = vmax.f32 %v795_v30, 0.0 }
  0xe1   : > { %v1158_v40 = vmax.f32 %v889_v33, %v1130_v34  ;;  %5632 = vmatmul.msk.f32.gmra.mxu2 %vm427_vm0, %v934_v31  ;;  %5660 = vmatmul.msk.f32.gmra.mxu3 %vm427_vm0, %v1203_v32 }
  0xe2   : > { %v890_v60 = vmax.f32 %v621_v43, %v862_v44  ;;  %v1206_v43 = vld [vmem:[%s5797_s23 + $0x378] sm:$0xff] }
  0xe3   : > { %v6230_v47 = vmax.f32 %v1158_v40, %v1399_v35  ;;  %v668_v40 = vld [vmem:[%s5797_s23 + $0x1b8] sm:$0xff] }
  0xe4   : > { %v1063_v51 = vpop.f32.mrf.mxu2  ;;  %v1332_v52 = vpop.f32.mrf.mxu3 }
  0xe5   : > { %1455 = vst [vmem:[#allocation2 + $0x50] sm:$0xff] %v6230_v47  ;;  %v1064_v54 = vadd.f32 %v5957_v19, %v1063_v51  ;;  %v1333_v55 = vadd.f32 %v5957_v19, %v1332_v52  ;;  %v556_v56 = vpop.f32.mrf.mxu0  ;;  %v797_v57 = vpop.f32.mrf.mxu1 }
  0xe6   : > { %v557_v1 = vadd.f32 %v5957_v19, %v556_v56  ;;  %v798_v2 = vadd.f32 %v5957_v19, %v797_v57 }
  0xe7   : > { %v1131_v63 = vmax.f32 %v1064_v54, 0.0  ;;  %v1400_v0 = vmax.f32 %v1333_v55, 0.0 }
  0xe8   : > { %5577 = vmatmul.msk.f32.gmra.mxu0 %vm427_vm0, %v421_v58  ;;  %5605 = vmatmul.msk.f32.gmra.mxu1 %vm427_vm0, %v666_v59  ;;  %v622_v8 = vmax.f32 %v557_v1, 0.0  ;;  %v863_v9 = vmax.f32 %v798_v2, 0.0  ;;  %v1691_v2 = vld [vmem:[#allocation2 + $0x19] sm:$0xff] }
  0xe9   : > { %v1159_v6 = vmax.f32 %v890_v60, %v1131_v63  ;;  %5633 = vmatmul.msk.f32.gmra.mxu2 %vm427_vm0, %v935_v61  ;;  %5661 = vmatmul.msk.f32.gmra.mxu3 %vm427_vm0, %v1204_v62 }
  0xea   : > { %v891_v26 = vmax.f32 %v622_v8, %v863_v9 }
  0xeb   : > { %v6263_v7 = vmax.f32 %v1159_v6, %v1400_v0 }
  0xec   : > { %v1066_v11 = vpop.f32.mrf.mxu2  ;;  %v1335_v12 = vpop.f32.mrf.mxu3 }
  0xed   : > { %1456 = vst [vmem:[#allocation2 + $0x60] sm:$0xff] %v6263_v7  ;;  %v1067_v14 = vadd.f32 %v5957_v19, %v1066_v11  ;;  %v1336_v15 = vadd.f32 %v5957_v19, %v1335_v12  ;;  %v559_v16 = vpop.f32.mrf.mxu0  ;;  %v800_v17 = vpop.f32.mrf.mxu1 }
  0xee   : > { %v560_v21 = vadd.f32 %v5957_v19, %v559_v16  ;;  %v801_v22 = vadd.f32 %v5957_v19, %v800_v17 }
  0xef   : > { %v1132_v27 = vmax.f32 %v1067_v14, 0.0  ;;  %v1401_v28 = vmax.f32 %v1336_v15, 0.0 }
  0xf0   : > { %5578 = vmatmul.msk.f32.gmra.mxu0 %vm427_vm0, %v422_v18  ;;  %5606 = vmatmul.msk.f32.gmra.mxu1 %vm427_vm0, %v667_v20  ;;  %v623_v30 = vmax.f32 %v560_v21, 0.0  ;;  %v864_v31 = vmax.f32 %v801_v22, 0.0 }
  0xf1   : > { %v1160_v29 = vmax.f32 %v891_v26, %v1132_v27  ;;  %5634 = vmatmul.msk.f32.gmra.mxu2 %vm427_vm0, %v936_v24  ;;  %5662 = vmatmul.msk.f32.gmra.mxu3 %vm427_vm0, %v1205_v25  ;;  %v1692_v24 = vld [vmem:[#allocation2 + $0x21] sm:$0xff] }
  0xf2   : > { %v892_v41 = vmax.f32 %v623_v30, %v864_v31  ;;  %v1712_v25 = vld [vmem:[#allocation2 + $0x22] sm:$0xff] }
  0xf3   : > { %v6278_v32 = vmax.f32 %v1160_v29, %v1401_v28  ;;  %v1732_v26 = vld [vmem:[#allocation2 + $0x23] sm:$0xff] }
  0xf4   : > { %v1069_v33 = vpop.f32.mrf.mxu2  ;;  %v1338_v34 = vpop.f32.mrf.mxu3 }
  0xf5   : > { %1457 = vst [vmem:[#allocation2 + $0x68] sm:$0xff] %v6278_v32  ;;  %v1070_v35 = vadd.f32 %v5957_v19, %v1069_v33  ;;  %v1339_v36 = vadd.f32 %v5957_v19, %v1338_v34  ;;  %v562_v37 = vpop.f32.mrf.mxu0  ;;  %v803_v38 = vpop.f32.mrf.mxu1 }
  0xf6   : > { %v563_v49 = vadd.f32 %v5957_v19, %v562_v37  ;;  %v804_v50 = vadd.f32 %v5957_v19, %v803_v38 }
  0xf7   : > { %v1133_v44 = vmax.f32 %v1070_v35, 0.0  ;;  %v1402_v45 = vmax.f32 %v1339_v36, 0.0 }
  0xf8   : > { %5579 = vmatmul.msk.f32.gmra.mxu0 %vm427_vm0, %v423_v39  ;;  %5607 = vmatmul.msk.f32.gmra.mxu1 %vm427_vm0, %v668_v40  ;;  %v624_v53 = vmax.f32 %v563_v49, 0.0  ;;  %v865_v54 = vmax.f32 %v804_v50, 0.0 }
  0xf9   : > { %v1161_v51 = vmax.f32 %v892_v41, %v1133_v44  ;;  %5635 = vmatmul.msk.f32.gmra.mxu2 %vm427_vm0, %v937_v42  ;;  %5663 = vmatmul.msk.f32.gmra.mxu3 %vm427_vm0, %v1206_v43  ;;  %v1693_v42 = vld [vmem:[#allocation2 + $0x31] sm:$0xff] }
  0xfa   : > { %v893_v63 = vmax.f32 %v624_v53, %v865_v54  ;;  %v1713_v43 = vld [vmem:[#allocation2 + $0x32] sm:$0xff] }
  0xfb   : > { %v6293_v52 = vmax.f32 %v1161_v51, %v1402_v45  ;;  %v1733_v44 = vld [vmem:[#allocation2 + $0x33] sm:$0xff] }
  0xfc   : > { %v1072_v55 = vpop.f32.mrf.mxu2  ;;  %v1341_v56 = vpop.f32.mrf.mxu3 }
  0xfd   : > { %1458 = vst [vmem:[#allocation2 + $0x78] sm:$0xff] %v6293_v52  ;;  %v1073_v57 = vadd.f32 %v5957_v19, %v1072_v55  ;;  %v1342_v58 = vadd.f32 %v5957_v19, %v1341_v56  ;;  %v565_v59 = vpop.f32.mrf.mxu0  ;;  %v806_v60 = vpop.f32.mrf.mxu1 }
  0xfe   : > { %v566_v61 = vadd.f32 %v5957_v19, %v565_v59  ;;  %v807_v62 = vadd.f32 %v5957_v19, %v806_v60 }
  0xff   : > { %v1134_v0 = vmax.f32 %v1073_v57, 0.0  ;;  %v1403_v1 = vmax.f32 %v1342_v58, 0.0  ;;  %v1850_v58 = vld [vmem:[%s10032_s3 + $0x4f8] sm:$0xff] }
 0x100   : > { %1867 = vmatmul.f32.vlgmr.msrb.gmra.mxu0 %v6011_v23  ;;  %1944 = vmatmul.f32.vlgmr.msrb.gmra.mxu1 %v1691_v2  ;;  %v625_v6 = vmax.f32 %v566_v61, 0.0  ;;  %v866_v8 = vmax.f32 %v807_v62, 0.0  ;;  %v1734_v2 = vld [vmem:[#allocation2 + $0x3b] sm:$0xff] }
 0x101   : > { %v1162_v5 = vmax.f32 %v893_v63, %v1134_v0  ;;  %2021 = vmatmul.f32.vlgmr.msrb.gmra.mxu2 %v1711_v3  ;;  %2098 = vmatmul.f32.vlgmr.msrb.gmra.mxu3 %v1731_v4  ;;  %v1694_v0 = vld [vmem:[#allocation2 + $0x39] sm:$0xff] }
 0x102   : > { %v894_v17 = vmax.f32 %v625_v6, %v866_v8  ;;  %2159 = vmatpush.msra.mxu0 %v1850_v58  ;;  %v1847_v58 = vld [vmem:[%s10032_s3 + $0x4e0] sm:$0xff] }
 0x103   : > { %v6301_v9 = vmax.f32 %v1162_v5, %v1403_v1  ;;  %v1714_v1 = vld [vmem:[#allocation2 + $0x3a] sm:$0xff] }
 0x104   : > { %v1075_v11 = vpop.f32.mrf.mxu2  ;;  %v1344_v12 = vpop.f32.mrf.mxu3 }
 0x105   : > { %1459 = vst [vmem:[#allocation2 + $0x80] sm:$0xff] %v6301_v9  ;;  %v1076_v14 = vadd.f32 %v5957_v19, %v1075_v11  ;;  %v1345_v15 = vadd.f32 %v5957_v19, %v1344_v12  ;;  %v568_v16 = vpop.f32.mrf.mxu0  ;;  %v809_v23 = vpop.f32.mrf.mxu1 }
 0x106   : > { %v569_v21 = vadd.f32 %v5957_v19, %v568_v16  ;;  %v810_v22 = vadd.f32 %v5957_v19, %v809_v23  ;;  %v1849_v16 = vld [vmem:[%s10032_s3 + $0x4f0] sm:$0xff] }
 0x107   : > { %v1135_v18 = vmax.f32 %v1076_v14, 0.0  ;;  %v1404_v20 = vmax.f32 %v1345_v15, 0.0  ;;  %2160 = vmatpush.msra.mxu0 %v1849_v16 }
 0x108   : > { %1870 = vmatmul.f32.gmra.mxu0 %v6038_v48  ;;  %1947 = vmatmul.f32.gmra.mxu1 %v1692_v24  ;;  %v626_v29 = vmax.f32 %v569_v21, 0.0  ;;  %v867_v30 = vmax.f32 %v810_v22, 0.0  ;;  %v1695_v22 = vld [vmem:[#allocation2 + $0x49] sm:$0xff] }
 0x109   : > { %v1163_v27 = vmax.f32 %v894_v17, %v1135_v18  ;;  %2024 = vmatmul.f32.gmra.mxu2 %v1712_v25  ;;  %2101 = vmatmul.f32.gmra.mxu3 %v1732_v26  ;;  %v1715_v24 = vld [vmem:[#allocation2 + $0x4a] sm:$0xff] }
 0x10a   : > { %v895_v39 = vmax.f32 %v626_v29, %v867_v30  ;;  %v1735_v25 = vld [vmem:[#allocation2 + $0x4b] sm:$0xff] }
 0x10b   : > { %v6309_v28 = vmax.f32 %v1163_v27, %v1404_v20 }
 0x10c   : > { %v1078_v31 = vpop.f32.mrf.mxu2  ;;  %v1347_v33 = vpop.f32.mrf.mxu3 }
 0x10d   : > { %1460 = vst [vmem:[#allocation2 + $0x90] sm:$0xff] %v6309_v28  ;;  %v1079_v34 = vadd.f32 %v5957_v19, %v1078_v31  ;;  %v1348_v35 = vadd.f32 %v5957_v19, %v1347_v33  ;;  %v571_v36 = vpop.f32.mrf.mxu0  ;;  %v812_v48 = vpop.f32.mrf.mxu1 }
 0x10e   : > { %v572_v37 = vadd.f32 %v5957_v19, %v571_v36  ;;  %v813_v38 = vadd.f32 %v5957_v19, %v812_v48  ;;  %v1848_v48 = vld [vmem:[%s10032_s3 + $0x4e8] sm:$0xff] }
 0x10f   : > { %v1136_v40 = vmax.f32 %v1079_v34, 0.0  ;;  %v1405_v41 = vmax.f32 %v1348_v35, 0.0  ;;  %2161 = vmatpush.msra.mxu0 %v1848_v48 }
 0x110   : > { %1873 = vmatmul.f32.gmra.mxu0 %v6089_v13  ;;  %1950 = vmatmul.f32.gmra.mxu1 %v1693_v42  ;;  %v627_v49 = vmax.f32 %v572_v37, 0.0  ;;  %v868_v50 = vmax.f32 %v813_v38, 0.0  ;;  %v1696_v42 = vld [vmem:[#allocation2 + $0x51] sm:$0xff] }
 0x111   : > { %v1164_v45 = vmax.f32 %v895_v39, %v1136_v40  ;;  %2027 = vmatmul.f32.gmra.mxu2 %v1713_v43  ;;  %2104 = vmatmul.f32.gmra.mxu3 %v1733_v44  ;;  %v1716_v43 = vld [vmem:[#allocation2 + $0x52] sm:$0xff] }
 0x112   : > { %v896_v59 = vmax.f32 %v627_v49, %v868_v50  ;;  %v1736_v44 = vld [vmem:[#allocation2 + $0x53] sm:$0xff]  ;;  %2162 = vmatpush.msra.mxu0 %v1847_v58 }
 0x113   : > { %v6317_v51 = vmax.f32 %v1164_v45, %v1405_v41 }
 0x114   : > { %v1081_v53 = vpop.f32.mrf.mxu2  ;;  %v1350_v54 = vpop.f32.mrf.mxu3 }
 0x115   : > { %1461 = vst [vmem:[#allocation2 + $0x98] sm:$0xff] %v6317_v51  ;;  %v1082_v55 = vadd.f32 %v5957_v19, %v1081_v53  ;;  %v1351_v56 = vadd.f32 %v5957_v19, %v1350_v54  ;;  %v574_v57 = vpop.f32.mrf.mxu0  ;;  %v815_v13 = vpop.f32.mrf.mxu1 }
 0x116   : > { %v575_v62 = vadd.f32 %v5957_v19, %v574_v57  ;;  %v816_v63 = vadd.f32 %v5957_v19, %v815_v13 }
 0x117   : > { %v1137_v60 = vmax.f32 %v1082_v55, 0.0  ;;  %v1406_v61 = vmax.f32 %v1351_v56, 0.0 }
 0x118   : > { %1876 = vmatmul.f32.gmra.mxu0 %v6134_v46  ;;  %1953 = vmatmul.f32.gmra.mxu1 %v1694_v0  ;;  %v628_v5 = vmax.f32 %v575_v62, 0.0  ;;  %v869_v6 = vmax.f32 %v816_v63, 0.0  ;;  %v1697_v0 = vld [vmem:[#allocation2 + $0x61] sm:$0xff] }
 0x119   : > { %v1165_v3 = vmax.f32 %v896_v59, %v1137_v60  ;;  %2030 = vmatmul.f32.gmra.mxu2 %v1714_v1  ;;  %2107 = vmatmul.f32.gmra.mxu3 %v1734_v2  ;;  %v1717_v1 = vld [vmem:[#allocation2 + $0x62] sm:$0xff] }
 0x11a   : > { %v897_v18 = vmax.f32 %v628_v5, %v869_v6  ;;  %v1737_v2 = vld [vmem:[#allocation2 + $0x63] sm:$0xff] }
 0x11b   : > { %v6328_v4 = vmax.f32 %v1165_v3, %v1406_v61 }
 0x11c   : > { %v1084_v8 = vpop.f32.mrf.mxu2  ;;  %v1353_v11 = vpop.f32.mrf.mxu3 }
 0x11d   : > { %1462 = vst [vmem:[#allocation2 + $0xa8] sm:$0xff] %v6328_v4  ;;  %v1085_v12 = vadd.f32 %v5957_v19, %v1084_v8  ;;  %v1354_v14 = vadd.f32 %v5957_v19, %v1353_v11  ;;  %v577_v15 = vpop.f32.mrf.mxu0  ;;  %v818_v46 = vpop.f32.mrf.mxu1 }
 0x11e   : > { %v578_v23 = vadd.f32 %v5957_v19, %v577_v15  ;;  %v819_v17 = vadd.f32 %v5957_v19, %v818_v46  ;;  %v6345_v19 = vld [vmem:[%s10031_s2] ss:$0 sm:$0xff] }
 0x11f   : > { %v1138_v20 = vmax.f32 %v1085_v12, 0.0  ;;  %v1407_v21 = vmax.f32 %v1354_v14, 0.0 }
 0x120   : > { %1879 = vmatmul.f32.gmra.mxu0 %v6179_v10  ;;  %1956 = vmatmul.f32.gmra.mxu1 %v1695_v22  ;;  %v629_v27 = vmax.f32 %v578_v23, 0.0  ;;  %v870_v29 = vmax.f32 %v819_v17, 0.0  ;;  %v1718_v22 = vld [vmem:[#allocation2 + $0x6a] sm:$0xff] }
 0x121   : > { %v1166_v26 = vmax.f32 %v897_v18, %v1138_v20  ;;  %2033 = vmatmul.f32.gmra.mxu2 %v1715_v24  ;;  %2110 = vmatmul.f32.gmra.mxu3 %v1735_v25  ;;  %v1738_v24 = vld [vmem:[#allocation2 + $0x6b] sm:$0xff] }
 0x122   : > { %v898_v37 = vmax.f32 %v629_v27, %v870_v29 }
 0x123   : > { %v6339_v30 = vmax.f32 %v1166_v26, %v1407_v21  ;;  %v1698_v21 = vld [vmem:[#allocation2 + $0x69] sm:$0xff] }
 0x124   : > { %v1087_v31 = vpop.f32.mrf.mxu2  ;;  %v1356_v33 = vpop.f32.mrf.mxu3 }
 0x125   : > { %1463 = vst [vmem:[#allocation2 + $0xb0] sm:$0xff] %v6339_v30  ;;  %v1088_v10 = vadd.f32 %v6345_v19, %v1087_v31  ;;  %v1357_v34 = vadd.f32 %v6345_v19, %v1356_v33  ;;  %v580_v35 = vpop.f32.mrf.mxu0  ;;  %v821_v36 = vpop.f32.mrf.mxu1 }
 0x126   : > { %v581_v40 = vadd.f32 %v6345_v19, %v580_v35  ;;  %v822_v41 = vadd.f32 %v6345_v19, %v821_v36  ;;  %v1846_v36 = vld [vmem:[%s10032_s3 + $0x4d8] sm:$0xff] }
 0x127   : > { %v1139_v38 = vmax.f32 %v1088_v10, 0.0  ;;  %v1408_v39 = vmax.f32 %v1357_v34, 0.0  ;;  %2163 = vmatpush.msra.mxu0 %v1846_v36  ;;  %v1843_v36 = vld [vmem:[%s10032_s3 + $0x4c0] sm:$0xff] }
 0x128   : > { %1882 = vmatmul.f32.gmra.mxu0 %v6230_v47  ;;  %1959 = vmatmul.f32.gmra.mxu1 %v1696_v42  ;;  %v630_v50 = vmax.f32 %v581_v40, 0.0  ;;  %v871_v53 = vmax.f32 %v822_v41, 0.0  ;;  %v1699_v41 = vld [vmem:[#allocation2 + $0x79] sm:$0xff] }
 0x129   : > { %v1167_v45 = vmax.f32 %v898_v37, %v1139_v38  ;;  %2036 = vmatmul.f32.gmra.mxu2 %v1716_v43  ;;  %2113 = vmatmul.f32.gmra.mxu3 %v1736_v44  ;;  %v1719_v42 = vld [vmem:[#allocation2 + $0x7a] sm:$0xff] }
 0x12a   : > { %v899_v61 = vmax.f32 %v630_v50, %v871_v53  ;;  %v1739_v43 = vld [vmem:[#allocation2 + $0x7b] sm:$0xff] }
 0x12b   : > { %v6355_v49 = vmax.f32 %v1167_v45, %v1408_v39 }
 0x12c   : > { %v1090_v54 = vpop.f32.mrf.mxu2  ;;  %v1359_v55 = vpop.f32.mrf.mxu3 }
 0x12d   : > { %1464 = vst [vmem:[#allocation2 + $0xc0] sm:$0xff] %v6355_v49  ;;  %v1091_v56 = vadd.f32 %v6345_v19, %v1090_v54  ;;  %v1360_v57 = vadd.f32 %v6345_v19, %v1359_v55  ;;  %v583_v13 = vpop.f32.mrf.mxu0  ;;  %v824_v47 = vpop.f32.mrf.mxu1 }
 0x12e   : > { %v584_v59 = vadd.f32 %v6345_v19, %v583_v13  ;;  %v825_v60 = vadd.f32 %v6345_v19, %v824_v47  ;;  %v1845_v47 = vld [vmem:[%s10032_s3 + $0x4d0] sm:$0xff] }
 0x12f   : > { %v1140_v62 = vmax.f32 %v1091_v56, 0.0  ;;  %v1409_v63 = vmax.f32 %v1360_v57, 0.0  ;;  %2164 = vmatpush.msra.mxu0 %v1845_v47 }
 0x130   : > { %1885 = vmatmul.f32.gmra.mxu0 %v6263_v7  ;;  %1962 = vmatmul.f32.gmra.mxu1 %v1697_v0  ;;  %v631_v5 = vmax.f32 %v584_v59, 0.0  ;;  %v872_v6 = vmax.f32 %v825_v60, 0.0  ;;  %v1720_v0 = vld [vmem:[#allocation2 + $0x82] sm:$0xff] }
 0x131   : > { %v1168_v3 = vmax.f32 %v899_v61, %v1140_v62  ;;  %2039 = vmatmul.f32.gmra.mxu2 %v1717_v1  ;;  %2116 = vmatmul.f32.gmra.mxu3 %v1737_v2  ;;  %v1740_v1 = vld [vmem:[#allocation2 + $0x83] sm:$0xff] }
 0x132   : > { %v900_v16 = vmax.f32 %v631_v5, %v872_v6 }
 0x133   : > { %v6366_v8 = vmax.f32 %v1168_v3, %v1409_v63  ;;  %v1700_v63 = vld [vmem:[#allocation2 + $0x81] sm:$0xff] }
 0x134   : > { %v1093_v11 = vpop.f32.mrf.mxu2  ;;  %v1362_v12 = vpop.f32.mrf.mxu3 }
 0x135   : > { %1465 = vst [vmem:[#allocation2 + $0xc8] sm:$0xff] %v6366_v8  ;;  %v1094_v14 = vadd.f32 %v6345_v19, %v1093_v11  ;;  %v1363_v15 = vadd.f32 %v6345_v19, %v1362_v12  ;;  %v586_v46 = vpop.f32.mrf.mxu0  ;;  %v827_v7 = vpop.f32.mrf.mxu1 }
 0x136   : > { %v587_v18 = vadd.f32 %v6345_v19, %v586_v46  ;;  %v828_v20 = vadd.f32 %v6345_v19, %v827_v7  ;;  %v1844_v7 = vld [vmem:[%s10032_s3 + $0x4c8] sm:$0xff] }
 0x137   : > { %v1141_v23 = vmax.f32 %v1094_v14, 0.0  ;;  %v1410_v17 = vmax.f32 %v1363_v15, 0.0  ;;  %2165 = vmatpush.msra.mxu0 %v1844_v7  ;;  %v1605_v7 = vld [vmem:[%s10032_s3 + $0x78] sm:$0xff] }
 0x138   : > { %1888 = vmatmul.f32.gmra.mxu0 %v6278_v32  ;;  %1965 = vmatmul.f32.gmra.mxu1 %v1698_v21  ;;  %v632_v27 = vmax.f32 %v587_v18, 0.0  ;;  %v873_v29 = vmax.f32 %v828_v20, 0.0  ;;  %v1701_v21 = vld [vmem:[#allocation2 + $0x91] sm:$0xff] }
 0x139   : > { %v1169_v25 = vmax.f32 %v900_v16, %v1141_v23  ;;  %2042 = vmatmul.f32.gmra.mxu2 %v1718_v22  ;;  %2119 = vmatmul.f32.gmra.mxu3 %v1738_v24  ;;  %v1721_v22 = vld [vmem:[#allocation2 + $0x92] sm:$0xff] }
 0x13a   : > { %v901_v38 = vmax.f32 %v632_v27, %v873_v29  ;;  %v1741_v24 = vld [vmem:[#allocation2 + $0x93] sm:$0xff]  ;;  %2166 = vmatpush.msra.mxu0 %v1843_v36  ;;  %2236 = vmatpush.msra.mxu1 %v1605_v7 }
 0x13b   : > { %v6374_v26 = vmax.f32 %v1169_v25, %v1410_v17 }
 0x13c   : > { %v1096_v31 = vpop.f32.mrf.mxu2  ;;  %v1365_v33 = vpop.f32.mrf.mxu3 }
 0x13d   : > { %1466 = vst [vmem:[#allocation2 + $0xd8] sm:$0xff] %v6374_v26  ;;  %v1097_v10 = vadd.f32 %v6345_v19, %v1096_v31  ;;  %v1366_v34 = vadd.f32 %v6345_v19, %v1365_v33  ;;  %v589_v35 = vpop.f32.mrf.mxu0  ;;  %v830_v32 = vpop.f32.mrf.mxu1 }
 0x13e   : > { %v590_v48 = vadd.f32 %v6345_v19, %v589_v35  ;;  %v831_v37 = vadd.f32 %v6345_v19, %v830_v32 }
 0x13f   : > { %v1142_v39 = vmax.f32 %v1097_v10, 0.0  ;;  %v1411_v40 = vmax.f32 %v1366_v34, 0.0 }
 0x140   : > { %1891 = vmatmul.f32.gmra.mxu0 %v6293_v52  ;;  %1968 = vmatmul.f32.gmra.mxu1 %v1699_v41  ;;  %v633_v45 = vmax.f32 %v590_v48, 0.0  ;;  %v874_v50 = vmax.f32 %v831_v37, 0.0  ;;  %v6417_v41 = vld [vmem:[#allocation2 + $0x99] sm:$0xff] }
 0x141   : > { %v1170_v44 = vmax.f32 %v901_v38, %v1142_v39  ;;  %2045 = vmatmul.f32.gmra.mxu2 %v1719_v42  ;;  %2122 = vmatmul.f32.gmra.mxu3 %v1739_v43  ;;  %v6421_v42 = vld [vmem:[#allocation2 + $0x9a] sm:$0xff] }
 0x142   : > { %v902_v58 = vmax.f32 %v633_v45, %v874_v50  ;;  %v1742_v43 = vld [vmem:[#allocation2 + $0x9b] sm:$0xff] }
 0x143   : > { %v6385_v53 = vmax.f32 %v1170_v44, %v1411_v40 }
 0x144   : > { %v1099_v54 = vpop.f32.mrf.mxu2  ;;  %v1368_v55 = vpop.f32.mrf.mxu3 }
 0x145   : > { %1467 = vst [vmem:[#allocation2 + $0xe0] sm:$0xff] %v6385_v53  ;;  %v1100_v56 = vadd.f32 %v6345_v19, %v1099_v54  ;;  %v1369_v57 = vadd.f32 %v6345_v19, %v1368_v55  ;;  %v592_v13 = vpop.f32.mrf.mxu0  ;;  %v833_v52 = vpop.f32.mrf.mxu1 }
 0x146   : > { %v593_v61 = vadd.f32 %v6345_v19, %v592_v13  ;;  %v834_v62 = vadd.f32 %v6345_v19, %v833_v52 }
 0x147   : > { %v1143_v59 = vmax.f32 %v1100_v56, 0.0  ;;  %v1412_v60 = vmax.f32 %v1369_v57, 0.0 }
 0x148   : > { %1894 = vmatmul.f32.gmra.mxu0 %v6301_v9  ;;  %1971 = vmatmul.f32.gmra.mxu1 %v1700_v63  ;;  %v634_v5 = vmax.f32 %v593_v61, 0.0  ;;  %v875_v6 = vmax.f32 %v834_v62, 0.0  ;;  %v1703_v62 = vld [vmem:[#allocation2 + $0xa9] sm:$0xff] }
 0x149   : > { %v1171_v2 = vmax.f32 %v902_v58, %v1143_v59  ;;  %2048 = vmatmul.f32.gmra.mxu2 %v1720_v0  ;;  %2125 = vmatmul.f32.gmra.mxu3 %v1740_v1  ;;  %v1723_v63 = vld [vmem:[#allocation2 + $0xaa] sm:$0xff] }
 0x14a   : > { %v903_v17 = vmax.f32 %v634_v5, %v875_v6  ;;  %v1743_v0 = vld [vmem:[#allocation2 + $0xab] sm:$0xff] }
 0x14b   : > { %v6396_v3 = vmax.f32 %v1171_v2, %v1412_v60 }
 0x14c   : > { %v1102_v11 = vpop.f32.mrf.mxu2  ;;  %v1371_v12 = vpop.f32.mrf.mxu3 }
 0x14d   : > { %1468 = vst [vmem:[#allocation2 + $0xf0] sm:$0xff] %v6396_v3  ;;  %v1103_v14 = vadd.f32 %v6345_v19, %v1102_v11  ;;  %v1372_v15 = vadd.f32 %v6345_v19, %v1371_v12  ;;  %v595_v46 = vpop.f32.mrf.mxu0  ;;  %v836_v9 = vpop.f32.mrf.mxu1 }
 0x14e   : > { %v596_v16 = vadd.f32 %v6345_v19, %v595_v46  ;;  %v837_v23 = vadd.f32 %v6345_v19, %v836_v9 }
 0x14f   : > { %v1144_v18 = vmax.f32 %v1103_v14, 0.0  ;;  %v1413_v20 = vmax.f32 %v1372_v15, 0.0 }
 0x150   : > { %1897 = vmatmul.f32.gmra.mxu0 %v6309_v28  ;;  %1974 = vmatmul.f32.gmra.mxu1 %v1701_v21  ;;  %v635_v27 = vmax.f32 %v596_v16, 0.0  ;;  %v876_v29 = vmax.f32 %v837_v23, 0.0  ;;  %v1621_v16 = vld [vmem:[%s10032_s3 + $0xf8] sm:$0xff] }
 0x151   : > { %v1172_v25 = vmax.f32 %v903_v17, %v1144_v18  ;;  %2051 = vmatmul.f32.gmra.mxu2 %v1721_v22  ;;  %2128 = vmatmul.f32.gmra.mxu3 %v1741_v24  ;;  %v1637_v17 = vld [vmem:[%s10032_s3 + $0x178] sm:$0xff] }
 0x152   : > { %v904_v48 = vmax.f32 %v635_v27, %v876_v29  ;;  %v1704_v24 = vld [vmem:[#allocation2 + $0xb1] sm:$0xff]  ;;  %2313 = vmatpush.msra.mxu2 %v1621_v16  ;;  %2390 = vmatpush.msra.mxu3 %v1637_v17 }
 0x153   : > { %v6407_v31 = vmax.f32 %v1172_v25, %v1413_v20  ;;  %v1604_v25 = vld [vmem:[%s10032_s3 + $0x70] sm:$0xff] }
 0x154   : > { %v1105_v33 = vpop.f32.mrf.mxu2  ;;  %v1374_v10 = vpop.f32.mrf.mxu3  ;;  %v1620_v27 = vld [vmem:[%s10032_s3 + $0xf0] sm:$0xff]  ;;  %2237 = vmatpush.msra.mxu1 %v1604_v25  ;;  %v1598_v25 = vld [vmem:[%s10032_s3 + $0x40] sm:$0xff] }
 0x155   : > { %1469 = vst [vmem:[#allocation2 + $0xf8] sm:$0xff] %v6407_v31  ;;  %v1106_v34 = vadd.f32 %v6345_v19, %v1105_v33  ;;  %v1375_v35 = vadd.f32 %v6345_v19, %v1374_v10  ;;  %v598_v32 = vpop.f32.mrf.mxu0  ;;  %v839_v28 = vpop.f32.mrf.mxu1  ;;  %v1724_v29 = vld [vmem:[#allocation2 + $0xb2] sm:$0xff]  ;;  %2314 = vmatpush.msra.mxu2 %v1620_v27  ;;  %v1614_v27 = vld [vmem:[%s10032_s3 + $0xc0] sm:$0xff] }
 0x156   : > { %v599_v39 = vadd.f32 %v6345_v19, %v598_v32  ;;  %v840_v40 = vadd.f32 %v6345_v19, %v839_v28  ;;  %v1744_v33 = vld [vmem:[#allocation2 + $0xb3] sm:$0xff]  ;;  %v1619_v32 = vld [vmem:[%s10032_s3 + $0xe8] sm:$0xff] }
 0x157   : > { %v1145_v37 = vmax.f32 %v1106_v34, 0.0  ;;  %v1414_v38 = vmax.f32 %v1375_v35, 0.0  ;;  %v1636_v10 = vld [vmem:[%s10032_s3 + $0x170] sm:$0xff]  ;;  %v1603_v35 = vld [vmem:[%s10032_s3 + $0x68] sm:$0xff]  ;;  %2315 = vmatpush.msra.mxu2 %v1619_v32  ;;  %v1839_v32 = vld [vmem:[%s10032_s3 + $0x4a0] sm:$0xff] }
 0x158   : > { %1900 = vmatmul.f32.gmra.mxu0 %v6317_v51  ;;  %1977 = vmatmul.f32.gmra.mxu1 %v6417_v41  ;;  %v636_v50 = vmax.f32 %v599_v39, 0.0  ;;  %v877_v54 = vmax.f32 %v840_v40, 0.0  ;;  %v1635_v28 = vld [vmem:[%s10032_s3 + $0x168] sm:$0xff]  ;;  %v1618_v39 = vld [vmem:[%s10032_s3 + $0xe0] sm:$0xff] }
 0x159   : > { %v1173_v44 = vmax.f32 %v904_v48, %v1145_v37  ;;  %2054 = vmatmul.f32.gmra.mxu2 %v6421_v42  ;;  %2131 = vmatmul.f32.gmra.mxu3 %v1742_v43 }
 0x15a   : > { %v905_v59 = vmax.f32 %v636_v50, %v877_v54  ;;  %2391 = vmatpush.msra.mxu3 %v1636_v10  ;;  %2238 = vmatpush.msra.mxu1 %v1603_v35  ;;  %v1630_v10 = vld [vmem:[%s10032_s3 + $0x140] sm:$0xff]  ;;  %v1597_v35 = vld [vmem:[%s10032_s3 + $0x38] sm:$0xff] }
 0x15b   : > { %v1442_v45 = vmax.f32 %v1173_v44, %v1414_v38  ;;  %v1602_v38 = vld [vmem:[%s10032_s3 + $0x60] sm:$0xff]  ;;  %2316 = vmatpush.msra.mxu2 %v1618_v39  ;;  %v1612_v39 = vld [vmem:[%s10032_s3 + $0xb0] sm:$0xff] }
 0x15c   : > { %v1108_v55 = vpop.f32.mrf.mxu2  ;;  %v1377_v56 = vpop.f32.mrf.mxu3  ;;  %v1634_v44 = vld [vmem:[%s10032_s3 + $0x160] sm:$0xff]  ;;  %2392 = vmatpush.msra.mxu3 %v1635_v28  ;;  %2239 = vmatpush.msra.mxu1 %v1602_v38  ;;  %v1838_v28 = vld [vmem:[%s10032_s3 + $0x498] sm:$0xff]  ;;  %v1596_v38 = vld [vmem:[%s10032_s3 + $0x30] sm:$0xff] }
 0x15d   : > { %1470 = vst [vmem:[#allocation2 + $0x108] sm:$0xff] %v1442_v45  ;;  %v1109_v57 = vadd.f32 %v6345_v19, %v1108_v55  ;;  %v1378_v13 = vadd.f32 %v6345_v19, %v1377_v56  ;;  %v601_v51 = vpop.f32.mrf.mxu0  ;;  %v842_v52 = vpop.f32.mrf.mxu1 }
 0x15e   : > { %v602_v47 = vadd.f32 %v6345_v19, %v601_v51  ;;  %v843_v58 = vadd.f32 %v6345_v19, %v842_v52  ;;  %2393 = vmatpush.msra.mxu3 %v1634_v44  ;;  %v1628_v44 = vld [vmem:[%s10032_s3 + $0x130] sm:$0xff] }
 0x15f   : > { %v1146_v60 = vmax.f32 %v1109_v57, 0.0  ;;  %v1415_v61 = vmax.f32 %v1378_v13, 0.0 }
 0x160   : > { %1903 = vmatmul.f32.gmra.mxu0 %v6328_v4  ;;  %1980 = vmatmul.f32.gmra.mxu1 %v1703_v62  ;;  %v637_v2 = vmax.f32 %v602_v47, 0.0  ;;  %v878_v5 = vmax.f32 %v843_v58, 0.0  ;;  %v1842_v4 = vld [vmem:[%s10032_s3 + $0x4b8] sm:$0xff]  ;;  %v1705_v47 = vld [vmem:[#allocation2 + $0xc1] sm:$0xff] }
 0x161   : > { %v1174_v1 = vmax.f32 %v905_v59, %v1146_v60  ;;  %2057 = vmatmul.f32.gmra.mxu2 %v1723_v63  ;;  %2134 = vmatmul.f32.gmra.mxu3 %v1743_v0  ;;  %v1601_v58 = vld [vmem:[%s10032_s3 + $0x58] sm:$0xff]  ;;  %v1725_v60 = vld [vmem:[#allocation2 + $0xc2] sm:$0xff]  ;;  %v1600_v0 = vld [vmem:[%s10032_s3 + $0x50] sm:$0xff] }
 0x162   : > { %v906_v23 = vmax.f32 %v637_v2, %v878_v5  ;;  %2167 = vmatpush.msra.mxu0 %v1842_v4  ;;  %v1617_v59 = vld [vmem:[%s10032_s3 + $0xd8] sm:$0xff]  ;;  %2240 = vmatpush.msra.mxu1 %v1601_v58  ;;  %v1632_v5 = vld [vmem:[%s10032_s3 + $0x150] sm:$0xff] }
 0x163   : > { %v1443_v6 = vmax.f32 %v1174_v1, %v1415_v61  ;;  %v1745_v61 = vld [vmem:[#allocation2 + $0xc3] sm:$0xff]  ;;  %v1633_v62 = vld [vmem:[%s10032_s3 + $0x158] sm:$0xff]  ;;  %v1616_v1 = vld [vmem:[%s10032_s3 + $0xd0] sm:$0xff]  ;;  %2317 = vmatpush.msra.mxu2 %v1617_v59 }
 0x164   : > { %v1111_v11 = vpop.f32.mrf.mxu2  ;;  %v1380_v12 = vpop.f32.mrf.mxu3  ;;  %2394 = vmatpush.msra.mxu3 %v1633_v62  ;;  %2241 = vmatpush.msra.mxu1 %v1600_v0  ;;  %v1747_v58 = vld [vmem:[#allocation2 + $0xdb] sm:$0xff]  ;;  %v1627_v59 = vld [vmem:[%s10032_s3 + $0x128] sm:$0xff] }
 0x165   : > { %1471 = vst [vmem:[#allocation2 + $0x110] sm:$0xff] %v1443_v6  ;;  %v1112_v14 = vadd.f32 %v6345_v19, %v1111_v11  ;;  %v1381_v15 = vadd.f32 %v6345_v19, %v1380_v12  ;;  %v604_v46 = vpop.f32.mrf.mxu0  ;;  %v845_v9 = vpop.f32.mrf.mxu1  ;;  %v1840_v6 = vld [vmem:[%s10032_s3 + $0x4a8] sm:$0xff]  ;;  %2318 = vmatpush.msra.mxu2 %v1616_v1  ;;  %v1594_v62 = vld [vmem:[%s10032_s3 + $0x20] sm:$0xff] }
 0x166   : > { %v605_v21 = vadd.f32 %v6345_v19, %v604_v46  ;;  %v846_v22 = vadd.f32 %v6345_v19, %v845_v9  ;;  %v1599_v12 = vld [vmem:[%s10032_s3 + $0x48] sm:$0xff]  ;;  %2395 = vmatpush.msra.mxu3 %v1632_v5  ;;  %v1609_v5 = vld [vmem:[%s10032_s3 + $0x98] sm:$0xff] }
 0x167   : > { %v1147_v18 = vmax.f32 %v1112_v14, 0.0  ;;  %v1416_v20 = vmax.f32 %v1381_v15, 0.0  ;;  %v1615_v14 = vld [vmem:[%s10032_s3 + $0xc8] sm:$0xff]  ;;  %2242 = vmatpush.msra.mxu1 %v1599_v12  ;;  %v1625_v12 = vld [vmem:[%s10032_s3 + $0x118] sm:$0xff] }
 0x168   : > { %1906 = vmatmul.f32.gmra.mxu0 %v6339_v30  ;;  %1983 = vmatmul.f32.gmra.mxu1 %v1704_v24  ;;  %v1841_v30 = vld [vmem:[%s10032_s3 + $0x4b0] sm:$0xff]  ;;  %v638_v48 = vmax.f32 %v605_v21, 0.0  ;;  %v879_v37 = vmax.f32 %v846_v22, 0.0  ;;  %v1631_v9 = vld [vmem:[%s10032_s3 + $0x148] sm:$0xff] }
 0x169   : > { %v1175_v34 = vmax.f32 %v906_v23, %v1147_v18  ;;  %2060 = vmatmul.f32.gmra.mxu2 %v1724_v29  ;;  %2137 = vmatmul.f32.gmra.mxu3 %v1744_v33  ;;  %v1706_v24 = vld [vmem:[#allocation2 + $0xc9] sm:$0xff] }
 0x16a   : > { %2168 = vmatpush.msra.mxu0 %v1841_v30  ;;  %v907_v13 = vmax.f32 %v638_v48, %v879_v37  ;;  %2319 = vmatpush.msra.mxu2 %v1615_v14  ;;  %v6522_v29 = vld [vmem:[#allocation2 + $0xca] sm:$0xff]  ;;  %v1629_v30 = vld [vmem:[%s10032_s3 + $0x138] sm:$0xff]  ;;  %v1835_v14 = vld [vmem:[%s10032_s3 + $0x480] sm:$0xff] }
 0x16b   : > { %v1444_v36 = vmax.f32 %v1175_v34, %v1416_v20  ;;  %2396 = vmatpush.msra.mxu3 %v1631_v9  ;;  %v1746_v33 = vld [vmem:[#allocation2 + $0xcb] sm:$0xff]  ;;  %2243 = vmatpush.msra.mxu1 %v1598_v25  ;;  %v1590_v25 = vld [vmem:[%s10032_s3] sm:$0xff] }
 0x16c   : > { %v1114_v40 = vpop.f32.mrf.mxu2  ;;  %v1383_v43 = vpop.f32.mrf.mxu3  ;;  %2169 = vmatpush.msra.mxu0 %v1840_v6  ;;  %2320 = vmatpush.msra.mxu2 %v1614_v27  ;;  %v1836_v0 = vld [vmem:[%s10032_s3 + $0x488] sm:$0xff]  ;;  %v1606_v27 = vld [vmem:[%s10032_s3 + $0x80] sm:$0xff] }
 0x16d   : > { %1472 = vst [vmem:[#allocation2 + $0x120] sm:$0xff] %v1444_v36  ;;  %v1115_v45 = vadd.f32 %v6345_v19, %v1114_v40  ;;  %v1384_v50 = vadd.f32 %v6345_v19, %v1383_v43  ;;  %v607_v54 = vpop.f32.mrf.mxu0  ;;  %v848_v55 = vpop.f32.mrf.mxu1  ;;  %2397 = vmatpush.msra.mxu3 %v1630_v10  ;;  %2244 = vmatpush.msra.mxu1 %v1597_v35 }
 0x16e   : > { %v608_v56 = vadd.f32 %v6345_v19, %v607_v54  ;;  %v849_v57 = vadd.f32 %v6345_v19, %v848_v55  ;;  %2170 = vmatpush.msra.mxu0 %v1839_v32 }
 0x16f   : > { %v1148_v51 = vmax.f32 %v1115_v45, 0.0  ;;  %v1417_v52 = vmax.f32 %v1384_v50, 0.0  ;;  %2398 = vmatpush.msra.mxu3 %v1629_v30  ;;  %2245 = vmatpush.msra.mxu1 %v1596_v38 }
 0x170   : > { %1909 = vmatmul.f32.gmra.mxu0 %v6355_v49  ;;  %1986 = vmatmul.f32.gmra.mxu1 %v1705_v47  ;;  %v639_v2 = vmax.f32 %v608_v56, 0.0  ;;  %v880_v49 = vmax.f32 %v849_v57, 0.0  ;;  %v1707_v56 = vld [vmem:[#allocation2 + $0xd9] sm:$0xff]  ;;  %v1595_v47 = vld [vmem:[%s10032_s3 + $0x28] sm:$0xff] }
 0x171   : > { %v1176_v63 = vmax.f32 %v907_v13, %v1148_v51  ;;  %2063 = vmatmul.f32.gmra.mxu2 %v1725_v60  ;;  %2140 = vmatmul.f32.gmra.mxu3 %v1745_v61  ;;  %v1837_v60 = vld [vmem:[%s10032_s3 + $0x490] sm:$0xff] }
 0x172   : > { %v908_v17 = vmax.f32 %v639_v2, %v880_v49  ;;  %2171 = vmatpush.msra.mxu0 %v1838_v28  ;;  %2399 = vmatpush.msra.mxu3 %v1628_v44  ;;  %v1593_v49 = vld [vmem:[%s10032_s3 + $0x18] sm:$0xff] }
 0x173   : > { %v1445_v11 = vmax.f32 %v1176_v63, %v1417_v52  ;;  %v1727_v52 = vld [vmem:[#allocation2 + $0xda] sm:$0xff]  ;;  %2246 = vmatpush.msra.mxu1 %v1595_v47  ;;  %v1709_v28 = vld [vmem:[#allocation2 + $0xf1] sm:$0xff] }
 0x174   : > { %v1117_v15 = vpop.f32.mrf.mxu2  ;;  %v1386_v46 = vpop.f32.mrf.mxu3  ;;  %v1626_v63 = vld [vmem:[%s10032_s3 + $0x120] sm:$0xff]  ;;  %2400 = vmatpush.msra.mxu3 %v1627_v59  ;;  %2172 = vmatpush.msra.mxu0 %v1837_v60 }
 0x175   : > { %1473 = vst [vmem:[#allocation2 + $0x128] sm:$0xff] %v1445_v11  ;;  %v1118_v4 = vadd.f32 %v6345_v19, %v1117_v15  ;;  %v1387_v7 = vadd.f32 %v6345_v19, %v1386_v46  ;;  %v610_v16 = vpop.f32.mrf.mxu0  ;;  %v851_v23 = vpop.f32.mrf.mxu1  ;;  %2247 = vmatpush.msra.mxu1 %v1594_v62  ;;  %v1530_v59 = vld [vmem:[#allocation2 + $0x2] sm:$0xff] }
 0x176   : > { %v611_v21 = vadd.f32 %v6345_v19, %v610_v16  ;;  %v852_v22 = vadd.f32 %v6345_v19, %v851_v23  ;;  %2401 = vmatpush.msra.mxu3 %v1626_v63  ;;  %2173 = vmatpush.msra.mxu0 %v1836_v0  ;;  %v1592_v16 = vld [vmem:[%s10032_s3 + $0x10] sm:$0xff] }
 0x177   : > { %v1149_v18 = vmax.f32 %v1118_v4, 0.0  ;;  %v1418_v20 = vmax.f32 %v1387_v7, 0.0  ;;  %2248 = vmatpush.msra.mxu1 %v1593_v49  ;;  %v1708_v7 = vld [vmem:[#allocation2 + $0xe1] sm:$0xff]  ;;  %v1608_v23 = vld [vmem:[%s10032_s3 + $0x90] sm:$0xff] }
 0x178   : > { %1912 = vmatmul.f32.gmra.mxu0 %v6366_v8  ;;  %1989 = vmatmul.f32.gmra.mxu1 %v1706_v24  ;;  %v1613_v8 = vld [vmem:[%s10032_s3 + $0xb8] sm:$0xff]  ;;  %v640_v48 = vmax.f32 %v611_v21, 0.0  ;;  %v881_v37 = vmax.f32 %v852_v22, 0.0  ;;  %v1591_v21 = vld [vmem:[%s10032_s3 + $0x8] sm:$0xff] }
 0x179   : > { %v1177_v34 = vmax.f32 %v908_v17, %v1149_v18  ;;  %2066 = vmatmul.f32.gmra.mxu2 %v6522_v29  ;;  %2143 = vmatmul.f32.gmra.mxu3 %v1746_v33  ;;  %v1728_v17 = vld [vmem:[#allocation2 + $0xe2] sm:$0xff] }
 0x17a   : > { %2321 = vmatpush.msra.mxu2 %v1613_v8  ;;  %v909_v57 = vmax.f32 %v640_v48, %v881_v37  ;;  %2402 = vmatpush.msra.mxu3 %v1625_v12  ;;  %v1748_v18 = vld [vmem:[#allocation2 + $0xe3] sm:$0xff]  ;;  %v1749_v48 = vld [vmem:[#allocation2 + $0xf3] sm:$0xff] }
 0x17b   : > { %v1446_v36 = vmax.f32 %v1177_v34, %v1418_v20  ;;  %2174 = vmatpush.msra.mxu0 %v1835_v14  ;;  %v1624_v20 = vld [vmem:[%s10032_s3 + $0x110] sm:$0xff]  ;;  %v1607_v22 = vld [vmem:[%s10032_s3 + $0x88] sm:$0xff]  ;;  %2249 = vmatpush.msra.mxu1 %v1592_v16  ;;  %v1622_v34 = vld [vmem:[%s10032_s3 + $0x100] sm:$0xff] }
 0x17c   : > { %v1120_v40 = vpop.f32.mrf.mxu2  ;;  %v1389_v43 = vpop.f32.mrf.mxu3  ;;  %2322 = vmatpush.msra.mxu2 %v1612_v39  ;;  %2403 = vmatpush.msra.mxu3 %v1624_v20  ;;  %v1491_v49 = vld [vmem:[#allocation2 + $0x8] sm:$0xff]  ;;  %v6639_v16 = vld [vmem:[#allocation2 + $0x34] sm:$0xff] }
 0x17d   : > { %1474 = vst [vmem:[#allocation2 + $0x138] sm:$0xff] %v1446_v36  ;;  %v1121_v45 = vadd.f32 %v6345_v19, %v1120_v40  ;;  %v1390_v50 = vadd.f32 %v6345_v19, %v1389_v43  ;;  %v1868_v54 = vpop.f32.mrf.mxu0  ;;  %v1945_v55 = vpop.f32.mrf.mxu1  ;;  %v1611_v19 = vld [vmem:[%s10032_s3 + $0xa8] sm:$0xff]  ;;  %2250 = vmatpush.msra.mxu1 %v1591_v21  ;;  %v1729_v36 = vld [vmem:[#allocation2 + $0xf2] sm:$0xff]  ;;  %v1532_v20 = vld [vmem:[#allocation2 + $0x1a] sm:$0xff] }
 0x17e   : > { %2323 = vmatpush.msra.mxu2 %v1611_v19  ;;  %v1946_v2 = vadd.f32 %v1945_v55, %v1868_v54  ;;  %v1730_v54 = vld [vmem:[#allocation2 + $0xfa] sm:$0xff] }
 0x17f   : > { %v1150_v13 = vmax.f32 %v1121_v45, 0.0  ;;  %v1419_v51 = vmax.f32 %v1390_v50, 0.0  ;;  %2251 = vmatpush.msra.mxu1 %v1590_v25  ;;  %v1710_v50 = vld [vmem:[#allocation2 + $0xf9] sm:$0xff] }
 0x180   : > { %1915 = vmatmul.f32.gmra.mxu0 %v6374_v26  ;;  %1992 = vmatmul.f32.gmra.mxu1 %v1707_v56  ;;  %v1610_v26 = vld [vmem:[%s10032_s3 + $0xa0] sm:$0xff] }
 0x181   : > { %v1178_v61 = vmax.f32 %v909_v57, %v1150_v13  ;;  %2069 = vmatmul.f32.gmra.mxu2 %v1727_v52  ;;  %2146 = vmatmul.f32.gmra.mxu3 %v1747_v58  ;;  %v1750_v55 = vld [vmem:[#allocation2 + $0xfb] sm:$0xff] }
 0x182   : > { %2324 = vmatpush.msra.mxu2 %v1610_v26  ;;  %v6629_v19 = vld [vmem:[#allocation2 + $0x1c] sm:$0xff] }
 0x183   : > { %v1447_v1 = vmax.f32 %v1178_v61, %v1419_v51  ;;  %v1490_v58 = vld [vmem:[#allocation2] sm:$0xff] }
 0x184   : > { %v2022_v6 = vpop.f32.mrf.mxu2  ;;  %v2099_v11 = vpop.f32.mrf.mxu3  ;;  %2325 = vmatpush.msra.mxu2 %v1609_v5  ;;  %v1511_v5 = vld [vmem:[#allocation2 + $0x9] sm:$0xff] }
 0x185   : > { %1475 = vst [vmem:[#allocation2 + $0x140] sm:$0xff] %v1447_v1  ;;  %v2023_v15 = vadd.f32 %v2022_v6, %v1946_v2  ;;  %v1871_v46 = vpop.f32.mrf.mxu0  ;;  %v1948_v9 = vpop.f32.mrf.mxu1  ;;  %v6634_v2 = vld [vmem:[#allocation2 + $0x24] sm:$0xff] }
 0x186   : > { %2326 = vmatpush.msra.mxu2 %v1608_v23  ;;  %v1949_v24 = vadd.f32 %v1948_v9, %v1871_v46  ;;  %v1531_v6 = vld [vmem:[#allocation2 + $0xa] sm:$0xff]  ;;  %v1492_v23 = vld [vmem:[#allocation2 + $0x18] sm:$0xff] }
 0x187   : > { %v6591_v4 = vadd.f32 %v2099_v11, %v2023_v15 }
 0x188   : > { %1918 = vmatmul.f32.gmra.mxu0 %v6385_v53  ;;  %1995 = vmatmul.f32.gmra.mxu1 %v1708_v7  ;;  %v1623_v53 = vld [vmem:[%s10032_s3 + $0x108] sm:$0xff] }
 0x189   : > { %2072 = vmatmul.f32.gmra.mxu2 %v1728_v17  ;;  %2149 = vmatmul.f32.gmra.mxu3 %v1748_v18  ;;  %v1653_v17 = vld [vmem:[%s10032_s3 + $0x1f8] sm:$0xff] }
 0x18a   : > { %2327 = vmatpush.msra.mxu2 %v1607_v22  ;;  %2404 = vmatpush.msra.mxu3 %v1623_v53  ;;  %v1512_v18 = vld [vmem:[#allocation2 + $0x19] sm:$0xff] }
 0x18b   : > { %2467 = vmatpush.msrb.mxu0 %v1653_v17 }
 0x18c   : > { %v2025_v33 = vpop.f32.mrf.mxu2  ;;  %v2102_v10 = vpop.f32.mrf.mxu3  ;;  %2328 = vmatpush.msra.mxu2 %v1606_v27  ;;  %2405 = vmatpush.msra.mxu3 %v1622_v34  ;;  %v1493_v34 = vld [vmem:[#allocation2 + $0x20] sm:$0xff] }
 0x18d   : > { %v2026_v35 = vadd.f32 %v2025_v33, %v1949_v24  ;;  %v1874_v8 = vpop.f32.mrf.mxu0  ;;  %v1951_v32 = vpop.f32.mrf.mxu1 }
 0x18e   : > { %v1952_v37 = vadd.f32 %v1951_v32, %v1874_v8  ;;  %v1513_v8 = vld [vmem:[#allocation2 + $0x21] sm:$0xff] }
 0x18f   : > { %v6621_v30 = vadd.f32 %v2102_v10, %v2026_v35  ;;  %v6647_v10 = vld [vmem:[#allocation2 + $0x3c] sm:$0xff]  ;;  %v1652_v35 = vld [vmem:[%s10032_s3 + $0x1f0] sm:$0xff] }
 0x190   : > { %1921 = vmatmul.f32.gmra.mxu0 %v6396_v3  ;;  %1998 = vmatmul.f32.gmra.mxu1 %v1709_v28  ;;  %v1533_v32 = vld [vmem:[#allocation2 + $0x22] sm:$0xff] }
 0x191   : > { %2075 = vmatmul.f32.gmra.mxu2 %v1729_v36  ;;  %2152 = vmatmul.f32.gmra.mxu3 %v1749_v48 }
 0x192   : > { %2468 = vmatpush.msrb.mxu0 %v1652_v35 }
 0x194   : > { %v2028_v38 = vpop.f32.mrf.mxu2  ;;  %v2105_v39 = vpop.f32.mrf.mxu3 }
 0x195   : > { %v2029_v40 = vadd.f32 %v2028_v38, %v1952_v37  ;;  %v1877_v43 = vpop.f32.mrf.mxu0  ;;  %v1954_v44 = vpop.f32.mrf.mxu1 }
 0x196   : > { %v1955_v3 = vadd.f32 %v1954_v44, %v1877_v43  ;;  %v6655_v43 = vld [vmem:[#allocation2 + $0x4c] sm:$0xff] }
 0x197   : > { %v6624_v45 = vadd.f32 %v2105_v39, %v2029_v40  ;;  %v6657_v44 = vld [vmem:[#allocation2 + $0x30] sm:$0xff] }
 0x198   : > { %1924 = vmatmul.f32.gmra.mxu0 %v6407_v31  ;;  %2001 = vmatmul.f32.gmra.mxu1 %v1710_v50  ;;  %v1510_v31 = vld [vmem:[#allocation2 + $0x1] sm:$0xff]  ;;  %v6661_v50 = vld [vmem:[#allocation2 + $0x31] sm:$0xff] }
 0x199   : > { %2078 = vmatmul.f32.gmra.mxu2 %v1730_v54  ;;  %2155 = vmatmul.f32.gmra.mxu3 %v1750_v55  ;;  %v1534_v54 = vld [vmem:[#allocation2 + $0x32] sm:$0xff]  ;;  %v1651_v55 = vld [vmem:[%s10032_s3 + $0x1e8] sm:$0xff] }
 0x19a   : > { %2469 = vmatpush.msrb.mxu0 %v1651_v55  ;;  %v6717_v55 = vld [vmem:[#allocation2 + $0x61] sm:$0xff] }
 0x19c   : > { %v2031_v56 = vpop.f32.mrf.mxu2  ;;  %v2108_v57 = vpop.f32.mrf.mxu3 }
 0x19d   : > { %v2032_v13 = vadd.f32 %v2031_v56, %v1955_v3  ;;  %v1880_v51 = vpop.f32.mrf.mxu0  ;;  %v1957_v52 = vpop.f32.mrf.mxu1 }
 0x19e   : > { %v1958_v60 = vadd.f32 %v1957_v52, %v1880_v51 }
 0x19f   : > { %v6627_v47 = vadd.f32 %v2108_v57, %v2032_v13 }
 0x1a0   : > { %2175 = vmatmul.f32.vlgmr.msra.gmra.mxu0 %v6629_v19  ;;  %2252 = vmatmul.f32.vlgmr.msra.gmra.mxu1 %v1490_v58 }
 0x1a1   : > { %2329 = vmatmul.f32.vlgmr.msra.gmra.mxu2 %v1510_v31  ;;  %2406 = vmatmul.f32.vlgmr.msra.gmra.mxu3 %v1530_v59  ;;  %v6669_v31 = vld [vmem:[#allocation2 + $0x54] sm:$0xff] }
 0x1a2   : > { %v6671_v59 = vld [vmem:[#allocation2 + $0x38] sm:$0xff] }
 0x1a4   : > { %v2034_v61 = vpop.f32.mrf.mxu2  ;;  %v2111_v62 = vpop.f32.mrf.mxu3 }
 0x1a5   : > { %v2035_v26 = vadd.f32 %v2034_v61, %v1958_v60  ;;  %v1883_v63 = vpop.f32.mrf.mxu0  ;;  %v1960_v0 = vpop.f32.mrf.mxu1  ;;  %v6675_v60 = vld [vmem:[#allocation2 + $0x39] sm:$0xff] }
 0x1a6   : > { %v1961_v11 = vadd.f32 %v1960_v0, %v1883_v63  ;;  %v1535_v61 = vld [vmem:[#allocation2 + $0x3a] sm:$0xff] }
 0x1a7   : > { %v6632_v1 = vadd.f32 %v2111_v62, %v2035_v26  ;;  %v1650_v62 = vld [vmem:[%s10032_s3 + $0x1e0] sm:$0xff] }
 0x1a8   : > { %2178 = vmatmul.f32.gmra.mxu0 %v6634_v2  ;;  %2255 = vmatmul.f32.gmra.mxu1 %v1491_v49 }
 0x1a9   : > { %2332 = vmatmul.f32.gmra.mxu2 %v1511_v5  ;;  %2409 = vmatmul.f32.gmra.mxu3 %v1531_v6 }
 0x1aa   : > { %2470 = vmatpush.msrb.mxu0 %v1650_v62 }
 0x1ac   : > { %v2037_v12 = vpop.f32.mrf.mxu2  ;;  %v2114_v14 = vpop.f32.mrf.mxu3 }
 0x1ad   : > { %v2038_v15 = vadd.f32 %v2037_v12, %v1961_v11  ;;  %v1886_v46 = vpop.f32.mrf.mxu0  ;;  %v1963_v9 = vpop.f32.mrf.mxu1  ;;  %v6683_v12 = vld [vmem:[#allocation2 + $0x64] sm:$0xff] }
 0x1ae   : > { %v1964_v21 = vadd.f32 %v1963_v9, %v1886_v46  ;;  %v1536_v46 = vld [vmem:[#allocation2 + $0x4a] sm:$0xff] }
 0x1af   : > { %v6637_v7 = vadd.f32 %v2114_v14, %v2038_v15  ;;  %v6685_v14 = vld [vmem:[#allocation2 + $0x48] sm:$0xff] }
 0x1b0   : > { %2181 = vmatmul.f32.gmra.mxu0 %v6639_v16  ;;  %2258 = vmatmul.f32.gmra.mxu1 %v1492_v23  ;;  %v6689_v15 = vld [vmem:[#allocation2 + $0x49] sm:$0xff] }
 0x1b1   : > { %2335 = vmatmul.f32.gmra.mxu2 %v1512_v18  ;;  %2412 = vmatmul.f32.gmra.mxu3 %v1532_v20 }
 0x1b4   : > { %v2040_v22 = vpop.f32.mrf.mxu2  ;;  %v2117_v53 = vpop.f32.mrf.mxu3 }
 0x1b5   : > { %v2041_v24 = vadd.f32 %v2040_v22, %v1964_v21  ;;  %v1889_v25 = vpop.f32.mrf.mxu0  ;;  %v1966_v27 = vpop.f32.mrf.mxu1 }
 0x1b6   : > { %v1967_v28 = vadd.f32 %v1966_v27, %v1889_v25  ;;  %v1649_v25 = vld [vmem:[%s10032_s3 + $0x1d8] sm:$0xff] }
 0x1b7   : > { %v6645_v33 = vadd.f32 %v2117_v53, %v2041_v24  ;;  %v6694_v53 = vld [vmem:[#allocation2 + $0x6c] sm:$0xff]  ;;  %2471 = vmatpush.msrb.mxu0 %v1649_v25  ;;  %v6738_v25 = vld [vmem:[#allocation2 + $0x78] sm:$0xff] }
 0x1b8   : > { %2184 = vmatmul.f32.gmra.mxu0 %v6647_v10  ;;  %2261 = vmatmul.f32.gmra.mxu1 %v1493_v34  ;;  %v6696_v24 = vld [vmem:[#allocation2 + $0x50] sm:$0xff] }
 0x1b9   : > { %2338 = vmatmul.f32.gmra.mxu2 %v1513_v8  ;;  %2415 = vmatmul.f32.gmra.mxu3 %v1533_v32  ;;  %v6703_v27 = vld [vmem:[#allocation2 + $0x51] sm:$0xff] }
 0x1ba   : > { %v1537_v34 = vld [vmem:[#allocation2 + $0x52] sm:$0xff] }
 0x1bc   : > { %v2043_v36 = vpop.f32.mrf.mxu2  ;;  %v2120_v48 = vpop.f32.mrf.mxu3 }
 0x1bd   : > { %v2044_v37 = vadd.f32 %v2043_v36, %v1967_v28  ;;  %v1892_v38 = vpop.f32.mrf.mxu0  ;;  %v1969_v39 = vpop.f32.mrf.mxu1 }
 0x1be   : > { %v1970_v3 = vadd.f32 %v1969_v39, %v1892_v38  ;;  %v6708_v38 = vld [vmem:[#allocation2 + $0x7c] sm:$0xff] }
 0x1bf   : > { %v6653_v40 = vadd.f32 %v2120_v48, %v2044_v37  ;;  %v6710_v39 = vld [vmem:[#allocation2 + $0x60] sm:$0xff] }
 0x1c0   : > { %2187 = vmatmul.f32.gmra.mxu0 %v6655_v43  ;;  %2264 = vmatmul.f32.gmra.mxu1 %v6657_v44 }
 0x1c1   : > { %2341 = vmatmul.f32.gmra.mxu2 %v6661_v50  ;;  %2418 = vmatmul.f32.gmra.mxu3 %v1534_v54  ;;  %v1648_v54 = vld [vmem:[%s10032_s3 + $0x1d0] sm:$0xff] }
 0x1c2   : > { %2472 = vmatpush.msrb.mxu0 %v1648_v54 }
 0x1c4   : > { %v2046_v56 = vpop.f32.mrf.mxu2  ;;  %v2123_v57 = vpop.f32.mrf.mxu3 }
 0x1c5   : > { %v2047_v13 = vadd.f32 %v2046_v56, %v1970_v3  ;;  %v1895_v51 = vpop.f32.mrf.mxu0  ;;  %v1972_v52 = vpop.f32.mrf.mxu1  ;;  %v1538_v3 = vld [vmem:[#allocation2 + $0x62] sm:$0xff] }
 0x1c6   : > { %v1973_v26 = vadd.f32 %v1972_v52, %v1895_v51 }
 0x1c7   : > { %v6667_v58 = vadd.f32 %v2123_v57, %v2047_v13 }
 0x1c8   : > { %2190 = vmatmul.f32.gmra.mxu0 %v6669_v31  ;;  %2267 = vmatmul.f32.gmra.mxu1 %v6671_v59 }
 0x1c9   : > { %2344 = vmatmul.f32.gmra.mxu2 %v6675_v60  ;;  %2421 = vmatmul.f32.gmra.mxu3 %v1535_v61 }
 0x1cc   : > { %v2049_v63 = vpop.f32.mrf.mxu2  ;;  %v2126_v0 = vpop.f32.mrf.mxu3 }
 0x1cd   : > { %v2050_v49 = vadd.f32 %v2049_v63, %v1973_v26  ;;  %v1898_v5 = vpop.f32.mrf.mxu0  ;;  %v1975_v6 = vpop.f32.mrf.mxu1  ;;  %v6722_v26 = vld [vmem:[#allocation2 + $0x84] sm:$0xff] }
 0x1ce   : > { %v1976_v9 = vadd.f32 %v1975_v6, %v1898_v5  ;;  %v6724_v63 = vld [vmem:[#allocation2 + $0x68] sm:$0xff] }
 0x1cf   : > { %v6681_v11 = vadd.f32 %v2126_v0, %v2050_v49  ;;  %v6728_v0 = vld [vmem:[#allocation2 + $0x69] sm:$0xff] }
 0x1d0   : > { %2193 = vmatmul.f32.gmra.mxu0 %v6683_v12  ;;  %2270 = vmatmul.f32.gmra.mxu1 %v6685_v14  ;;  %v1539_v49 = vld [vmem:[#allocation2 + $0x6a] sm:$0xff] }
 0x1d1   : > { %2347 = vmatmul.f32.gmra.mxu2 %v6689_v15  ;;  %2424 = vmatmul.f32.gmra.mxu3 %v1536_v46  ;;  %v1647_v5 = vld [vmem:[%s10032_s3 + $0x1c8] sm:$0xff] }
 0x1d2   : > { %2473 = vmatpush.msrb.mxu0 %v1647_v5 }
 0x1d4   : > { %v2052_v23 = vpop.f32.mrf.mxu2  ;;  %v2129_v17 = vpop.f32.mrf.mxu3 }
 0x1d5   : > { %v2053_v18 = vadd.f32 %v2052_v23, %v1976_v9  ;;  %v1901_v20 = vpop.f32.mrf.mxu0  ;;  %v1978_v21 = vpop.f32.mrf.mxu1 }
 0x1d6   : > { %v1979_v35 = vadd.f32 %v1978_v21, %v1901_v20  ;;  %v6736_v21 = vld [vmem:[#allocation2 + $0x94] sm:$0xff] }
 0x1d7   : > { %v6692_v22 = vadd.f32 %v2129_v17, %v2053_v18  ;;  %10056 = vst [vmem:[#allocation3_spill] sm:$0xff] %v6736_v21 }
 0x1d8   : > { %2196 = vmatmul.f32.gmra.mxu0 %v6694_v53  ;;  %2273 = vmatmul.f32.gmra.mxu1 %v6696_v24 }
 0x1d9   : > { %2350 = vmatmul.f32.gmra.mxu2 %v6703_v27  ;;  %2427 = vmatmul.f32.gmra.mxu3 %v1537_v34  ;;  %v6742_v34 = vld [vmem:[#allocation2 + $0x79] sm:$0xff] }
 0x1dc   : > { %v2055_v8 = vpop.f32.mrf.mxu2  ;;  %v2132_v32 = vpop.f32.mrf.mxu3 }
 0x1dd   : > { %v2056_v28 = vadd.f32 %v2055_v8, %v1979_v35  ;;  %v1904_v36 = vpop.f32.mrf.mxu0  ;;  %v1981_v48 = vpop.f32.mrf.mxu1  ;;  %v1540_v35 = vld [vmem:[#allocation2 + $0x7a] sm:$0xff] }
 0x1de   : > { %v1982_v56 = vadd.f32 %v1981_v48, %v1904_v36  ;;  %v1646_v8 = vld [vmem:[%s10032_s3 + $0x1c0] sm:$0xff] }
 0x1df   : > { %v6706_v37 = vadd.f32 %v2132_v32, %v2056_v28  ;;  %2474 = vmatpush.msrb.mxu0 %v1646_v8  ;;  %v6770_v8 = vld [vmem:[#allocation2 + $0x91] sm:$0xff] }
 0x1e0   : > { %2199 = vmatmul.f32.gmra.mxu0 %v6708_v38  ;;  %2276 = vmatmul.f32.gmra.mxu1 %v6710_v39 }
 0x1e1   : > { %2353 = vmatmul.f32.gmra.mxu2 %v6717_v55  ;;  %2430 = vmatmul.f32.gmra.mxu3 %v1538_v3 }
 0x1e4   : > { %v2058_v57 = vpop.f32.mrf.mxu2  ;;  %v2135_v13 = vpop.f32.mrf.mxu3 }
 0x1e5   : > { %v2059_v51 = vadd.f32 %v2058_v57, %v1982_v56  ;;  %v1907_v52 = vpop.f32.mrf.mxu0  ;;  %v1984_v61 = vpop.f32.mrf.mxu1  ;;  %v6750_v57 = vld [vmem:[#allocation2 + $0x9c] sm:$0xff] }
 0x1e6   : > { %v1985_v6 = vadd.f32 %v1984_v61, %v1907_v52  ;;  %10057 = vst [vmem:[#allocation4_spill] sm:$0xff] %v6750_v57  ;;  %v1541_v52 = vld [vmem:[#allocation2 + $0x82] sm:$0xff] }
 0x1e7   : > { %v6720_v62 = vadd.f32 %v2135_v13, %v2059_v51  ;;  %v6752_v13 = vld [vmem:[#allocation2 + $0x80] sm:$0xff] }
 0x1e8   : > { %2202 = vmatmul.f32.gmra.mxu0 %v6722_v26  ;;  %2279 = vmatmul.f32.gmra.mxu1 %v6724_v63  ;;  %v6756_v51 = vld [vmem:[#allocation2 + $0x81] sm:$0xff] }
 0x1e9   : > { %2356 = vmatmul.f32.gmra.mxu2 %v6728_v0  ;;  %2433 = vmatmul.f32.gmra.mxu3 %v1539_v49 }
 0x1ec   : > { %v2061_v46 = vpop.f32.mrf.mxu2  ;;  %v2138_v9 = vpop.f32.mrf.mxu3 }
 0x1ed   : > { %v2062_v23 = vadd.f32 %v2061_v46, %v1985_v6  ;;  %v1910_v17 = vpop.f32.mrf.mxu0  ;;  %v1987_v18 = vpop.f32.mrf.mxu1 }
 0x1ee   : > { %v1988_v32 = vadd.f32 %v1987_v18, %v1910_v17  ;;  %v6761_v17 = vld [vmem:[#allocation2 + $0xac] sm:$0xff] }
 0x1ef   : > { %v6734_v20 = vadd.f32 %v2138_v9, %v2062_v23  ;;  %10058 = vst [vmem:[#allocation5_spill] sm:$0xff] %v6761_v17  ;;  %v6763_v18 = vld [vmem:[#allocation2 + $0x90] sm:$0xff] }
 0x1f0   : > { %2205 = vmatmul.f32.gmra.mxu0 %v6736_v21  ;;  %2282 = vmatmul.f32.gmra.mxu1 %v6738_v25  ;;  %v6864_v21 = vld [vmem:[#allocation2 + $0xcc] sm:$0xff] }
 0x1f1   : > { %2359 = vmatmul.f32.gmra.mxu2 %v6742_v34  ;;  %2436 = vmatmul.f32.gmra.mxu3 %v1540_v35  ;;  %v1645_v35 = vld [vmem:[%s10032_s3 + $0x1b8] sm:$0xff]  ;;  %10065 = vst [vmem:[#allocation12_spill] sm:$0xff] %v6864_v21 }
 0x1f2   : > { %2475 = vmatpush.msrb.mxu0 %v1645_v35  ;;  %v1667_v35 = vld [vmem:[%s10032_s3 + $0x268] sm:$0xff] }
 0x1f4   : > { %v2064_v28 = vpop.f32.mrf.mxu2  ;;  %v2141_v36 = vpop.f32.mrf.mxu3 }
 0x1f5   : > { %v2065_v48 = vadd.f32 %v2064_v28, %v1988_v32  ;;  %v1913_v54 = vpop.f32.mrf.mxu0  ;;  %v1990_v3 = vpop.f32.mrf.mxu1  ;;  %v1542_v32 = vld [vmem:[#allocation2 + $0x92] sm:$0xff] }
 0x1f6   : > { %v1991_v61 = vadd.f32 %v1990_v3, %v1913_v54  ;;  %v1669_v28 = vld [vmem:[%s10032_s3 + $0x278] sm:$0xff] }
 0x1f7   : > { %v6748_v56 = vadd.f32 %v2141_v36, %v2065_v48  ;;  %v2737_v36 = vld [vmem:[%s10032_s3 + $0x578] sm:$0xff]  ;;  %2544 = vmatpush.msrb.mxu1 %v1669_v28  ;;  %v2735_v28 = vld [vmem:[%s10032_s3 + $0x568] sm:$0xff] }
 0x1f8   : > { %2208 = vmatmul.f32.gmra.mxu0 %v6750_v57  ;;  %2285 = vmatmul.f32.gmra.mxu1 %v6752_v13  ;;  %v2753_v48 = vld [vmem:[%s10032_s3 + $0x5f8] sm:$0xff]  ;;  %v1668_v57 = vld [vmem:[%s10032_s3 + $0x270] sm:$0xff] }
 0x1f9   : > { %2362 = vmatmul.f32.gmra.mxu2 %v6756_v51  ;;  %2439 = vmatmul.f32.gmra.mxu3 %v1541_v52 }
 0x1fa   : > { %2802 = vmatpush.msrb.mxu2 %v2737_v36  ;;  %2879 = vmatpush.msrb.mxu3 %v2753_v48  ;;  %v1644_v36 = vld [vmem:[%s10032_s3 + $0x1b0] sm:$0xff] }
 0x1fb   : > { %2545 = vmatpush.msrb.mxu1 %v1668_v57  ;;  %2476 = vmatpush.msrb.mxu0 %v1644_v36  ;;  %v2750_v57 = vld [vmem:[%s10032_s3 + $0x5e0] sm:$0xff] }
 0x1fc   : > { %v2067_v49 = vpop.f32.mrf.mxu2  ;;  %v2144_v5 = vpop.f32.mrf.mxu3  ;;  %v6826_v36 = vld [vmem:[#allocation2 + $0xc4] sm:$0xff] }
 0x1fd   : > { %v2068_v6 = vadd.f32 %v2067_v49, %v1991_v61  ;;  %v1916_v46 = vpop.f32.mrf.mxu0  ;;  %v1993_v9 = vpop.f32.mrf.mxu1  ;;  %2546 = vmatpush.msrb.mxu1 %v1667_v35  ;;  %10062 = vst [vmem:[#allocation9_spill] sm:$0xff] %v6826_v36  ;;  %v1665_v35 = vld [vmem:[%s10032_s3 + $0x258] sm:$0xff] }
 0x1fe   : > { %v1994_v54 = vadd.f32 %v1993_v9, %v1916_v46  ;;  %v2736_v46 = vld [vmem:[%s10032_s3 + $0x570] sm:$0xff] }
 0x1ff   : > { %v6759_v23 = vadd.f32 %v2144_v5, %v2068_v6  ;;  %v6782_v6 = vld [vmem:[#allocation2 + $0x98] sm:$0xff]  ;;  %v2752_v9 = vld [vmem:[%s10032_s3 + $0x5f0] sm:$0xff]  ;;  %2803 = vmatpush.msrb.mxu2 %v2736_v46  ;;  %v6822_v46 = vld [vmem:[#allocation2 + $0xa8] sm:$0xff] }
 0x200   : > { %2211 = vmatmul.f32.gmra.mxu0 %v6761_v17  ;;  %2288 = vmatmul.f32.gmra.mxu1 %v6763_v18  ;;  %v6786_v17 = vld [vmem:[#allocation2 + $0xb4] sm:$0xff] }
 0x201   : > { %2365 = vmatmul.f32.gmra.mxu2 %v6770_v8  ;;  %2442 = vmatmul.f32.gmra.mxu3 %v1542_v32  ;;  %10060 = vst [vmem:[#allocation7_spill] sm:$0xff] %v6786_v17 }
 0x202   : > { %2880 = vmatpush.msrb.mxu3 %v2752_v9  ;;  %2804 = vmatpush.msrb.mxu2 %v2735_v28  ;;  %v2733_v28 = vld [vmem:[%s10032_s3 + $0x558] sm:$0xff] }
 0x204   : > { %v2070_v3 = vpop.f32.mrf.mxu2  ;;  %v2147_v52 = vpop.f32.mrf.mxu3 }
 0x205   : > { %v2071_v61 = vadd.f32 %v2070_v3, %v1994_v54  ;;  %v1919_v49 = vpop.f32.mrf.mxu0  ;;  %v1996_v5 = vpop.f32.mrf.mxu1  ;;  %v2734_v54 = vld [vmem:[%s10032_s3 + $0x560] sm:$0xff] }
 0x206   : > { %v1997_v48 = vadd.f32 %v1996_v5, %v1919_v49  ;;  %2805 = vmatpush.msrb.mxu2 %v2734_v54  ;;  %v1664_v54 = vld [vmem:[%s10032_s3 + $0x250] sm:$0xff] }
 0x207   : > { %v6784_v32 = vadd.f32 %v2147_v52, %v2071_v61 }
 0x208   : > { %2214 = vmatmul.f32.gmra.mxu0 %v6786_v17  ;;  %2291 = vmatmul.f32.gmra.mxu1 %v6782_v6 }
 0x209   : > { %10059 = vst [vmem:[#allocation6_spill] sm:$0xff] %v6784_v32  ;;  %2368 = vmatmul.f32.gmra.mxu2 %v6417_v41  ;;  %2445 = vmatmul.f32.gmra.mxu3 %v6421_v42  ;;  %v2751_v41 = vld [vmem:[%s10032_s3 + $0x5e8] sm:$0xff]  ;;  %v1666_v42 = vld [vmem:[%s10032_s3 + $0x260] sm:$0xff] }
 0x20a   : > { %2881 = vmatpush.msrb.mxu3 %v2751_v41  ;;  %2547 = vmatpush.msrb.mxu1 %v1666_v42  ;;  %v2749_v41 = vld [vmem:[%s10032_s3 + $0x5d8] sm:$0xff]  ;;  %v5680_v42 = vld [vmem:[#allocation2 + $0xaa] sm:$0xff]  ;;  %v6902_v32 = vld [vmem:[#allocation2 + $0xc0] sm:$0xff] }
 0x20b   : > { %2806 = vmatpush.msrb.mxu2 %v2733_v28 }
 0x20c   : > { %v2073_v3 = vpop.f32.mrf.mxu2  ;;  %v2150_v52 = vpop.f32.mrf.mxu3  ;;  %2882 = vmatpush.msrb.mxu3 %v2750_v57  ;;  %2548 = vmatpush.msrb.mxu1 %v1665_v35  ;;  %v1643_v57 = vld [vmem:[%s10032_s3 + $0x1a8] sm:$0xff] }
 0x20d   : > { %v2074_v61 = vadd.f32 %v2073_v3, %v1997_v48  ;;  %v1922_v49 = vpop.f32.mrf.mxu0  ;;  %v1999_v5 = vpop.f32.mrf.mxu1  ;;  %v5679_v48 = vld [vmem:[#allocation2 + $0xa9] sm:$0xff]  ;;  %2477 = vmatpush.msrb.mxu0 %v1643_v57  ;;  %v5682_v57 = vld [vmem:[#allocation2 + $0xb2] sm:$0xff] }
 0x20e   : > { %v2732_v3 = vld [vmem:[%s10032_s3 + $0x550] sm:$0xff]  ;;  %2883 = vmatpush.msrb.mxu3 %v2749_v41  ;;  %2549 = vmatpush.msrb.mxu1 %v1664_v54  ;;  %v1662_v54 = vld [vmem:[%s10032_s3 + $0x240] sm:$0xff] }
 0x20f   : > { %v6824_v9 = vadd.f32 %v2150_v52, %v2074_v61  ;;  %v2748_v52 = vld [vmem:[%s10032_s3 + $0x5d0] sm:$0xff]  ;;  %v2000_v61 = vadd.f32 %v1999_v5, %v1922_v49  ;;  %2807 = vmatpush.msrb.mxu2 %v2732_v3  ;;  %v2730_v3 = vld [vmem:[%s10032_s3 + $0x540] sm:$0xff] }
 0x210   : > { %2217 = vmatmul.f32.gmra.mxu0 %v6826_v36  ;;  %2294 = vmatmul.f32.gmra.mxu1 %v6822_v46  ;;  %v2747_v36 = vld [vmem:[%s10032_s3 + $0x5c8] sm:$0xff]  ;;  %v6860_v41 = vld [vmem:[#allocation2 + $0xb0] sm:$0xff] }
 0x211   : > { %10061 = vst [vmem:[#allocation8_spill] sm:$0xff] %v6824_v9  ;;  %2371 = vmatmul.f32.gmra.mxu2 %v5679_v48  ;;  %2448 = vmatmul.f32.gmra.mxu3 %v5680_v42  ;;  %v1663_v48 = vld [vmem:[%s10032_s3 + $0x248] sm:$0xff] }
 0x212   : > { %v2731_v42 = vld [vmem:[%s10032_s3 + $0x548] sm:$0xff]  ;;  %2884 = vmatpush.msrb.mxu3 %v2748_v52  ;;  %10063 = vst [vmem:[#allocation10_spill] sm:$0xff] %v6860_v41  ;;  %2550 = vmatpush.msrb.mxu1 %v1663_v48  ;;  %v5681_v52 = vld [vmem:[#allocation2 + $0xb1] sm:$0xff]  ;;  %v1642_v48 = vld [vmem:[%s10032_s3 + $0x1a0] sm:$0xff] }
 0x213   : > { %2808 = vmatpush.msrb.mxu2 %v2731_v42  ;;  %v2745_v42 = vld [vmem:[%s10032_s3 + $0x5b8] sm:$0xff]  ;;  %2478 = vmatpush.msrb.mxu0 %v1642_v48 }
 0x214   : > { %v2076_v35 = vpop.f32.mrf.mxu2  ;;  %v2153_v28 = vpop.f32.mrf.mxu3  ;;  %2885 = vmatpush.msrb.mxu3 %v2747_v36  ;;  %v1661_v36 = vld [vmem:[%s10032_s3 + $0x238] sm:$0xff]  ;;  %2551 = vmatpush.msrb.mxu1 %v1662_v54 }
 0x215   : > { %v2077_v17 = vadd.f32 %v2076_v35, %v2000_v61  ;;  %v1925_v49 = vpop.f32.mrf.mxu0  ;;  %v2002_v5 = vpop.f32.mrf.mxu1  ;;  %v2729_v61 = vld [vmem:[%s10032_s3 + $0x538] sm:$0xff]  ;;  %2809 = vmatpush.msrb.mxu2 %v2730_v3 }
 0x216   : > { %v1641_v35 = vld [vmem:[%s10032_s3 + $0x198] sm:$0xff]  ;;  %2552 = vmatpush.msrb.mxu1 %v1661_v36  ;;  %v1659_v36 = vld [vmem:[%s10032_s3 + $0x228] sm:$0xff] }
 0x217   : > { %v6862_v9 = vadd.f32 %v2153_v28, %v2077_v17  ;;  %v2746_v17 = vld [vmem:[%s10032_s3 + $0x5c0] sm:$0xff]  ;;  %v2003_v28 = vadd.f32 %v2002_v5, %v1925_v49  ;;  %2810 = vmatpush.msrb.mxu2 %v2729_v61  ;;  %2479 = vmatpush.msrb.mxu0 %v1641_v35  ;;  %v2727_v61 = vld [vmem:[%s10032_s3 + $0x528] sm:$0xff] }
 0x218   : > { %2220 = vmatmul.f32.gmra.mxu0 %v6864_v21  ;;  %2297 = vmatmul.f32.gmra.mxu1 %v6860_v41  ;;  %v2744_v21 = vld [vmem:[%s10032_s3 + $0x5b0] sm:$0xff]  ;;  %v1767_v41 = vld [vmem:[#allocation2 + $0xdc] sm:$0xff] }
 0x219   : > { %10064 = vst [vmem:[#allocation11_spill] sm:$0xff] %v6862_v9  ;;  %2374 = vmatmul.f32.gmra.mxu2 %v5681_v52  ;;  %2451 = vmatmul.f32.gmra.mxu3 %v5682_v57  ;;  %v1660_v52 = vld [vmem:[%s10032_s3 + $0x230] sm:$0xff]  ;;  %v5684_v35 = vld [vmem:[#allocation2 + $0xc2] sm:$0xff] }
 0x21a   : > { %2886 = vmatpush.msrb.mxu3 %v2746_v17  ;;  %v2728_v57 = vld [vmem:[%s10032_s3 + $0x530] sm:$0xff]  ;;  %2553 = vmatpush.msrb.mxu1 %v1660_v52  ;;  %v2742_v52 = vld [vmem:[%s10032_s3 + $0x5a0] sm:$0xff] }
 0x21b   : > { %2811 = vmatpush.msrb.mxu2 %v2728_v57  ;;  %v1639_v57 = vld [vmem:[%s10032_s3 + $0x188] sm:$0xff] }
 0x21c   : > { %v2079_v54 = vpop.f32.mrf.mxu2  ;;  %v2156_v3 = vpop.f32.mrf.mxu3  ;;  %2887 = vmatpush.msrb.mxu3 %v2745_v42  ;;  %2554 = vmatpush.msrb.mxu1 %v1659_v36  ;;  %v1638_v36 = vld [vmem:[%s10032_s3 + $0x180] sm:$0xff] }
 0x21d   : > { %v2080_v9 = vadd.f32 %v2079_v54, %v2003_v28  ;;  %v2176_v49 = vpop.f32.mrf.mxu0  ;;  %v2253_v5 = vpop.f32.mrf.mxu1  ;;  %v1658_v28 = vld [vmem:[%s10032_s3 + $0x220] sm:$0xff]  ;;  %2812 = vmatpush.msrb.mxu2 %v2727_v61  ;;  %v1657_v54 = vld [vmem:[%s10032_s3 + $0x218] sm:$0xff] }
 0x21e   : > { %v2177_v17 = vadd.f32 %v2176_v49, %v6591_v4  ;;  %2888 = vmatpush.msrb.mxu3 %v2744_v21  ;;  %v2743_v4 = vld [vmem:[%s10032_s3 + $0x5a8] sm:$0xff]  ;;  %v1640_v21 = vld [vmem:[%s10032_s3 + $0x190] sm:$0xff]  ;;  %2555 = vmatpush.msrb.mxu1 %v1658_v28 }
 0x21f   : > { %v6904_v48 = vadd.f32 %v2156_v3, %v2080_v9  ;;  %v5683_v9 = vld [vmem:[#allocation2 + $0xc1] sm:$0xff]  ;;  %v2725_v3 = vld [vmem:[%s10032_s3 + $0x518] sm:$0xff]  ;;  %2480 = vmatpush.msrb.mxu0 %v1640_v21 }
 0x220   : > { %v2254_v42 = vadd.f32 %v2253_v5, %v2177_v17  ;;  %2223 = vmatmul.f32.gmra.mxu0 %v1767_v41  ;;  %2300 = vmatmul.f32.gmra.mxu1 %v6902_v32  ;;  %v2726_v41 = vld [vmem:[%s10032_s3 + $0x520] sm:$0xff]  ;;  %v2741_v17 = vld [vmem:[%s10032_s3 + $0x598] sm:$0xff]  ;;  %v6944_v21 = vld [vmem:[#allocation2 + $0xc8] sm:$0xff] }
 0x221   : > { %10066 = vst [vmem:[#allocation13_spill] sm:$0xff] %v6904_v48  ;;  %2377 = vmatmul.f32.gmra.mxu2 %v5683_v9  ;;  %2454 = vmatmul.f32.gmra.mxu3 %v5684_v35  ;;  %v1656_v48 = vld [vmem:[%s10032_s3 + $0x210] sm:$0xff] }
 0x222   : > { %2889 = vmatpush.msrb.mxu3 %v2743_v4  ;;  %2813 = vmatpush.msrb.mxu2 %v2726_v41  ;;  %v1768_v41 = vld [vmem:[#allocation2 + $0xe4] sm:$0xff] }
 0x223   : > { %2481 = vmatpush.msrb.mxu0 %v1639_v57  ;;  %2556 = vmatpush.msrb.mxu1 %v1657_v54  ;;  %v5685_v57 = vld [vmem:[#allocation2 + $0xc9] sm:$0xff] }
 0x224   : > { %v2330_v49 = vpop.f32.mrf.mxu2  ;;  %v2407_v5 = vpop.f32.mrf.mxu3  ;;  %2890 = vmatpush.msrb.mxu3 %v2742_v52  ;;  %2814 = vmatpush.msrb.mxu2 %v2725_v3  ;;  %v1655_v54 = vld [vmem:[%s10032_s3 + $0x208] sm:$0xff] }
 0x225   : > { %v2331_v61 = vadd.f32 %v2330_v49, %v2254_v42  ;;  %v2179_v4 = vpop.f32.mrf.mxu0  ;;  %v2256_v9 = vpop.f32.mrf.mxu1  ;;  %v2724_v42 = vld [vmem:[%s10032_s3 + $0x510] sm:$0xff]  ;;  %2482 = vmatpush.msrb.mxu0 %v1638_v36  ;;  %v2723_v3 = vld [vmem:[%s10032_s3 + $0x508] sm:$0xff]  ;;  %2557 = vmatpush.msrb.mxu1 %v1656_v48  ;;  %v2738_v48 = vld [vmem:[%s10032_s3 + $0x580] sm:$0xff] }
 0x226   : > { %v2180_v35 = vadd.f32 %v2179_v4, %v6621_v30  ;;  %2891 = vmatpush.msrb.mxu3 %v2741_v17  ;;  %v2740_v30 = vld [vmem:[%s10032_s3 + $0x590] sm:$0xff]  ;;  %2815 = vmatpush.msrb.mxu2 %v2724_v42  ;;  %v2739_v49 = vld [vmem:[%s10032_s3 + $0x588] sm:$0xff] }
 0x227   : > { %v6946_v28 = vadd.f32 %v2407_v5, %v2331_v61  ;;  %v1654_v5 = vld [vmem:[%s10032_s3 + $0x200] sm:$0xff]  ;;  %2558 = vmatpush.msrb.mxu1 %v1655_v54  ;;  %v1769_v42 = vld [vmem:[#allocation2 + $0xf4] sm:$0xff] }
 0x228   : > { %v2257_v52 = vadd.f32 %v2256_v9, %v2180_v35  ;;  %2226 = vmatmul.f32.gmra.mxu0 %v1768_v41  ;;  %2303 = vmatmul.f32.gmra.mxu1 %v6944_v21  ;;  %v6983_v54 = vld [vmem:[#allocation2 + $0xd9] sm:$0xff] }
 0x229   : > { %10067 = vst [vmem:[#allocation14_spill] sm:$0xff] %v6946_v28  ;;  %2380 = vmatmul.f32.gmra.mxu2 %v5685_v57  ;;  %2457 = vmatmul.f32.gmra.mxu3 %v6522_v29  ;;  %v2722_v29 = vld [vmem:[%s10032_s3 + $0x500] sm:$0xff] }
 0x22a   : > { %2892 = vmatpush.msrb.mxu3 %v2740_v30  ;;  %2816 = vmatpush.msrb.mxu2 %v2723_v3  ;;  %v6980_v30 = vld [vmem:[#allocation2 + $0xd8] sm:$0xff] }
 0x22b   : > { %2559 = vmatpush.msrb.mxu1 %v1654_v5 }
 0x22c   : > { %v2333_v17 = vpop.f32.mrf.mxu2  ;;  %v2410_v36 = vpop.f32.mrf.mxu3  ;;  %2893 = vmatpush.msrb.mxu3 %v2739_v49  ;;  %2817 = vmatpush.msrb.mxu2 %v2722_v29 }
 0x22d   : > { %v2334_v61 = vadd.f32 %v2333_v17, %v2257_v52  ;;  %v2182_v4 = vpop.f32.mrf.mxu0  ;;  %v2259_v9 = vpop.f32.mrf.mxu1  ;;  %v1548_v52 = vld [vmem:[#allocation2 + $0xda] sm:$0xff] }
 0x22e   : > { %v2183_v35 = vadd.f32 %v2182_v4, %v6624_v45  ;;  %2894 = vmatpush.msrb.mxu3 %v2738_v48  ;;  %v1770_v48 = vld [vmem:[#allocation2 + $0xfc] sm:$0xff] }
 0x22f   : > { %v6978_v41 = vadd.f32 %v2410_v36, %v2334_v61  ;;  %v6989_v61 = vld [vmem:[#allocation2 + $0xe0] sm:$0xff] }
 0x230   : > { %v2260_v57 = vadd.f32 %v2259_v9, %v2183_v35  ;;  %2229 = vmatmul.f32.gmra.mxu0 %v1769_v42  ;;  %2306 = vmatmul.f32.gmra.mxu1 %v6980_v30  ;;  %v6992_v9 = vld [vmem:[#allocation2 + $0xe1] sm:$0xff] }
 0x231   : > { %10068 = vst [vmem:[#allocation15_spill] sm:$0xff] %v6978_v41  ;;  %2383 = vmatmul.f32.gmra.mxu2 %v6983_v54  ;;  %2460 = vmatmul.f32.gmra.mxu3 %v1548_v52  ;;  %v1549_v35 = vld [vmem:[#allocation2 + $0xe2] sm:$0xff] }
 0x234   : > { %v2336_v3 = vpop.f32.mrf.mxu2  ;;  %v2413_v45 = vpop.f32.mrf.mxu3 }
 0x235   : > { %v2337_v49 = vadd.f32 %v2336_v3, %v2260_v57  ;;  %v2185_v5 = vpop.f32.mrf.mxu0  ;;  %v2262_v29 = vpop.f32.mrf.mxu1 }
 0x236   : > { %v2186_v17 = vadd.f32 %v2185_v5, %v6627_v47  ;;  %v1550_v5 = vld [vmem:[#allocation2 + $0x3] sm:$0xff] }
 0x237   : > { %v6987_v36 = vadd.f32 %v2413_v45, %v2337_v49 }
 0x238   : > { %v2263_v4 = vadd.f32 %v2262_v29, %v2186_v17  ;;  %2232 = vmatmul.f32.gmra.mxu0 %v1770_v48  ;;  %2309 = vmatmul.f32.gmra.mxu1 %v6989_v61  ;;  %v1570_v29 = vld [vmem:[#allocation2 + $0x4] sm:$0xff] }
 0x239   : > { %10069 = vst [vmem:[#allocation16_spill] sm:$0xff] %v6987_v36  ;;  %2386 = vmatmul.f32.gmra.mxu2 %v6992_v9  ;;  %2463 = vmatmul.f32.gmra.mxu3 %v1549_v35 }
 0x23c   : > { %v2339_v42 = vpop.f32.mrf.mxu2  ;;  %v2416_v57 = vpop.f32.mrf.mxu3 }
 0x23d   : > { %v2340_v52 = vadd.f32 %v2339_v42, %v2263_v4  ;;  %v2188_v3 = vpop.f32.mrf.mxu0  ;;  %v2265_v47 = vpop.f32.mrf.mxu1 }
 0x23e   : > { %v2189_v45 = vadd.f32 %v2188_v3, %v6632_v1  ;;  %v1551_v1 = vld [vmem:[#allocation2 + $0xb] sm:$0xff] }
 0x23f   : > { %v6996_v49 = vadd.f32 %v2416_v57, %v2340_v52  ;;  %v1571_v57 = vld [vmem:[#allocation2 + $0xc] sm:$0xff] }
 0x240   : > { %v2266_v17 = vadd.f32 %v2265_v47, %v2189_v45  ;;  %2483 = vmatmul.f32.vlgmr.msrb.gmra.mxu0 %v1550_v5  ;;  %2560 = vmatmul.f32.vlgmr.msrb.gmra.mxu1 %v1570_v29 }
 0x241   : > { %2818 = vmatmul.f32.vlgmr.msrb.gmra.mxu2 %v6657_v44  ;;  %2895 = vmatmul.f32.vlgmr.msrb.gmra.mxu3 %v6661_v50 }
 0x244   : > { %v2342_v48 = vpop.f32.mrf.mxu2  ;;  %v2419_v35 = vpop.f32.mrf.mxu3 }
 0x245   : > { %v2343_v36 = vadd.f32 %v2342_v48, %v2266_v17  ;;  %v2191_v41 = vpop.f32.mrf.mxu0  ;;  %v2268_v4 = vpop.f32.mrf.mxu1 }
 0x246   : > { %v2192_v42 = vadd.f32 %v2191_v41, %v6637_v7  ;;  %v1552_v7 = vld [vmem:[#allocation2 + $0x1b] sm:$0xff] }
 0x247   : > { %v7001_v28 = vadd.f32 %v2419_v35, %v2343_v36  ;;  %v2769_v41 = vld [vmem:[%s10032_s3 + $0x678] sm:$0xff] }
 0x248   : > { %v2269_v52 = vadd.f32 %v2268_v4, %v2192_v42  ;;  %2486 = vmatmul.f32.gmra.mxu0 %v1551_v1  ;;  %2563 = vmatmul.f32.gmra.mxu1 %v1571_v57  ;;  %v1553_v42 = vld [vmem:[#allocation2 + $0x23] sm:$0xff] }
 0x249   : > { %2821 = vmatmul.f32.gmra.mxu2 %v6671_v59  ;;  %2898 = vmatmul.f32.gmra.mxu3 %v6675_v60 }
 0x24a   : > { %2956 = vmatpush.msra.mxu0 %v2769_v41 }
 0x24c   : > { %v2345_v44 = vpop.f32.mrf.mxu2  ;;  %v2422_v50 = vpop.f32.mrf.mxu3 }
 0x24d   : > { %v2346_v3 = vadd.f32 %v2345_v44, %v2269_v52  ;;  %v2194_v47 = vpop.f32.mrf.mxu0  ;;  %v2271_v45 = vpop.f32.mrf.mxu1 }
 0x24e   : > { %v2195_v5 = vadd.f32 %v2194_v47, %v6645_v33 }
 0x24f   : > { %v7006_v29 = vadd.f32 %v2422_v50, %v2346_v3  ;;  %v7026_v3 = vld [vmem:[#allocation2 + $0x33] sm:$0xff] }
 0x250   : > { %v2272_v36 = vadd.f32 %v2271_v45, %v2195_v5  ;;  %2489 = vmatmul.f32.gmra.mxu0 %v1552_v7  ;;  %2566 = vmatmul.f32.gmra.mxu1 %v6629_v19  ;;  %v2768_v19 = vld [vmem:[%s10032_s3 + $0x670] sm:$0xff] }
 0x251   : > { %2824 = vmatmul.f32.gmra.mxu2 %v6685_v14  ;;  %2901 = vmatmul.f32.gmra.mxu3 %v6689_v15 }
 0x252   : > { %2957 = vmatpush.msra.mxu0 %v2768_v19 }
 0x254   : > { %v2348_v59 = vpop.f32.mrf.mxu2  ;;  %v2425_v60 = vpop.f32.mrf.mxu3 }
 0x255   : > { %v2349_v17 = vadd.f32 %v2348_v59, %v2272_v36  ;;  %v2197_v33 = vpop.f32.mrf.mxu0  ;;  %v2274_v48 = vpop.f32.mrf.mxu1  ;;  %v7038_v36 = vld [vmem:[#allocation2 + $0x3b] sm:$0xff] }
 0x256   : > { %v2198_v35 = vadd.f32 %v2197_v33, %v6653_v40 }
 0x257   : > { %v7015_v4 = vadd.f32 %v2425_v60, %v2349_v17 }
 0x258   : > { %v2275_v1 = vadd.f32 %v2274_v48, %v2198_v35  ;;  %2492 = vmatmul.f32.gmra.mxu0 %v1553_v42  ;;  %2569 = vmatmul.f32.gmra.mxu1 %v6634_v2  ;;  %v7050_v35 = vld [vmem:[#allocation2 + $0x4b] sm:$0xff] }
 0x259   : > { %2827 = vmatmul.f32.gmra.mxu2 %v6696_v24  ;;  %2904 = vmatmul.f32.gmra.mxu3 %v6703_v27  ;;  %v2767_v24 = vld [vmem:[%s10032_s3 + $0x668] sm:$0xff] }
 0x25a   : > { %2958 = vmatpush.msra.mxu0 %v2767_v24  ;;  %v7071_v24 = vld [vmem:[#allocation2 + $0x63] sm:$0xff] }
 0x25c   : > { %v2351_v14 = vpop.f32.mrf.mxu2  ;;  %v2428_v15 = vpop.f32.mrf.mxu3 }
 0x25d   : > { %v2352_v57 = vadd.f32 %v2351_v14, %v2275_v1  ;;  %v2200_v40 = vpop.f32.mrf.mxu0  ;;  %v2277_v52 = vpop.f32.mrf.mxu1 }
 0x25e   : > { %v2201_v44 = vadd.f32 %v2200_v40, %v6667_v58 }
 0x25f   : > { %v7024_v50 = vadd.f32 %v2428_v15, %v2352_v57  ;;  %v7059_v15 = vld [vmem:[#allocation2 + $0x53] sm:$0xff] }
 0x260   : > { %v2278_v2 = vadd.f32 %v2277_v52, %v2201_v44  ;;  %2495 = vmatmul.f32.gmra.mxu0 %v7026_v3  ;;  %2572 = vmatmul.f32.gmra.mxu1 %v6639_v16  ;;  %v2765_v57 = vld [vmem:[%s10032_s3 + $0x658] sm:$0xff] }
 0x261   : > { %2830 = vmatmul.f32.gmra.mxu2 %v6710_v39  ;;  %2907 = vmatmul.f32.gmra.mxu3 %v6717_v55  ;;  %v2766_v39 = vld [vmem:[%s10032_s3 + $0x660] sm:$0xff] }
 0x262   : > { %2959 = vmatpush.msra.mxu0 %v2766_v39 }
 0x264   : > { %v2354_v27 = vpop.f32.mrf.mxu2  ;;  %v2431_v58 = vpop.f32.mrf.mxu3  ;;  %2960 = vmatpush.msra.mxu0 %v2765_v57  ;;  %v10070_v57 = vld [vmem:[#allocation10_spill] sm:$0xff] }
 0x265   : > { %v2355_v47 = vadd.f32 %v2354_v27, %v2278_v2  ;;  %v2203_v45 = vpop.f32.mrf.mxu0  ;;  %v2280_v5 = vpop.f32.mrf.mxu1 }
 0x266   : > { %v2204_v7 = vadd.f32 %v2203_v45, %v6681_v11 }
 0x267   : > { %v7036_v41 = vadd.f32 %v2431_v58, %v2355_v47 }
 0x268   : > { %v2281_v16 = vadd.f32 %v2280_v5, %v2204_v7  ;;  %2498 = vmatmul.f32.gmra.mxu0 %v7038_v36  ;;  %2575 = vmatmul.f32.gmra.mxu1 %v6647_v10  ;;  %v7083_v7 = vld [vmem:[#allocation2 + $0x6b] sm:$0xff] }
 0x269   : > { %2833 = vmatmul.f32.gmra.mxu2 %v6724_v63  ;;  %2910 = vmatmul.f32.gmra.mxu3 %v6728_v0 }
 0x26c   : > { %v2357_v55 = vpop.f32.mrf.mxu2  ;;  %v2434_v11 = vpop.f32.mrf.mxu3 }
 0x26d   : > { %v2358_v59 = vadd.f32 %v2357_v55, %v2281_v16  ;;  %v2206_v60 = vpop.f32.mrf.mxu0  ;;  %v2283_v17 = vpop.f32.mrf.mxu1 }
 0x26e   : > { %v2207_v33 = vadd.f32 %v2206_v60, %v6692_v22 }
 0x26f   : > { %v7048_v48 = vadd.f32 %v2434_v11, %v2358_v59 }
 0x270   : > { %v2284_v10 = vadd.f32 %v2283_v17, %v2207_v33  ;;  %2501 = vmatmul.f32.gmra.mxu0 %v7050_v35  ;;  %2578 = vmatmul.f32.gmra.mxu1 %v6655_v43  ;;  %v7094_v17 = vld [vmem:[#allocation2 + $0x7b] sm:$0xff] }
 0x271   : > { %2836 = vmatmul.f32.gmra.mxu2 %v6738_v25  ;;  %2913 = vmatmul.f32.gmra.mxu3 %v6742_v34  ;;  %v2762_v33 = vld [vmem:[%s10032_s3 + $0x640] sm:$0xff] }
 0x274   : > { %v2360_v63 = vpop.f32.mrf.mxu2  ;;  %v2437_v0 = vpop.f32.mrf.mxu3 }
 0x275   : > { %v2361_v42 = vadd.f32 %v2360_v63, %v2284_v10  ;;  %v2209_v1 = vpop.f32.mrf.mxu0  ;;  %v2286_v19 = vpop.f32.mrf.mxu1 }
 0x276   : > { %v2210_v22 = vadd.f32 %v2209_v1, %v6706_v37 }
 0x277   : > { %v7057_v14 = vadd.f32 %v2437_v0, %v2361_v42 }
 0x278   : > { %v2287_v43 = vadd.f32 %v2286_v19, %v2210_v22  ;;  %2504 = vmatmul.f32.gmra.mxu0 %v7059_v15  ;;  %2581 = vmatmul.f32.gmra.mxu1 %v6669_v31  ;;  %v2764_v31 = vld [vmem:[%s10032_s3 + $0x650] sm:$0xff]  ;;  %v7105_v22 = vld [vmem:[#allocation2 + $0x83] sm:$0xff] }
 0x279   : > { %2839 = vmatmul.f32.gmra.mxu2 %v6752_v13  ;;  %2916 = vmatmul.f32.gmra.mxu3 %v6756_v51 }
 0x27a   : > { %2961 = vmatpush.msra.mxu0 %v2764_v31  ;;  %v2761_v31 = vld [vmem:[%s10032_s3 + $0x638] sm:$0xff] }
 0x27c   : > { %v2363_v25 = vpop.f32.mrf.mxu2  ;;  %v2440_v37 = vpop.f32.mrf.mxu3 }
 0x27d   : > { %v2364_v34 = vadd.f32 %v2363_v25, %v2287_v43  ;;  %v2212_v40 = vpop.f32.mrf.mxu0  ;;  %v2289_v52 = vpop.f32.mrf.mxu1 }
 0x27e   : > { %v2213_v44 = vadd.f32 %v2212_v40, %v6720_v62 }
 0x27f   : > { %v7069_v2 = vadd.f32 %v2440_v37, %v2364_v34 }
 0x280   : > { %v2290_v27 = vadd.f32 %v2289_v52, %v2213_v44  ;;  %2507 = vmatmul.f32.gmra.mxu0 %v7071_v24  ;;  %2584 = vmatmul.f32.gmra.mxu1 %v6683_v12  ;;  %v10071_v52 = vld [vmem:[#allocation6_spill] sm:$0xff] }
 0x281   : > { %2842 = vmatmul.f32.gmra.mxu2 %v6763_v18  ;;  %2919 = vmatmul.f32.gmra.mxu3 %v6770_v8  ;;  %v2651_v18 = vld [vmem:[#allocation2 + $0x99] sm:$0xff]  ;;  %v2763_v8 = vld [vmem:[%s10032_s3 + $0x648] sm:$0xff] }
 0x282   : > { %2962 = vmatpush.msra.mxu0 %v2763_v8 }
 0x284   : > { %v2366_v13 = vpop.f32.mrf.mxu2  ;;  %v2443_v62 = vpop.f32.mrf.mxu3  ;;  %2963 = vmatpush.msra.mxu0 %v2762_v33 }
 0x285   : > { %v2367_v51 = vadd.f32 %v2366_v13, %v2290_v27  ;;  %v2215_v58 = vpop.f32.mrf.mxu0  ;;  %v2292_v47 = vpop.f32.mrf.mxu1  ;;  %v7113_v27 = vld [vmem:[#allocation2 + $0x93] sm:$0xff] }
 0x286   : > { %v2216_v45 = vadd.f32 %v2215_v58, %v6734_v20  ;;  %v10072_v13 = vld [vmem:[#allocation3_spill] sm:$0xff]  ;;  %v2801_v58 = vld [vmem:[%s10032_s3 + $0x778] sm:$0xff]  ;;  %2964 = vmatpush.msra.mxu0 %v2761_v31 }
 0x287   : > { %v7081_v5 = vadd.f32 %v2443_v62, %v2367_v51  ;;  %v2654_v62 = vld [vmem:[#allocation2 + $0xc1] sm:$0xff]  ;;  %v2785_v51 = vld [vmem:[%s10032_s3 + $0x6f8] sm:$0xff]  ;;  %3110 = vmatpush.msra.mxu2 %v2801_v58 }
 0x288   : > { %v2293_v12 = vadd.f32 %v2292_v47, %v2216_v45  ;;  %2510 = vmatmul.f32.gmra.mxu0 %v7083_v7  ;;  %2587 = vmatmul.f32.gmra.mxu1 %v6694_v53  ;;  %v3323_v47 = vld [vmem:[%s10032_s3 + $0x7f8] sm:$0xff] }
 0x289   : > { %2845 = vmatmul.f32.gmra.mxu2 %v6782_v6  ;;  %2922 = vmatmul.f32.gmra.mxu3 %v2651_v18  ;;  %v2652_v6 = vld [vmem:[#allocation2 + $0xa9] sm:$0xff] }
 0x28a   : > { %3033 = vmatpush.msra.mxu1 %v2785_v51  ;;  %3388 = vmatpush.msra.mxu3 %v3323_v47  ;;  %v2796_v51 = vld [vmem:[%s10032_s3 + $0x750] sm:$0xff]  ;;  %v10076_v47 = vld [vmem:[#allocation5_spill] sm:$0xff] }
 0x28c   : > { %v2369_v16 = vpop.f32.mrf.mxu2  ;;  %v2446_v20 = vpop.f32.mrf.mxu3 }
 0x28d   : > { %v2370_v39 = vadd.f32 %v2369_v16, %v2293_v12  ;;  %v2218_v55 = vpop.f32.mrf.mxu0  ;;  %v2295_v11 = vpop.f32.mrf.mxu1  ;;  %v2784_v16 = vld [vmem:[%s10032_s3 + $0x6f0] sm:$0xff] }
 0x28e   : > { %v2219_v59 = vadd.f32 %v2218_v55, %v6748_v56  ;;  %v10073_v55 = vld [vmem:[#allocation8_spill] sm:$0xff]  ;;  %3034 = vmatpush.msra.mxu1 %v2784_v16 }
 0x28f   : > { %v7092_v60 = vadd.f32 %v2446_v20, %v2370_v39  ;;  %v2800_v20 = vld [vmem:[%s10032_s3 + $0x770] sm:$0xff] }
 0x290   : > { %v2296_v53 = vadd.f32 %v2295_v11, %v2219_v59  ;;  %2513 = vmatmul.f32.gmra.mxu0 %v7094_v17  ;;  %2590 = vmatmul.f32.gmra.mxu1 %v6708_v38  ;;  %v3322_v39 = vld [vmem:[%s10032_s3 + $0x7f0] sm:$0xff] }
 0x291   : > { %2848 = vmatmul.f32.gmra.mxu2 %v6822_v46  ;;  %2925 = vmatmul.f32.gmra.mxu3 %v2652_v6  ;;  %v2653_v46 = vld [vmem:[#allocation2 + $0xb1] sm:$0xff]  ;;  %v2655_v6 = vld [vmem:[#allocation2 + $0xc9] sm:$0xff] }
 0x292   : > { %3111 = vmatpush.msra.mxu2 %v2800_v20  ;;  %3389 = vmatpush.msra.mxu3 %v3322_v39  ;;  %v3316_v39 = vld [vmem:[%s10032_s3 + $0x7c0] sm:$0xff] }
 0x294   : > { %v2372_v10 = vpop.f32.mrf.mxu2  ;;  %v2449_v56 = vpop.f32.mrf.mxu3 }
 0x295   : > { %v2373_v63 = vadd.f32 %v2372_v10, %v2296_v53  ;;  %v2221_v0 = vpop.f32.mrf.mxu0  ;;  %v2298_v42 = vpop.f32.mrf.mxu1  ;;  %v7142_v53 = vld [vmem:[#allocation2 + $0x9b] sm:$0xff] }
 0x296   : > { %v2222_v1 = vadd.f32 %v2221_v0, %v6759_v23  ;;  %v10074_v10 = vld [vmem:[#allocation4_spill] sm:$0xff]  ;;  %v3321_v0 = vld [vmem:[%s10032_s3 + $0x7e8] sm:$0xff] }
 0x297   : > { %v7103_v19 = vadd.f32 %v2449_v56, %v2373_v63  ;;  %v2783_v56 = vld [vmem:[%s10032_s3 + $0x6e8] sm:$0xff]  ;;  %3390 = vmatpush.msra.mxu3 %v3321_v0  ;;  %v2777_v0 = vld [vmem:[%s10032_s3 + $0x6b8] sm:$0xff] }
 0x298   : > { %v2299_v38 = vadd.f32 %v2298_v42, %v2222_v1  ;;  %2516 = vmatmul.f32.gmra.mxu0 %v7105_v22  ;;  %2593 = vmatmul.f32.gmra.mxu1 %v6722_v26  ;;  %v2799_v63 = vld [vmem:[%s10032_s3 + $0x768] sm:$0xff]  ;;  %v2760_v42 = vld [vmem:[%s10032_s3 + $0x630] sm:$0xff]  ;;  %v2782_v1 = vld [vmem:[%s10032_s3 + $0x6e0] sm:$0xff] }
 0x299   : > { %2851 = vmatmul.f32.gmra.mxu2 %v10070_v57  ;;  %2928 = vmatmul.f32.gmra.mxu3 %v2653_v46  ;;  %v3320_v46 = vld [vmem:[%s10032_s3 + $0x7e0] sm:$0xff]  ;;  %v2797_v57 = vld [vmem:[%s10032_s3 + $0x758] sm:$0xff] }
 0x29a   : > { %3035 = vmatpush.msra.mxu1 %v2783_v56  ;;  %3112 = vmatpush.msra.mxu2 %v2799_v63  ;;  %v7219_v63 = vld [vmem:[#allocation2 + $0xb3] sm:$0xff] }
 0x29b   : > { %2965 = vmatpush.msra.mxu0 %v2760_v42  ;;  %3391 = vmatpush.msra.mxu3 %v3320_v46  ;;  %v2793_v42 = vld [vmem:[%s10032_s3 + $0x738] sm:$0xff] }
 0x29c   : > { %v2375_v43 = vpop.f32.mrf.mxu2  ;;  %v2452_v25 = vpop.f32.mrf.mxu3  ;;  %3036 = vmatpush.msra.mxu1 %v2782_v1  ;;  %v3315_v46 = vld [vmem:[%s10032_s3 + $0x7b8] sm:$0xff] }
 0x29d   : > { %v2376_v37 = vadd.f32 %v2375_v43, %v2299_v38  ;;  %v2224_v34 = vpop.f32.mrf.mxu0  ;;  %v2301_v40 = vpop.f32.mrf.mxu1  ;;  %v2798_v38 = vld [vmem:[%s10032_s3 + $0x760] sm:$0xff] }
 0x29e   : > { %v2225_v23 = vadd.f32 %v2224_v34, %v10071_v52  ;;  %3113 = vmatpush.msra.mxu2 %v2798_v38  ;;  %v10078_v38 = vld [vmem:[#allocation7_spill] sm:$0xff] }
 0x29f   : > { %v7111_v44 = vadd.f32 %v2452_v25, %v2376_v37  ;;  %v3319_v37 = vld [vmem:[%s10032_s3 + $0x7d8] sm:$0xff] }
 0x2a0   : > { %v2302_v26 = vadd.f32 %v2301_v40, %v2225_v23  ;;  %2519 = vmatmul.f32.gmra.mxu0 %v7113_v27  ;;  %2596 = vmatmul.f32.gmra.mxu1 %v10072_v13  ;;  %v10075_v23 = vld [vmem:[#allocation11_spill] sm:$0xff] }
 0x2a1   : > { %2854 = vmatmul.f32.gmra.mxu2 %v6902_v32  ;;  %2931 = vmatmul.f32.gmra.mxu3 %v2654_v62  ;;  %v7180_v13 = vld [vmem:[#allocation2 + $0xab] sm:$0xff] }
 0x2a2   : > { %3114 = vmatpush.msra.mxu2 %v2797_v57  ;;  %3392 = vmatpush.msra.mxu3 %v3319_v37  ;;  %v2780_v62 = vld [vmem:[%s10032_s3 + $0x6d0] sm:$0xff]  ;;  %v2791_v37 = vld [vmem:[%s10032_s3 + $0x728] sm:$0xff] }
 0x2a3   : > { %v2792_v57 = vld [vmem:[%s10032_s3 + $0x730] sm:$0xff] }
 0x2a4   : > { %v2378_v45 = vpop.f32.mrf.mxu2  ;;  %v2455_v12 = vpop.f32.mrf.mxu3  ;;  %3115 = vmatpush.msra.mxu2 %v2796_v51  ;;  %v2756_v51 = vld [vmem:[%s10032_s3 + $0x610] sm:$0xff] }
 0x2a5   : > { %v2379_v32 = vadd.f32 %v2378_v45, %v2302_v26  ;;  %v2227_v18 = vpop.f32.mrf.mxu0  ;;  %v2304_v8 = vpop.f32.mrf.mxu1  ;;  %v3318_v45 = vld [vmem:[%s10032_s3 + $0x7d0] sm:$0xff] }
 0x2a6   : > { %v2228_v11 = vadd.f32 %v2227_v18, %v10073_v55  ;;  %v3317_v18 = vld [vmem:[%s10032_s3 + $0x7c8] sm:$0xff]  ;;  %3393 = vmatpush.msra.mxu3 %v3318_v45 }
 0x2a7   : > { %v7140_v59 = vadd.f32 %v2455_v12, %v2379_v32  ;;  %v2779_v12 = vld [vmem:[%s10032_s3 + $0x6c8] sm:$0xff] }
 0x2a8   : > { %v2305_v33 = vadd.f32 %v2304_v8, %v2228_v11  ;;  %2522 = vmatmul.f32.gmra.mxu0 %v7142_v53  ;;  %2599 = vmatmul.f32.gmra.mxu1 %v10074_v10  ;;  %v2795_v32 = vld [vmem:[%s10032_s3 + $0x748] sm:$0xff]  ;;  %v2794_v8 = vld [vmem:[%s10032_s3 + $0x740] sm:$0xff] }
 0x2a9   : > { %2857 = vmatmul.f32.gmra.mxu2 %v6944_v21  ;;  %2934 = vmatmul.f32.gmra.mxu3 %v2655_v6  ;;  %v2781_v21 = vld [vmem:[%s10032_s3 + $0x6d8] sm:$0xff]  ;;  %v7262_v45 = vld [vmem:[#allocation2 + $0xc3] sm:$0xff] }
 0x2aa   : > { %3037 = vmatpush.msra.mxu1 %v2781_v21  ;;  %3116 = vmatpush.msra.mxu2 %v2795_v32  ;;  %v2776_v21 = vld [vmem:[%s10032_s3 + $0x6b0] sm:$0xff] }
 0x2ab   : > { %3394 = vmatpush.msra.mxu3 %v3317_v18  ;;  %v7266_v32 = vld [vmem:[#allocation2 + $0xf0] sm:$0xff]  ;;  %v2774_v18 = vld [vmem:[%s10032_s3 + $0x6a0] sm:$0xff] }
 0x2ac   : > { %v2381_v43 = vpop.f32.mrf.mxu2  ;;  %v2458_v25 = vpop.f32.mrf.mxu3  ;;  %3038 = vmatpush.msra.mxu1 %v2780_v62  ;;  %3117 = vmatpush.msra.mxu2 %v2794_v8  ;;  %v10080_v8 = vld [vmem:[#allocation9_spill] sm:$0xff] }
 0x2ad   : > { %v2382_v34 = vadd.f32 %v2381_v43, %v2305_v33  ;;  %v2230_v40 = vpop.f32.mrf.mxu0  ;;  %v2307_v52 = vpop.f32.mrf.mxu1  ;;  %v10077_v33 = vld [vmem:[#allocation13_spill] sm:$0xff]  ;;  %3395 = vmatpush.msra.mxu3 %v3316_v39  ;;  %v2755_v39 = vld [vmem:[%s10032_s3 + $0x608] sm:$0xff] }
 0x2ae   : > { %v2231_v31 = vadd.f32 %v2230_v40, %v10075_v23  ;;  %3039 = vmatpush.msra.mxu1 %v2779_v12  ;;  %v2758_v43 = vld [vmem:[%s10032_s3 + $0x620] sm:$0xff]  ;;  %3118 = vmatpush.msra.mxu2 %v2793_v42 }
 0x2af   : > { %v7178_v26 = vadd.f32 %v2458_v25, %v2382_v34  ;;  %3396 = vmatpush.msra.mxu3 %v3315_v46  ;;  %v2775_v25 = vld [vmem:[%s10032_s3 + $0x6a8] sm:$0xff] }
 0x2b0   : > { %v2308_v58 = vadd.f32 %v2307_v52, %v2231_v31  ;;  %2525 = vmatmul.f32.gmra.mxu0 %v7180_v13  ;;  %2602 = vmatmul.f32.gmra.mxu1 %v10076_v47  ;;  %v3313_v52 = vld [vmem:[%s10032_s3 + $0x7a8] sm:$0xff] }
 0x2b1   : > { %2860 = vmatmul.f32.gmra.mxu2 %v6980_v30  ;;  %2937 = vmatmul.f32.gmra.mxu3 %v6983_v54  ;;  %v2759_v30 = vld [vmem:[%s10032_s3 + $0x628] sm:$0xff]  ;;  %v2778_v54 = vld [vmem:[%s10032_s3 + $0x6c0] sm:$0xff] }
 0x2b2   : > { %2966 = vmatpush.msra.mxu0 %v2759_v30  ;;  %3040 = vmatpush.msra.mxu1 %v2778_v54  ;;  %v2790_v30 = vld [vmem:[%s10032_s3 + $0x720] sm:$0xff] }
 0x2b3   : > { %3119 = vmatpush.msra.mxu2 %v2792_v57 }
 0x2b4   : > { %v2384_v16 = vpop.f32.mrf.mxu2  ;;  %v2461_v20 = vpop.f32.mrf.mxu3  ;;  %3041 = vmatpush.msra.mxu1 %v2777_v0  ;;  %2967 = vmatpush.msra.mxu0 %v2758_v43  ;;  %v2788_v0 = vld [vmem:[%s10032_s3 + $0x710] sm:$0xff] }
 0x2b5   : > { %v2385_v55 = vadd.f32 %v2384_v16, %v2308_v58  ;;  %v2233_v11 = vpop.f32.mrf.mxu0  ;;  %v2310_v6 = vpop.f32.mrf.mxu1  ;;  %v10079_v58 = vld [vmem:[#allocation14_spill] sm:$0xff]  ;;  %3120 = vmatpush.msra.mxu2 %v2791_v37  ;;  %v2658_v16 = vld [vmem:[#allocation2 + $0xf1] sm:$0xff] }
 0x2b6   : > { %v2234_v10 = vadd.f32 %v2233_v11, %v10077_v33  ;;  %3042 = vmatpush.msra.mxu1 %v2776_v21  ;;  %v2789_v11 = vld [vmem:[%s10032_s3 + $0x718] sm:$0xff]  ;;  %v2754_v33 = vld [vmem:[%s10032_s3 + $0x600] sm:$0xff]  ;;  %v10081_v43 = vld [vmem:[#allocation15_spill] sm:$0xff] }
 0x2b7   : > { %v7217_v56 = vadd.f32 %v2461_v20, %v2385_v55  ;;  %v3312_v20 = vld [vmem:[%s10032_s3 + $0x7a0] sm:$0xff]  ;;  %v2773_v55 = vld [vmem:[%s10032_s3 + $0x698] sm:$0xff]  ;;  %3121 = vmatpush.msra.mxu2 %v2790_v30  ;;  %v2787_v37 = vld [vmem:[%s10032_s3 + $0x708] sm:$0xff] }
 0x2b8   : > { %v2311_v1 = vadd.f32 %v2310_v6, %v2234_v10  ;;  %2528 = vmatmul.f32.gmra.mxu0 %v7219_v63  ;;  %2605 = vmatmul.f32.gmra.mxu1 %v10078_v38  ;;  %v3311_v6 = vld [vmem:[%s10032_s3 + $0x798] sm:$0xff]  ;;  %v2772_v10 = vld [vmem:[%s10032_s3 + $0x690] sm:$0xff] }
 0x2b9   : > { %2863 = vmatmul.f32.gmra.mxu2 %v6989_v61  ;;  %2940 = vmatmul.f32.gmra.mxu3 %v6992_v9  ;;  %v3314_v61 = vld [vmem:[%s10032_s3 + $0x7b0] sm:$0xff]  ;;  %v2757_v9 = vld [vmem:[%s10032_s3 + $0x618] sm:$0xff] }
 0x2ba   : > { %3397 = vmatpush.msra.mxu3 %v3314_v61  ;;  %2968 = vmatpush.msra.mxu0 %v2757_v9  ;;  %v3310_v38 = vld [vmem:[%s10032_s3 + $0x790] sm:$0xff] }
 0x2bb   : > { %3043 = vmatpush.msra.mxu1 %v2775_v25  ;;  %3122 = vmatpush.msra.mxu2 %v2789_v11  ;;  %v7309_v9 = vld [vmem:[#allocation2 + $0xcb] sm:$0xff]  ;;  %v7341_v11 = vld [vmem:[#allocation2 + $0xdc] sm:$0xff] }
 0x2bc   : > { %v2387_v34 = vpop.f32.mrf.mxu2  ;;  %v2464_v40 = vpop.f32.mrf.mxu3  ;;  %3398 = vmatpush.msra.mxu3 %v3313_v52  ;;  %2969 = vmatpush.msra.mxu0 %v2756_v51  ;;  %v2771_v25 = vld [vmem:[%s10032_s3 + $0x688] sm:$0xff]  ;;  %v7321_v52 = vld [vmem:[#allocation2 + $0xf8] sm:$0xff]  ;;  %v2786_v51 = vld [vmem:[%s10032_s3 + $0x700] sm:$0xff] }
 0x2bd   : > { %v2388_v23 = vadd.f32 %v2387_v34, %v2311_v1  ;;  %v2484_v31 = vpop.f32.mrf.mxu0  ;;  %v2561_v62 = vpop.f32.mrf.mxu1  ;;  %3044 = vmatpush.msra.mxu1 %v2774_v18  ;;  %3123 = vmatpush.msra.mxu2 %v2788_v0 }
 0x2be   : > { %v2485_v47 = vadd.f32 %v2484_v31, %v10079_v58  ;;  %3399 = vmatpush.msra.mxu3 %v3312_v20  ;;  %2970 = vmatpush.msra.mxu0 %v2755_v39  ;;  %v3309_v31 = vld [vmem:[%s10032_s3 + $0x788] sm:$0xff]  ;;  %v3308_v58 = vld [vmem:[%s10032_s3 + $0x780] sm:$0xff]  ;;  %v10083_v20 = vld [vmem:[#allocation16_spill] sm:$0xff] }
 0x2bf   : > { %v7264_v12 = vadd.f32 %v2464_v40, %v2388_v23  ;;  %3045 = vmatpush.msra.mxu1 %v2773_v55  ;;  %v10082_v40 = vld [vmem:[#allocation12_spill] sm:$0xff]  ;;  %3124 = vmatpush.msra.mxu2 %v2787_v37  ;;  %v7361_v37 = vld [vmem:[#allocation2 + $0x110] sm:$0xff] }
 0x2c0   : > { %v7274_v54 = vadd.f32 %v2561_v62, %v2485_v47  ;;  %2531 = vmatmul.f32.gmra.mxu0 %v7262_v45  ;;  %2608 = vmatmul.f32.gmra.mxu1 %v10080_v8  ;;  %v2659_v23 = vld [vmem:[#allocation2 + $0xf9] sm:$0xff] }
 0x2c1   : > { %2866 = vmatmul.f32.gmra.mxu2 %v7266_v32  ;;  %2943 = vmatmul.f32.gmra.mxu3 %v2658_v16  ;;  %v2770_v62 = vld [vmem:[%s10032_s3 + $0x680] sm:$0xff] }
 0x2c2   : > { %3400 = vmatpush.msra.mxu3 %v3311_v6  ;;  %2971 = vmatpush.msra.mxu0 %v2754_v33  ;;  %v7339_v55 = vld [vmem:[#allocation2 + $0xdb] sm:$0xff]  ;;  %v7347_v33 = vld [vmem:[#allocation2 + $0x108] sm:$0xff] }
 0x2c3   : > { %3046 = vmatpush.msra.mxu1 %v2772_v10  ;;  %3125 = vmatpush.msra.mxu2 %v2786_v51  ;;  %v2660_v10 = vld [vmem:[#allocation2 + $0x109] sm:$0xff] }
 0x2c4   : > { %v2819_v42 = vpop.f32.mrf.mxu2  ;;  %v2896_v1 = vpop.f32.mrf.mxu3  ;;  %3401 = vmatpush.msra.mxu3 %v3310_v38 }
 0x2c5   : > { %v7306_v46 = vadd.f32 %v2896_v1, %v2819_v42  ;;  %v2487_v21 = vpop.f32.mrf.mxu0  ;;  %v2564_v57 = vpop.f32.mrf.mxu1  ;;  %3047 = vmatpush.msra.mxu1 %v2771_v25 }
 0x2c6   : > { %v2488_v61 = vadd.f32 %v2487_v21, %v10081_v43  ;;  %3402 = vmatpush.msra.mxu3 %v3309_v31  ;;  %v7353_v43 = vld [vmem:[#allocation2 + $0xe3] sm:$0xff] }
 0x2c7   : > { %3048 = vmatpush.msra.mxu1 %v2770_v62 }
 0x2c8   : > { %v7317_v34 = vadd.f32 %v2564_v57, %v2488_v61  ;;  %2534 = vmatmul.f32.gmra.mxu0 %v7309_v9  ;;  %2611 = vmatmul.f32.gmra.mxu1 %v10082_v40  ;;  %v7355_v61 = vld [vmem:[#allocation2 + $0xe4] sm:$0xff]  ;;  %v2661_v40 = vld [vmem:[#allocation2 + $0x111] sm:$0xff] }
 0x2c9   : > { %2869 = vmatmul.f32.gmra.mxu2 %v7321_v52  ;;  %2946 = vmatmul.f32.gmra.mxu3 %v2659_v23 }
 0x2ca   : > { %3403 = vmatpush.msra.mxu3 %v3308_v58 }
 0x2cc   : > { %v2822_v47 = vpop.f32.mrf.mxu2  ;;  %v2899_v18 = vpop.f32.mrf.mxu3 }
 0x2cd   : > { %v7336_v30 = vadd.f32 %v2899_v18, %v2822_v47  ;;  %v2490_v8 = vpop.f32.mrf.mxu0  ;;  %v2567_v16 = vpop.f32.mrf.mxu1  ;;  %v2662_v47 = vld [vmem:[#allocation2 + $0x32] sm:$0xff] }
 0x2ce   : > { %v2491_v39 = vadd.f32 %v2490_v8, %v10083_v20  ;;  %v2702_v8 = vld [vmem:[#allocation2 + $0x34] sm:$0xff] }
 0x2d0   : > { %v7343_v6 = vadd.f32 %v2567_v16, %v2491_v39  ;;  %2537 = vmatmul.f32.gmra.mxu0 %v7339_v55  ;;  %2614 = vmatmul.f32.gmra.mxu1 %v7341_v11  ;;  %v3208_v16 = vld [vmem:[#allocation2 + $0x48] sm:$0xff] }
 0x2d1   : > { %2872 = vmatmul.f32.gmra.mxu2 %v7347_v33  ;;  %2949 = vmatmul.f32.gmra.mxu3 %v2660_v10 }
 0x2d4   : > { %v2825_v0 = vpop.f32.mrf.mxu2  ;;  %v2902_v42 = vpop.f32.mrf.mxu3 }
 0x2d5   : > { %v7350_v1 = vadd.f32 %v2902_v42, %v2825_v0  ;;  %v2493_v38 = vpop.f32.mrf.mxu0  ;;  %v2570_v21 = vpop.f32.mrf.mxu1 }
 0x2d6   : > { %v2494_v57 = vadd.f32 %v2493_v38, %v6996_v49 }
 0x2d8   : > { %v7357_v25 = vadd.f32 %v2570_v21, %v2494_v57  ;;  %2540 = vmatmul.f32.gmra.mxu0 %v7353_v43  ;;  %2617 = vmatmul.f32.gmra.mxu1 %v7355_v61  ;;  %v2663_v21 = vld [vmem:[#allocation2 + $0x3a] sm:$0xff] }
 0x2d9   : > { %2875 = vmatmul.f32.gmra.mxu2 %v7361_v37  ;;  %2952 = vmatmul.f32.gmra.mxu3 %v2661_v40  ;;  %v2703_v57 = vld [vmem:[#allocation2 + $0x3c] sm:$0xff] }
 0x2dc   : > { %v2828_v23 = vpop.f32.mrf.mxu2  ;;  %v2905_v31 = vpop.f32.mrf.mxu3 }
 0x2dd   : > { %v7364_v62 = vadd.f32 %v2905_v31, %v2828_v23  ;;  %v2496_v49 = vpop.f32.mrf.mxu0  ;;  %v2573_v51 = vpop.f32.mrf.mxu1 }
 0x2de   : > { %v2497_v58 = vadd.f32 %v2496_v49, %v7001_v28 }
 0x2e0   : > { %v7367_v18 = vadd.f32 %v2573_v51, %v2497_v58  ;;  %2972 = vmatmul.f32.vlgmr.msra.gmra.mxu0 %v2662_v47  ;;  %3049 = vmatmul.f32.vlgmr.msra.gmra.mxu1 %v7026_v3  ;;  %v3209_v3 = vld [vmem:[#allocation2 + $0x50] sm:$0xff] }
 0x2e1   : > { %3126 = vmatmul.f32.vlgmr.msra.gmra.mxu2 %v2702_v8  ;;  %3404 = vmatmul.f32.vlgmr.msra.gmra.mxu3 %v3208_v16  ;;  %v7382_v47 = vld [vmem:[#allocation2 + $0x4a] sm:$0xff]  ;;  %v3210_v16 = vld [vmem:[#allocation2 + $0x60] sm:$0xff] }
 0x2e2   : > { %v7388_v8 = vld [vmem:[#allocation2 + $0x4c] sm:$0xff] }
 0x2e4   : > { %v2831_v20 = vpop.f32.mrf.mxu2  ;;  %v2908_v39 = vpop.f32.mrf.mxu3 }
 0x2e5   : > { %v7370_v10 = vadd.f32 %v2908_v39, %v2831_v20  ;;  %v2499_v0 = vpop.f32.mrf.mxu0  ;;  %v2576_v42 = vpop.f32.mrf.mxu1 }
 0x2e6   : > { %v2500_v38 = vadd.f32 %v2499_v0, %v7006_v29  ;;  %v3339_v29 = vld [vmem:[%s10032_s3 + $0x878] sm:$0xff] }
 0x2e7   : > { %3465 = vmatpush.msrb.mxu0 %v3339_v29 }
 0x2e8   : > { %v7373_v28 = vadd.f32 %v2576_v42, %v2500_v38  ;;  %2975 = vmatmul.f32.gmra.mxu0 %v2663_v21  ;;  %3052 = vmatmul.f32.gmra.mxu1 %v7038_v36  ;;  %v7394_v21 = vld [vmem:[#allocation2 + $0x52] sm:$0xff] }
 0x2e9   : > { %3129 = vmatmul.f32.gmra.mxu2 %v2703_v57  ;;  %3407 = vmatmul.f32.gmra.mxu3 %v3209_v3  ;;  %v3211_v3 = vld [vmem:[#allocation2 + $0x68] sm:$0xff] }
 0x2ec   : > { %v2834_v40 = vpop.f32.mrf.mxu2  ;;  %v2911_v23 = vpop.f32.mrf.mxu3 }
 0x2ed   : > { %v7376_v31 = vadd.f32 %v2911_v23, %v2834_v40  ;;  %v2502_v49 = vpop.f32.mrf.mxu0  ;;  %v2579_v51 = vpop.f32.mrf.mxu1  ;;  %v3338_v40 = vld [vmem:[%s10032_s3 + $0x870] sm:$0xff] }
 0x2ee   : > { %v2503_v58 = vadd.f32 %v2502_v49, %v7015_v4  ;;  %3466 = vmatpush.msrb.mxu0 %v3338_v40 }
 0x2f0   : > { %v7384_v36 = vadd.f32 %v2579_v51, %v2503_v58  ;;  %2978 = vmatmul.f32.gmra.mxu0 %v7382_v47  ;;  %3055 = vmatmul.f32.gmra.mxu1 %v7050_v35  ;;  %v7400_v35 = vld [vmem:[#allocation2 + $0x54] sm:$0xff] }
 0x2f1   : > { %3132 = vmatmul.f32.gmra.mxu2 %v7388_v8  ;;  %3410 = vmatmul.f32.gmra.mxu3 %v3210_v16 }
 0x2f4   : > { %v2837_v20 = vpop.f32.mrf.mxu2  ;;  %v2914_v39 = vpop.f32.mrf.mxu3 }
 0x2f5   : > { %v7391_v0 = vadd.f32 %v2914_v39, %v2837_v20  ;;  %v2505_v4 = vpop.f32.mrf.mxu0  ;;  %v2582_v42 = vpop.f32.mrf.mxu1  ;;  %v7415_v20 = vld [vmem:[#allocation2 + $0x64] sm:$0xff]  ;;  %v3212_v39 = vld [vmem:[#allocation2 + $0x78] sm:$0xff] }
 0x2f6   : > { %v2506_v38 = vadd.f32 %v2505_v4, %v7024_v50  ;;  %v3337_v4 = vld [vmem:[%s10032_s3 + $0x868] sm:$0xff] }
 0x2f7   : > { %3467 = vmatpush.msrb.mxu0 %v3337_v4 }
 0x2f8   : > { %v7396_v57 = vadd.f32 %v2582_v42, %v2506_v38  ;;  %2981 = vmatmul.f32.gmra.mxu0 %v7394_v21  ;;  %3058 = vmatmul.f32.gmra.mxu1 %v7059_v15  ;;  %v7409_v15 = vld [vmem:[#allocation2 + $0x62] sm:$0xff] }
 0x2f9   : > { %3135 = vmatmul.f32.gmra.mxu2 %v7400_v35  ;;  %3413 = vmatmul.f32.gmra.mxu3 %v3211_v3 }
 0x2fc   : > { %v2840_v50 = vpop.f32.mrf.mxu2  ;;  %v2917_v23 = vpop.f32.mrf.mxu3 }
 0x2fd   : > { %v7406_v49 = vadd.f32 %v2917_v23, %v2840_v50  ;;  %v2508_v51 = vpop.f32.mrf.mxu0  ;;  %v2585_v29 = vpop.f32.mrf.mxu1 }
 0x2fe   : > { %v2509_v58 = vadd.f32 %v2508_v51, %v7036_v41  ;;  %v7430_v51 = vld [vmem:[#allocation2 + $0x6c] sm:$0xff] }
 0x300   : > { %v7411_v16 = vadd.f32 %v2585_v29, %v2509_v58  ;;  %2984 = vmatmul.f32.gmra.mxu0 %v7409_v15  ;;  %3061 = vmatmul.f32.gmra.mxu1 %v7071_v24  ;;  %v7424_v24 = vld [vmem:[#allocation2 + $0x6a] sm:$0xff]  ;;  %v3213_v29 = vld [vmem:[#allocation2 + $0x80] sm:$0xff] }
 0x301   : > { %3138 = vmatmul.f32.gmra.mxu2 %v7415_v20  ;;  %3416 = vmatmul.f32.gmra.mxu3 %v3212_v39  ;;  %v3336_v58 = vld [vmem:[%s10032_s3 + $0x860] sm:$0xff] }
 0x302   : > { %3468 = vmatpush.msrb.mxu0 %v3336_v58 }
 0x304   : > { %v2843_v41 = vpop.f32.mrf.mxu2  ;;  %v2920_v42 = vpop.f32.mrf.mxu3 }
 0x305   : > { %v7421_v38 = vadd.f32 %v2920_v42, %v2843_v41  ;;  %v2511_v3 = vpop.f32.mrf.mxu0  ;;  %v2588_v40 = vpop.f32.mrf.mxu1 }
 0x306   : > { %v2512_v50 = vadd.f32 %v2511_v3, %v7048_v48 }
 0x308   : > { %v7426_v23 = vadd.f32 %v2588_v40, %v2512_v50  ;;  %2987 = vmatmul.f32.gmra.mxu0 %v7424_v24  ;;  %3064 = vmatmul.f32.gmra.mxu1 %v7083_v7  ;;  %v7439_v7 = vld [vmem:[#allocation2 + $0x7a] sm:$0xff] }
 0x309   : > { %3141 = vmatmul.f32.gmra.mxu2 %v7430_v51  ;;  %3419 = vmatmul.f32.gmra.mxu3 %v3213_v29  ;;  %v7445_v50 = vld [vmem:[#allocation2 + $0x7c] sm:$0xff]  ;;  %v3214_v29 = vld [vmem:[#allocation2 + $0x90] sm:$0xff] }
 0x30a   : > { %10084 = vst [vmem:[#allocation10_spill] sm:$0xff] %v7426_v23 }
 0x30c   : > { %v2846_v48 = vpop.f32.mrf.mxu2  ;;  %v2923_v39 = vpop.f32.mrf.mxu3 }
 0x30d   : > { %v7436_v4 = vadd.f32 %v2923_v39, %v2846_v48  ;;  %v2514_v41 = vpop.f32.mrf.mxu0  ;;  %v2591_v42 = vpop.f32.mrf.mxu1 }
 0x30e   : > { %v2515_v3 = vadd.f32 %v2514_v41, %v7057_v14  ;;  %v3335_v41 = vld [vmem:[%s10032_s3 + $0x858] sm:$0xff] }
 0x30f   : > { %3469 = vmatpush.msrb.mxu0 %v3335_v41 }
 0x310   : > { %v7441_v40 = vadd.f32 %v2591_v42, %v2515_v3  ;;  %2990 = vmatmul.f32.gmra.mxu0 %v7439_v7  ;;  %3067 = vmatmul.f32.gmra.mxu1 %v7094_v17  ;;  %v7454_v17 = vld [vmem:[#allocation2 + $0x82] sm:$0xff] }
 0x311   : > { %3144 = vmatmul.f32.gmra.mxu2 %v7445_v50  ;;  %3422 = vmatmul.f32.gmra.mxu3 %v3214_v29  ;;  %v7460_v29 = vld [vmem:[#allocation2 + $0x84] sm:$0xff] }
 0x312   : > { %10085 = vst [vmem:[#allocation6_spill] sm:$0xff] %v7441_v40 }
 0x314   : > { %v2849_v58 = vpop.f32.mrf.mxu2  ;;  %v2926_v48 = vpop.f32.mrf.mxu3 }
 0x315   : > { %v7448_v39 = vadd.f32 %v2926_v48, %v2849_v58  ;;  %v2517_v23 = vpop.f32.mrf.mxu0  ;;  %v2594_v14 = vpop.f32.mrf.mxu1  ;;  %v3215_v58 = vld [vmem:[#allocation2 + $0x98] sm:$0xff] }
 0x316   : > { %v2518_v42 = vadd.f32 %v2517_v23, %v7069_v2 }
 0x317   : > { %10086 = vst [vmem:[#allocation3_spill] sm:$0xff] %v7448_v39 }
 0x318   : > { %v7456_v3 = vadd.f32 %v2594_v14, %v2518_v42  ;;  %2993 = vmatmul.f32.gmra.mxu0 %v7454_v17  ;;  %3070 = vmatmul.f32.gmra.mxu1 %v7105_v22  ;;  %v7466_v14 = vld [vmem:[#allocation2 + $0x92] sm:$0xff] }
 0x319   : > { %3147 = vmatmul.f32.gmra.mxu2 %v7460_v29  ;;  %3425 = vmatmul.f32.gmra.mxu3 %v3215_v58  ;;  %v7472_v22 = vld [vmem:[#allocation2 + $0x94] sm:$0xff] }
 0x31a   : > { %10087 = vst [vmem:[#allocation8_spill] sm:$0xff] %v7456_v3  ;;  %v3216_v3 = vld [vmem:[#allocation2 + $0xa8] sm:$0xff] }
 0x31c   : > { %v2852_v48 = vpop.f32.mrf.mxu2  ;;  %v2929_v40 = vpop.f32.mrf.mxu3 }
 0x31d   : > { %v7463_v39 = vadd.f32 %v2929_v40, %v2852_v48  ;;  %v2520_v2 = vpop.f32.mrf.mxu0  ;;  %v2597_v23 = vpop.f32.mrf.mxu1  ;;  %v3334_v40 = vld [vmem:[%s10032_s3 + $0x850] sm:$0xff] }
 0x31e   : > { %v2521_v41 = vadd.f32 %v2520_v2, %v7081_v5  ;;  %3470 = vmatpush.msrb.mxu0 %v3334_v40  ;;  %v3333_v40 = vld [vmem:[%s10032_s3 + $0x848] sm:$0xff] }
 0x31f   : > { %10088 = vst [vmem:[#allocation4_spill] sm:$0xff] %v7463_v39  ;;  %v7487_v39 = vld [vmem:[#allocation2 + $0x9c] sm:$0xff] }
 0x320   : > { %v7468_v42 = vadd.f32 %v2597_v23, %v2521_v41  ;;  %2996 = vmatmul.f32.gmra.mxu0 %v7466_v14  ;;  %3073 = vmatmul.f32.gmra.mxu1 %v7113_v27  ;;  %v7481_v27 = vld [vmem:[#allocation2 + $0x9a] sm:$0xff] }
 0x321   : > { %3150 = vmatmul.f32.gmra.mxu2 %v7472_v22  ;;  %3428 = vmatmul.f32.gmra.mxu3 %v3216_v3  ;;  %v3217_v3 = vld [vmem:[#allocation2 + $0xb0] sm:$0xff] }
 0x322   : > { %10089 = vst [vmem:[#allocation11_spill] sm:$0xff] %v7468_v42  ;;  %3471 = vmatpush.msrb.mxu0 %v3333_v40  ;;  %v3332_v40 = vld [vmem:[%s10032_s3 + $0x840] sm:$0xff] }
 0x324   : > { %v2855_v5 = vpop.f32.mrf.mxu2  ;;  %v2932_v58 = vpop.f32.mrf.mxu3  ;;  %3472 = vmatpush.msrb.mxu0 %v3332_v40 }
 0x325   : > { %v7478_v48 = vadd.f32 %v2932_v58, %v2855_v5  ;;  %v2523_v2 = vpop.f32.mrf.mxu0  ;;  %v2600_v23 = vpop.f32.mrf.mxu1 }
 0x326   : > { %v2524_v41 = vadd.f32 %v2523_v2, %v7092_v60 }
 0x327   : > { %10090 = vst [vmem:[#allocation5_spill] sm:$0xff] %v7478_v48  ;;  %v3218_v48 = vld [vmem:[#allocation2 + $0xc0] sm:$0xff] }
 0x328   : > { %v7483_v42 = vadd.f32 %v2600_v23, %v2524_v41  ;;  %2999 = vmatmul.f32.gmra.mxu0 %v7481_v27  ;;  %3076 = vmatmul.f32.gmra.mxu1 %v7142_v53  ;;  %v7496_v53 = vld [vmem:[#allocation2 + $0xaa] sm:$0xff] }
 0x329   : > { %3153 = vmatmul.f32.gmra.mxu2 %v7487_v39  ;;  %3431 = vmatmul.f32.gmra.mxu3 %v3217_v3  ;;  %v7502_v3 = vld [vmem:[#allocation2 + $0xac] sm:$0xff] }
 0x32a   : > { %10091 = vst [vmem:[#allocation13_spill] sm:$0xff] %v7483_v42 }
 0x32c   : > { %v2858_v60 = vpop.f32.mrf.mxu2  ;;  %v2935_v5 = vpop.f32.mrf.mxu3 }
 0x32d   : > { %v7493_v58 = vadd.f32 %v2935_v5, %v2858_v60  ;;  %v2526_v2 = vpop.f32.mrf.mxu0  ;;  %v2603_v23 = vpop.f32.mrf.mxu1 }
 0x32e   : > { %v2527_v41 = vadd.f32 %v2526_v2, %v7103_v19 }
 0x32f   : > { %10092 = vst [vmem:[#allocation7_spill] sm:$0xff] %v7493_v58  ;;  %v3219_v58 = vld [vmem:[#allocation2 + $0xc8] sm:$0xff] }
 0x330   : > { %v7498_v42 = vadd.f32 %v2603_v23, %v2527_v41  ;;  %3002 = vmatmul.f32.gmra.mxu0 %v7496_v53  ;;  %3079 = vmatmul.f32.gmra.mxu1 %v7180_v13  ;;  %v7511_v13 = vld [vmem:[#allocation2 + $0xb2] sm:$0xff] }
 0x331   : > { %3156 = vmatmul.f32.gmra.mxu2 %v7502_v3  ;;  %3434 = vmatmul.f32.gmra.mxu3 %v3218_v48  ;;  %v7517_v48 = vld [vmem:[#allocation2 + $0xb4] sm:$0xff] }
 0x332   : > { %10093 = vst [vmem:[#allocation14_spill] sm:$0xff] %v7498_v42 }
 0x334   : > { %v2861_v19 = vpop.f32.mrf.mxu2  ;;  %v2938_v60 = vpop.f32.mrf.mxu3 }
 0x335   : > { %v7508_v5 = vadd.f32 %v2938_v60, %v2861_v19  ;;  %v2529_v2 = vpop.f32.mrf.mxu0  ;;  %v2606_v23 = vpop.f32.mrf.mxu1 }
 0x336   : > { %v2530_v41 = vadd.f32 %v2529_v2, %v7111_v44  ;;  %v3331_v2 = vld [vmem:[%s10032_s3 + $0x838] sm:$0xff] }
 0x337   : > { %10094 = vst [vmem:[#allocation9_spill] sm:$0xff] %v7508_v5  ;;  %3473 = vmatpush.msrb.mxu0 %v3331_v2 }
 0x338   : > { %v7513_v42 = vadd.f32 %v2606_v23, %v2530_v41  ;;  %3005 = vmatmul.f32.gmra.mxu0 %v7511_v13  ;;  %3082 = vmatmul.f32.gmra.mxu1 %v7219_v63  ;;  %v7526_v63 = vld [vmem:[#allocation2 + $0xc2] sm:$0xff] }
 0x339   : > { %3159 = vmatmul.f32.gmra.mxu2 %v7517_v48  ;;  %3437 = vmatmul.f32.gmra.mxu3 %v3219_v58  ;;  %v7532_v58 = vld [vmem:[#allocation2 + $0xc4] sm:$0xff] }
 0x33a   : > { %10095 = vst [vmem:[#allocation15_spill] sm:$0xff] %v7513_v42  ;;  %v7547_v42 = vld [vmem:[#allocation2 + $0xca] sm:$0xff] }
 0x33b   : > { %10099 = vst [vmem:[#allocation18_spill] sm:$0xff] %v7547_v42 }
 0x33c   : > { %v2864_v40 = vpop.f32.mrf.mxu2  ;;  %v2941_v19 = vpop.f32.mrf.mxu3 }
 0x33d   : > { %v7520_v60 = vadd.f32 %v2941_v19, %v2864_v40  ;;  %v2532_v5 = vpop.f32.mrf.mxu0  ;;  %v2609_v44 = vpop.f32.mrf.mxu1  ;;  %v3220_v40 = vld [vmem:[#allocation2 + $0xd8] sm:$0xff] }
 0x33e   : > { %v2533_v23 = vadd.f32 %v2532_v5, %v7140_v59  ;;  %v3355_v19 = vld [vmem:[%s10032_s3 + $0x8f8] sm:$0xff] }
 0x33f   : > { %10096 = vst [vmem:[#allocation12_spill] sm:$0xff] %v7520_v60  ;;  %v3371_v59 = vld [vmem:[%s10032_s3 + $0x978] sm:$0xff]  ;;  %3542 = vmatpush.msrb.mxu1 %v3355_v19  ;;  %v3354_v60 = vld [vmem:[%s10032_s3 + $0x8f0] sm:$0xff] }
 0x340   : > { %v7528_v41 = vadd.f32 %v2609_v44, %v2533_v23  ;;  %3008 = vmatmul.f32.gmra.mxu0 %v7526_v63  ;;  %3085 = vmatmul.f32.gmra.mxu1 %v7262_v45  ;;  %v3387_v5 = vld [vmem:[%s10032_s3 + $0x9f8] sm:$0xff]  ;;  %v3370_v19 = vld [vmem:[%s10032_s3 + $0x970] sm:$0xff] }
 0x341   : > { %3162 = vmatmul.f32.gmra.mxu2 %v7532_v58  ;;  %3440 = vmatmul.f32.gmra.mxu3 %v3220_v40 }
 0x342   : > { %10097 = vst [vmem:[#allocation16_spill] sm:$0xff] %v7528_v41  ;;  %3619 = vmatpush.msrb.mxu2 %v3371_v59  ;;  %3696 = vmatpush.msrb.mxu3 %v3387_v5  ;;  %v7559_v5 = vld [vmem:[#allocation2 + $0xcc] sm:$0xff] }
 0x343   : > { %10101 = vst [vmem:[#allocation20_spill] sm:$0xff] %v7559_v5  ;;  %3543 = vmatpush.msrb.mxu1 %v3354_v60  ;;  %v3384_v60 = vld [vmem:[%s10032_s3 + $0x9e0] sm:$0xff] }
 0x344   : > { %v2867_v45 = vpop.f32.mrf.mxu2  ;;  %v2944_v44 = vpop.f32.mrf.mxu3  ;;  %3620 = vmatpush.msrb.mxu2 %v3370_v19 }
 0x345   : > { %v7544_v2 = vadd.f32 %v2944_v44, %v2867_v45  ;;  %v2535_v23 = vpop.f32.mrf.mxu0  ;;  %v2612_v40 = vpop.f32.mrf.mxu1  ;;  %v3221_v45 = vld [vmem:[#allocation2 + $0xe0] sm:$0xff]  ;;  %v3353_v44 = vld [vmem:[%s10032_s3 + $0x8e8] sm:$0xff] }
 0x346   : > { %v2536_v41 = vadd.f32 %v2535_v23, %v7178_v26  ;;  %v3386_v26 = vld [vmem:[%s10032_s3 + $0x9f0] sm:$0xff]  ;;  %v3385_v23 = vld [vmem:[%s10032_s3 + $0x9e8] sm:$0xff]  ;;  %3544 = vmatpush.msrb.mxu1 %v3353_v44  ;;  %v3351_v44 = vld [vmem:[%s10032_s3 + $0x8d8] sm:$0xff] }
 0x347   : > { %10098 = vst [vmem:[#allocation17_spill] sm:$0xff] %v7544_v2  ;;  %3697 = vmatpush.msrb.mxu3 %v3386_v26 }
 0x348   : > { %v7555_v59 = vadd.f32 %v2612_v40, %v2536_v41  ;;  %3011 = vmatmul.f32.gmra.mxu0 %v7547_v42  ;;  %3088 = vmatmul.f32.gmra.mxu1 %v7309_v9  ;;  %v3369_v41 = vld [vmem:[%s10032_s3 + $0x968] sm:$0xff]  ;;  %v3330_v9 = vld [vmem:[%s10032_s3 + $0x830] sm:$0xff]  ;;  %v3352_v40 = vld [vmem:[%s10032_s3 + $0x8e0] sm:$0xff] }
 0x349   : > { %3165 = vmatmul.f32.gmra.mxu2 %v7559_v5  ;;  %3443 = vmatmul.f32.gmra.mxu3 %v3221_v45  ;;  %v3368_v45 = vld [vmem:[%s10032_s3 + $0x960] sm:$0xff] }
 0x34a   : > { %10100 = vst [vmem:[#allocation19_spill] sm:$0xff] %v7555_v59  ;;  %3474 = vmatpush.msrb.mxu0 %v3330_v9  ;;  %3621 = vmatpush.msrb.mxu2 %v3369_v41  ;;  %v7589_v42 = vld [vmem:[#allocation2 + $0xda] sm:$0xff] }
 0x34b   : > { %3698 = vmatpush.msrb.mxu3 %v3385_v23  ;;  %3545 = vmatpush.msrb.mxu1 %v3352_v40  ;;  %v3367_v41 = vld [vmem:[%s10032_s3 + $0x958] sm:$0xff]  ;;  %v3365_v23 = vld [vmem:[%s10032_s3 + $0x948] sm:$0xff] }
 0x34c   : > { %v2870_v59 = vpop.f32.mrf.mxu2  ;;  %v2947_v2 = vpop.f32.mrf.mxu3  ;;  %3622 = vmatpush.msrb.mxu2 %v3368_v45 }
 0x34d   : > { %v7586_v19 = vadd.f32 %v2947_v2, %v2870_v59  ;;  %v2538_v26 = vpop.f32.mrf.mxu0  ;;  %v2615_v9 = vpop.f32.mrf.mxu1  ;;  %3699 = vmatpush.msrb.mxu3 %v3384_v60  ;;  %v3350_v59 = vld [vmem:[%s10032_s3 + $0x8d0] sm:$0xff]  ;;  %3546 = vmatpush.msrb.mxu1 %v3351_v44  ;;  %v3381_v60 = vld [vmem:[%s10032_s3 + $0x9c8] sm:$0xff] }
 0x34e   : > { %v2539_v5 = vadd.f32 %v2538_v26, %v7217_v56  ;;  %v3383_v56 = vld [vmem:[%s10032_s3 + $0x9d8] sm:$0xff]  ;;  %3623 = vmatpush.msrb.mxu2 %v3367_v41 }
 0x34f   : > { %3700 = vmatpush.msrb.mxu3 %v3383_v56  ;;  %3547 = vmatpush.msrb.mxu1 %v3350_v59  ;;  %v7630_v56 = vld [vmem:[#allocation2 + $0xe2] sm:$0xff] }
 0x350   : > { %v7597_v2 = vadd.f32 %v2615_v9, %v2539_v5  ;;  %3014 = vmatmul.f32.gmra.mxu0 %v7589_v42  ;;  %3091 = vmatmul.f32.gmra.mxu1 %v7339_v55  ;;  %v3366_v5 = vld [vmem:[%s10032_s3 + $0x950] sm:$0xff]  ;;  %v3348_v59 = vld [vmem:[%s10032_s3 + $0x8c0] sm:$0xff] }
 0x351   : > { %3168 = vmatmul.f32.gmra.mxu2 %v7341_v11  ;;  %3446 = vmatmul.f32.gmra.mxu3 %v7266_v32  ;;  %v3382_v55 = vld [vmem:[%s10032_s3 + $0x9d0] sm:$0xff]  ;;  %v3329_v11 = vld [vmem:[%s10032_s3 + $0x828] sm:$0xff] }
 0x352   : > { %10102 = vst [vmem:[#allocation21_spill] sm:$0xff] %v7597_v2  ;;  %v3349_v32 = vld [vmem:[%s10032_s3 + $0x8c8] sm:$0xff]  ;;  %3475 = vmatpush.msrb.mxu0 %v3329_v11  ;;  %3624 = vmatpush.msrb.mxu2 %v3366_v5  ;;  %v3364_v5 = vld [vmem:[%s10032_s3 + $0x940] sm:$0xff] }
 0x353   : > { %3701 = vmatpush.msrb.mxu3 %v3382_v55  ;;  %3548 = vmatpush.msrb.mxu1 %v3349_v32  ;;  %v3347_v55 = vld [vmem:[%s10032_s3 + $0x8b8] sm:$0xff] }
 0x354   : > { %v2873_v40 = vpop.f32.mrf.mxu2  ;;  %v2950_v45 = vpop.f32.mrf.mxu3  ;;  %3625 = vmatpush.msrb.mxu2 %v3365_v23  ;;  %v3363_v32 = vld [vmem:[%s10032_s3 + $0x938] sm:$0xff]  ;;  %v3346_v23 = vld [vmem:[%s10032_s3 + $0x8b0] sm:$0xff] }
 0x355   : > { %v7627_v26 = vadd.f32 %v2950_v45, %v2873_v40  ;;  %v2541_v9 = vpop.f32.mrf.mxu0  ;;  %v2618_v44 = vpop.f32.mrf.mxu1  ;;  %3702 = vmatpush.msrb.mxu3 %v3381_v60  ;;  %3549 = vmatpush.msrb.mxu1 %v3348_v59  ;;  %v3362_v40 = vld [vmem:[%s10032_s3 + $0x930] sm:$0xff] }
 0x356   : > { %v2542_v41 = vadd.f32 %v2541_v9, %v7264_v12  ;;  %v3380_v12 = vld [vmem:[%s10032_s3 + $0x9c0] sm:$0xff]  ;;  %3626 = vmatpush.msrb.mxu2 %v3364_v5  ;;  %v3378_v9 = vld [vmem:[%s10032_s3 + $0x9b0] sm:$0xff] }
 0x357   : > { %3703 = vmatpush.msrb.mxu3 %v3380_v12  ;;  %3550 = vmatpush.msrb.mxu1 %v3347_v55  ;;  %v7674_v12 = vld [vmem:[#allocation2 + $0xf2] sm:$0xff]  ;;  %v3345_v55 = vld [vmem:[%s10032_s3 + $0x8a8] sm:$0xff] }
 0x358   : > { %v7638_v11 = vadd.f32 %v2618_v44, %v2542_v41  ;;  %3017 = vmatmul.f32.gmra.mxu0 %v7630_v56  ;;  %3094 = vmatmul.f32.gmra.mxu1 %v7353_v43  ;;  %v3328_v43 = vld [vmem:[%s10032_s3 + $0x820] sm:$0xff] }
 0x359   : > { %3171 = vmatmul.f32.gmra.mxu2 %v7355_v61  ;;  %3449 = vmatmul.f32.gmra.mxu3 %v7321_v52  ;;  %v3379_v61 = vld [vmem:[%s10032_s3 + $0x9b8] sm:$0xff] }
 0x35a   : > { %10103 = vst [vmem:[#allocation22_spill] sm:$0xff] %v7638_v11  ;;  %v3327_v52 = vld [vmem:[%s10032_s3 + $0x818] sm:$0xff]  ;;  %3476 = vmatpush.msrb.mxu0 %v3328_v43  ;;  %3627 = vmatpush.msrb.mxu2 %v3363_v32  ;;  %v3361_v32 = vld [vmem:[%s10032_s3 + $0x928] sm:$0xff] }
 0x35b   : > { %3704 = vmatpush.msrb.mxu3 %v3379_v61  ;;  %3551 = vmatpush.msrb.mxu1 %v3346_v23  ;;  %v7676_v43 = vld [vmem:[#allocation2 + $0xf3] sm:$0xff]  ;;  %v3377_v61 = vld [vmem:[%s10032_s3 + $0x9a8] sm:$0xff]  ;;  %v3344_v23 = vld [vmem:[%s10032_s3 + $0x8a0] sm:$0xff] }
 0x35c   : > { %v2876_v45 = vpop.f32.mrf.mxu2  ;;  %v2953_v60 = vpop.f32.mrf.mxu3  ;;  %3477 = vmatpush.msrb.mxu0 %v3327_v52  ;;  %3628 = vmatpush.msrb.mxu2 %v3362_v40  ;;  %v3326_v52 = vld [vmem:[%s10032_s3 + $0x810] sm:$0xff]  ;;  %v3360_v40 = vld [vmem:[%s10032_s3 + $0x920] sm:$0xff] }
 0x35d   : > { %v7671_v44 = vadd.f32 %v2953_v60, %v2876_v45  ;;  %v2973_v41 = vpop.f32.mrf.mxu0  ;;  %v3050_v59 = vpop.f32.mrf.mxu1  ;;  %3705 = vmatpush.msrb.mxu3 %v3378_v9  ;;  %3552 = vmatpush.msrb.mxu1 %v3345_v55  ;;  %v3376_v60 = vld [vmem:[%s10032_s3 + $0x9a0] sm:$0xff]  ;;  %v3325_v9 = vld [vmem:[%s10032_s3 + $0x808] sm:$0xff]  ;;  %v3375_v55 = vld [vmem:[%s10032_s3 + $0x998] sm:$0xff] }
 0x35e   : > { %v2974_v5 = vadd.f32 %v2973_v41, %v7306_v46  ;;  %v7686_v46 = vld [vmem:[#allocation2 + $0xf4] sm:$0xff]  ;;  %3629 = vmatpush.msrb.mxu2 %v3361_v32  ;;  %3478 = vmatpush.msrb.mxu0 %v3326_v52  ;;  %v3324_v32 = vld [vmem:[%s10032_s3 + $0x800] sm:$0xff] }
 0x35f   : > { %10104 = vst [vmem:[#allocation23_spill] sm:$0xff] %v7671_v44  ;;  %3706 = vmatpush.msrb.mxu3 %v3377_v61  ;;  %v3359_v41 = vld [vmem:[%s10032_s3 + $0x918] sm:$0xff]  ;;  %3553 = vmatpush.msrb.mxu1 %v3344_v23 }
 0x360   : > { %v3051_v45 = vadd.f32 %v3050_v59, %v2974_v5  ;;  %3020 = vmatmul.f32.gmra.mxu0 %v7674_v12  ;;  %3097 = vmatmul.f32.gmra.mxu1 %v7676_v43  ;;  %v7723_v44 = vld [vmem:[#allocation2 + $0xfa] sm:$0xff] }
 0x361   : > { %3174 = vmatmul.f32.gmra.mxu2 %v7686_v46  ;;  %3452 = vmatmul.f32.gmra.mxu3 %v7347_v33  ;;  %v3343_v33 = vld [vmem:[%s10032_s3 + $0x898] sm:$0xff] }
 0x362   : > { %3630 = vmatpush.msrb.mxu2 %v3360_v40  ;;  %3707 = vmatpush.msrb.mxu3 %v3376_v60  ;;  %v7728_v40 = vld [vmem:[#allocation2 + $0xfb] sm:$0xff]  ;;  %v3358_v60 = vld [vmem:[%s10032_s3 + $0x910] sm:$0xff] }
 0x363   : > { %3479 = vmatpush.msrb.mxu0 %v3325_v9  ;;  %3554 = vmatpush.msrb.mxu1 %v3343_v33  ;;  %v3341_v9 = vld [vmem:[%s10032_s3 + $0x888] sm:$0xff] }
 0x364   : > { %v3127_v59 = vpop.f32.mrf.mxu2  ;;  %v7714_v5 = vpop.f32.mrf.mxu3  ;;  %3631 = vmatpush.msrb.mxu2 %v3359_v41  ;;  %3708 = vmatpush.msrb.mxu3 %v3375_v55  ;;  %v3373_v33 = vld [vmem:[%s10032_s3 + $0x988] sm:$0xff]  ;;  %v3340_v41 = vld [vmem:[%s10032_s3 + $0x880] sm:$0xff] }
 0x365   : > { %v3128_v61 = vadd.f32 %v3127_v59, %v3051_v45  ;;  %v2976_v11 = vpop.f32.mrf.mxu0  ;;  %v3053_v2 = vpop.f32.mrf.mxu1  ;;  %v3342_v45 = vld [vmem:[%s10032_s3 + $0x890] sm:$0xff]  ;;  %3480 = vmatpush.msrb.mxu0 %v3324_v32  ;;  %v3372_v32 = vld [vmem:[%s10032_s3 + $0x980] sm:$0xff] }
 0x366   : > { %v2977_v52 = vadd.f32 %v2976_v11, %v7336_v30  ;;  %v7738_v11 = vld [vmem:[#allocation2 + $0xfc] sm:$0xff]  ;;  %3555 = vmatpush.msrb.mxu1 %v3342_v45  ;;  %3632 = vmatpush.msrb.mxu2 %v3358_v60 }
 0x367   : > { %v7726_v23 = vadd.f32 %v3128_v61, %v7274_v54  ;;  %v3374_v54 = vld [vmem:[%s10032_s3 + $0x990] sm:$0xff] }
 0x368   : > { %v3054_v30 = vadd.f32 %v3053_v2, %v2977_v52  ;;  %3023 = vmatmul.f32.gmra.mxu0 %v7723_v44  ;;  %3100 = vmatmul.f32.gmra.mxu1 %v7728_v40  ;;  %v3357_v2 = vld [vmem:[%s10032_s3 + $0x908] sm:$0xff] }
 0x369   : > { %10105 = vst [vmem:[#allocation24_spill] sm:$0xff] %v7726_v23  ;;  %3177 = vmatmul.f32.gmra.mxu2 %v7738_v11  ;;  %3455 = vmatmul.f32.gmra.mxu3 %v7361_v37  ;;  %v3356_v37 = vld [vmem:[%s10032_s3 + $0x900] sm:$0xff]  ;;  %v7769_v23 = vld [vmem:[#allocation2 + $0x10a] sm:$0xff] }
 0x36a   : > { %3709 = vmatpush.msrb.mxu3 %v3374_v54  ;;  %3556 = vmatpush.msrb.mxu1 %v3341_v9 }
 0x36b   : > { %3633 = vmatpush.msrb.mxu2 %v3357_v2  ;;  %v3226_v2 = vld [vmem:[#allocation2 + $0x120] sm:$0xff] }
 0x36c   : > { %v3130_v59 = vpop.f32.mrf.mxu2  ;;  %v7760_v55 = vpop.f32.mrf.mxu3  ;;  %3710 = vmatpush.msrb.mxu3 %v3373_v33  ;;  %3557 = vmatpush.msrb.mxu1 %v3340_v41 }
 0x36d   : > { %10106 = vst [vmem:[#allocation25_spill] sm:$0xff] %v7760_v55  ;;  %v3131_v61 = vadd.f32 %v3130_v59, %v3054_v30  ;;  %v2979_v52 = vpop.f32.mrf.mxu0  ;;  %v3056_v45 = vpop.f32.mrf.mxu1  ;;  %3634 = vmatpush.msrb.mxu2 %v3356_v37  ;;  %v7771_v55 = vld [vmem:[#allocation2 + $0x10b] sm:$0xff] }
 0x36e   : > { %v2980_v60 = vadd.f32 %v2979_v52, %v7350_v1  ;;  %3711 = vmatpush.msrb.mxu3 %v3372_v32  ;;  %v7775_v30 = vld [vmem:[#allocation2 + $0x10c] sm:$0xff] }
 0x36f   : > { %v7767_v54 = vadd.f32 %v3131_v61, %v7317_v34  ;;  %v7784_v61 = vld [vmem:[#allocation2 + $0x112] sm:$0xff] }
 0x370   : > { %v3057_v9 = vadd.f32 %v3056_v45, %v2980_v60  ;;  %3026 = vmatmul.f32.gmra.mxu0 %v7769_v23  ;;  %3103 = vmatmul.f32.gmra.mxu1 %v7771_v55  ;;  %v7786_v52 = vld [vmem:[#allocation2 + $0x113] sm:$0xff] }
 0x371   : > { %10107 = vst [vmem:[#allocation26_spill] sm:$0xff] %v7767_v54  ;;  %3180 = vmatmul.f32.gmra.mxu2 %v7775_v30  ;;  %3458 = vmatmul.f32.gmra.mxu3 %v3226_v2  ;;  %v7790_v60 = vld [vmem:[#allocation2 + $0x114] sm:$0xff]  ;;  %v3227_v2 = vld [vmem:[#allocation2 + $0x128] sm:$0xff] }
 0x372   : > { %v3268_v54 = vld [vmem:[#allocation2 + $0x4b] sm:$0xff] }
 0x374   : > { %v3133_v1 = vpop.f32.mrf.mxu2  ;;  %v7778_v33 = vpop.f32.mrf.mxu3 }
 0x375   : > { %10108 = vst [vmem:[#allocation27_spill] sm:$0xff] %v7778_v33  ;;  %v3134_v34 = vadd.f32 %v3133_v1, %v3057_v9  ;;  %v2982_v41 = vpop.f32.mrf.mxu0  ;;  %v3059_v37 = vpop.f32.mrf.mxu1 }
 0x376   : > { %v2983_v59 = vadd.f32 %v2982_v41, %v7364_v62 }
 0x377   : > { %v7782_v32 = vadd.f32 %v3134_v34, %v7343_v6 }
 0x378   : > { %v3060_v45 = vadd.f32 %v3059_v37, %v2983_v59  ;;  %3029 = vmatmul.f32.gmra.mxu0 %v7784_v61  ;;  %3106 = vmatmul.f32.gmra.mxu1 %v7786_v52  ;;  %v3228_v59 = vld [vmem:[#allocation2 + $0x49] sm:$0xff] }
 0x379   : > { %10109 = vst [vmem:[#allocation28_spill] sm:$0xff] %v7782_v32  ;;  %3183 = vmatmul.f32.gmra.mxu2 %v7790_v60  ;;  %3461 = vmatmul.f32.gmra.mxu3 %v3227_v2 }
 0x37c   : > { %v3136_v9 = vpop.f32.mrf.mxu2  ;;  %v7793_v62 = vpop.f32.mrf.mxu3 }
 0x37d   : > { %10110 = vst [vmem:[#allocation29_spill] sm:$0xff] %v7793_v62  ;;  %v3137_v6 = vadd.f32 %v3136_v9, %v3060_v45  ;;  %v2985_v1 = vpop.f32.mrf.mxu0  ;;  %v3062_v34 = vpop.f32.mrf.mxu1 }
 0x37e   : > { %v2986_v41 = vadd.f32 %v2985_v1, %v7370_v10 }
 0x37f   : > { %v7797_v37 = vadd.f32 %v3137_v6, %v7357_v25  ;;  %v3229_v6 = vld [vmem:[#allocation2 + $0x51] sm:$0xff] }
 0x380   : > { %v3063_v32 = vadd.f32 %v3062_v34, %v2986_v41  ;;  %3481 = vmatmul.f32.vlgmr.msrb.gmra.mxu0 %v3228_v59  ;;  %3558 = vmatmul.f32.vlgmr.msrb.gmra.mxu1 %v7382_v47  ;;  %v3269_v47 = vld [vmem:[#allocation2 + $0x53] sm:$0xff]  ;;  %v7815_v59 = vld [vmem:[#allocation2 + $0x61] sm:$0xff] }
 0x381   : > { %3635 = vmatmul.f32.vlgmr.msrb.gmra.mxu2 %v3268_v54  ;;  %3712 = vmatmul.f32.vlgmr.msrb.gmra.mxu3 %v7388_v8 }
 0x384   : > { %v3139_v2 = vpop.f32.mrf.mxu2  ;;  %v7801_v33 = vpop.f32.mrf.mxu3 }
 0x385   : > { %v3140_v45 = vadd.f32 %v3139_v2, %v3063_v32  ;;  %v2988_v9 = vpop.f32.mrf.mxu0  ;;  %v3065_v62 = vpop.f32.mrf.mxu1 }
 0x386   : > { %v2989_v10 = vadd.f32 %v2988_v9, %v7376_v31 }
 0x387   : > { %v7805_v25 = vadd.f32 %v3140_v45, %v7367_v18 }
 0x388   : > { %v3066_v1 = vadd.f32 %v3065_v62, %v2989_v10  ;;  %3484 = vmatmul.f32.gmra.mxu0 %v3229_v6  ;;  %3561 = vmatmul.f32.gmra.mxu1 %v7394_v21  ;;  %v3909_v21 = vld [vmem:[%s10032_s3 + $0xa78] sm:$0xff] }
 0x389   : > { %3638 = vmatmul.f32.gmra.mxu2 %v3269_v47  ;;  %3715 = vmatmul.f32.gmra.mxu3 %v7400_v35  ;;  %v7822_v35 = vld [vmem:[#allocation2 + $0x63] sm:$0xff]  ;;  %v3908_v47 = vld [vmem:[%s10032_s3 + $0xa70] sm:$0xff] }
 0x38a   : > { %3974 = vmatpush.msra.mxu0 %v3909_v21 }
 0x38c   : > { %v3142_v8 = vpop.f32.mrf.mxu2  ;;  %v7809_v54 = vpop.f32.mrf.mxu3  ;;  %3975 = vmatpush.msra.mxu0 %v3908_v47 }
 0x38d   : > { %v3143_v32 = vadd.f32 %v3142_v8, %v3066_v1  ;;  %v2991_v34 = vpop.f32.mrf.mxu0  ;;  %v3068_v41 = vpop.f32.mrf.mxu1  ;;  %v7832_v1 = vld [vmem:[#allocation2 + $0x69] sm:$0xff] }
 0x38e   : > { %v2992_v31 = vadd.f32 %v2991_v34, %v7391_v0 }
 0x38f   : > { %v7813_v18 = vadd.f32 %v3143_v32, %v7373_v28 }
 0x390   : > { %v3069_v62 = vadd.f32 %v3068_v41, %v2992_v31  ;;  %3487 = vmatmul.f32.gmra.mxu0 %v7815_v59  ;;  %3564 = vmatmul.f32.gmra.mxu1 %v7409_v15  ;;  %v7849_v31 = vld [vmem:[#allocation2 + $0x79] sm:$0xff] }
 0x391   : > { %3641 = vmatmul.f32.gmra.mxu2 %v7822_v35  ;;  %3718 = vmatmul.f32.gmra.mxu3 %v7415_v20  ;;  %v7836_v20 = vld [vmem:[#allocation2 + $0x6b] sm:$0xff] }
 0x394   : > { %v3145_v28 = vpop.f32.mrf.mxu2  ;;  %v7826_v0 = vpop.f32.mrf.mxu3 }
 0x395   : > { %v3146_v2 = vadd.f32 %v3145_v28, %v3069_v62  ;;  %v2994_v45 = vpop.f32.mrf.mxu0  ;;  %v3071_v9 = vpop.f32.mrf.mxu1 }
 0x396   : > { %v2995_v10 = vadd.f32 %v2994_v45, %v7406_v49 }
 0x397   : > { %v7830_v6 = vadd.f32 %v3146_v2, %v7384_v36 }
 0x398   : > { %v3072_v15 = vadd.f32 %v3071_v9, %v2995_v10  ;;  %3490 = vmatmul.f32.gmra.mxu0 %v7832_v1  ;;  %3567 = vmatmul.f32.gmra.mxu1 %v7424_v24  ;;  %v7866_v10 = vld [vmem:[#allocation2 + $0x81] sm:$0xff] }
 0x399   : > { %3644 = vmatmul.f32.gmra.mxu2 %v7836_v20  ;;  %3721 = vmatmul.f32.gmra.mxu3 %v7430_v51  ;;  %v7853_v51 = vld [vmem:[#allocation2 + $0x7b] sm:$0xff] }
 0x39c   : > { %v3148_v36 = vpop.f32.mrf.mxu2  ;;  %v7843_v49 = vpop.f32.mrf.mxu3 }
 0x39d   : > { %v3149_v8 = vadd.f32 %v3148_v36, %v3072_v15  ;;  %v2997_v32 = vpop.f32.mrf.mxu0  ;;  %v3074_v34 = vpop.f32.mrf.mxu1 }
 0x39e   : > { %v2998_v41 = vadd.f32 %v2997_v32, %v7421_v38  ;;  %v3907_v38 = vld [vmem:[%s10032_s3 + $0xa68] sm:$0xff] }
 0x39f   : > { %v7847_v24 = vadd.f32 %v3149_v8, %v7396_v57  ;;  %3976 = vmatpush.msra.mxu0 %v3907_v38  ;;  %v7883_v38 = vld [vmem:[#allocation2 + $0x91] sm:$0xff] }
 0x3a0   : > { %v3075_v21 = vadd.f32 %v3074_v34, %v2998_v41  ;;  %3493 = vmatmul.f32.gmra.mxu0 %v7849_v31  ;;  %3570 = vmatmul.f32.gmra.mxu1 %v7439_v7  ;;  %v10111_v34 = vld [vmem:[#allocation3_spill] sm:$0xff] }
 0x3a1   : > { %3647 = vmatmul.f32.gmra.mxu2 %v7853_v51  ;;  %3724 = vmatmul.f32.gmra.mxu3 %v7445_v50  ;;  %v7870_v50 = vld [vmem:[#allocation2 + $0x83] sm:$0xff] }
 0x3a4   : > { %v3151_v57 = vpop.f32.mrf.mxu2  ;;  %v7860_v62 = vpop.f32.mrf.mxu3 }
 0x3a5   : > { %v3152_v28 = vadd.f32 %v3151_v57, %v3075_v21  ;;  %v3000_v2 = vpop.f32.mrf.mxu0  ;;  %v3077_v45 = vpop.f32.mrf.mxu1 }
 0x3a6   : > { %v3001_v9 = vadd.f32 %v3000_v2, %v7436_v4  ;;  %v3906_v4 = vld [vmem:[%s10032_s3 + $0xa60] sm:$0xff] }
 0x3a7   : > { %v7864_v7 = vadd.f32 %v3152_v28, %v7411_v16  ;;  %3977 = vmatpush.msra.mxu0 %v3906_v4  ;;  %v10113_v4 = vld [vmem:[#allocation4_spill] sm:$0xff] }
 0x3a8   : > { %v3078_v15 = vadd.f32 %v3077_v45, %v3001_v9  ;;  %3496 = vmatmul.f32.gmra.mxu0 %v7866_v10  ;;  %3573 = vmatmul.f32.gmra.mxu1 %v7454_v17  ;;  %v10112_v17 = vld [vmem:[#allocation10_spill] sm:$0xff] }
 0x3a9   : > { %3650 = vmatmul.f32.gmra.mxu2 %v7870_v50  ;;  %3727 = vmatmul.f32.gmra.mxu3 %v7460_v29  ;;  %v7887_v29 = vld [vmem:[#allocation2 + $0x93] sm:$0xff] }
 0x3ac   : > { %v3154_v16 = vpop.f32.mrf.mxu2  ;;  %v7877_v47 = vpop.f32.mrf.mxu3 }
 0x3ad   : > { %v3155_v36 = vadd.f32 %v3154_v16, %v3078_v15  ;;  %v3003_v8 = vpop.f32.mrf.mxu0  ;;  %v3080_v32 = vpop.f32.mrf.mxu1 }
 0x3ae   : > { %v3004_v41 = vadd.f32 %v3003_v8, %v10111_v34 }
 0x3af   : > { %v7881_v21 = vadd.f32 %v3155_v36, %v10112_v17  ;;  %v10114_v36 = vld [vmem:[#allocation6_spill] sm:$0xff] }
 0x3b0   : > { %v3081_v57 = vadd.f32 %v3080_v32, %v3004_v41  ;;  %3499 = vmatmul.f32.gmra.mxu0 %v7883_v38  ;;  %3576 = vmatmul.f32.gmra.mxu1 %v7466_v14  ;;  %v7897_v32 = vld [vmem:[#allocation2 + $0x99] sm:$0xff] }
 0x3b1   : > { %3653 = vmatmul.f32.gmra.mxu2 %v7887_v29  ;;  %3730 = vmatmul.f32.gmra.mxu3 %v7472_v22  ;;  %v3905_v14 = vld [vmem:[%s10032_s3 + $0xa58] sm:$0xff] }
 0x3b2   : > { %v7904_v22 = vld [vmem:[#allocation2 + $0x9b] sm:$0xff]  ;;  %3978 = vmatpush.msra.mxu0 %v3905_v14  ;;  %v3904_v14 = vld [vmem:[%s10032_s3 + $0xa50] sm:$0xff] }
 0x3b4   : > { %v3157_v28 = vpop.f32.mrf.mxu2  ;;  %v7891_v2 = vpop.f32.mrf.mxu3  ;;  %3979 = vmatpush.msra.mxu0 %v3904_v14 }
 0x3b5   : > { %v3158_v45 = vadd.f32 %v3157_v28, %v3081_v57  ;;  %v3006_v9 = vpop.f32.mrf.mxu0  ;;  %v3083_v15 = vpop.f32.mrf.mxu1 }
 0x3b6   : > { %v3007_v16 = vadd.f32 %v3006_v9, %v10113_v4  ;;  %v10116_v9 = vld [vmem:[#allocation5_spill] sm:$0xff] }
 0x3b7   : > { %v7895_v8 = vadd.f32 %v3158_v45, %v10114_v36  ;;  %v7914_v36 = vld [vmem:[#allocation2 + $0xa9] sm:$0xff] }
 0x3b8   : > { %v3084_v34 = vadd.f32 %v3083_v15, %v3007_v16  ;;  %3502 = vmatmul.f32.gmra.mxu0 %v7897_v32  ;;  %3579 = vmatmul.f32.gmra.mxu1 %v7481_v27  ;;  %v10117_v15 = vld [vmem:[#allocation8_spill] sm:$0xff] }
 0x3b9   : > { %10115 = vst [vmem:[#allocation3_spill] sm:$0xff] %v7895_v8  ;;  %3656 = vmatmul.f32.gmra.mxu2 %v7904_v22  ;;  %3733 = vmatmul.f32.gmra.mxu3 %v7487_v39  ;;  %v7918_v39 = vld [vmem:[#allocation2 + $0xab] sm:$0xff] }
 0x3bc   : > { %v3160_v41 = vpop.f32.mrf.mxu2  ;;  %v7908_v17 = vpop.f32.mrf.mxu3 }
 0x3bd   : > { %v3161_v57 = vadd.f32 %v3160_v41, %v3084_v34  ;;  %v3009_v28 = vpop.f32.mrf.mxu0  ;;  %v3086_v45 = vpop.f32.mrf.mxu1 }
 0x3be   : > { %v3010_v4 = vadd.f32 %v3009_v28, %v10116_v9  ;;  %v10120_v9 = vld [vmem:[#allocation7_spill] sm:$0xff] }
 0x3bf   : > { %v7912_v16 = vadd.f32 %v3161_v57, %v10117_v15 }
 0x3c0   : > { %v3087_v27 = vadd.f32 %v3086_v45, %v3010_v4  ;;  %3505 = vmatmul.f32.gmra.mxu0 %v7914_v36  ;;  %3582 = vmatmul.f32.gmra.mxu1 %v7496_v53  ;;  %v10121_v53 = vld [vmem:[#allocation11_spill] sm:$0xff] }
 0x3c1   : > { %10118 = vst [vmem:[#allocation10_spill] sm:$0xff] %v7912_v16  ;;  %3659 = vmatmul.f32.gmra.mxu2 %v7918_v39  ;;  %3736 = vmatmul.f32.gmra.mxu3 %v7502_v3  ;;  %v7931_v16 = vld [vmem:[#allocation2 + $0xb1] sm:$0xff] }
 0x3c2   : > { %v7935_v3 = vld [vmem:[#allocation2 + $0xb3] sm:$0xff] }
 0x3c4   : > { %v3163_v34 = vpop.f32.mrf.mxu2  ;;  %v7925_v41 = vpop.f32.mrf.mxu3 }
 0x3c5   : > { %10119 = vst [vmem:[#allocation4_spill] sm:$0xff] %v7925_v41  ;;  %v3164_v57 = vadd.f32 %v3163_v34, %v3087_v27  ;;  %v3012_v28 = vpop.f32.mrf.mxu0  ;;  %v3089_v45 = vpop.f32.mrf.mxu1  ;;  %v3903_v27 = vld [vmem:[%s10032_s3 + $0xa48] sm:$0xff] }
 0x3c6   : > { %v3013_v4 = vadd.f32 %v3012_v28, %v10120_v9  ;;  %3980 = vmatpush.msra.mxu0 %v3903_v27  ;;  %v10124_v9 = vld [vmem:[#allocation9_spill] sm:$0xff] }
 0x3c7   : > { %v7929_v15 = vadd.f32 %v3164_v57, %v10121_v53 }
 0x3c8   : > { %v3090_v8 = vadd.f32 %v3089_v45, %v3013_v4  ;;  %3508 = vmatmul.f32.gmra.mxu0 %v7931_v16  ;;  %3585 = vmatmul.f32.gmra.mxu1 %v7511_v13  ;;  %v10125_v13 = vld [vmem:[#allocation13_spill] sm:$0xff] }
 0x3c9   : > { %10122 = vst [vmem:[#allocation6_spill] sm:$0xff] %v7929_v15  ;;  %3662 = vmatmul.f32.gmra.mxu2 %v7935_v3  ;;  %3739 = vmatmul.f32.gmra.mxu3 %v7517_v48  ;;  %v7948_v15 = vld [vmem:[#allocation2 + $0xc1] sm:$0xff] }
 0x3ca   : > { %v7952_v48 = vld [vmem:[#allocation2 + $0xc3] sm:$0xff] }
 0x3cb   : > { %10127 = vst [vmem:[#allocation7_spill] sm:$0xff] %v7952_v48 }
 0x3cc   : > { %v3166_v14 = vpop.f32.mrf.mxu2  ;;  %v7942_v34 = vpop.f32.mrf.mxu3 }
 0x3cd   : > { %10123 = vst [vmem:[#allocation5_spill] sm:$0xff] %v7942_v34  ;;  %v3167_v57 = vadd.f32 %v3166_v14, %v3090_v8  ;;  %v3015_v28 = vpop.f32.mrf.mxu0  ;;  %v3092_v45 = vpop.f32.mrf.mxu1  ;;  %v3902_v8 = vld [vmem:[%s10032_s3 + $0xa40] sm:$0xff] }
 0x3ce   : > { %v3016_v4 = vadd.f32 %v3015_v28, %v10124_v9  ;;  %3981 = vmatpush.msra.mxu0 %v3902_v8  ;;  %v10129_v9 = vld [vmem:[#allocation12_spill] sm:$0xff] }
 0x3cf   : > { %v7946_v53 = vadd.f32 %v3167_v57, %v10125_v13  ;;  %v10134_v8 = vld [vmem:[#allocation20_spill] sm:$0xff] }
 0x3d0   : > { %v3093_v41 = vadd.f32 %v3092_v45, %v3016_v4  ;;  %3511 = vmatmul.f32.gmra.mxu0 %v7948_v15  ;;  %3588 = vmatmul.f32.gmra.mxu1 %v7526_v63  ;;  %v10130_v63 = vld [vmem:[#allocation14_spill] sm:$0xff] }
 0x3d1   : > { %10126 = vst [vmem:[#allocation8_spill] sm:$0xff] %v7946_v53  ;;  %3665 = vmatmul.f32.gmra.mxu2 %v7952_v48  ;;  %3742 = vmatmul.f32.gmra.mxu3 %v7532_v58  ;;  %v7965_v53 = vld [vmem:[#allocation2 + $0xc9] sm:$0xff] }
 0x3d2   : > { %v10132_v58 = vld [vmem:[#allocation18_spill] sm:$0xff] }
 0x3d3   : > { %v7969_v48 = vld [vmem:[#allocation2 + $0xcb] sm:$0xff] }
 0x3d4   : > { %v3169_v27 = vpop.f32.mrf.mxu2  ;;  %v7959_v14 = vpop.f32.mrf.mxu3  ;;  %10133 = vst [vmem:[#allocation13_spill] sm:$0xff] %v7969_v48 }
 0x3d5   : > { %10128 = vst [vmem:[#allocation11_spill] sm:$0xff] %v7959_v14  ;;  %v3170_v57 = vadd.f32 %v3169_v27, %v3093_v41  ;;  %v3018_v28 = vpop.f32.mrf.mxu0  ;;  %v3095_v45 = vpop.f32.mrf.mxu1  ;;  %v10137_v14 = vld [vmem:[#allocation15_spill] sm:$0xff] }
 0x3d6   : > { %v3019_v4 = vadd.f32 %v3018_v28, %v10129_v9 }
 0x3d7   : > { %v7963_v13 = vadd.f32 %v3170_v57, %v10130_v63  ;;  %v10136_v63 = vld [vmem:[#allocation17_spill] sm:$0xff] }
 0x3d8   : > { %v3096_v34 = vadd.f32 %v3095_v45, %v3019_v4  ;;  %3514 = vmatmul.f32.gmra.mxu0 %v7965_v53  ;;  %3591 = vmatmul.f32.gmra.mxu1 %v10132_v58  ;;  %v7979_v4 = vld [vmem:[#allocation2 + $0xd9] sm:$0xff] }
 0x3d9   : > { %10131 = vst [vmem:[#allocation9_spill] sm:$0xff] %v7963_v13  ;;  %3668 = vmatmul.f32.gmra.mxu2 %v7969_v48  ;;  %3745 = vmatmul.f32.gmra.mxu3 %v10134_v8  ;;  %v3901_v58 = vld [vmem:[%s10032_s3 + $0xa38] sm:$0xff] }
 0x3da   : > { %10139 = vst [vmem:[#allocation18_spill] sm:$0xff] %v7979_v4  ;;  %v7986_v8 = vld [vmem:[#allocation2 + $0xdb] sm:$0xff]  ;;  %3982 = vmatpush.msra.mxu0 %v3901_v58  ;;  %v8008_v58 = vld [vmem:[#allocation2 + $0xe3] sm:$0xff] }
 0x3db   : > { %10140 = vst [vmem:[#allocation20_spill] sm:$0xff] %v7986_v8 }
 0x3dc   : > { %v3172_v41 = vpop.f32.mrf.mxu2  ;;  %v7973_v27 = vpop.f32.mrf.mxu3  ;;  %10145 = vst [vmem:[#allocation30_spill] sm:$0xff] %v8008_v58 }
 0x3dd   : > { %10135 = vst [vmem:[#allocation12_spill] sm:$0xff] %v7973_v27  ;;  %v3173_v28 = vadd.f32 %v3172_v41, %v3096_v34  ;;  %v3021_v9 = vpop.f32.mrf.mxu0  ;;  %v3098_v57 = vpop.f32.mrf.mxu1  ;;  %v3300_v34 = vld [vmem:[#allocation2 + $0xdc] sm:$0xff] }
 0x3de   : > { %v3022_v13 = vadd.f32 %v3021_v9, %v10136_v63  ;;  %v3941_v41 = vld [vmem:[%s10032_s3 + $0xb78] sm:$0xff] }
 0x3df   : > { %v7977_v45 = vadd.f32 %v3173_v28, %v10137_v14  ;;  %v3925_v14 = vld [vmem:[%s10032_s3 + $0xaf8] sm:$0xff]  ;;  %4128 = vmatpush.msra.mxu2 %v3941_v41  ;;  %v3939_v41 = vld [vmem:[%s10032_s3 + $0xb68] sm:$0xff] }
 0x3e0   : > { %v3099_v48 = vadd.f32 %v3098_v57, %v3022_v13  ;;  %3517 = vmatmul.f32.gmra.mxu0 %v7979_v4  ;;  %3594 = vmatmul.f32.gmra.mxu1 %v7589_v42  ;;  %v3957_v13 = vld [vmem:[%s10032_s3 + $0xbf8] sm:$0xff] }
 0x3e1   : > { %10138 = vst [vmem:[#allocation14_spill] sm:$0xff] %v7977_v45  ;;  %3671 = vmatmul.f32.gmra.mxu2 %v7986_v8  ;;  %3748 = vmatmul.f32.gmra.mxu3 %v3300_v34  ;;  %v10142_v45 = vld [vmem:[#allocation16_spill] sm:$0xff]  ;;  %v8004_v8 = vld [vmem:[#allocation2 + $0xe1] sm:$0xff] }
 0x3e2   : > { %4051 = vmatpush.msra.mxu1 %v3925_v14  ;;  %4205 = vmatpush.msra.mxu3 %v3957_v13  ;;  %10144 = vst [vmem:[#allocation16_spill] sm:$0xff] %v8004_v8  ;;  %v3301_v14 = vld [vmem:[#allocation2 + $0xe4] sm:$0xff] }
 0x3e3   : > { %v3955_v13 = vld [vmem:[%s10032_s3 + $0xbe8] sm:$0xff] }
 0x3e4   : > { %v3175_v42 = vpop.f32.mrf.mxu2  ;;  %v7998_v28 = vpop.f32.mrf.mxu3 }
 0x3e5   : > { %10141 = vst [vmem:[#allocation17_spill] sm:$0xff] %v7998_v28  ;;  %v3176_v9 = vadd.f32 %v3175_v42, %v3099_v48  ;;  %v3024_v57 = vpop.f32.mrf.mxu0  ;;  %v3101_v63 = vpop.f32.mrf.mxu1  ;;  %v3940_v48 = vld [vmem:[%s10032_s3 + $0xb70] sm:$0xff] }
 0x3e6   : > { %v3025_v34 = vadd.f32 %v3024_v57, %v7586_v19  ;;  %v3924_v19 = vld [vmem:[%s10032_s3 + $0xaf0] sm:$0xff]  ;;  %4129 = vmatpush.msra.mxu2 %v3940_v48  ;;  %v3938_v57 = vld [vmem:[%s10032_s3 + $0xb60] sm:$0xff] }
 0x3e7   : > { %v8002_v27 = vadd.f32 %v3176_v9, %v10142_v45  ;;  %v3956_v45 = vld [vmem:[%s10032_s3 + $0xbf0] sm:$0xff]  ;;  %4052 = vmatpush.msra.mxu1 %v3924_v19  ;;  %v3922_v9 = vld [vmem:[%s10032_s3 + $0xae0] sm:$0xff] }
 0x3e8   : > { %v3102_v4 = vadd.f32 %v3101_v63, %v3025_v34  ;;  %3520 = vmatmul.f32.gmra.mxu0 %v8004_v8  ;;  %3597 = vmatmul.f32.gmra.mxu1 %v7630_v56  ;;  %v3923_v56 = vld [vmem:[%s10032_s3 + $0xae8] sm:$0xff]  ;;  %v3900_v42 = vld [vmem:[%s10032_s3 + $0xa30] sm:$0xff] }
 0x3e9   : > { %10143 = vst [vmem:[#allocation15_spill] sm:$0xff] %v8002_v27  ;;  %3674 = vmatmul.f32.gmra.mxu2 %v8008_v58  ;;  %3751 = vmatmul.f32.gmra.mxu3 %v3301_v14  ;;  %v3954_v14 = vld [vmem:[%s10032_s3 + $0xbe0] sm:$0xff]  ;;  %v10147_v28 = vld [vmem:[#allocation19_spill] sm:$0xff] }
 0x3ea   : > { %4206 = vmatpush.msra.mxu3 %v3956_v45  ;;  %4053 = vmatpush.msra.mxu1 %v3923_v56  ;;  %v8047_v8 = vld [vmem:[#allocation2 + $0xf1] sm:$0xff] }
 0x3eb   : > { %4130 = vmatpush.msra.mxu2 %v3939_v41  ;;  %3983 = vmatpush.msra.mxu0 %v3900_v42  ;;  %v3921_v56 = vld [vmem:[%s10032_s3 + $0xad8] sm:$0xff] }
 0x3ec   : > { %v3178_v63 = vpop.f32.mrf.mxu2  ;;  %v8038_v34 = vpop.f32.mrf.mxu3  ;;  %4207 = vmatpush.msra.mxu3 %v3955_v13  ;;  %4054 = vmatpush.msra.mxu1 %v3922_v9  ;;  %v3951_v9 = vld [vmem:[%s10032_s3 + $0xbc8] sm:$0xff] }
 0x3ed   : > { %10146 = vst [vmem:[#allocation31_spill] sm:$0xff] %v8038_v34  ;;  %v3179_v19 = vadd.f32 %v3178_v63, %v3102_v4  ;;  %v3027_v48 = vpop.f32.mrf.mxu0  ;;  %v3104_v45 = vpop.f32.mrf.mxu1  ;;  %4131 = vmatpush.msra.mxu2 %v3938_v57  ;;  %v3937_v4 = vld [vmem:[%s10032_s3 + $0xb58] sm:$0xff]  ;;  %v3899_v57 = vld [vmem:[%s10032_s3 + $0xa28] sm:$0xff] }
 0x3ee   : > { %v3028_v27 = vadd.f32 %v3027_v48, %v7627_v26  ;;  %4208 = vmatpush.msra.mxu3 %v3954_v14  ;;  %v3953_v26 = vld [vmem:[%s10032_s3 + $0xbd8] sm:$0xff]  ;;  %4055 = vmatpush.msra.mxu1 %v3921_v56  ;;  %v10150_v48 = vld [vmem:[#allocation23_spill] sm:$0xff]  ;;  %v10151_v56 = vld [vmem:[#allocation21_spill] sm:$0xff] }
 0x3ef   : > { %v8045_v58 = vadd.f32 %v3179_v19, %v10147_v28  ;;  %v3920_v28 = vld [vmem:[%s10032_s3 + $0xad0] sm:$0xff]  ;;  %4132 = vmatpush.msra.mxu2 %v3937_v4  ;;  %3984 = vmatpush.msra.mxu0 %v3899_v57 }
 0x3f0   : > { %v3105_v41 = vadd.f32 %v3104_v45, %v3028_v27  ;;  %3523 = vmatmul.f32.gmra.mxu0 %v8047_v8  ;;  %3600 = vmatmul.f32.gmra.mxu1 %v7674_v12  ;;  %v3936_v27 = vld [vmem:[%s10032_s3 + $0xb50] sm:$0xff] }
 0x3f1   : > { %10148 = vst [vmem:[#allocation19_spill] sm:$0xff] %v8045_v58  ;;  %3677 = vmatmul.f32.gmra.mxu2 %v7676_v43  ;;  %3754 = vmatmul.f32.gmra.mxu3 %v7686_v46  ;;  %v3952_v12 = vld [vmem:[%s10032_s3 + $0xbd0] sm:$0xff]  ;;  %v3919_v43 = vld [vmem:[%s10032_s3 + $0xac8] sm:$0xff] }
 0x3f2   : > { %4209 = vmatpush.msra.mxu3 %v3953_v26  ;;  %v3935_v46 = vld [vmem:[%s10032_s3 + $0xb48] sm:$0xff]  ;;  %4056 = vmatpush.msra.mxu1 %v3920_v28  ;;  %v8089_v26 = vld [vmem:[#allocation2 + $0xf9] sm:$0xff] }
 0x3f3   : > { %4133 = vmatpush.msra.mxu2 %v3936_v27  ;;  %v3918_v28 = vld [vmem:[%s10032_s3 + $0xac0] sm:$0xff] }
 0x3f4   : > { %v3181_v13 = vpop.f32.mrf.mxu2  ;;  %v8077_v42 = vpop.f32.mrf.mxu3  ;;  %4210 = vmatpush.msra.mxu3 %v3952_v12  ;;  %4057 = vmatpush.msra.mxu1 %v3919_v43  ;;  %v3950_v12 = vld [vmem:[%s10032_s3 + $0xbc0] sm:$0xff]  ;;  %v3917_v43 = vld [vmem:[%s10032_s3 + $0xab8] sm:$0xff] }
 0x3f5   : > { %10149 = vst [vmem:[#allocation32_spill] sm:$0xff] %v8077_v42  ;;  %v3182_v63 = vadd.f32 %v3181_v13, %v3105_v41  ;;  %v3030_v14 = vpop.f32.mrf.mxu0  ;;  %v3107_v19 = vpop.f32.mrf.mxu1  ;;  %4134 = vmatpush.msra.mxu2 %v3935_v46  ;;  %v3934_v41 = vld [vmem:[%s10032_s3 + $0xb40] sm:$0xff]  ;;  %v3933_v46 = vld [vmem:[%s10032_s3 + $0xb38] sm:$0xff] }
 0x3f6   : > { %v3031_v45 = vadd.f32 %v3030_v14, %v10150_v48  ;;  %4211 = vmatpush.msra.mxu3 %v3951_v9  ;;  %4058 = vmatpush.msra.mxu1 %v3918_v28  ;;  %v3898_v13 = vld [vmem:[%s10032_s3 + $0xa20] sm:$0xff]  ;;  %v3897_v14 = vld [vmem:[%s10032_s3 + $0xa18] sm:$0xff] }
 0x3f7   : > { %v8087_v4 = vadd.f32 %v3182_v63, %v10151_v56  ;;  %4135 = vmatpush.msra.mxu2 %v3934_v41  ;;  %v3948_v63 = vld [vmem:[%s10032_s3 + $0xbb0] sm:$0xff]  ;;  %3985 = vmatpush.msra.mxu0 %v3898_v13  ;;  %v10154_v56 = vld [vmem:[#allocation22_spill] sm:$0xff]  ;;  %v3929_v13 = vld [vmem:[%s10032_s3 + $0xb18] sm:$0xff] }
 0x3f8   : > { %v3108_v27 = vadd.f32 %v3107_v19, %v3031_v45  ;;  %3526 = vmatmul.f32.gmra.mxu0 %v8089_v26  ;;  %3603 = vmatmul.f32.gmra.mxu1 %v7723_v44  ;;  %v3949_v44 = vld [vmem:[%s10032_s3 + $0xbb8] sm:$0xff] }
 0x3f9   : > { %10152 = vst [vmem:[#allocation23_spill] sm:$0xff] %v8087_v4  ;;  %3680 = vmatmul.f32.gmra.mxu2 %v7728_v40  ;;  %3757 = vmatmul.f32.gmra.mxu3 %v7738_v11  ;;  %v3916_v40 = vld [vmem:[%s10032_s3 + $0xab0] sm:$0xff]  ;;  %v3794_v4 = vld [vmem:[#allocation2 + $0x60] sm:$0xff] }
 0x3fa   : > { %4212 = vmatpush.msra.mxu3 %v3950_v12  ;;  %v3932_v11 = vld [vmem:[%s10032_s3 + $0xb30] sm:$0xff]  ;;  %4059 = vmatpush.msra.mxu1 %v3917_v43  ;;  %v3915_v43 = vld [vmem:[%s10032_s3 + $0xaa8] sm:$0xff] }
 0x3fb   : > { %4136 = vmatpush.msra.mxu2 %v3933_v46  ;;  %v8134_v12 = vld [vmem:[#allocation2 + $0x109] sm:$0xff]  ;;  %3986 = vmatpush.msra.mxu0 %v3897_v14  ;;  %v3914_v46 = vld [vmem:[%s10032_s3 + $0xaa0] sm:$0xff]  ;;  %v3945_v14 = vld [vmem:[%s10032_s3 + $0xb98] sm:$0xff] }
 0x3fc   : > { %v3184_v9 = vpop.f32.mrf.mxu2  ;;  %v8122_v57 = vpop.f32.mrf.mxu3  ;;  %4213 = vmatpush.msra.mxu3 %v3949_v44  ;;  %4060 = vmatpush.msra.mxu1 %v3916_v40  ;;  %v3930_v44 = vld [vmem:[%s10032_s3 + $0xb20] sm:$0xff] }
 0x3fd   : > { %10153 = vst [vmem:[#allocation21_spill] sm:$0xff] %v8122_v57  ;;  %v3185_v19 = vadd.f32 %v3184_v9, %v3108_v27  ;;  %v3482_v48 = vpop.f32.mrf.mxu0  ;;  %v3559_v45 = vpop.f32.mrf.mxu1  ;;  %4137 = vmatpush.msra.mxu2 %v3932_v11  ;;  %v3931_v27 = vld [vmem:[%s10032_s3 + $0xb28] sm:$0xff]  ;;  %v3913_v11 = vld [vmem:[%s10032_s3 + $0xa98] sm:$0xff] }
 0x3fe   : > { %v3483_v41 = vadd.f32 %v3482_v48, %v7714_v5  ;;  %4214 = vmatpush.msra.mxu3 %v3948_v63  ;;  %v3947_v5 = vld [vmem:[%s10032_s3 + $0xba8] sm:$0xff]  ;;  %4061 = vmatpush.msra.mxu1 %v3915_v43  ;;  %v10156_v43 = vld [vmem:[#allocation25_spill] sm:$0xff] }
 0x3ff   : > { %v8131_v28 = vadd.f32 %v3185_v19, %v10154_v56  ;;  %4138 = vmatpush.msra.mxu2 %v3931_v27  ;;  %v3894_v19 = vld [vmem:[%s10032_s3 + $0xa00] sm:$0xff] }
 0x400   : > { %3529 = vmatmul.f32.gmra.mxu0 %v8134_v12  ;;  %3606 = vmatmul.f32.gmra.mxu1 %v7769_v23  ;;  %v3896_v23 = vld [vmem:[%s10032_s3 + $0xa10] sm:$0xff]  ;;  %v3560_v40 = vadd.f32 %v3559_v45, %v3483_v41  ;;  %v3834_v57 = vld [vmem:[#allocation2 + $0x62] sm:$0xff] }
 0x401   : > { %10155 = vst [vmem:[#allocation22_spill] sm:$0xff] %v8131_v28  ;;  %3683 = vmatmul.f32.gmra.mxu2 %v7771_v55  ;;  %3760 = vmatmul.f32.gmra.mxu3 %v7775_v30  ;;  %v3946_v55 = vld [vmem:[%s10032_s3 + $0xba0] sm:$0xff]  ;;  %v3895_v30 = vld [vmem:[%s10032_s3 + $0xa08] sm:$0xff] }
 0x402   : > { %4215 = vmatpush.msra.mxu3 %v3947_v5  ;;  %3987 = vmatpush.msra.mxu0 %v3896_v23  ;;  %v8177_v5 = vld [vmem:[#allocation2 + $0x111] sm:$0xff] }
 0x403   : > { %4062 = vmatpush.msra.mxu1 %v3914_v46  ;;  %4139 = vmatpush.msra.mxu2 %v3930_v44  ;;  %v3912_v46 = vld [vmem:[%s10032_s3 + $0xa90] sm:$0xff] }
 0x404   : > { %v3636_v9 = vpop.f32.mrf.mxu2  ;;  %v3713_v63 = vpop.f32.mrf.mxu3  ;;  %4216 = vmatpush.msra.mxu3 %v3946_v55  ;;  %3988 = vmatpush.msra.mxu0 %v3895_v30  ;;  %v3928_v44 = vld [vmem:[%s10032_s3 + $0xb10] sm:$0xff]  ;;  %v10157_v55 = vld [vmem:[#allocation24_spill] sm:$0xff] }
 0x405   : > { %v3637_v48 = vadd.f32 %v3636_v9, %v3560_v40  ;;  %v3485_v45 = vpop.f32.mrf.mxu0  ;;  %v3562_v56 = vpop.f32.mrf.mxu1  ;;  %4063 = vmatpush.msra.mxu1 %v3913_v11  ;;  %4140 = vmatpush.msra.mxu2 %v3929_v13  ;;  %v3944_v23 = vld [vmem:[%s10032_s3 + $0xb90] sm:$0xff]  ;;  %v3911_v40 = vld [vmem:[%s10032_s3 + $0xa88] sm:$0xff] }
 0x406   : > { %v3486_v27 = vadd.f32 %v3485_v45, %v10156_v43  ;;  %4217 = vmatpush.msra.mxu3 %v3945_v14  ;;  %3989 = vmatpush.msra.mxu0 %v3894_v19  ;;  %v3927_v11 = vld [vmem:[%s10032_s3 + $0xb08] sm:$0xff]  ;;  %v3942_v14 = vld [vmem:[%s10032_s3 + $0xb80] sm:$0xff] }
 0x407   : > { %v3714_v41 = vadd.f32 %v3713_v63, %v3637_v48  ;;  %4064 = vmatpush.msra.mxu1 %v3912_v46  ;;  %4141 = vmatpush.msra.mxu2 %v3928_v44  ;;  %v8216_v46 = vld [vmem:[#allocation2 + $0x122] sm:$0xff] }
 0x408   : > { %3532 = vmatmul.f32.gmra.mxu0 %v8177_v5  ;;  %3609 = vmatmul.f32.gmra.mxu1 %v7784_v61  ;;  %v3943_v61 = vld [vmem:[%s10032_s3 + $0xb88] sm:$0xff]  ;;  %v3563_v13 = vadd.f32 %v3562_v56, %v3486_v27 }
 0x409   : > { %v8191_v30 = vadd.f32 %v3714_v41, %v10157_v55  ;;  %3686 = vmatmul.f32.gmra.mxu2 %v7786_v52  ;;  %3763 = vmatmul.f32.gmra.mxu3 %v7790_v60  ;;  %v3910_v52 = vld [vmem:[%s10032_s3 + $0xa80] sm:$0xff]  ;;  %v10158_v41 = vld [vmem:[#allocation27_spill] sm:$0xff]  ;;  %v10159_v55 = vld [vmem:[#allocation26_spill] sm:$0xff] }
 0x40a   : > { %4218 = vmatpush.msra.mxu3 %v3944_v23  ;;  %v3926_v60 = vld [vmem:[%s10032_s3 + $0xb00] sm:$0xff]  ;;  %4065 = vmatpush.msra.mxu1 %v3911_v40 }
 0x40b   : > { %4142 = vmatpush.msra.mxu2 %v3927_v11  ;;  %v8214_v27 = vld [vmem:[#allocation2 + $0x121] sm:$0xff] }
 0x40c   : > { %v3639_v9 = vpop.f32.mrf.mxu2  ;;  %v3716_v63 = vpop.f32.mrf.mxu3  ;;  %4219 = vmatpush.msra.mxu3 %v3943_v61  ;;  %4066 = vmatpush.msra.mxu1 %v3910_v52  ;;  %v8220_v44 = vld [vmem:[#allocation2 + $0x123] sm:$0xff] }
 0x40d   : > { %v3640_v19 = vadd.f32 %v3639_v9, %v3563_v13  ;;  %v3488_v48 = vpop.f32.mrf.mxu0  ;;  %v3565_v45 = vpop.f32.mrf.mxu1  ;;  %4143 = vmatpush.msra.mxu2 %v3926_v60  ;;  %v3306_v23 = vld [vmem:[#allocation2 + $0x124] sm:$0xff] }
 0x40e   : > { %v3489_v43 = vadd.f32 %v3488_v48, %v10158_v41  ;;  %4220 = vmatpush.msra.mxu3 %v3942_v14  ;;  %v10160_v14 = vld [vmem:[#allocation29_spill] sm:$0xff]  ;;  %v8227_v48 = vld [vmem:[#allocation2 + $0x129] sm:$0xff] }
 0x40f   : > { %v3717_v56 = vadd.f32 %v3716_v63, %v3640_v19  ;;  %v8229_v41 = vld [vmem:[#allocation2 + $0x12a] sm:$0xff] }
 0x410   : > { %3535 = vmatmul.f32.gmra.mxu0 %v8214_v27  ;;  %3612 = vmatmul.f32.gmra.mxu1 %v8216_v46  ;;  %v3566_v11 = vadd.f32 %v3565_v45, %v3489_v43  ;;  %v10161_v45 = vld [vmem:[#allocation28_spill] sm:$0xff] }
 0x411   : > { %v8223_v40 = vadd.f32 %v3717_v56, %v10159_v55  ;;  %3689 = vmatmul.f32.gmra.mxu2 %v8220_v44  ;;  %3766 = vmatmul.f32.gmra.mxu3 %v3306_v23  ;;  %v8233_v56 = vld [vmem:[#allocation2 + $0x12b] sm:$0xff] }
 0x412   : > { %v3307_v23 = vld [vmem:[#allocation2 + $0x12c] sm:$0xff] }
 0x414   : > { %v3642_v61 = vpop.f32.mrf.mxu2  ;;  %v3719_v13 = vpop.f32.mrf.mxu3 }
 0x415   : > { %v3643_v52 = vadd.f32 %v3642_v61, %v3566_v11  ;;  %v3491_v60 = vpop.f32.mrf.mxu0  ;;  %v3568_v9 = vpop.f32.mrf.mxu1 }
 0x416   : > { %v3492_v19 = vadd.f32 %v3491_v60, %v10160_v14 }
 0x417   : > { %v3720_v63 = vadd.f32 %v3719_v13, %v3643_v52 }
 0x418   : > { %3538 = vmatmul.f32.gmra.mxu0 %v8227_v48  ;;  %3615 = vmatmul.f32.gmra.mxu1 %v8229_v41  ;;  %v3569_v55 = vadd.f32 %v3568_v9, %v3492_v19 }
 0x419   : > { %v8236_v43 = vadd.f32 %v3720_v63, %v10161_v45  ;;  %3692 = vmatmul.f32.gmra.mxu2 %v8233_v56  ;;  %3769 = vmatmul.f32.gmra.mxu3 %v3307_v23 }
 0x41c   : > { %v3645_v11 = vpop.f32.mrf.mxu2  ;;  %v3722_v61 = vpop.f32.mrf.mxu3 }
 0x41d   : > { %v3646_v13 = vadd.f32 %v3645_v11, %v3569_v55  ;;  %v3494_v52 = vpop.f32.mrf.mxu0  ;;  %v3571_v60 = vpop.f32.mrf.mxu1 }
 0x41e   : > { %v3495_v28 = vadd.f32 %v3494_v52, %v7801_v33 }
 0x41f   : > { %v3723_v14 = vadd.f32 %v3722_v61, %v3646_v13  ;;  %v3795_v13 = vld [vmem:[#allocation2 + $0x68] sm:$0xff] }
 0x420   : > { %3990 = vmatmul.f32.vlgmr.msra.gmra.mxu0 %v3794_v4  ;;  %4067 = vmatmul.f32.vlgmr.msra.gmra.mxu1 %v7815_v59  ;;  %v3572_v9 = vadd.f32 %v3571_v60, %v3495_v28  ;;  %v3835_v59 = vld [vmem:[#allocation2 + $0x6a] sm:$0xff] }
 0x421   : > { %v8242_v63 = vadd.f32 %v3723_v14, %v7797_v37  ;;  %4144 = vmatmul.f32.vlgmr.msra.gmra.mxu2 %v3834_v57  ;;  %4221 = vmatmul.f32.vlgmr.msra.gmra.mxu3 %v7822_v35 }
 0x424   : > { %v3648_v19 = vpop.f32.mrf.mxu2  ;;  %v3725_v23 = vpop.f32.mrf.mxu3 }
 0x425   : > { %v3649_v45 = vadd.f32 %v3648_v19, %v3572_v9  ;;  %v3497_v55 = vpop.f32.mrf.mxu0  ;;  %v3574_v11 = vpop.f32.mrf.mxu1  ;;  %v3796_v9 = vld [vmem:[#allocation2 + $0x78] sm:$0xff] }
 0x426   : > { %v3498_v33 = vadd.f32 %v3497_v55, %v7809_v54 }
 0x427   : > { %v3726_v61 = vadd.f32 %v3725_v23, %v3649_v45 }
 0x428   : > { %3993 = vmatmul.f32.gmra.mxu0 %v3795_v13  ;;  %4070 = vmatmul.f32.gmra.mxu1 %v7832_v1  ;;  %v3575_v35 = vadd.f32 %v3574_v11, %v3498_v33  ;;  %v3836_v1 = vld [vmem:[#allocation2 + $0x7a] sm:$0xff]  ;;  %v3972_v13 = vld [vmem:[%s10032_s3 + $0xc70] sm:$0xff] }
 0x429   : > { %v8248_v37 = vadd.f32 %v3726_v61, %v7805_v25  ;;  %4147 = vmatmul.f32.gmra.mxu2 %v3835_v59  ;;  %4224 = vmatmul.f32.gmra.mxu3 %v7836_v20  ;;  %v3973_v20 = vld [vmem:[%s10032_s3 + $0xc78] sm:$0xff]  ;;  %v3797_v33 = vld [vmem:[#allocation2 + $0x80] sm:$0xff] }
 0x42a   : > { %4282 = vmatpush.msrb.mxu0 %v3973_v20 }
 0x42c   : > { %v3651_v4 = vpop.f32.mrf.mxu2  ;;  %v3728_v57 = vpop.f32.mrf.mxu3  ;;  %4283 = vmatpush.msrb.mxu0 %v3972_v13  ;;  %v3800_v13 = vld [vmem:[#allocation2 + $0xa8] sm:$0xff] }
 0x42d   : > { %v3652_v28 = vadd.f32 %v3651_v4, %v3575_v35  ;;  %v3500_v52 = vpop.f32.mrf.mxu0  ;;  %v3577_v60 = vpop.f32.mrf.mxu1 }
 0x42e   : > { %v3501_v54 = vadd.f32 %v3500_v52, %v7826_v0 }
 0x42f   : > { %v3729_v14 = vadd.f32 %v3728_v57, %v3652_v28 }
 0x430   : > { %3996 = vmatmul.f32.gmra.mxu0 %v3796_v9  ;;  %4073 = vmatmul.f32.gmra.mxu1 %v7849_v31  ;;  %v3578_v19 = vadd.f32 %v3577_v60, %v3501_v54  ;;  %v3798_v60 = vld [vmem:[#allocation2 + $0x90] sm:$0xff] }
 0x431   : > { %v8254_v25 = vadd.f32 %v3729_v14, %v7813_v18  ;;  %4150 = vmatmul.f32.gmra.mxu2 %v3836_v1  ;;  %4227 = vmatmul.f32.gmra.mxu3 %v7853_v51  ;;  %v3837_v18 = vld [vmem:[#allocation2 + $0x82] sm:$0xff] }
 0x432   : > { %v3971_v14 = vld [vmem:[%s10032_s3 + $0xc68] sm:$0xff] }
 0x433   : > { %4284 = vmatpush.msrb.mxu0 %v3971_v14 }
 0x434   : > { %v3654_v23 = vpop.f32.mrf.mxu2  ;;  %v3731_v45 = vpop.f32.mrf.mxu3 }
 0x435   : > { %v3655_v0 = vadd.f32 %v3654_v23, %v3578_v19  ;;  %v3503_v55 = vpop.f32.mrf.mxu0  ;;  %v3580_v11 = vpop.f32.mrf.mxu1 }
 0x436   : > { %v3504_v31 = vadd.f32 %v3503_v55, %v7843_v49 }
 0x437   : > { %v3732_v61 = vadd.f32 %v3731_v45, %v3655_v0  ;;  %v3799_v45 = vld [vmem:[#allocation2 + $0x98] sm:$0xff]  ;;  %v3970_v0 = vld [vmem:[%s10032_s3 + $0xc60] sm:$0xff] }
 0x438   : > { %3999 = vmatmul.f32.gmra.mxu0 %v3797_v33  ;;  %4076 = vmatmul.f32.gmra.mxu1 %v7866_v10  ;;  %v3581_v59 = vadd.f32 %v3580_v11, %v3504_v31 }
 0x439   : > { %v8263_v51 = vadd.f32 %v3732_v61, %v7830_v6  ;;  %4153 = vmatmul.f32.gmra.mxu2 %v3837_v18  ;;  %4230 = vmatmul.f32.gmra.mxu3 %v7870_v50  ;;  %v3838_v6 = vld [vmem:[#allocation2 + $0x92] sm:$0xff] }
 0x43a   : > { %4285 = vmatpush.msrb.mxu0 %v3970_v0 }
 0x43c   : > { %v3657_v35 = vpop.f32.mrf.mxu2  ;;  %v3734_v4 = vpop.f32.mrf.mxu3 }
 0x43d   : > { %v3658_v49 = vadd.f32 %v3657_v35, %v3581_v59  ;;  %v3506_v57 = vpop.f32.mrf.mxu0  ;;  %v3583_v28 = vpop.f32.mrf.mxu1 }
 0x43e   : > { %v3507_v10 = vadd.f32 %v3506_v57, %v7860_v62 }
 0x43f   : > { %v3735_v52 = vadd.f32 %v3734_v4, %v3658_v49 }
 0x440   : > { %4002 = vmatmul.f32.gmra.mxu0 %v3798_v60  ;;  %4079 = vmatmul.f32.gmra.mxu1 %v7883_v38  ;;  %v3584_v54 = vadd.f32 %v3583_v28, %v3507_v10  ;;  %v3801_v10 = vld [vmem:[#allocation2 + $0xb0] sm:$0xff] }
 0x441   : > { %v8272_v50 = vadd.f32 %v3735_v52, %v7847_v24  ;;  %4156 = vmatmul.f32.gmra.mxu2 %v3838_v6  ;;  %4233 = vmatmul.f32.gmra.mxu3 %v7887_v29  ;;  %v3839_v24 = vld [vmem:[#allocation2 + $0x9a] sm:$0xff]  ;;  %v10164_v60 = vld [vmem:[#allocation3_spill] sm:$0xff] }
 0x444   : > { %v3660_v9 = vpop.f32.mrf.mxu2  ;;  %v3737_v1 = vpop.f32.mrf.mxu3 }
 0x445   : > { %v3661_v62 = vadd.f32 %v3660_v9, %v3584_v54  ;;  %v3509_v20 = vpop.f32.mrf.mxu0  ;;  %v3586_v19 = vpop.f32.mrf.mxu1 }
 0x446   : > { %v3510_v38 = vadd.f32 %v3509_v20, %v7877_v47 }
 0x447   : > { %v3738_v23 = vadd.f32 %v3737_v1, %v3661_v62 }
 0x448   : > { %4005 = vmatmul.f32.gmra.mxu0 %v3799_v45  ;;  %4082 = vmatmul.f32.gmra.mxu1 %v7897_v32  ;;  %v3587_v55 = vadd.f32 %v3586_v19, %v3510_v38  ;;  %v3802_v19 = vld [vmem:[#allocation2 + $0xc0] sm:$0xff]  ;;  %v10169_v45 = vld [vmem:[#allocation7_spill] sm:$0xff] }
 0x449   : > { %v8281_v29 = vadd.f32 %v3738_v23, %v7864_v7  ;;  %4159 = vmatmul.f32.gmra.mxu2 %v3839_v24  ;;  %4236 = vmatmul.f32.gmra.mxu3 %v7904_v22  ;;  %v3840_v7 = vld [vmem:[#allocation2 + $0xaa] sm:$0xff]  ;;  %v3842_v23 = vld [vmem:[#allocation2 + $0xc2] sm:$0xff] }
 0x44a   : > { %v3968_v24 = vld [vmem:[%s10032_s3 + $0xc50] sm:$0xff] }
 0x44b   : > { %10162 = vst [vmem:[#allocation25_spill] sm:$0xff] %v8281_v29 }
 0x44c   : > { %v3663_v11 = vpop.f32.mrf.mxu2  ;;  %v3740_v61 = vpop.f32.mrf.mxu3 }
 0x44d   : > { %v3664_v47 = vadd.f32 %v3663_v11, %v3587_v55  ;;  %v3512_v31 = vpop.f32.mrf.mxu0  ;;  %v3589_v33 = vpop.f32.mrf.mxu1 }
 0x44e   : > { %v3513_v32 = vadd.f32 %v3512_v31, %v7891_v2 }
 0x44f   : > { %v3741_v18 = vadd.f32 %v3740_v61, %v3664_v47 }
 0x450   : > { %4008 = vmatmul.f32.gmra.mxu0 %v3800_v13  ;;  %4085 = vmatmul.f32.gmra.mxu1 %v7914_v36  ;;  %v3590_v59 = vadd.f32 %v3589_v33, %v3513_v32  ;;  %v3841_v36 = vld [vmem:[#allocation2 + $0xb2] sm:$0xff]  ;;  %v3803_v32 = vld [vmem:[#allocation2 + $0xc8] sm:$0xff] }
 0x451   : > { %v8290_v22 = vadd.f32 %v3741_v18, %v7881_v21  ;;  %4162 = vmatmul.f32.gmra.mxu2 %v3840_v7  ;;  %4239 = vmatmul.f32.gmra.mxu3 %v7918_v39  ;;  %v3969_v39 = vld [vmem:[%s10032_s3 + $0xc58] sm:$0xff]  ;;  %v3843_v13 = vld [vmem:[#allocation2 + $0xca] sm:$0xff] }
 0x452   : > { %4286 = vmatpush.msrb.mxu0 %v3969_v39  ;;  %v10171_v7 = vld [vmem:[#allocation6_spill] sm:$0xff]  ;;  %v3804_v39 = vld [vmem:[#allocation2 + $0xd8] sm:$0xff] }
 0x453   : > { %10163 = vst [vmem:[#allocation24_spill] sm:$0xff] %v8290_v22 }
 0x454   : > { %v3666_v35 = vpop.f32.mrf.mxu2  ;;  %v3743_v4 = vpop.f32.mrf.mxu3  ;;  %4287 = vmatpush.msrb.mxu0 %v3968_v24  ;;  %v10179_v24 = vld [vmem:[#allocation12_spill] sm:$0xff] }
 0x455   : > { %v3667_v49 = vadd.f32 %v3666_v35, %v3590_v59  ;;  %v3515_v57 = vpop.f32.mrf.mxu0  ;;  %v3592_v28 = vpop.f32.mrf.mxu1  ;;  %v10173_v35 = vld [vmem:[#allocation13_spill] sm:$0xff] }
 0x456   : > { %v3516_v2 = vadd.f32 %v3515_v57, %v7908_v17 }
 0x457   : > { %v3744_v52 = vadd.f32 %v3743_v4, %v3667_v49  ;;  %v3967_v4 = vld [vmem:[%s10032_s3 + $0xc48] sm:$0xff] }
 0x458   : > { %4011 = vmatmul.f32.gmra.mxu0 %v3801_v10  ;;  %4088 = vmatmul.f32.gmra.mxu1 %v7931_v16  ;;  %v3593_v6 = vadd.f32 %v3592_v28, %v3516_v2  ;;  %v10166_v16 = vld [vmem:[#allocation4_spill] sm:$0xff] }
 0x459   : > { %v8296_v21 = vadd.f32 %v3744_v52, %v10164_v60  ;;  %4165 = vmatmul.f32.gmra.mxu2 %v3841_v36  ;;  %4242 = vmatmul.f32.gmra.mxu3 %v7935_v3  ;;  %v10167_v3 = vld [vmem:[#allocation10_spill] sm:$0xff] }
 0x45a   : > { %4288 = vmatpush.msrb.mxu0 %v3967_v4 }
 0x45b   : > { %10165 = vst [vmem:[#allocation27_spill] sm:$0xff] %v8296_v21  ;;  %v3882_v21 = vld [vmem:[#allocation2 + $0xc4] sm:$0xff] }
 0x45c   : > { %v3669_v14 = vpop.f32.mrf.mxu2  ;;  %v3746_v54 = vpop.f32.mrf.mxu3 }
 0x45d   : > { %v3670_v17 = vadd.f32 %v3669_v14, %v3593_v6  ;;  %v3518_v9 = vpop.f32.mrf.mxu0  ;;  %v3595_v1 = vpop.f32.mrf.mxu1  ;;  %v10175_v6 = vld [vmem:[#allocation18_spill] sm:$0xff]  ;;  %v3844_v14 = vld [vmem:[#allocation2 + $0xda] sm:$0xff] }
 0x45e   : > { %v3519_v20 = vadd.f32 %v3518_v9, %v10166_v16  ;;  %v10178_v9 = vld [vmem:[#allocation20_spill] sm:$0xff] }
 0x45f   : > { %v3747_v62 = vadd.f32 %v3746_v54, %v3670_v17  ;;  %v10176_v54 = vld [vmem:[#allocation8_spill] sm:$0xff] }
 0x460   : > { %4014 = vmatmul.f32.gmra.mxu0 %v3802_v19  ;;  %4091 = vmatmul.f32.gmra.mxu1 %v7948_v15  ;;  %v3596_v0 = vadd.f32 %v3595_v1, %v3519_v20  ;;  %v10170_v15 = vld [vmem:[#allocation5_spill] sm:$0xff] }
 0x461   : > { %v8305_v38 = vadd.f32 %v3747_v62, %v10167_v3  ;;  %4168 = vmatmul.f32.gmra.mxu2 %v3842_v23  ;;  %4245 = vmatmul.f32.gmra.mxu3 %v10169_v45  ;;  %v3966_v1 = vld [vmem:[%s10032_s3 + $0xc40] sm:$0xff] }
 0x462   : > { %4289 = vmatpush.msrb.mxu0 %v3966_v1 }
 0x463   : > { %10168 = vst [vmem:[#allocation26_spill] sm:$0xff] %v8305_v38 }
 0x464   : > { %v3672_v55 = vpop.f32.mrf.mxu2  ;;  %v3749_v11 = vpop.f32.mrf.mxu3 }
 0x465   : > { %v3673_v61 = vadd.f32 %v3672_v55, %v3596_v0  ;;  %v3521_v47 = vpop.f32.mrf.mxu0  ;;  %v3598_v31 = vpop.f32.mrf.mxu1  ;;  %v3805_v55 = vld [vmem:[#allocation2 + $0xe0] sm:$0xff] }
 0x466   : > { %v3522_v18 = vadd.f32 %v3521_v47, %v10170_v15  ;;  %v10181_v47 = vld [vmem:[#allocation9_spill] sm:$0xff] }
 0x467   : > { %v3750_v33 = vadd.f32 %v3749_v11, %v3673_v61  ;;  %v10180_v11 = vld [vmem:[#allocation16_spill] sm:$0xff]  ;;  %v3845_v61 = vld [vmem:[#allocation2 + $0xe2] sm:$0xff] }
 0x468   : > { %4017 = vmatmul.f32.gmra.mxu0 %v3803_v32  ;;  %4094 = vmatmul.f32.gmra.mxu1 %v7965_v53  ;;  %v3599_v49 = vadd.f32 %v3598_v31, %v3522_v18  ;;  %v10174_v53 = vld [vmem:[#allocation11_spill] sm:$0xff] }
 0x469   : > { %v8314_v59 = vadd.f32 %v3750_v33, %v10171_v7  ;;  %4171 = vmatmul.f32.gmra.mxu2 %v3843_v13  ;;  %4248 = vmatmul.f32.gmra.mxu3 %v10173_v35  ;;  %v10183_v33 = vld [vmem:[#allocation30_spill] sm:$0xff] }
 0x46b   : > { %10172 = vst [vmem:[#allocation29_spill] sm:$0xff] %v8314_v59  ;;  %v4471_v59 = vld [vmem:[%s10034_s5 + $0xf0] sm:$0xff] }
 0x46c   : > { %v3675_v57 = vpop.f32.mrf.mxu2  ;;  %v3752_v28 = vpop.f32.mrf.mxu3 }
 0x46d   : > { %v3676_v52 = vadd.f32 %v3675_v57, %v3599_v49  ;;  %v3524_v2 = vpop.f32.mrf.mxu0  ;;  %v3601_v10 = vpop.f32.mrf.mxu1  ;;  %v3806_v49 = vld [vmem:[#allocation2 + $0xf0] sm:$0xff] }
 0x46e   : > { %v3525_v60 = vadd.f32 %v3524_v2, %v10174_v53  ;;  %v3846_v57 = vld [vmem:[#allocation2 + $0xf2] sm:$0xff] }
 0x46f   : > { %v3753_v36 = vadd.f32 %v3752_v28, %v3676_v52  ;;  %v3866_v28 = vld [vmem:[#allocation2 + $0xf3] sm:$0xff]  ;;  %v10186_v52 = vld [vmem:[#allocation14_spill] sm:$0xff] }
 0x470   : > { %4020 = vmatmul.f32.gmra.mxu0 %v3804_v39  ;;  %4097 = vmatmul.f32.gmra.mxu1 %v10175_v6  ;;  %v3602_v62 = vadd.f32 %v3601_v10, %v3525_v60  ;;  %v3965_v10 = vld [vmem:[%s10032_s3 + $0xc38] sm:$0xff]  ;;  %v3964_v6 = vld [vmem:[%s10032_s3 + $0xc30] sm:$0xff] }
 0x471   : > { %v8323_v17 = vadd.f32 %v3753_v36, %v10176_v54  ;;  %4174 = vmatmul.f32.gmra.mxu2 %v3844_v14  ;;  %4251 = vmatmul.f32.gmra.mxu3 %v10178_v9  ;;  %v3847_v14 = vld [vmem:[#allocation2 + $0xfa] sm:$0xff] }
 0x472   : > { %4290 = vmatpush.msrb.mxu0 %v3965_v10  ;;  %v3867_v54 = vld [vmem:[#allocation2 + $0xfb] sm:$0xff] }
 0x473   : > { %10177 = vst [vmem:[#allocation28_spill] sm:$0xff] %v8323_v17 }
 0x474   : > { %v3678_v16 = vpop.f32.mrf.mxu2  ;;  %v3755_v20 = vpop.f32.mrf.mxu3  ;;  %4291 = vmatpush.msrb.mxu0 %v3964_v6 }
 0x475   : > { %v3679_v19 = vadd.f32 %v3678_v16, %v3602_v62  ;;  %v3527_v23 = vpop.f32.mrf.mxu0  ;;  %v3604_v3 = vpop.f32.mrf.mxu1 }
 0x476   : > { %v3528_v0 = vadd.f32 %v3527_v23, %v10179_v24  ;;  %v3868_v23 = vld [vmem:[#allocation2 + $0x10b] sm:$0xff] }
 0x477   : > { %v3756_v45 = vadd.f32 %v3755_v20, %v3679_v19  ;;  %v3808_v20 = vld [vmem:[#allocation2 + $0x108] sm:$0xff] }
 0x478   : > { %4023 = vmatmul.f32.gmra.mxu0 %v3805_v55  ;;  %4100 = vmatmul.f32.gmra.mxu1 %v10180_v11  ;;  %v3605_v15 = vadd.f32 %v3604_v3, %v3528_v0  ;;  %v3848_v19 = vld [vmem:[#allocation2 + $0x10a] sm:$0xff]  ;;  %v3849_v11 = vld [vmem:[#allocation2 + $0x112] sm:$0xff] }
 0x479   : > { %v8332_v31 = vadd.f32 %v3756_v45, %v10181_v47  ;;  %4177 = vmatmul.f32.gmra.mxu2 %v3845_v61  ;;  %4254 = vmatmul.f32.gmra.mxu3 %v10183_v33  ;;  %v3809_v55 = vld [vmem:[#allocation2 + $0x110] sm:$0xff]  ;;  %v3961_v47 = vld [vmem:[%s10032_s3 + $0xc18] sm:$0xff] }
 0x47a   : > { %v3869_v61 = vld [vmem:[#allocation2 + $0x113] sm:$0xff] }
 0x47b   : > { %10182 = vst [vmem:[#allocation3_spill] sm:$0xff] %v8332_v31  ;;  %v3881_v31 = vld [vmem:[#allocation2 + $0xb4] sm:$0xff] }
 0x47c   : > { %v3681_v18 = vpop.f32.mrf.mxu2  ;;  %v3758_v32 = vpop.f32.mrf.mxu3 }
 0x47d   : > { %v3682_v13 = vadd.f32 %v3681_v18, %v3605_v15  ;;  %v8335_v7 = vpop.f32.mrf.mxu0  ;;  %v8337_v35 = vpop.f32.mrf.mxu1 }
 0x47e   : > { %10184 = vst [vmem:[#allocation4_spill] sm:$0xff] %v8335_v7  ;;  %v4488_v7 = vld [vmem:[%s10034_s5 + $0x178] sm:$0xff] }
 0x47f   : > { %10185 = vst [vmem:[#allocation10_spill] sm:$0xff] %v8337_v35  ;;  %v3759_v4 = vadd.f32 %v3758_v32, %v3682_v13  ;;  %v3810_v13 = vld [vmem:[#allocation2 + $0x120] sm:$0xff]  ;;  %4561 = vmatpush.msrb.mxu3 %v4488_v7  ;;  %v4455_v7 = vld [vmem:[%s10034_s5 + $0x70] sm:$0xff] }
 0x480   : > { %4026 = vmatmul.f32.gmra.mxu0 %v3806_v49  ;;  %4103 = vmatmul.f32.gmra.mxu1 %v8047_v8  ;;  %v3807_v8 = vld [vmem:[#allocation2 + $0xf8] sm:$0xff]  ;;  %v3958_v49 = vld [vmem:[%s10032_s3 + $0xc00] sm:$0xff] }
 0x481   : > { %v8341_v2 = vadd.f32 %v3759_v4, %v10186_v52  ;;  %4180 = vmatmul.f32.gmra.mxu2 %v3846_v57  ;;  %4257 = vmatmul.f32.gmra.mxu3 %v3866_v28  ;;  %v3959_v4 = vld [vmem:[%s10032_s3 + $0xc08] sm:$0xff] }
 0x483   : > { %10187 = vst [vmem:[#allocation7_spill] sm:$0xff] %v8341_v2 }
 0x484   : > { %v8346_v36 = vpop.f32.mrf.mxu2  ;;  %v8348_v53 = vpop.f32.mrf.mxu3 }
 0x485   : > { %10188 = vst [vmem:[#allocation5_spill] sm:$0xff] %v8346_v36  ;;  %v8350_v60 = vpop.f32.mrf.mxu0  ;;  %v8352_v39 = vpop.f32.mrf.mxu1 }
 0x486   : > { %10189 = vst [vmem:[#allocation6_spill] sm:$0xff] %v8348_v53  ;;  %v3878_v53 = vld [vmem:[#allocation2 + $0x94] sm:$0xff] }
 0x487   : > { %10190 = vst [vmem:[#allocation13_spill] sm:$0xff] %v8350_v60 }
 0x488   : > { %10191 = vst [vmem:[#allocation11_spill] sm:$0xff] %v8352_v39  ;;  %4029 = vmatmul.f32.gmra.mxu0 %v3807_v8  ;;  %4106 = vmatmul.f32.gmra.mxu1 %v8089_v26  ;;  %v3963_v26 = vld [vmem:[%s10032_s3 + $0xc28] sm:$0xff] }
 0x489   : > { %4183 = vmatmul.f32.gmra.mxu2 %v3847_v14  ;;  %4260 = vmatmul.f32.gmra.mxu3 %v3867_v54  ;;  %v3812_v14 = vld [vmem:[#allocation2 + $0x138] sm:$0xff]  ;;  %v3880_v39 = vld [vmem:[#allocation2 + $0xac] sm:$0xff] }
 0x48a   : > { %4292 = vmatpush.msrb.mxu0 %v3963_v26  ;;  %v3832_v54 = vld [vmem:[#allocation2 + $0x139] sm:$0xff] }
 0x48b   : > { %v3813_v26 = vld [vmem:[#allocation2 + $0x140] sm:$0xff] }
 0x48c   : > { %v8358_v9 = vpop.f32.mrf.mxu2  ;;  %v8360_v1 = vpop.f32.mrf.mxu3 }
 0x48d   : > { %10192 = vst [vmem:[#allocation18_spill] sm:$0xff] %v8358_v9  ;;  %v8362_v62 = vpop.f32.mrf.mxu0  ;;  %v8364_v16 = vpop.f32.mrf.mxu1 }
 0x48e   : > { %10193 = vst [vmem:[#allocation8_spill] sm:$0xff] %v8360_v1 }
 0x48f   : > { %10194 = vst [vmem:[#allocation20_spill] sm:$0xff] %v8362_v62  ;;  %v3879_v62 = vld [vmem:[#allocation2 + $0x9c] sm:$0xff] }
 0x490   : > { %10195 = vst [vmem:[#allocation12_spill] sm:$0xff] %v8364_v16  ;;  %4032 = vmatmul.f32.gmra.mxu0 %v3808_v20  ;;  %4109 = vmatmul.f32.gmra.mxu1 %v8134_v12  ;;  %v3962_v12 = vld [vmem:[%s10032_s3 + $0xc20] sm:$0xff] }
 0x491   : > { %4186 = vmatmul.f32.gmra.mxu2 %v3848_v19  ;;  %4263 = vmatmul.f32.gmra.mxu3 %v3868_v23  ;;  %v3852_v20 = vld [vmem:[#allocation2 + $0x13a] sm:$0xff] }
 0x492   : > { %4293 = vmatpush.msrb.mxu0 %v3962_v12  ;;  %v3872_v19 = vld [vmem:[#allocation2 + $0x13b] sm:$0xff] }
 0x493   : > { %v3853_v12 = vld [vmem:[#allocation2 + $0x142] sm:$0xff] }
 0x494   : > { %v8370_v3 = vpop.f32.mrf.mxu2  ;;  %v8372_v45 = vpop.f32.mrf.mxu3  ;;  %4294 = vmatpush.msrb.mxu0 %v3961_v47 }
 0x495   : > { %10196 = vst [vmem:[#allocation16_spill] sm:$0xff] %v8370_v3  ;;  %v8374_v24 = vpop.f32.mrf.mxu0  ;;  %v8376_v0 = vpop.f32.mrf.mxu1 }
 0x496   : > { %10197 = vst [vmem:[#allocation9_spill] sm:$0xff] %v8372_v45  ;;  %v3877_v45 = vld [vmem:[#allocation2 + $0x84] sm:$0xff] }
 0x497   : > { %10198 = vst [vmem:[#allocation30_spill] sm:$0xff] %v8374_v24 }
 0x498   : > { %10199 = vst [vmem:[#allocation14_spill] sm:$0xff] %v8376_v0  ;;  %4035 = vmatmul.f32.gmra.mxu0 %v3809_v55  ;;  %4112 = vmatmul.f32.gmra.mxu1 %v8177_v5  ;;  %v3960_v5 = vld [vmem:[%s10032_s3 + $0xc10] sm:$0xff]  ;;  %v3833_v55 = vld [vmem:[#allocation2 + $0x141] sm:$0xff] }
 0x499   : > { %4189 = vmatmul.f32.gmra.mxu2 %v3849_v11  ;;  %4266 = vmatmul.f32.gmra.mxu3 %v3869_v61  ;;  %v3873_v11 = vld [vmem:[#allocation2 + $0x143] sm:$0xff] }
 0x49a   : > { %4295 = vmatpush.msrb.mxu0 %v3960_v5 }
 0x49c   : > { %v8385_v33 = vpop.f32.mrf.mxu2  ;;  %v8387_v15 = vpop.f32.mrf.mxu3  ;;  %4296 = vmatpush.msrb.mxu0 %v3959_v4  ;;  %v3874_v4 = vld [vmem:[#allocation2 + $0x64] sm:$0xff] }
 0x49d   : > { %10200 = vst [vmem:[#allocation33_spill] sm:$0xff] %v8385_v33  ;;  %v8389_v18 = vpop.f32.mrf.mxu0  ;;  %v8391_v32 = vpop.f32.mrf.mxu1 }
 0x49e   : > { %10201 = vst [vmem:[#allocation34_spill] sm:$0xff] %v8387_v15  ;;  %4297 = vmatpush.msrb.mxu0 %v3958_v49 }
 0x4a0   : > { %4038 = vmatmul.f32.gmra.mxu0 %v3810_v13  ;;  %4115 = vmatmul.f32.gmra.mxu1 %v8214_v27 }
 0x4a1   : > { %4192 = vmatmul.f32.gmra.mxu2 %v8216_v46  ;;  %4269 = vmatmul.f32.gmra.mxu3 %v8220_v44  ;;  %v3811_v46 = vld [vmem:[#allocation2 + $0x128] sm:$0xff] }
 0x4a4   : > { %v8405_v57 = vpop.f32.mrf.mxu2  ;;  %v8407_v28 = vpop.f32.mrf.mxu3 }
 0x4a5   : > { %v8409_v52 = vpop.f32.mrf.mxu0  ;;  %v8411_v27 = vpop.f32.mrf.mxu1 }
 0x4a8   : > { %4041 = vmatmul.f32.gmra.mxu0 %v3811_v46  ;;  %4118 = vmatmul.f32.gmra.mxu1 %v8227_v48 }
 0x4a9   : > { %4195 = vmatmul.f32.gmra.mxu2 %v8229_v41  ;;  %4272 = vmatmul.f32.gmra.mxu3 %v8233_v56 }
 0x4ac   : > { %v8416_v44 = vpop.f32.mrf.mxu2  ;;  %v8418_v10 = vpop.f32.mrf.mxu3 }
 0x4ad   : > { %v8420_v8 = vpop.f32.mrf.mxu0  ;;  %v8422_v6 = vpop.f32.mrf.mxu1 }
 0x4b0   : > { %4044 = vmatmul.f32.gmra.mxu0 %v3812_v14  ;;  %4121 = vmatmul.f32.gmra.mxu1 %v3832_v54 }
 0x4b1   : > { %4198 = vmatmul.f32.gmra.mxu2 %v3852_v20  ;;  %4275 = vmatmul.f32.gmra.mxu3 %v3872_v19  ;;  %v3875_v20 = vld [vmem:[#allocation2 + $0x6c] sm:$0xff] }
 0x4b4   : > { %v8424_v48 = vpop.f32.mrf.mxu2  ;;  %v8426_v41 = vpop.f32.mrf.mxu3 }
 0x4b5   : > { %v8428_v56 = vpop.f32.mrf.mxu0  ;;  %v8430_v23 = vpop.f32.mrf.mxu1 }
 0x4b8   : > { %4047 = vmatmul.f32.gmra.mxu0 %v3813_v26  ;;  %4124 = vmatmul.f32.gmra.mxu1 %v3833_v55 }
 0x4b9   : > { %4201 = vmatmul.f32.gmra.mxu2 %v3853_v12  ;;  %4278 = vmatmul.f32.gmra.mxu3 %v3873_v11  ;;  %v3876_v11 = vld [vmem:[#allocation2 + $0x7c] sm:$0xff] }
 0x4bc   : > { %v8432_v61 = vpop.f32.mrf.mxu2  ;;  %v8434_v47 = vpop.f32.mrf.mxu3 }
 0x4bd   : > { %v8436_v13 = vpop.f32.mrf.mxu0  ;;  %v8438_v5 = vpop.f32.mrf.mxu1 }
 0x4c0   : > { %4298 = vmatmul.f32.vlgmr.msrb.gmra.mxu0 %v3874_v4 }
 0x4c4   : > { %v8440_v49 = vpop.f32.mrf.mxu2  ;;  %v8442_v46 = vpop.f32.mrf.mxu3 }
 0x4c5   : > { %v8444_v14 = vpop.f32.mrf.mxu0  ;;  %v8446_v54 = vpop.f32.mrf.mxu1 }
 0x4c8   : > { %4301 = vmatmul.f32.gmra.mxu0 %v3875_v20 }
 0x4cc   : > { %v8448_v19 = vpop.f32.mrf.mxu2  ;;  %v8450_v26 = vpop.f32.mrf.mxu3 }
 0x4cd   : > { %v8452_v55 = vpop.f32.mrf.mxu0  ;;  %v8454_v12 = vpop.f32.mrf.mxu1 }
 0x4d0   : > { %4304 = vmatmul.f32.gmra.mxu0 %v3876_v11 }
 0x4d4   : > { %v8456_v4 = vpop.f32.mrf.mxu2  ;;  %v8458_v15 = vpop.f32.mrf.mxu3 }
 0x4d5   : > { %v8460_v33 = vpop.f32.mrf.mxu0  ;;  %v8462_v0 = vpop.f32.mrf.mxu1 }
 0x4d8   : > { %4307 = vmatmul.f32.gmra.mxu0 %v3877_v45 }
 0x4dc   : > { %v8464_v20 = vpop.f32.mrf.mxu2  ;;  %v8466_v24 = vpop.f32.mrf.mxu3 }
 0x4dd   : > { %v8468_v3 = vpop.f32.mrf.mxu0  ;;  %v8470_v58 = vpop.f32.mrf.mxu1 }
 0x4e0   : > { %4310 = vmatmul.f32.gmra.mxu0 %v3878_v53  ;;  %v4472_v53 = vld [vmem:[%s10034_s5 + $0xf8] sm:$0xff] }
 0x4e1   : > { %4541 = vmatpush.msrb.mxu2 %v4472_v53 }
 0x4e3   : > { %4542 = vmatpush.msrb.mxu2 %v4471_v59  ;;  %v4486_v59 = vld [vmem:[%s10034_s5 + $0x168] sm:$0xff] }
 0x4e4   : > { %v8472_v11 = vpop.f32.mrf.mxu2  ;;  %v8474_v16 = vpop.f32.mrf.mxu3 }
 0x4e5   : > { %v8476_v1 = vpop.f32.mrf.mxu0  ;;  %v8478_v36 = vpop.f32.mrf.mxu1 }
 0x4e8   : > { %4313 = vmatmul.f32.gmra.mxu0 %v3879_v62  ;;  %v4456_v62 = vld [vmem:[%s10034_s5 + $0x78] sm:$0xff] }
 0x4e9   : > { %4521 = vmatpush.msrb.mxu1 %v4456_v62 }
 0x4eb   : > { %4522 = vmatpush.msrb.mxu1 %v4455_v7 }
 0x4ec   : > { %v8480_v45 = vpop.f32.mrf.mxu2  ;;  %v8482_v42 = vpop.f32.mrf.mxu3 }
 0x4ed   : > { %10202 = vst [vmem:[#allocation35_spill] sm:$0xff] %v8482_v42  ;;  %v8484_v35 = vpop.f32.mrf.mxu0  ;;  %v8486_v9 = vpop.f32.mrf.mxu1 }
 0x4f0   : > { %4316 = vmatmul.f32.gmra.mxu0 %v3880_v39  ;;  %v4487_v39 = vld [vmem:[%s10034_s5 + $0x170] sm:$0xff] }
 0x4f1   : > { %4562 = vmatpush.msrb.mxu3 %v4487_v39  ;;  %v4454_v39 = vld [vmem:[%s10034_s5 + $0x68] sm:$0xff] }
 0x4f2   : > { %4523 = vmatpush.msrb.mxu1 %v4454_v39  ;;  %v4485_v39 = vld [vmem:[%s10034_s5 + $0x160] sm:$0xff] }
 0x4f3   : > { %4563 = vmatpush.msrb.mxu3 %v4486_v59  ;;  %v4469_v59 = vld [vmem:[%s10034_s5 + $0xe0] sm:$0xff] }
 0x4f4   : > { %v8497_v2 = vpop.f32.mrf.mxu2  ;;  %v8499_v60 = vpop.f32.mrf.mxu3 }
 0x4f5   : > { %v8501_v34 = vpop.f32.mrf.mxu0  ;;  %v8503_v17 = vpop.f32.mrf.mxu1  ;;  %4564 = vmatpush.msrb.mxu3 %v4485_v39 }
 0x4f6   : > { %10203 = vst [vmem:[#allocation36_spill] sm:$0xff] %v8501_v34  ;;  %v4651_v34 = vld [vmem:[%s10034_s5 + $0x2e0] sm:$0xff] }
 0x4f7   : > { %10204 = vst [vmem:[#allocation37_spill] sm:$0xff] %v8503_v17  ;;  %v3884_v17 = vld [vmem:[#allocation2 + $0xdc] sm:$0xff] }
 0x4f8   : > { %4319 = vmatmul.f32.gmra.mxu0 %v3881_v31  ;;  %v4470_v31 = vld [vmem:[%s10034_s5 + $0xe8] sm:$0xff] }
 0x4f9   : > { %4543 = vmatpush.msrb.mxu2 %v4470_v31  ;;  %v4453_v31 = vld [vmem:[%s10034_s5 + $0x60] sm:$0xff] }
 0x4fa   : > { %4524 = vmatpush.msrb.mxu1 %v4453_v31  ;;  %v4483_v31 = vld [vmem:[%s10034_s5 + $0x150] sm:$0xff] }
 0x4fb   : > { %4544 = vmatpush.msrb.mxu2 %v4469_v59  ;;  %v4450_v59 = vld [vmem:[%s10034_s5 + $0x48] sm:$0xff] }
 0x4fc   : > { %v8514_v53 = vpop.f32.mrf.mxu2  ;;  %v8516_v62 = vpop.f32.mrf.mxu3 }
 0x4fd   : > { %10205 = vst [vmem:[#allocation38_spill] sm:$0xff] %v8514_v53  ;;  %v8518_v38 = vpop.f32.mrf.mxu0  ;;  %v8520_v22 = vpop.f32.mrf.mxu1  ;;  %v4452_v53 = vld [vmem:[%s10034_s5 + $0x58] sm:$0xff] }
 0x4fe   : > { %10206 = vst [vmem:[#allocation39_spill] sm:$0xff] %v8516_v62  ;;  %4525 = vmatpush.msrb.mxu1 %v4452_v53 }
 0x4ff   : > { %10207 = vst [vmem:[#allocation40_spill] sm:$0xff] %v8518_v38 }
 0x500   : > { %10208 = vst [vmem:[#allocation41_spill] sm:$0xff] %v8520_v22  ;;  %4322 = vmatmul.f32.gmra.mxu0 %v3882_v21  ;;  %v3883_v21 = vld [vmem:[#allocation2 + $0xcc] sm:$0xff] }
 0x504   : > { %v8531_v7 = vpop.f32.mrf.mxu2  ;;  %v8533_v22 = vpop.f32.mrf.mxu3 }
 0x505   : > { %10209 = vst [vmem:[#allocation42_spill] sm:$0xff] %v8531_v7  ;;  %v8535_v38 = vpop.f32.mrf.mxu0  ;;  %v8537_v62 = vpop.f32.mrf.mxu1 }
 0x506   : > { %10210 = vst [vmem:[#allocation43_spill] sm:$0xff] %v8533_v22  ;;  %v4484_v22 = vld [vmem:[%s10034_s5 + $0x158] sm:$0xff] }
 0x507   : > { %10211 = vst [vmem:[#allocation44_spill] sm:$0xff] %v8535_v38  ;;  %v4451_v38 = vld [vmem:[%s10034_s5 + $0x50] sm:$0xff]  ;;  %4565 = vmatpush.msrb.mxu3 %v4484_v22  ;;  %v4449_v22 = vld [vmem:[%s10034_s5 + $0x40] sm:$0xff] }
 0x508   : > { %10212 = vst [vmem:[#allocation45_spill] sm:$0xff] %v8537_v62  ;;  %4325 = vmatmul.f32.gmra.mxu0 %v3883_v21  ;;  %v4468_v62 = vld [vmem:[%s10034_s5 + $0xd8] sm:$0xff]  ;;  %v4467_v21 = vld [vmem:[%s10034_s5 + $0xd0] sm:$0xff]  ;;  %4526 = vmatpush.msrb.mxu1 %v4451_v38  ;;  %v4482_v38 = vld [vmem:[%s10034_s5 + $0x148] sm:$0xff] }
 0x509   : > { %4545 = vmatpush.msrb.mxu2 %v4468_v62  ;;  %4566 = vmatpush.msrb.mxu3 %v4483_v31  ;;  %v4466_v62 = vld [vmem:[%s10034_s5 + $0xc8] sm:$0xff]  ;;  %v4465_v31 = vld [vmem:[%s10034_s5 + $0xc0] sm:$0xff] }
 0x50a   : > { %4527 = vmatpush.msrb.mxu1 %v4450_v59  ;;  %v4481_v59 = vld [vmem:[%s10034_s5 + $0x140] sm:$0xff] }
 0x50b   : > { %4546 = vmatpush.msrb.mxu2 %v4467_v21  ;;  %v4448_v21 = vld [vmem:[%s10034_s5 + $0x38] sm:$0xff]  ;;  %4567 = vmatpush.msrb.mxu3 %v4482_v38 }
 0x50c   : > { %v8569_v39 = vpop.f32.mrf.mxu2  ;;  %v8571_v7 = vpop.f32.mrf.mxu3  ;;  %4528 = vmatpush.msrb.mxu1 %v4449_v22  ;;  %v4480_v22 = vld [vmem:[%s10034_s5 + $0x138] sm:$0xff] }
 0x50d   : > { %10213 = vst [vmem:[#allocation46_spill] sm:$0xff] %v8569_v39  ;;  %v8573_v53 = vpop.f32.mrf.mxu0  ;;  %v8575_v42 = vpop.f32.mrf.mxu1  ;;  %4547 = vmatpush.msrb.mxu2 %v4466_v62  ;;  %4568 = vmatpush.msrb.mxu3 %v4481_v59  ;;  %v4446_v62 = vld [vmem:[%s10034_s5 + $0x28] sm:$0xff] }
 0x50e   : > { %10214 = vst [vmem:[#allocation47_spill] sm:$0xff] %v8571_v7  ;;  %v4447_v7 = vld [vmem:[%s10034_s5 + $0x30] sm:$0xff]  ;;  %4529 = vmatpush.msrb.mxu1 %v4448_v21  ;;  %v3885_v59 = vld [vmem:[#allocation2 + $0xe4] sm:$0xff] }
 0x50f   : > { %10215 = vst [vmem:[#allocation48_spill] sm:$0xff] %v8573_v53  ;;  %4548 = vmatpush.msrb.mxu2 %v4465_v31  ;;  %v4463_v21 = vld [vmem:[%s10034_s5 + $0xb0] sm:$0xff]  ;;  %4569 = vmatpush.msrb.mxu3 %v4480_v22  ;;  %v4477_v22 = vld [vmem:[%s10034_s5 + $0x120] sm:$0xff] }
 0x510   : > { %10216 = vst [vmem:[#allocation49_spill] sm:$0xff] %v8575_v42  ;;  %4328 = vmatmul.f32.gmra.mxu0 %v3884_v17  ;;  %v4464_v17 = vld [vmem:[%s10034_s5 + $0xb8] sm:$0xff]  ;;  %4530 = vmatpush.msrb.mxu1 %v4447_v7  ;;  %v4479_v42 = vld [vmem:[%s10034_s5 + $0x130] sm:$0xff]  ;;  %v4445_v7 = vld [vmem:[%s10034_s5 + $0x20] sm:$0xff] }
 0x511   : > { %4549 = vmatpush.msrb.mxu2 %v4464_v17  ;;  %4570 = vmatpush.msrb.mxu3 %v4479_v42  ;;  %v4444_v17 = vld [vmem:[%s10034_s5 + $0x18] sm:$0xff]  ;;  %v4461_v42 = vld [vmem:[%s10034_s5 + $0xa0] sm:$0xff] }
 0x512   : > { %4531 = vmatpush.msrb.mxu1 %v4446_v62  ;;  %v4443_v62 = vld [vmem:[%s10034_s5 + $0x10] sm:$0xff] }
 0x513   : > { %4550 = vmatpush.msrb.mxu2 %v4463_v21  ;;  %v4460_v21 = vld [vmem:[%s10034_s5 + $0x98] sm:$0xff] }
 0x514   : > { %v8607_v38 = vpop.f32.mrf.mxu2  ;;  %v8609_v39 = vpop.f32.mrf.mxu3  ;;  %4532 = vmatpush.msrb.mxu1 %v4445_v7 }
 0x515   : > { %10217 = vst [vmem:[#allocation50_spill] sm:$0xff] %v8607_v38  ;;  %v8617_v53 = vpop.f32.mrf.mxu0  ;;  %v8619_v31 = vpop.f32.mrf.mxu1 }
 0x516   : > { %10218 = vst [vmem:[#allocation51_spill] sm:$0xff] %v8609_v39  ;;  %v4462_v39 = vld [vmem:[%s10034_s5 + $0xa8] sm:$0xff]  ;;  %4533 = vmatpush.msrb.mxu1 %v4444_v17  ;;  %v4459_v17 = vld [vmem:[%s10034_s5 + $0x90] sm:$0xff] }
 0x517   : > { %10219 = vst [vmem:[#allocation52_spill] sm:$0xff] %v8617_v53  ;;  %v4478_v53 = vld [vmem:[%s10034_s5 + $0x128] sm:$0xff]  ;;  %4551 = vmatpush.msrb.mxu2 %v4462_v39 }
 0x518   : > { %10220 = vst [vmem:[#allocation53_spill] sm:$0xff] %v8619_v31  ;;  %4331 = vmatmul.f32.gmra.mxu0 %v3885_v59  ;;  %4571 = vmatpush.msrb.mxu3 %v4478_v53  ;;  %v4476_v59 = vld [vmem:[%s10034_s5 + $0x118] sm:$0xff]  ;;  %v4442_v39 = vld [vmem:[%s10034_s5 + $0x8] sm:$0xff]  ;;  %v4475_v31 = vld [vmem:[%s10034_s5 + $0x110] sm:$0xff] }
 0x519   : > { %4552 = vmatpush.msrb.mxu2 %v4461_v42  ;;  %4534 = vmatpush.msrb.mxu1 %v4443_v62  ;;  %v4441_v62 = vld [vmem:[%s10034_s5] sm:$0xff] }
 0x51a   : > { %4572 = vmatpush.msrb.mxu3 %v4477_v22  ;;  %v3886_v22 = vld [vmem:[#allocation2 + $0xf4] sm:$0xff] }
 0x51b   : > { %4553 = vmatpush.msrb.mxu2 %v4460_v21  ;;  %4535 = vmatpush.msrb.mxu1 %v4442_v39  ;;  %v4457_v39 = vld [vmem:[%s10034_s5 + $0x80] sm:$0xff] }
 0x51c   : > { %v8651_v53 = vpop.f32.mrf.mxu2  ;;  %v8653_v7 = vpop.f32.mrf.mxu3  ;;  %4573 = vmatpush.msrb.mxu3 %v4476_v59 }
 0x51d   : > { %10221 = vst [vmem:[#allocation54_spill] sm:$0xff] %v8651_v53  ;;  %v8661_v38 = vpop.f32.mrf.mxu0  ;;  %v8663_v42 = vpop.f32.mrf.mxu1  ;;  %4554 = vmatpush.msrb.mxu2 %v4459_v17  ;;  %4536 = vmatpush.msrb.mxu1 %v4441_v62  ;;  %v4473_v17 = vld [vmem:[%s10034_s5 + $0x100] sm:$0xff]  ;;  %v4654_v62 = vld [vmem:[%s10034_s5 + $0x2f8] sm:$0xff]  ;;  %v4652_v53 = vld [vmem:[%s10034_s5 + $0x2e8] sm:$0xff] }
 0x51e   : > { %10222 = vst [vmem:[#allocation55_spill] sm:$0xff] %v8653_v7  ;;  %4574 = vmatpush.msrb.mxu3 %v4475_v31  ;;  %v4458_v7 = vld [vmem:[%s10034_s5 + $0x88] sm:$0xff]  ;;  %v4504_v31 = vld [vmem:[%s10034_s5 + $0x1f8] sm:$0xff] }
 0x51f   : > { %10223 = vst [vmem:[#allocation56_spill] sm:$0xff] %v8661_v38  ;;  %v4474_v38 = vld [vmem:[%s10034_s5 + $0x108] sm:$0xff]  ;;  %4555 = vmatpush.msrb.mxu2 %v4458_v7  ;;  %4581 = vmatpush.msra.mxu1 %v4504_v31  ;;  %v4520_v7 = vld [vmem:[%s10034_s5 + $0x278] sm:$0xff]  ;;  %v4519_v31 = vld [vmem:[%s10034_s5 + $0x270] sm:$0xff] }
 0x520   : > { %10224 = vst [vmem:[#allocation57_spill] sm:$0xff] %v8663_v42  ;;  %4334 = vmatmul.f32.gmra.mxu0 %v3886_v22  ;;  %4575 = vmatpush.msrb.mxu3 %v4474_v38  ;;  %v4503_v38 = vld [vmem:[%s10034_s5 + $0x1f0] sm:$0xff]  ;;  %v4501_v42 = vld [vmem:[%s10034_s5 + $0x1e0] sm:$0xff] }
 0x521   : > { %4556 = vmatpush.msrb.mxu2 %v4457_v39  ;;  %v4653_v39 = vld [vmem:[%s10034_s5 + $0x2f0] sm:$0xff]  ;;  %4582 = vmatpush.msra.mxu1 %v4503_v38 }
 0x522   : > { %4576 = vmatpush.msrb.mxu3 %v4473_v17  ;;  %v4518_v17 = vld [vmem:[%s10034_s5 + $0x268] sm:$0xff] }
 0x523   : > { %4601 = vmatpush.msra.mxu2 %v4520_v7 }
 0x524   : > { %v8674_v21 = vpop.f32.mrf.mxu2  ;;  %v8676_v59 = vpop.f32.mrf.mxu3  ;;  %4719 = vmatpush.msra.mxu3 %v4654_v62 }
 0x525   : > { %10225 = vst [vmem:[#allocation58_spill] sm:$0xff] %v8674_v21  ;;  %v4042_v22 = vpop.f32.mrf.mxu0  ;;  %v3887_v21 = vld [vmem:[#allocation2 + $0xfc] sm:$0xff]  ;;  %v4119_v7 = vpop.f32.mrf.mxu1  ;;  %4602 = vmatpush.msra.mxu2 %v4519_v31 }
 0x526   : > { %10226 = vst [vmem:[#allocation59_spill] sm:$0xff] %v8676_v59  ;;  %v4502_v59 = vld [vmem:[%s10034_s5 + $0x1e8] sm:$0xff]  ;;  %4720 = vmatpush.msra.mxu3 %v4653_v39  ;;  %v4120_v38 = vadd.f32 %v4119_v7, %v4042_v22  ;;  %v4517_v31 = vld [vmem:[%s10034_s5 + $0x260] sm:$0xff]  ;;  %v4650_v22 = vld [vmem:[%s10034_s5 + $0x2d8] sm:$0xff] }
 0x527   : > { %4583 = vmatpush.msra.mxu1 %v4502_v59  ;;  %4603 = vmatpush.msra.mxu2 %v4518_v17  ;;  %v4498_v17 = vld [vmem:[%s10034_s5 + $0x1c8] sm:$0xff]  ;;  %v4515_v7 = vld [vmem:[%s10034_s5 + $0x250] sm:$0xff] }
 0x528   : > { %4337 = vmatmul.f32.gmra.mxu0 %v3887_v21  ;;  %4721 = vmatpush.msra.mxu3 %v4652_v53  ;;  %v4500_v21 = vld [vmem:[%s10034_s5 + $0x1d8] sm:$0xff]  ;;  %v4499_v53 = vld [vmem:[%s10034_s5 + $0x1d0] sm:$0xff] }
 0x529   : > { %4584 = vmatpush.msra.mxu1 %v4501_v42  ;;  %4604 = vmatpush.msra.mxu2 %v4517_v31  ;;  %v4516_v42 = vld [vmem:[%s10034_s5 + $0x258] sm:$0xff]  ;;  %v4514_v31 = vld [vmem:[%s10034_s5 + $0x248] sm:$0xff] }
 0x52a   : > { %4722 = vmatpush.msra.mxu3 %v4651_v34  ;;  %v4497_v34 = vld [vmem:[%s10034_s5 + $0x1c0] sm:$0xff] }
 0x52b   : > { %4585 = vmatpush.msra.mxu1 %v4500_v21  ;;  %4605 = vmatpush.msra.mxu2 %v4516_v42  ;;  %v4649_v21 = vld [vmem:[%s10034_s5 + $0x2d0] sm:$0xff] }
 0x52c   : > { %v4196_v62 = vpop.f32.mrf.mxu2  ;;  %v4273_v39 = vpop.f32.mrf.mxu3  ;;  %4723 = vmatpush.msra.mxu3 %v4650_v22  ;;  %v3889_v42 = vld [vmem:[#allocation2 + $0x114] sm:$0xff] }
 0x52d   : > { %v4197_v29 = vadd.f32 %v4196_v62, %v4120_v38  ;;  %v8723_v59 = vpop.f32.mrf.mxu0  ;;  %v3888_v62 = vld [vmem:[#allocation2 + $0x10c] sm:$0xff]  ;;  %4586 = vmatpush.msra.mxu1 %v4499_v53  ;;  %4606 = vmatpush.msra.mxu2 %v4515_v7  ;;  %v4496_v22 = vld [vmem:[%s10034_s5 + $0x1b8] sm:$0xff] }
 0x52e   : > { %4724 = vmatpush.msra.mxu3 %v4649_v21  ;;  %v4495_v7 = vld [vmem:[%s10034_s5 + $0x1b0] sm:$0xff]  ;;  %v4646_v21 = vld [vmem:[%s10034_s5 + $0x2b8] sm:$0xff] }
 0x52f   : > { %v8740_v38 = vadd.f32 %v4273_v39, %v4197_v29  ;;  %4587 = vmatpush.msra.mxu1 %v4498_v17  ;;  %v4648_v29 = vld [vmem:[%s10034_s5 + $0x2c8] sm:$0xff]  ;;  %4607 = vmatpush.msra.mxu2 %v4514_v31  ;;  %v4513_v39 = vld [vmem:[%s10034_s5 + $0x240] sm:$0xff]  ;;  %v4511_v31 = vld [vmem:[%s10034_s5 + $0x230] sm:$0xff] }
 0x530   : > { %4340 = vmatmul.f32.gmra.mxu0 %v3888_v62  ;;  %4725 = vmatpush.msra.mxu3 %v4648_v29  ;;  %v4647_v17 = vld [vmem:[%s10034_s5 + $0x2c0] sm:$0xff]  ;;  %v4512_v62 = vld [vmem:[%s10034_s5 + $0x238] sm:$0xff] }
 0x531   : > { %4588 = vmatpush.msra.mxu1 %v4497_v34  ;;  %4608 = vmatpush.msra.mxu2 %v4513_v39  ;;  %v4494_v34 = vld [vmem:[%s10034_s5 + $0x1a8] sm:$0xff] }
 0x532   : > { %4726 = vmatpush.msra.mxu3 %v4647_v17  ;;  %v4510_v39 = vld [vmem:[%s10034_s5 + $0x228] sm:$0xff] }
 0x533   : > { %4589 = vmatpush.msra.mxu1 %v4496_v22  ;;  %4609 = vmatpush.msra.mxu2 %v4512_v62  ;;  %v4493_v22 = vld [vmem:[%s10034_s5 + $0x1a0] sm:$0xff]  ;;  %v4069_v62 = vadd.f32 %v8391_v32, %v8389_v18  ;;  %v5050_v18 = vld [vmem:[%s10034_s5 + $0x7f8] sm:$0xff]  ;;  %v4491_v32 = vld [vmem:[%s10034_s5 + $0x190] sm:$0xff] }
 0x534   : > { %4727 = vmatpush.msra.mxu3 %v4646_v21  ;;  %v3890_v17 = vld [vmem:[#allocation2 + $0x124] sm:$0xff]  ;;  %5115 = vmatpush.msra.mxu0 %v5050_v18  ;;  %v3891_v18 = vld [vmem:[#allocation2 + $0x12c] sm:$0xff] }
 0x535   : > { %v8754_v53 = vpop.f32.mrf.mxu0  ;;  %4590 = vmatpush.msra.mxu1 %v4495_v7  ;;  %4610 = vmatpush.msra.mxu2 %v4511_v31  ;;  %v4644_v7 = vld [vmem:[%s10034_s5 + $0x2a8] sm:$0xff]  ;;  %v4146_v21 = vadd.f32 %v8405_v57, %v4069_v62  ;;  %v4643_v31 = vld [vmem:[%s10034_s5 + $0x2a0] sm:$0xff]  ;;  %v4508_v57 = vld [vmem:[%s10034_s5 + $0x218] sm:$0xff]  ;;  %v4075_v62 = vadd.f32 %v8422_v6, %v8420_v8 }
 0x536   : > { %10227 = vst [vmem:[#allocation60_spill] sm:$0xff] %v8754_v53  ;;  %v4492_v53 = vld [vmem:[%s10034_s5 + $0x198] sm:$0xff] }
 0x537   : > { %4591 = vmatpush.msra.mxu1 %v4494_v34  ;;  %4611 = vmatpush.msra.mxu2 %v4510_v39  ;;  %v4509_v34 = vld [vmem:[%s10034_s5 + $0x220] sm:$0xff]  ;;  %v4152_v8 = vadd.f32 %v8424_v48, %v4075_v62 }
 0x538   : > { %4343 = vmatmul.f32.gmra.mxu0 %v3889_v42  ;;  %v4645_v42 = vld [vmem:[%s10034_s5 + $0x2b0] sm:$0xff] }
 0x539   : > { %4728 = vmatpush.msra.mxu3 %v4645_v42  ;;  %4592 = vmatpush.msra.mxu1 %v4493_v22  ;;  %v4642_v42 = vld [vmem:[%s10034_s5 + $0x298] sm:$0xff]  ;;  %v4507_v22 = vld [vmem:[%s10034_s5 + $0x210] sm:$0xff] }
 0x53a   : > { %4612 = vmatpush.msra.mxu2 %v4509_v34  ;;  %v4489_v34 = vld [vmem:[%s10034_s5 + $0x180] sm:$0xff] }
 0x53b   : > { %4729 = vmatpush.msra.mxu3 %v4644_v7  ;;  %4593 = vmatpush.msra.mxu1 %v4492_v53  ;;  %v4490_v53 = vld [vmem:[%s10034_s5 + $0x188] sm:$0xff]  ;;  %v4223_v7 = vadd.f32 %v8407_v28, %v4146_v21  ;;  %v4072_v28 = vadd.f32 %v8411_v27, %v8409_v52  ;;  %v4505_v21 = vld [vmem:[%s10034_s5 + $0x200] sm:$0xff]  ;;  %v4229_v27 = vadd.f32 %v8426_v41, %v4152_v8 }
 0x53c   : > { %4613 = vmatpush.msra.mxu2 %v4508_v57  ;;  %v5049_v57 = vld [vmem:[%s10034_s5 + $0x7f0] sm:$0xff]  ;;  %v3892_v41 = vld [vmem:[#allocation2 + $0x13c] sm:$0xff] }
 0x53d   : > { %v4299_v29 = vpop.f32.mrf.mxu0  ;;  %4730 = vmatpush.msra.mxu3 %v4643_v31  ;;  %4594 = vmatpush.msra.mxu1 %v4491_v32  ;;  %v4506_v31 = vld [vmem:[%s10034_s5 + $0x208] sm:$0xff]  ;;  %v4149_v52 = vadd.f32 %v8416_v44, %v4072_v28 }
 0x53e   : > { %4614 = vmatpush.msra.mxu2 %v4507_v22  ;;  %v4640_v32 = vld [vmem:[%s10034_s5 + $0x288] sm:$0xff]  ;;  %v4300_v6 = vadd.f32 %v4299_v29, %v4223_v7  ;;  %5116 = vmatpush.msra.mxu0 %v5049_v57  ;;  %v8855_v29 = vld [vmem:[%s10033_s4] ss:$0 sm:$0xff] }
 0x53f   : > { %4731 = vmatpush.msra.mxu3 %v4642_v42  ;;  %4595 = vmatpush.msra.mxu1 %v4490_v53  ;;  %v4639_v42 = vld [vmem:[%s10034_s5 + $0x280] sm:$0xff]  ;;  %v4226_v22 = vadd.f32 %v8418_v10, %v4149_v52  ;;  %v5048_v7 = vld [vmem:[%s10034_s5 + $0x7e8] sm:$0xff] }
 0x540   : > { %4346 = vmatmul.f32.gmra.mxu0 %v3890_v17  ;;  %v4641_v17 = vld [vmem:[%s10034_s5 + $0x290] sm:$0xff]  ;;  %4615 = vmatpush.msra.mxu2 %v4506_v31  ;;  %v4359_v48 = vadd.f32 %v4300_v6, %v8191_v30 }
 0x541   : > { %4732 = vmatpush.msra.mxu3 %v4641_v17  ;;  %4596 = vmatpush.msra.mxu1 %v4489_v34  ;;  %v4078_v17 = vadd.f32 %v8430_v23, %v8428_v56 }
 0x542   : > { %4616 = vmatpush.msra.mxu2 %v4505_v21  ;;  %5117 = vmatpush.msra.mxu0 %v5048_v7  ;;  %v4383_v62 = vadd.f32 %v8855_v29, %v4359_v48  ;;  %v3893_v21 = vld [vmem:[#allocation2 + $0x144] sm:$0xff] }
 0x543   : > { %4733 = vmatpush.msra.mxu3 %v4640_v32  ;;  %v4155_v30 = vadd.f32 %v8432_v61, %v4078_v17  ;;  %v4702_v17 = vld [vmem:[%s10034_s5 + $0x478] sm:$0xff] }
 0x544   : > { %v4403_v56 = vmax.f32 %v4383_v62, 0.0  ;;  %v4701_v62 = vld [vmem:[%s10034_s5 + $0x470] sm:$0xff] }
 0x545   : > { %v4302_v39 = vpop.f32.mrf.mxu0  ;;  %4734 = vmatpush.msra.mxu3 %v4639_v42 }
 0x546   : > { %v4303_v34 = vadd.f32 %v4302_v39, %v4226_v22 }
 0x548   : > { %4349 = vmatmul.f32.gmra.mxu0 %v3891_v18  ;;  %v4232_v18 = vadd.f32 %v8434_v47, %v4155_v30  ;;  %v4360_v23 = vadd.f32 %v4303_v34, %v8223_v40  ;;  %v4670_v47 = vld [vmem:[%s10034_s5 + $0x378] sm:$0xff]  ;;  %v4685_v30 = vld [vmem:[%s10034_s5 + $0x3f0] sm:$0xff]  ;;  %v4081_v34 = vadd.f32 %v8438_v5, %v8436_v13 }
 0x549   : > { %v4666_v5 = vld [vmem:[%s10034_s5 + $0x358] sm:$0xff] }
 0x54a   : > { %v4384_v61 = vadd.f32 %v8855_v29, %v4360_v23  ;;  %v4158_v23 = vadd.f32 %v8440_v49, %v4081_v34  ;;  %v4665_v49 = vld [vmem:[%s10034_s5 + $0x350] sm:$0xff] }
 0x54c   : > { %v4404_v52 = vmax.f32 %v4384_v61, 0.0  ;;  %v4698_v61 = vld [vmem:[%s10034_s5 + $0x458] sm:$0xff] }
 0x54d   : > { %v4305_v53 = vpop.f32.mrf.mxu0 }
 0x54e   : > { %v4306_v44 = vadd.f32 %v4305_v53, %v4229_v27  ;;  %v4669_v53 = vld [vmem:[%s10034_s5 + $0x370] sm:$0xff] }
 0x550   : > { %v4361_v31 = vadd.f32 %v4306_v44, %v8236_v43  ;;  %4352 = vmatmul.f32.gmra.mxu0 %v3892_v41  ;;  %v5047_v44 = vld [vmem:[%s10034_s5 + $0x7e0] sm:$0xff]  ;;  %v4668_v41 = vld [vmem:[%s10034_s5 + $0x368] sm:$0xff] }
 0x551   : > { %5118 = vmatpush.msra.mxu0 %v5047_v44  ;;  %v4090_v44 = vadd.f32 %v8462_v0, %v8460_v33  ;;  %v5045_v0 = vld [vmem:[%s10034_s5 + $0x7d0] sm:$0xff] }
 0x552   : > { %v4385_v10 = vadd.f32 %v8855_v29, %v4361_v31 }
 0x553   : > { %v4167_v33 = vadd.f32 %v8464_v20, %v4090_v44  ;;  %v4676_v20 = vld [vmem:[%s10034_s5 + $0x3a8] sm:$0xff] }
 0x554   : > { %v4405_v32 = vmax.f32 %v4385_v10, 0.0  ;;  %v4667_v10 = vld [vmem:[%s10034_s5 + $0x360] sm:$0xff] }
 0x555   : > { %v4308_v28 = vpop.f32.mrf.mxu0 }
 0x556   : > { %v4424_v8 = vmax.f32 %v4403_v56, %v4405_v32  ;;  %v4309_v6 = vadd.f32 %v4308_v28, %v4232_v18  ;;  %v4684_v18 = vld [vmem:[%s10034_s5 + $0x3e8] sm:$0xff]  ;;  %v4683_v32 = vld [vmem:[%s10034_s5 + $0x3e0] sm:$0xff] }
 0x557   : > { %v4700_v56 = vld [vmem:[%s10034_s5 + $0x468] sm:$0xff]  ;;  %v4699_v28 = vld [vmem:[%s10034_s5 + $0x460] sm:$0xff] }
 0x558   : > { %v4427_v57 = vrot.slane %v4424_v8, 1  ;;  %v4362_v39 = vadd.f32 %v4309_v6, %v8242_v63  ;;  %4355 = vmatmul.f32.gmra.mxu0 %v3893_v21  ;;  %v4686_v63 = vld [vmem:[%s10034_s5 + $0x3f8] sm:$0xff] }
 0x559   : > { %v4682_v6 = vld [vmem:[%s10034_s5 + $0x3d8] sm:$0xff] }
 0x55a   : > { %v4429_v43 = vmax.f32 %v4424_v8, %v4427_v57  ;;  %v4386_v42 = vadd.f32 %v8855_v29, %v4362_v39  ;;  %v4235_v57 = vadd.f32 %v8442_v46, %v4158_v23  ;;  %v4087_v39 = vadd.f32 %v8454_v12, %v8452_v55  ;;  %v5046_v46 = vld [vmem:[%s10034_s5 + $0x7d8] sm:$0xff] }
 0x55b   : > { %v4084_v55 = vadd.f32 %v8446_v54, %v8444_v14  ;;  %5119 = vmatpush.msra.mxu0 %v5046_v46  ;;  %v4662_v54 = vld [vmem:[%s10034_s5 + $0x338] sm:$0xff] }
 0x55c   : > { %v4406_v40 = vmax.f32 %v4386_v42, 0.0  ;;  %4537 = vmatmul.f32.vlgmr.msrb.gmra.mxu1 %v4429_v43  ;;  %v4435_v27 = vrot.slane %v4429_v43, 2  ;;  %v4437_v48 = vrot.slane %v4429_v43, 4  ;;  %v4439_v13 = vrot.slane %v4429_v43, 6  ;;  %v4664_v43 = vld [vmem:[%s10034_s5 + $0x348] sm:$0xff]  ;;  %v4681_v42 = vld [vmem:[%s10034_s5 + $0x3d0] sm:$0xff] }
 0x55d   : > { %4739 = vmatpush.msrb.mxu1 %v4670_v47  ;;  %v4311_v22 = vpop.f32.mrf.mxu0  ;;  %v4697_v47 = vld [vmem:[%s10034_s5 + $0x450] sm:$0xff]  ;;  %v4164_v12 = vadd.f32 %v8456_v4, %v4087_v39  ;;  %v4161_v14 = vadd.f32 %v8448_v19, %v4084_v55  ;;  %v4679_v4 = vld [vmem:[%s10034_s5 + $0x3c0] sm:$0xff]  ;;  %5120 = vmatpush.msra.mxu0 %v5045_v0  ;;  %v4656_v39 = vld [vmem:[%s10034_s5 + $0x308] sm:$0xff]  ;;  %v4093_v0 = vadd.f32 %v8470_v58, %v8468_v3 }
 0x55e   : > { %v4425_v7 = vmax.f32 %v4404_v52, %v4406_v40  ;;  %4557 = vmatmul.f32.vlgmr.msrb.gmra.mxu2 %v4435_v27  ;;  %4577 = vmatmul.f32.vlgmr.msrb.gmra.mxu3 %v4437_v48  ;;  %v4312_v52 = vadd.f32 %v4311_v22, %v4235_v57  ;;  %v4663_v40 = vld [vmem:[%s10034_s5 + $0x340] sm:$0xff]  ;;  %v4680_v27 = vld [vmem:[%s10034_s5 + $0x3c8] sm:$0xff]  ;;  %v4661_v19 = vld [vmem:[%s10034_s5 + $0x330] sm:$0xff] }
 0x55f   : > { %4740 = vmatpush.msrb.mxu1 %v4669_v53  ;;  %4759 = vmatpush.msrb.mxu2 %v4686_v63  ;;  %v4696_v48 = vld [vmem:[%s10034_s5 + $0x448] sm:$0xff]  ;;  %v4695_v53 = vld [vmem:[%s10034_s5 + $0x440] sm:$0xff]  ;;  %v4241_v63 = vadd.f32 %v8458_v15, %v4164_v12  ;;  %v4694_v15 = vld [vmem:[%s10034_s5 + $0x438] sm:$0xff]  ;;  %v4170_v3 = vadd.f32 %v8472_v11, %v4093_v0 }
 0x560   : > { %v4431_v31 = vrot.slane %v4425_v7, 1  ;;  %4779 = vmatpush.msrb.mxu3 %v4702_v17  ;;  %v4363_v22 = vadd.f32 %v4312_v52, %v8248_v37  ;;  %v4678_v17 = vld [vmem:[%s10034_s5 + $0x3b8] sm:$0xff]  ;;  %v4238_v37 = vadd.f32 %v8450_v26, %v4161_v14  ;;  %v4693_v26 = vld [vmem:[%s10034_s5 + $0x430] sm:$0xff]  ;;  %v4655_v12 = vld [vmem:[%s10034_s5 + $0x300] sm:$0xff] }
 0x561   : > { %4741 = vmatpush.msrb.mxu1 %v4668_v41  ;;  %4760 = vmatpush.msrb.mxu2 %v4685_v30  ;;  %v4660_v30 = vld [vmem:[%s10034_s5 + $0x328] sm:$0xff]  ;;  %v4671_v14 = vld [vmem:[%s10034_s5 + $0x380] sm:$0xff]  ;;  %v5042_v11 = vld [vmem:[%s10034_s5 + $0x7b8] sm:$0xff] }
 0x562   : > { %4780 = vmatpush.msrb.mxu3 %v4701_v62  ;;  %v4433_v8 = vmax.f32 %v4425_v7, %v4431_v31  ;;  %v4677_v62 = vld [vmem:[%s10034_s5 + $0x3b0] sm:$0xff]  ;;  %v4387_v34 = vadd.f32 %v8855_v29, %v4363_v22  ;;  %v4672_v52 = vld [vmem:[%s10034_s5 + $0x388] sm:$0xff]  ;;  %v4852_v22 = vld [vmem:[%s10034_s5 + $0x578] sm:$0xff] }
 0x563   : > { %4742 = vmatpush.msrb.mxu1 %v4667_v10  ;;  %4761 = vmatpush.msrb.mxu2 %v4684_v18  ;;  %v4659_v18 = vld [vmem:[%s10034_s5 + $0x320] sm:$0xff]  ;;  %v4858_v0 = vld [vmem:[%s10034_s5 + $0x5a8] sm:$0xff] }
 0x564   : > { %4781 = vmatpush.msrb.mxu3 %v4700_v56  ;;  %4597 = vmatmul.f32.vlgmr.msra.gmra.mxu1 %v4439_v13  ;;  %v4692_v56 = vld [vmem:[%s10034_s5 + $0x428] sm:$0xff]  ;;  %v4675_v13 = vld [vmem:[%s10034_s5 + $0x3a0] sm:$0xff] }
 0x565   : > { %4743 = vmatpush.msrb.mxu1 %v4666_v5  ;;  %4762 = vmatpush.msrb.mxu2 %v4683_v32  ;;  %v4314_v21 = vpop.f32.mrf.mxu0  ;;  %v4691_v5 = vld [vmem:[%s10034_s5 + $0x420] sm:$0xff]  ;;  %v4244_v32 = vadd.f32 %v8466_v24, %v4167_v33  ;;  %v4690_v24 = vld [vmem:[%s10034_s5 + $0x418] sm:$0xff] }
 0x566   : > { %4782 = vmatpush.msrb.mxu3 %v4699_v28  ;;  %4617 = vmatmul.f32.vlgmr.msra.gmra.mxu2 %v4433_v8  ;;  %v4315_v31 = vadd.f32 %v4314_v21, %v4238_v37  ;;  %v4407_v28 = vmax.f32 %v4387_v34, 0.0  ;;  %v4674_v21 = vld [vmem:[%s10034_s5 + $0x398] sm:$0xff]  ;;  %v4716_v37 = vld [vmem:[%s10034_s5 + $0x4e8] sm:$0xff]  ;;  %v4715_v33 = vld [vmem:[%s10034_s5 + $0x4e0] sm:$0xff] }
 0x567   : > { %4744 = vmatpush.msrb.mxu1 %v4665_v49  ;;  %4763 = vmatpush.msrb.mxu2 %v4682_v6  ;;  %v4657_v6 = vld [vmem:[%s10034_s5 + $0x310] sm:$0xff]  ;;  %v4866_v34 = vld [vmem:[%s10034_s5 + $0x5e8] sm:$0xff]  ;;  %v5043_v58 = vld [vmem:[%s10034_s5 + $0x7c0] sm:$0xff] }
 0x568   : > { %4783 = vmatpush.msrb.mxu3 %v4698_v61  ;;  %v4364_v8 = vadd.f32 %v4315_v31, %v8254_v25  ;;  %v4714_v31 = vld [vmem:[%s10034_s5 + $0x4d8] sm:$0xff] }
 0x569   : > { %4745 = vmatpush.msrb.mxu1 %v4664_v43  ;;  %4764 = vmatpush.msrb.mxu2 %v4681_v42  ;;  %v4673_v43 = vld [vmem:[%s10034_s5 + $0x390] sm:$0xff] }
 0x56a   : > { %4784 = vmatpush.msrb.mxu3 %v4697_v47  ;;  %v4689_v42 = vld [vmem:[%s10034_s5 + $0x410] sm:$0xff]  ;;  %v4388_v47 = vadd.f32 %v8855_v29, %v4364_v8 }
 0x56b   : > { %4746 = vmatpush.msrb.mxu1 %v4663_v40  ;;  %4765 = vmatpush.msrb.mxu2 %v4680_v27  ;;  %v4688_v40 = vld [vmem:[%s10034_s5 + $0x408] sm:$0xff]  ;;  %v4718_v27 = vld [vmem:[%s10034_s5 + $0x4f8] sm:$0xff]  ;;  %v5041_v8 = vld [vmem:[%s10034_s5 + $0x7b0] sm:$0xff] }
 0x56c   : > { %4785 = vmatpush.msrb.mxu3 %v4696_v48 }
 0x56d   : > { %4747 = vmatpush.msrb.mxu1 %v4662_v54  ;;  %4766 = vmatpush.msrb.mxu2 %v4679_v4  ;;  %v4317_v7 = vpop.f32.mrf.mxu0  ;;  %v4687_v54 = vld [vmem:[%s10034_s5 + $0x400] sm:$0xff]  ;;  %v4717_v4 = vld [vmem:[%s10034_s5 + $0x4f0] sm:$0xff] }
 0x56e   : > { %4786 = vmatpush.msrb.mxu3 %v4695_v53  ;;  %v4318_v41 = vadd.f32 %v4317_v7, %v4241_v63  ;;  %v4408_v53 = vmax.f32 %v4388_v47, 0.0  ;;  %v4709_v47 = vld [vmem:[%s10034_s5 + $0x4b0] sm:$0xff] }
 0x56f   : > { %4748 = vmatpush.msrb.mxu1 %v4661_v19  ;;  %4767 = vmatpush.msrb.mxu2 %v4678_v17  ;;  %v4868_v19 = vld [vmem:[%s10034_s5 + $0x5f8] sm:$0xff] }
 0x570   : > { %v4365_v10 = vadd.f32 %v4318_v41, %v8263_v51  ;;  %4787 = vmatpush.msrb.mxu3 %v4694_v15  ;;  %v4658_v51 = vld [vmem:[%s10034_s5 + $0x318] sm:$0xff]  ;;  %v4851_v41 = vld [vmem:[%s10034_s5 + $0x570] sm:$0xff] }
 0x571   : > { %4749 = vmatpush.msrb.mxu1 %v4660_v30  ;;  %4768 = vmatpush.msrb.mxu2 %v4677_v62  ;;  %v4867_v30 = vld [vmem:[%s10034_s5 + $0x5f0] sm:$0xff]  ;;  %v5044_v62 = vld [vmem:[%s10034_s5 + $0x7c8] sm:$0xff] }
 0x572   : > { %v4389_v23 = vadd.f32 %v8855_v29, %v4365_v10  ;;  %4788 = vmatpush.msrb.mxu3 %v4693_v26  ;;  %v4850_v26 = vld [vmem:[%s10034_s5 + $0x568] sm:$0xff]  ;;  %v4849_v10 = vld [vmem:[%s10034_s5 + $0x560] sm:$0xff]  ;;  %5121 = vmatpush.msra.mxu0 %v5044_v62 }
 0x573   : > { %4750 = vmatpush.msrb.mxu1 %v4659_v18  ;;  %4769 = vmatpush.msrb.mxu2 %v4676_v20  ;;  %v4865_v18 = vld [vmem:[%s10034_s5 + $0x5e0] sm:$0xff]  ;;  %v4713_v20 = vld [vmem:[%s10034_s5 + $0x4d0] sm:$0xff]  ;;  %v4842_v62 = vld [vmem:[%s10034_s5 + $0x528] sm:$0xff] }
 0x574   : > { %v4409_v49 = vmax.f32 %v4389_v23, 0.0  ;;  %4789 = vmatpush.msrb.mxu3 %v4692_v56  ;;  %5122 = vmatpush.msra.mxu0 %v5043_v58  ;;  %v4841_v58 = vld [vmem:[%s10034_s5 + $0x520] sm:$0xff] }
 0x575   : > { %4751 = vmatpush.msrb.mxu1 %v4658_v51  ;;  %4770 = vmatpush.msrb.mxu2 %v4675_v13  ;;  %v4320_v61 = vpop.f32.mrf.mxu0  ;;  %v4848_v51 = vld [vmem:[%s10034_s5 + $0x558] sm:$0xff] }
 0x576   : > { %v4622_v57 = vmax.f32 %v4407_v28, %v4409_v49  ;;  %4790 = vmatpush.msrb.mxu3 %v4691_v5  ;;  %v4321_v25 = vadd.f32 %v4320_v61, %v4244_v32  ;;  %v4864_v13 = vld [vmem:[%s10034_s5 + $0x5d8] sm:$0xff]  ;;  %v4247_v5 = vadd.f32 %v8474_v16, %v4170_v3  ;;  %v4099_v32 = vadd.f32 %v8486_v9, %v8484_v35  ;;  %v4712_v28 = vld [vmem:[%s10034_s5 + $0x4c8] sm:$0xff]  ;;  %v4847_v49 = vld [vmem:[%s10034_s5 + $0x550] sm:$0xff] }
 0x577   : > { %4752 = vmatpush.msrb.mxu1 %v4657_v6  ;;  %4771 = vmatpush.msrb.mxu2 %v4674_v21  ;;  %v4863_v35 = vld [vmem:[%s10034_s5 + $0x5d0] sm:$0xff]  ;;  %v4096_v9 = vadd.f32 %v8478_v36, %v8476_v1  ;;  %v4711_v21 = vld [vmem:[%s10034_s5 + $0x4c0] sm:$0xff]  ;;  %v5040_v61 = vld [vmem:[%s10034_s5 + $0x7a8] sm:$0xff] }
 0x578   : > { %v4625_v46 = vrot.slane %v4622_v57, 1  ;;  %v4366_v55 = vadd.f32 %v4321_v25, %v8272_v50  ;;  %4791 = vmatpush.msrb.mxu3 %v4690_v24  ;;  %5123 = vmatpush.msra.mxu0 %v5042_v11  ;;  %v4176_v16 = vadd.f32 %v8497_v2, %v4099_v32  ;;  %v4846_v24 = vld [vmem:[%s10034_s5 + $0x548] sm:$0xff]  ;;  %v4710_v1 = vld [vmem:[%s10034_s5 + $0x4b8] sm:$0xff]  ;;  %v4845_v25 = vld [vmem:[%s10034_s5 + $0x540] sm:$0xff] }
 0x579   : > { %4753 = vmatpush.msrb.mxu1 %v4656_v39  ;;  %4772 = vmatpush.msrb.mxu2 %v4673_v43  ;;  %v4862_v2 = vld [vmem:[%s10034_s5 + $0x5c8] sm:$0xff]  ;;  %v4173_v36 = vadd.f32 %v8480_v45, %v4096_v9  ;;  %v4861_v39 = vld [vmem:[%s10034_s5 + $0x5c0] sm:$0xff]  ;;  %v10235_v11 = vld [vmem:[#allocation24_spill] sm:$0xff] }
 0x57a   : > { %v4627_v50 = vmax.f32 %v4622_v57, %v4625_v46  ;;  %v4390_v48 = vadd.f32 %v8855_v29, %v4366_v55  ;;  %4792 = vmatpush.msrb.mxu3 %v4689_v42  ;;  %5124 = vmatpush.msra.mxu0 %v5041_v8  ;;  %v5039_v57 = vld [vmem:[%s10034_s5 + $0x7a0] sm:$0xff]  ;;  %v4253_v45 = vadd.f32 %v8499_v60, %v4176_v16  ;;  %v5038_v46 = vld [vmem:[%s10034_s5 + $0x798] sm:$0xff]  ;;  %v4839_v16 = vld [vmem:[%s10034_s5 + $0x510] sm:$0xff] }
 0x57b   : > { %4754 = vmatpush.msrb.mxu1 %v4655_v12  ;;  %4773 = vmatpush.msrb.mxu2 %v4672_v52  ;;  %v10228_v43 = vld [vmem:[#allocation25_spill] sm:$0xff]  ;;  %v10229_v55 = vld [vmem:[#allocation36_spill] sm:$0xff] }
 0x57c   : > { %v4410_v63 = vmax.f32 %v4390_v48, 0.0  ;;  %4793 = vmatpush.msrb.mxu3 %v4688_v40  ;;  %v4633_v17 = vrot.slane %v4627_v50, 2  ;;  %v4635_v44 = vrot.slane %v4627_v50, 4  ;;  %v4637_v56 = vrot.slane %v4627_v50, 6  ;;  %5125 = vmatpush.msra.mxu0 %v5040_v61  ;;  %v10230_v12 = vld [vmem:[#allocation37_spill] sm:$0xff]  ;;  %v4844_v60 = vld [vmem:[%s10034_s5 + $0x538] sm:$0xff] }
 0x57d   : > { %4799 = vmatpush.msra.mxu1 %v4718_v27  ;;  %4735 = vmatmul.f32.vlgmr.msra.gmra.mxu3 %v4627_v50  ;;  %v4323_v7 = vpop.f32.mrf.mxu0  ;;  %v4102_v52 = vadd.f32 %v10230_v12, %v10229_v55  ;;  %v4860_v27 = vld [vmem:[%s10034_s5 + $0x5b8] sm:$0xff]  ;;  %v10231_v50 = vld [vmem:[#allocation35_spill] sm:$0xff]  ;;  %v4857_v3 = vld [vmem:[%s10034_s5 + $0x5a0] sm:$0xff] }
 0x57e   : > { %4774 = vmatpush.msrb.mxu2 %v4671_v14  ;;  %v9061_v15 = vmax.f32 %v4408_v53, %v4410_v63  ;;  %4794 = vmatpush.msrb.mxu3 %v4687_v54  ;;  %v4324_v6 = vadd.f32 %v4323_v7, %v4247_v5  ;;  %v4250_v48 = vadd.f32 %v10231_v50, %v4173_v36  ;;  %v4708_v54 = vld [vmem:[%s10034_s5 + $0x4a8] sm:$0xff]  ;;  %v10233_v7 = vld [vmem:[#allocation27_spill] sm:$0xff]  ;;  %v4840_v5 = vld [vmem:[%s10034_s5 + $0x518] sm:$0xff] }
 0x57f   : > { %4800 = vmatpush.msra.mxu1 %v4717_v4  ;;  %4775 = vmatmul.f32.vlgmr.msrb.gmra.mxu2 %v4635_v44  ;;  %v5037_v4 = vld [vmem:[%s10034_s5 + $0x790] sm:$0xff]  ;;  %v10232_v53 = vld [vmem:[#allocation38_spill] sm:$0xff]  ;;  %v4856_v32 = vld [vmem:[%s10034_s5 + $0x598] sm:$0xff] }
 0x580   : > { %4917 = vmatpush.msra.mxu2 %v4852_v22  ;;  %4937 = vmatpush.msra.mxu3 %v4868_v19  ;;  %v4367_v42 = vadd.f32 %v4324_v6, %v10228_v43  ;;  %v4179_v63 = vadd.f32 %v10232_v53, %v4102_v52  ;;  %v4843_v22 = vld [vmem:[%s10034_s5 + $0x530] sm:$0xff]  ;;  %v4629_v9 = vrot.slane %v9061_v15, 1  ;;  %v4703_v36 = vld [vmem:[%s10034_s5 + $0x480] sm:$0xff]  ;;  %v4916_v50 = vld [vmem:[%s10034_s5 + $0x778] sm:$0xff] }
 0x581   : > { %4755 = vmatmul.f32.vlgmr.msrb.gmra.mxu1 %v4633_v17  ;;  %5126 = vmatpush.msra.mxu0 %v5039_v57  ;;  %v4859_v19 = vld [vmem:[%s10034_s5 + $0x5b0] sm:$0xff]  ;;  %v4838_v57 = vld [vmem:[%s10034_s5 + $0x508] sm:$0xff]  ;;  %v5111_v43 = vld [vmem:[%s10034_s5 + $0x9e0] sm:$0xff] }
 0x582   : > { %4801 = vmatpush.msra.mxu1 %v4716_v37  ;;  %4918 = vmatpush.msra.mxu2 %v4851_v41  ;;  %v4391_v17 = vadd.f32 %v8855_v29, %v4367_v42  ;;  %v4707_v41 = vld [vmem:[%s10034_s5 + $0x4a0] sm:$0xff]  ;;  %v4855_v6 = vld [vmem:[%s10034_s5 + $0x590] sm:$0xff]  ;;  %v4631_v42 = vmax.f32 %v9061_v15, %v4629_v9 }
 0x583   : > { %4938 = vmatpush.msra.mxu3 %v4867_v30  ;;  %5127 = vmatpush.msra.mxu0 %v5038_v46  ;;  %v5036_v30 = vld [vmem:[%s10034_s5 + $0x788] sm:$0xff]  ;;  %v4837_v46 = vld [vmem:[%s10034_s5 + $0x500] sm:$0xff]  ;;  %v4883_v15 = vld [vmem:[%s10034_s5 + $0x670] sm:$0xff] }
 0x584   : > { %4802 = vmatpush.msra.mxu1 %v4715_v33  ;;  %4919 = vmatpush.msra.mxu2 %v4850_v26  ;;  %v4706_v26 = vld [vmem:[%s10034_s5 + $0x498] sm:$0xff]  ;;  %v4853_v52 = vld [vmem:[%s10034_s5 + $0x580] sm:$0xff]  ;;  %v4895_v9 = vld [vmem:[%s10034_s5 + $0x6d0] sm:$0xff] }
 0x585   : > { %4939 = vmatpush.msra.mxu3 %v4866_v34  ;;  %v4326_v23 = vpop.f32.mrf.mxu0  ;;  %5128 = vmatpush.msra.mxu0 %v5037_v4  ;;  %v5035_v34 = vld [vmem:[%s10034_s5 + $0x780] sm:$0xff]  ;;  %v10237_v4 = vld [vmem:[#allocation40_spill] sm:$0xff] }
 0x586   : > { %4803 = vmatpush.msra.mxu1 %v4714_v31  ;;  %4920 = vmatpush.msra.mxu2 %v4849_v10  ;;  %v4327_v44 = vadd.f32 %v4326_v23, %v4250_v48  ;;  %v10234_v31 = vld [vmem:[#allocation39_spill] sm:$0xff]  ;;  %v10238_v53 = vld [vmem:[#allocation41_spill] sm:$0xff] }
 0x587   : > { %4940 = vmatpush.msra.mxu3 %v4865_v18  ;;  %5129 = vmatpush.msra.mxu0 %v5036_v30  ;;  %v4256_v10 = vadd.f32 %v10234_v31, %v4179_v63  ;;  %v4411_v18 = vmax.f32 %v4391_v17, 0.0  ;;  %v4705_v23 = vld [vmem:[%s10034_s5 + $0x490] sm:$0xff]  ;;  %v4105_v63 = vadd.f32 %v10238_v53, %v10237_v4  ;;  %v4881_v17 = vld [vmem:[%s10034_s5 + $0x660] sm:$0xff]  ;;  %v4914_v30 = vld [vmem:[%s10034_s5 + $0x768] sm:$0xff] }
 0x588   : > { %4795 = vmatmul.f32.vlgmr.msrb.gmra.mxu3 %v4637_v56  ;;  %4804 = vmatpush.msra.mxu1 %v4713_v20  ;;  %v4368_v20 = vadd.f32 %v4327_v44, %v10235_v11  ;;  %v5109_v44 = vld [vmem:[%s10034_s5 + $0x9d0] sm:$0xff]  ;;  %v10242_v11 = vld [vmem:[#allocation49_spill] sm:$0xff]  ;;  %v10252_v53 = vld [vmem:[#allocation54_spill] sm:$0xff] }
 0x589   : > { %4921 = vmatpush.msra.mxu2 %v4848_v51  ;;  %4941 = vmatpush.msra.mxu3 %v4864_v13  ;;  %v5114_v51 = vld [vmem:[%s10034_s5 + $0x9f8] sm:$0xff]  ;;  %v10240_v31 = vld [vmem:[#allocation43_spill] sm:$0xff] }
 0x58a   : > { %4805 = vmatpush.msra.mxu1 %v4712_v28  ;;  %5130 = vmatpush.msra.mxu0 %v5035_v34  ;;  %v4879_v34 = vld [vmem:[%s10034_s5 + $0x650] sm:$0xff] }
 0x58b   : > { %4922 = vmatpush.msra.mxu2 %v4847_v49  ;;  %4942 = vmatpush.msra.mxu3 %v4863_v35  ;;  %v4704_v49 = vld [vmem:[%s10034_s5 + $0x488] sm:$0xff]  ;;  %v5113_v35 = vld [vmem:[%s10034_s5 + $0x9f0] sm:$0xff] }
 0x58c   : > { %4806 = vmatpush.msra.mxu1 %v4711_v21  ;;  %5195 = vmatpush.msrb.mxu0 %v5114_v51  ;;  %v4392_v21 = vadd.f32 %v8855_v29, %v4368_v20  ;;  %v4878_v51 = vld [vmem:[%s10034_s5 + $0x648] sm:$0xff] }
 0x58d   : > { %4923 = vmatpush.msra.mxu2 %v4846_v24  ;;  %4943 = vmatpush.msra.mxu3 %v4862_v2  ;;  %v4329_v40 = vpop.f32.mrf.mxu0  ;;  %v10236_v24 = vld [vmem:[#allocation26_spill] sm:$0xff] }
 0x58e   : > { %4807 = vmatpush.msra.mxu1 %v4710_v1  ;;  %v4330_v14 = vadd.f32 %v4329_v40, %v4253_v45  ;;  %v5112_v1 = vld [vmem:[%s10034_s5 + $0x9e8] sm:$0xff]  ;;  %5196 = vmatpush.msrb.mxu0 %v5113_v35  ;;  %v4412_v55 = vmax.f32 %v4392_v21, 0.0  ;;  %v4900_v40 = vld [vmem:[%s10034_s5 + $0x6f8] sm:$0xff]  ;;  %v5105_v21 = vld [vmem:[%s10034_s5 + $0x9b0] sm:$0xff] }
 0x58f   : > { %4924 = vmatpush.msra.mxu2 %v4845_v25  ;;  %4944 = vmatpush.msra.mxu3 %v4861_v39  ;;  %v4854_v25 = vld [vmem:[%s10034_s5 + $0x588] sm:$0xff] }
 0x590   : > { %4808 = vmatpush.msra.mxu1 %v4709_v47  ;;  %v4369_v37 = vadd.f32 %v4330_v14, %v10233_v7  ;;  %v4884_v47 = vld [vmem:[%s10034_s5 + $0x678] sm:$0xff]  ;;  %5197 = vmatpush.msrb.mxu0 %v5112_v1  ;;  %v10239_v7 = vld [vmem:[#allocation42_spill] sm:$0xff] }
 0x591   : > { %4925 = vmatpush.msra.mxu2 %v4844_v60  ;;  %4945 = vmatpush.msra.mxu3 %v4860_v27  ;;  %v5110_v14 = vld [vmem:[%s10034_s5 + $0x9d8] sm:$0xff] }
 0x592   : > { %4809 = vmatpush.msra.mxu1 %v4708_v54  ;;  %v4393_v33 = vadd.f32 %v8855_v29, %v4369_v37  ;;  %5198 = vmatpush.msrb.mxu0 %v5111_v43  ;;  %v4882_v54 = vld [vmem:[%s10034_s5 + $0x668] sm:$0xff]  ;;  %v4182_v37 = vadd.f32 %v10239_v7, %v4105_v63  ;;  %v4876_v1 = vld [vmem:[%s10034_s5 + $0x638] sm:$0xff]  ;;  %v10248_v43 = vld [vmem:[#allocation29_spill] sm:$0xff] }
 0x593   : > { %4926 = vmatpush.msra.mxu2 %v4843_v22  ;;  %4946 = vmatpush.msra.mxu3 %v4859_v19  ;;  %v4899_v22 = vld [vmem:[%s10034_s5 + $0x6f0] sm:$0xff] }
 0x594   : > { %4810 = vmatpush.msra.mxu1 %v4707_v41  ;;  %v4413_v56 = vmax.f32 %v4393_v33, 0.0  ;;  %v4915_v19 = vld [vmem:[%s10034_s5 + $0x770] sm:$0xff]  ;;  %5199 = vmatpush.msrb.mxu0 %v5110_v14  ;;  %v4898_v41 = vld [vmem:[%s10034_s5 + $0x6e8] sm:$0xff]  ;;  %v4897_v33 = vld [vmem:[%s10034_s5 + $0x6e0] sm:$0xff] }
 0x595   : > { %4927 = vmatpush.msra.mxu2 %v4842_v62  ;;  %4947 = vmatpush.msra.mxu3 %v4858_v0  ;;  %v4332_v13 = vpop.f32.mrf.mxu0  ;;  %v4880_v62 = vld [vmem:[%s10034_s5 + $0x658] sm:$0xff]  ;;  %v5108_v0 = vld [vmem:[%s10034_s5 + $0x9c8] sm:$0xff]  ;;  %v10253_v7 = vld [vmem:[#allocation3_spill] sm:$0xff] }
 0x596   : > { %4811 = vmatpush.msra.mxu1 %v4706_v26  ;;  %v4820_v28 = vmax.f32 %v4411_v18, %v4413_v56  ;;  %v4333_v8 = vadd.f32 %v4332_v13, %v4256_v10  ;;  %v4913_v26 = vld [vmem:[%s10034_s5 + $0x760] sm:$0xff]  ;;  %5200 = vmatpush.msrb.mxu0 %v5109_v44  ;;  %v4259_v10 = vadd.f32 %v10240_v31, %v4182_v37  ;;  %v10241_v18 = vld [vmem:[#allocation48_spill] sm:$0xff]  ;;  %v10254_v31 = vld [vmem:[#allocation55_spill] sm:$0xff] }
 0x597   : > { %4928 = vmatpush.msra.mxu2 %v4841_v58  ;;  %4948 = vmatpush.msra.mxu3 %v4857_v3  ;;  %v5107_v3 = vld [vmem:[%s10034_s5 + $0x9c0] sm:$0xff]  ;;  %v4111_v20 = vadd.f32 %v10242_v11, %v10241_v18  ;;  %v4896_v56 = vld [vmem:[%s10034_s5 + $0x6d8] sm:$0xff] }
 0x598   : > { %4812 = vmatpush.msra.mxu1 %v4705_v23  ;;  %v4823_v61 = vrot.slane %v4820_v28, 1  ;;  %v4370_v2 = vadd.f32 %v4333_v8, %v10236_v24  ;;  %v4912_v23 = vld [vmem:[%s10034_s5 + $0x758] sm:$0xff]  ;;  %5201 = vmatpush.msrb.mxu0 %v5108_v0  ;;  %v10245_v8 = vld [vmem:[#allocation50_spill] sm:$0xff]  ;;  %v5101_v0 = vld [vmem:[%s10034_s5 + $0x990] sm:$0xff] }
 0x599   : > { %4929 = vmatpush.msra.mxu2 %v4840_v5  ;;  %4949 = vmatpush.msra.mxu3 %v4856_v32  ;;  %v5106_v13 = vld [vmem:[%s10034_s5 + $0x9b8] sm:$0xff]  ;;  %v10244_v32 = vld [vmem:[#allocation45_spill] sm:$0xff] }
 0x59a   : > { %4813 = vmatpush.msra.mxu1 %v4704_v49  ;;  %v9252_v39 = vmax.f32 %v4820_v28, %v4823_v61  ;;  %v4394_v45 = vadd.f32 %v8855_v29, %v4370_v2  ;;  %v10243_v5 = vld [vmem:[#allocation44_spill] sm:$0xff]  ;;  %v4188_v49 = vadd.f32 %v10245_v8, %v4111_v20  ;;  %5202 = vmatpush.msrb.mxu0 %v5107_v3  ;;  %v10246_v61 = vld [vmem:[#allocation46_spill] sm:$0xff] }
 0x59b   : > { %4930 = vmatpush.msra.mxu2 %v4839_v16  ;;  %4950 = vmatpush.msra.mxu3 %v4855_v6  ;;  %v4108_v28 = vadd.f32 %v10244_v32, %v10243_v5  ;;  %v4911_v16 = vld [vmem:[%s10034_s5 + $0x750] sm:$0xff]  ;;  %v4877_v6 = vld [vmem:[%s10034_s5 + $0x640] sm:$0xff]  ;;  %v4894_v2 = vld [vmem:[%s10034_s5 + $0x6c8] sm:$0xff] }
 0x59c   : > { %4814 = vmatpush.msra.mxu1 %v4703_v36  ;;  %v4414_v12 = vmax.f32 %v4394_v45, 0.0  ;;  %v4831_v48 = vrot.slane %v9252_v39, 2  ;;  %v4910_v36 = vld [vmem:[%s10034_s5 + $0x748] sm:$0xff]  ;;  %5203 = vmatpush.msrb.mxu0 %v5106_v13  ;;  %v4892_v14 = vld [vmem:[%s10034_s5 + $0x6b8] sm:$0xff]  ;;  %v4871_v13 = vld [vmem:[%s10034_s5 + $0x610] sm:$0xff] }
 0x59d   : > { %4931 = vmatpush.msra.mxu2 %v4838_v57  ;;  %4951 = vmatpush.msra.mxu3 %v4854_v25  ;;  %v4335_v60 = vpop.f32.mrf.mxu0  ;;  %v4185_v24 = vadd.f32 %v10246_v61, %v4108_v28  ;;  %v5104_v57 = vld [vmem:[%s10034_s5 + $0x9a8] sm:$0xff]  ;;  %v10247_v25 = vld [vmem:[#allocation51_spill] sm:$0xff]  ;;  %v10255_v11 = vld [vmem:[#allocation28_spill] sm:$0xff] }
 0x59e   : > { %4815 = vmatmul.f32.vlgmr.msra.gmra.mxu1 %v4631_v42  ;;  %v9274_v27 = vmax.f32 %v4412_v55, %v4414_v12  ;;  %v4336_v35 = vadd.f32 %v4335_v60, %v4259_v10  ;;  %v4265_v45 = vadd.f32 %v10247_v25, %v4188_v49  ;;  %5204 = vmatpush.msrb.mxu0 %v5105_v21  ;;  %v10249_v55 = vld [vmem:[#allocation52_spill] sm:$0xff]  ;;  %v10250_v12 = vld [vmem:[#allocation53_spill] sm:$0xff]  ;;  %v5100_v3 = vld [vmem:[%s10034_s5 + $0x988] sm:$0xff] }
 0x59f   : > { %4957 = vmatpush.msrb.mxu1 %v4884_v47  ;;  %4932 = vmatpush.msra.mxu2 %v4837_v46  ;;  %v4893_v47 = vld [vmem:[%s10034_s5 + $0x6c0] sm:$0xff]  ;;  %v4888_v8 = vld [vmem:[%s10034_s5 + $0x698] sm:$0xff]  ;;  %v4870_v21 = vld [vmem:[%s10034_s5 + $0x608] sm:$0xff] }
 0x5a0   : > { %4952 = vmatpush.msra.mxu3 %v4853_v52  ;;  %4933 = vmatmul.f32.vlgmr.msra.gmra.mxu2 %v9252_v39  ;;  %v4371_v42 = vadd.f32 %v4336_v35, %v10248_v43  ;;  %v4909_v46 = vld [vmem:[%s10034_s5 + $0x740] sm:$0xff]  ;;  %v4114_v52 = vadd.f32 %v10250_v12, %v10249_v55  ;;  %v4904_v49 = vld [vmem:[%s10034_s5 + $0x718] sm:$0xff] }
 0x5a1   : > { %4958 = vmatpush.msrb.mxu1 %v4883_v15  ;;  %4977 = vmatpush.msrb.mxu2 %v4900_v40  ;;  %v4875_v15 = vld [vmem:[%s10034_s5 + $0x630] sm:$0xff]  ;;  %v5103_v60 = vld [vmem:[%s10034_s5 + $0x9a0] sm:$0xff]  ;;  %v10260_v55 = vld [vmem:[#allocation4_spill] sm:$0xff] }
 0x5a2   : > { %4997 = vmatpush.msrb.mxu3 %v4916_v50  ;;  %v10251_v50 = vld [vmem:[#allocation47_spill] sm:$0xff]  ;;  %5205 = vmatpush.msrb.mxu0 %v5104_v57  ;;  %v4191_v63 = vadd.f32 %v10252_v53, %v4114_v52  ;;  %v5099_v32 = vld [vmem:[%s10034_s5 + $0x980] sm:$0xff] }
 0x5a3   : > { %4953 = vmatmul.f32.vlgmr.msra.gmra.mxu3 %v4831_v48  ;;  %4959 = vmatpush.msrb.mxu1 %v4882_v54  ;;  %v4262_v48 = vadd.f32 %v10251_v50, %v4185_v24  ;;  %v4908_v54 = vld [vmem:[%s10034_s5 + $0x738] sm:$0xff]  ;;  %v4903_v57 = vld [vmem:[%s10034_s5 + $0x710] sm:$0xff]  ;;  %v4869_v25 = vld [vmem:[%s10034_s5 + $0x600] sm:$0xff] }
 0x5a4   : > { %4978 = vmatpush.msrb.mxu2 %v4899_v22  ;;  %4998 = vmatpush.msrb.mxu3 %v4915_v19  ;;  %v4874_v22 = vld [vmem:[%s10034_s5 + $0x628] sm:$0xff]  ;;  %v5102_v19 = vld [vmem:[%s10034_s5 + $0x998] sm:$0xff]  ;;  %v4268_v10 = vadd.f32 %v10254_v31, %v4191_v63  ;;  %v10261_v52 = vld [vmem:[#allocation11_spill] sm:$0xff] }
 0x5a5   : > { %4960 = vmatpush.msrb.mxu1 %v4881_v17  ;;  %v4338_v58 = vpop.f32.mrf.mxu0  ;;  %v4395_v17 = vadd.f32 %v8855_v29, %v4371_v42  ;;  %5206 = vmatpush.msrb.mxu0 %v5103_v60  ;;  %v4886_v42 = vld [vmem:[%s10034_s5 + $0x688] sm:$0xff]  ;;  %v4901_v63 = vld [vmem:[%s10034_s5 + $0x700] sm:$0xff]  ;;  %v5295_v31 = vld [vmem:[%s10034_s5 + $0xbf0] sm:$0xff] }
 0x5a6   : > { %4979 = vmatpush.msrb.mxu2 %v4898_v41  ;;  %4999 = vmatpush.msrb.mxu3 %v4914_v30  ;;  %v4339_v44 = vadd.f32 %v4338_v58, %v4262_v48  ;;  %v4891_v41 = vld [vmem:[%s10034_s5 + $0x6b0] sm:$0xff]  ;;  %v4872_v58 = vld [vmem:[%s10034_s5 + $0x618] sm:$0xff]  ;;  %v4833_v48 = vrot.slane %v9252_v39, 4 }
 0x5a7   : > { %4961 = vmatpush.msrb.mxu1 %v4880_v62  ;;  %v4907_v30 = vld [vmem:[%s10034_s5 + $0x730] sm:$0xff]  ;;  %v4873_v62 = vld [vmem:[%s10034_s5 + $0x620] sm:$0xff]  ;;  %5207 = vmatpush.msrb.mxu0 %v5102_v19  ;;  %v4415_v18 = vmax.f32 %v4395_v17, 0.0  ;;  %v4835_v17 = vrot.slane %v9252_v39, 6  ;;  %v5098_v39 = vld [vmem:[%s10034_s5 + $0x978] sm:$0xff] }
 0x5a8   : > { %4980 = vmatpush.msrb.mxu2 %v4897_v33  ;;  %5000 = vmatpush.msrb.mxu3 %v4913_v26  ;;  %v4890_v26 = vld [vmem:[%s10034_s5 + $0x6a8] sm:$0xff]  ;;  %v4372_v20 = vadd.f32 %v4339_v44, %v10255_v11  ;;  %v5065_v44 = vld [vmem:[%s10034_s5 + $0x870] sm:$0xff]  ;;  %v10269_v11 = vld [vmem:[#allocation8_spill] sm:$0xff] }
 0x5a9   : > { %4962 = vmatpush.msrb.mxu1 %v4879_v34  ;;  %v4906_v34 = vld [vmem:[%s10034_s5 + $0x728] sm:$0xff]  ;;  %5208 = vmatpush.msrb.mxu0 %v5101_v0 }
 0x5aa   : > { %4981 = vmatpush.msrb.mxu2 %v4896_v56  ;;  %5001 = vmatpush.msrb.mxu3 %v4912_v23  ;;  %v4889_v23 = vld [vmem:[%s10034_s5 + $0x6a0] sm:$0xff]  ;;  %v4396_v61 = vadd.f32 %v8855_v29, %v4372_v20 }
 0x5ab   : > { %4963 = vmatpush.msrb.mxu1 %v4878_v51  ;;  %v4905_v51 = vld [vmem:[%s10034_s5 + $0x720] sm:$0xff]  ;;  %5209 = vmatpush.msrb.mxu0 %v5100_v3 }
 0x5ac   : > { %4982 = vmatpush.msrb.mxu2 %v4895_v9  ;;  %5002 = vmatpush.msrb.mxu3 %v4911_v16  ;;  %v10256_v9 = vld [vmem:[#allocation31_spill] sm:$0xff]  ;;  %v10257_v16 = vld [vmem:[#allocation13_spill] sm:$0xff]  ;;  %v4416_v60 = vmax.f32 %v4396_v61, 0.0  ;;  %v10272_v61 = vld [vmem:[#allocation6_spill] sm:$0xff] }
 0x5ad   : > { %4964 = vmatpush.msrb.mxu1 %v4877_v6  ;;  %v4341_v40 = vpop.f32.mrf.mxu0  ;;  %v3534_v6 = vadd.f32 %v10257_v16, %v10256_v9  ;;  %5210 = vmatpush.msrb.mxu0 %v5099_v32  ;;  %v5063_v32 = vld [vmem:[%s10034_s5 + $0x860] sm:$0xff]  ;;  %v5080_v16 = vld [vmem:[%s10034_s5 + $0x8e8] sm:$0xff] }
 0x5ae   : > { %4983 = vmatpush.msrb.mxu2 %v4894_v2  ;;  %5003 = vmatpush.msrb.mxu3 %v4910_v36  ;;  %v4342_v4 = vadd.f32 %v4341_v40, %v4265_v45  ;;  %v10258_v2 = vld [vmem:[#allocation7_spill] sm:$0xff]  ;;  %v4827_v40 = vrot.slane %v9274_v27, 1 }
 0x5af   : > { %4965 = vmatpush.msrb.mxu1 %v4876_v1  ;;  %v4887_v1 = vld [vmem:[%s10034_s5 + $0x690] sm:$0xff] }
 0x5b0   : > { %4984 = vmatpush.msrb.mxu2 %v4893_v47  ;;  %5004 = vmatpush.msrb.mxu3 %v4909_v46  ;;  %v4373_v37 = vadd.f32 %v4342_v4, %v10253_v7  ;;  %v4902_v47 = vld [vmem:[%s10034_s5 + $0x708] sm:$0xff]  ;;  %v10259_v46 = vld [vmem:[#allocation17_spill] sm:$0xff]  ;;  %v4829_v0 = vmax.f32 %v9274_v27, %v4827_v40 }
 0x5b1   : > { %4966 = vmatpush.msrb.mxu1 %v4875_v15  ;;  %v3531_v12 = vadd.f32 %v10260_v55, %v10259_v46  ;;  %v3611_v15 = vadd.f32 %v10261_v52, %v3534_v6  ;;  %v10262_v4 = vld [vmem:[#allocation18_spill] sm:$0xff]  ;;  %v10276_v40 = vld [vmem:[#allocation21_spill] sm:$0xff] }
 0x5b2   : > { %4985 = vmatpush.msrb.mxu2 %v4892_v14  ;;  %5005 = vmatpush.msrb.mxu3 %v4908_v54  ;;  %v4397_v33 = vadd.f32 %v8855_v29, %v4373_v37  ;;  %v5066_v14 = vld [vmem:[%s10034_s5 + $0x878] sm:$0xff]  ;;  %v4885_v54 = vld [vmem:[%s10034_s5 + $0x680] sm:$0xff]  ;;  %v10263_v7 = vld [vmem:[#allocation10_spill] sm:$0xff] }
 0x5b3   : > { %4967 = vmatpush.msrb.mxu1 %v4874_v22  ;;  %v3688_v53 = vadd.f32 %v10262_v4, %v3611_v15  ;;  %v3608_v37 = vadd.f32 %v10263_v7, %v3531_v12  ;;  %v5064_v27 = vld [vmem:[%s10034_s5 + $0x868] sm:$0xff]  ;;  %v5061_v12 = vld [vmem:[%s10034_s5 + $0x850] sm:$0xff]  ;;  %v5293_v15 = vld [vmem:[%s10034_s5 + $0xbe0] sm:$0xff] }
 0x5b4   : > { %4986 = vmatpush.msrb.mxu2 %v4891_v41  ;;  %5006 = vmatpush.msrb.mxu3 %v4907_v30  ;;  %v4417_v56 = vmax.f32 %v4397_v33, 0.0  ;;  %v10264_v41 = vld [vmem:[#allocation32_spill] sm:$0xff]  ;;  %v5096_v6 = vld [vmem:[%s10034_s5 + $0x968] sm:$0xff] }
 0x5b5   : > { %4968 = vmatpush.msrb.mxu1 %v4873_v62  ;;  %v4344_v5 = vpop.f32.mrf.mxu0  ;;  %v10265_v30 = vld [vmem:[#allocation20_spill] sm:$0xff]  ;;  %v3765_v20 = vadd.f32 %v10269_v11, %v3688_v53  ;;  %v10278_v53 = vld [vmem:[#allocation9_spill] sm:$0xff] }
 0x5b6   : > { %4987 = vmatpush.msrb.mxu2 %v4890_v26  ;;  %5007 = vmatpush.msrb.mxu3 %v4906_v34  ;;  %v5018_v28 = vmax.f32 %v4415_v18, %v4417_v56  ;;  %v4345_v35 = vadd.f32 %v4344_v5, %v4268_v10  ;;  %v3537_v62 = vadd.f32 %v10265_v30, %v10264_v41  ;;  %v5082_v33 = vld [vmem:[%s10034_s5 + $0x8f8] sm:$0xff]  ;;  %v10267_v34 = vld [vmem:[#allocation57_spill] sm:$0xff]  ;;  %v4122_v56 = vpop.f32.mrf.mxu1  ;;  %v5291_v41 = vld [vmem:[%s10034_s5 + $0xbd0] sm:$0xff] }
 0x5b7   : > { %4969 = vmatpush.msrb.mxu1 %v4872_v58  ;;  %v10266_v26 = vld [vmem:[#allocation56_spill] sm:$0xff]  ;;  %v10268_v10 = vld [vmem:[#allocation5_spill] sm:$0xff]  ;;  %v4123_v55 = vadd.f32 %v4122_v56, %v8723_v59 }
 0x5b8   : > { %4988 = vmatpush.msrb.mxu2 %v4889_v23  ;;  %5008 = vmatpush.msrb.mxu3 %v4905_v51  ;;  %v5021_v24 = vrot.slane %v5018_v28, 1  ;;  %v4374_v36 = vadd.f32 %v4345_v35, %v10258_v2  ;;  %v4117_v58 = vadd.f32 %v10267_v34, %v10266_v26  ;;  %v3685_v18 = vadd.f32 %v10268_v10, %v3608_v37  ;;  %v5081_v23 = vld [vmem:[%s10034_s5 + $0x8f0] sm:$0xff]  ;;  %v4199_v35 = vpop.f32.mrf.mxu2  ;;  %v5078_v59 = vld [vmem:[%s10034_s5 + $0x8d8] sm:$0xff]  ;;  %v5059_v37 = vld [vmem:[%s10034_s5 + $0x840] sm:$0xff] }
 0x5b9   : > { %4970 = vmatpush.msrb.mxu1 %v4871_v13  ;;  %v5097_v51 = vld [vmem:[%s10034_s5 + $0x970] sm:$0xff]  ;;  %v10270_v13 = vld [vmem:[#allocation58_spill] sm:$0xff]  ;;  %v5292_v4 = vld [vmem:[%s10034_s5 + $0xbd8] sm:$0xff] }
 0x5ba   : > { %4989 = vmatpush.msrb.mxu2 %v4888_v8  ;;  %5009 = vmatpush.msrb.mxu3 %v4904_v49  ;;  %v9462_v45 = vmax.f32 %v5018_v28, %v5021_v24  ;;  %v4398_v43 = vadd.f32 %v8855_v29, %v4374_v36  ;;  %v5296_v29 = vld [vmem:[%s10034_s5 + $0xbf8] sm:$0xff]  ;;  %v4194_v5 = vadd.f32 %v10270_v13, %v4117_v58  ;;  %v5294_v28 = vld [vmem:[%s10034_s5 + $0xbe8] sm:$0xff]  ;;  %v10273_v2 = vld [vmem:[#allocation19_spill] sm:$0xff] }
 0x5bb   : > { %4971 = vmatpush.msrb.mxu1 %v4870_v21  ;;  %v10271_v8 = vld [vmem:[#allocation12_spill] sm:$0xff]  ;;  %v3762_v24 = vadd.f32 %v10272_v61, %v3685_v18  ;;  %v3790_v36 = vadd.f32 %v3765_v20, %v10273_v2  ;;  %v5075_v18 = vld [vmem:[%s10034_s5 + $0x8c0] sm:$0xff]  ;;  %v5089_v2 = vld [vmem:[%s10034_s5 + $0x930] sm:$0xff] }
 0x5bc   : > { %4990 = vmatpush.msrb.mxu2 %v4887_v1  ;;  %5010 = vmatpush.msrb.mxu3 %v4903_v57  ;;  %v4418_v50 = vmax.f32 %v4398_v43, 0.0  ;;  %v3614_v49 = vadd.f32 %v10271_v8, %v3537_v62  ;;  %v5062_v21 = vld [vmem:[%s10034_s5 + $0x858] sm:$0xff]  ;;  %v5095_v43 = vld [vmem:[%s10034_s5 + $0x960] sm:$0xff]  ;;  %v5076_v62 = vld [vmem:[%s10034_s5 + $0x8c8] sm:$0xff] }
 0x5bd   : > { %4972 = vmatpush.msrb.mxu1 %v4869_v25  ;;  %5131 = vmatmul.f32.vlgmr.msra.gmra.mxu0 %v9462_v45  ;;  %v4347_v22 = vpop.f32.mrf.mxu0  ;;  %v10274_v1 = vld [vmem:[#allocation16_spill] sm:$0xff]  ;;  %v5079_v25 = vld [vmem:[%s10034_s5 + $0x8e0] sm:$0xff] }
 0x5be   : > { %4991 = vmatpush.msrb.mxu2 %v4886_v42  ;;  %5011 = vmatpush.msrb.mxu3 %v4902_v47  ;;  %v5019_v19 = vmax.f32 %v4416_v60, %v4418_v50  ;;  %v3691_v57 = vadd.f32 %v10274_v1, %v3614_v49  ;;  %v10275_v47 = vld [vmem:[#allocation59_spill] sm:$0xff]  ;;  %v5094_v50 = vld [vmem:[%s10034_s5 + $0x958] sm:$0xff]  ;;  %v4125_v30 = vpop.f32.mrf.mxu1  ;;  %v5091_v11 = vld [vmem:[%s10034_s5 + $0x940] sm:$0xff] }
 0x5bf   : > { %4973 = vmatmul.f32.vlgmr.msrb.gmra.mxu1 %v4833_v48  ;;  %5373 = vmatpush.msra.mxu0 %v5296_v29  ;;  %v4271_v46 = vadd.f32 %v10275_v47, %v4194_v5  ;;  %v10277_v29 = vld [vmem:[#allocation30_spill] sm:$0xff]  ;;  %v4200_v48 = vadd.f32 %v4199_v35, %v4123_v55  ;;  %v5058_v58 = vld [vmem:[%s10034_s5 + $0x838] sm:$0xff]  ;;  %v10282_v56 = vld [vmem:[#allocation33_spill] sm:$0xff] }
 0x5c0   : > { %5135 = vmatpush.msra.mxu1 %v5066_v14  ;;  %4992 = vmatpush.msrb.mxu2 %v4885_v54  ;;  %v5025_v3 = vrot.slane %v5019_v19, 1  ;;  %v3540_v60 = vadd.f32 %v10277_v29, %v10276_v40  ;;  %v5060_v54 = vld [vmem:[%s10034_s5 + $0x848] sm:$0xff]  ;;  %v4202_v10 = vpop.f32.mrf.mxu2  ;;  %v5057_v5 = vld [vmem:[%s10034_s5 + $0x830] sm:$0xff]  ;;  %v5074_v8 = vld [vmem:[%s10034_s5 + $0x8b8] sm:$0xff] }
 0x5c1   : > { %5012 = vmatpush.msrb.mxu3 %v4901_v63  ;;  %4993 = vmatmul.f32.vlgmr.msrb.gmra.mxu2 %v4835_v17  ;;  %v4348_v14 = vadd.f32 %v4347_v22, %v4271_v46  ;;  %v3768_v63 = vadd.f32 %v10278_v53, %v3691_v57  ;;  %v5077_v22 = vld [vmem:[%s10034_s5 + $0x8d0] sm:$0xff]  ;;  %v5090_v49 = vld [vmem:[%s10034_s5 + $0x938] sm:$0xff]  ;;  %v5072_v47 = vld [vmem:[%s10034_s5 + $0x8a8] sm:$0xff] }
 0x5c2   : > { %5013 = vmatmul.f32.vlgmr.msrb.gmra.mxu3 %v4829_v0  ;;  %5136 = vmatpush.msra.mxu1 %v5065_v44  ;;  %v5027_v9 = vmax.f32 %v5019_v19, %v5025_v3  ;;  %v4276_v19 = vpop.f32.mrf.mxu3  ;;  %v5093_v17 = vld [vmem:[%s10034_s5 + $0x950] sm:$0xff]  ;;  %v5092_v0 = vld [vmem:[%s10034_s5 + $0x948] sm:$0xff]  ;;  %v5288_v61 = vld [vmem:[%s10034_s5 + $0xbb8] sm:$0xff] }
 0x5c3   : > { %5155 = vmatpush.msra.mxu2 %v5082_v33  ;;  %5175 = vmatpush.msra.mxu3 %v5098_v39  ;;  %v10279_v44 = vld [vmem:[#allocation15_spill] sm:$0xff]  ;;  %v10280_v33 = vld [vmem:[#allocation14_spill] sm:$0xff]  ;;  %v4277_v26 = vadd.f32 %v4276_v19, %v4200_v48  ;;  %v5071_v29 = vld [vmem:[%s10034_s5 + $0x8a0] sm:$0xff] }
 0x5c4   : > { %5137 = vmatpush.msra.mxu1 %v5064_v27  ;;  %5374 = vmatpush.msra.mxu0 %v5295_v31  ;;  %v3789_v7 = vadd.f32 %v3762_v24, %v10279_v44  ;;  %v3617_v39 = vadd.f32 %v10280_v33, %v3540_v60  ;;  %v5290_v3 = vld [vmem:[%s10034_s5 + $0xbc8] sm:$0xff]  ;;  %v10281_v27 = vld [vmem:[#allocation23_spill] sm:$0xff]  ;;  %v5087_v60 = vld [vmem:[%s10034_s5 + $0x920] sm:$0xff] }
 0x5c5   : > { %5156 = vmatpush.msra.mxu2 %v5081_v23  ;;  %5176 = vmatpush.msra.mxu3 %v5097_v51  ;;  %v4350_v42 = vpop.f32.mrf.mxu0  ;;  %v3791_v31 = vadd.f32 %v3768_v63, %v10281_v27  ;;  %v10283_v51 = vld [vmem:[#allocation60_spill] sm:$0xff]  ;;  %v5073_v24 = vld [vmem:[%s10034_s5 + $0x8b0] sm:$0xff]  ;;  %v5088_v46 = vld [vmem:[%s10034_s5 + $0x928] sm:$0xff] }
 0x5c6   : > { %5138 = vmatpush.msra.mxu1 %v5063_v32  ;;  %5375 = vmatpush.msra.mxu0 %v5294_v28  ;;  %v4351_v52 = vadd.f32 %v4350_v42, %v8740_v38  ;;  %v4375_v34 = vadd.f32 %v4348_v14, %v3789_v7  ;;  %v3694_v23 = vadd.f32 %v10282_v56, %v3617_v39  ;;  %v5289_v28 = vld [vmem:[%s10034_s5 + $0xbc0] sm:$0xff]  ;;  %v5286_v40 = vld [vmem:[%s10034_s5 + $0xba8] sm:$0xff]  ;;  %v5070_v63 = vld [vmem:[%s10034_s5 + $0x898] sm:$0xff] }
 0x5c7   : > { %5157 = vmatpush.msra.mxu2 %v5080_v16  ;;  %5177 = vmatpush.msra.mxu3 %v5096_v6  ;;  %v4126_v13 = vadd.f32 %v4125_v30, %v10283_v51  ;;  %v5285_v53 = vld [vmem:[%s10034_s5 + $0xba0] sm:$0xff]  ;;  %v5086_v19 = vld [vmem:[%s10034_s5 + $0x918] sm:$0xff]  ;;  %v5052_v44 = vld [vmem:[%s10034_s5 + $0x808] sm:$0xff] }
 0x5c8   : > { %5139 = vmatpush.msra.mxu1 %v5062_v21  ;;  %5211 = vmatmul.f32.vlgmr.msrb.gmra.mxu0 %v5027_v9  ;;  %v9563_v38 = vadd.f32 %v4351_v52, %v3790_v36  ;;  %v5686_v9 = vld [vmem:[%s10033_s4] ss:$0 sm:$0xff]  ;;  %v5056_v21 = vld [vmem:[%s10034_s5 + $0x828] sm:$0xff]  ;;  %v5284_v7 = vld [vmem:[%s10034_s5 + $0xb98] sm:$0xff] }
 0x5c9   : > { %5158 = vmatpush.msra.mxu2 %v5079_v25  ;;  %5178 = vmatpush.msra.mxu3 %v5095_v43  ;;  %v4203_v35 = vadd.f32 %v4202_v10, %v4126_v13  ;;  %v4399_v16 = vadd.f32 %v5686_v9, %v4375_v34  ;;  %v10284_v36 = vld [vmem:[#allocation34_spill] sm:$0xff]  ;;  %v5055_v25 = vld [vmem:[%s10034_s5 + $0x820] sm:$0xff]  ;;  %v5287_v43 = vld [vmem:[%s10034_s5 + $0xbb0] sm:$0xff] }
 0x5ca   : > { %5140 = vmatpush.msra.mxu1 %v5061_v12  ;;  %5376 = vmatpush.msra.mxu0 %v5293_v15  ;;  %v3771_v1 = vadd.f32 %v10284_v36, %v3694_v23  ;;  %v4279_v42 = vpop.f32.mrf.mxu3  ;;  %v5054_v15 = vld [vmem:[%s10034_s5 + $0x818] sm:$0xff]  ;;  %v5068_v33 = vld [vmem:[%s10034_s5 + $0x888] sm:$0xff]  ;;  %v5247_v56 = vld [vmem:[%s10034_s5 + $0xa70] sm:$0xff]  ;;  %v5033_v23 = vrot.slane %v9462_v45, 6 }
 0x5cb   : > { %5159 = vmatpush.msra.mxu2 %v5078_v59  ;;  %5179 = vmatpush.msra.mxu3 %v5094_v50  ;;  %v4280_v55 = vadd.f32 %v4279_v42, %v4203_v35  ;;  %v4419_v12 = vmax.f32 %v4399_v16, 0.0  ;;  %v10285_v50 = vld [vmem:[#allocation22_spill] sm:$0xff]  ;;  %v5248_v27 = vld [vmem:[%s10034_s5 + $0xa78] sm:$0xff] }
 0x5cc   : > { %5141 = vmatpush.msra.mxu1 %v5060_v54  ;;  %5377 = vmatpush.msra.mxu0 %v5292_v4  ;;  %v3792_v48 = vadd.f32 %v3771_v1, %v10285_v50  ;;  %v5053_v54 = vld [vmem:[%s10034_s5 + $0x810] sm:$0xff]  ;;  %v5084_v39 = vld [vmem:[%s10034_s5 + $0x908] sm:$0xff]  ;;  %v5264_v51 = vld [vmem:[%s10034_s5 + $0xaf8] sm:$0xff] }
 0x5cd   : > { %5160 = vmatpush.msra.mxu2 %v5077_v22  ;;  %5180 = vmatpush.msra.mxu3 %v5093_v17  ;;  %v4353_v20 = vpop.f32.mrf.mxu0  ;;  %v4400_v22 = vadd.f32 %v5686_v9, %v9563_v38  ;;  %v5085_v38 = vld [vmem:[%s10034_s5 + $0x910] sm:$0xff]  ;;  %v5280_v13 = vld [vmem:[%s10034_s5 + $0xb78] sm:$0xff]  ;;  %v5262_v35 = vld [vmem:[%s10034_s5 + $0xae8] sm:$0xff] }
 0x5ce   : > { %5142 = vmatpush.msra.mxu1 %v5059_v37  ;;  %5378 = vmatpush.msra.mxu0 %v5291_v41  ;;  %v4354_v32 = vadd.f32 %v4353_v20, %v4277_v26  ;;  %v5069_v37 = vld [vmem:[%s10034_s5 + $0x890] sm:$0xff]  ;;  %v5031_v20 = vrot.slane %v9462_v45, 4  ;;  %v5244_v16 = vld [vmem:[%s10034_s5 + $0xa58] sm:$0xff]  ;;  %v5242_v36 = vld [vmem:[%s10034_s5 + $0xa48] sm:$0xff] }
 0x5cf   : > { %5161 = vmatpush.msra.mxu2 %v5076_v62  ;;  %5181 = vmatpush.msra.mxu3 %v5092_v0  ;;  %v5051_v62 = vld [vmem:[%s10034_s5 + $0x800] sm:$0xff]  ;;  %v5283_v0 = vld [vmem:[%s10034_s5 + $0xb90] sm:$0xff]  ;;  %v4420_v26 = vmax.f32 %v4400_v22, 0.0  ;;  %v5274_v42 = vld [vmem:[%s10034_s5 + $0xb48] sm:$0xff] }
 0x5d0   : > { %5143 = vmatpush.msra.mxu1 %v5058_v58  ;;  %5379 = vmatpush.msra.mxu0 %v5290_v3  ;;  %v4377_v6 = vadd.f32 %v4354_v32, %v3791_v31  ;;  %v5282_v58 = vld [vmem:[%s10034_s5 + $0xb88] sm:$0xff]  ;;  %v5029_v3 = vrot.slane %v9462_v45, 2  ;;  %v5067_v31 = vld [vmem:[%s10034_s5 + $0x880] sm:$0xff]  ;;  %v5263_v45 = vld [vmem:[%s10034_s5 + $0xaf0] sm:$0xff] }
 0x5d1   : > { %5162 = vmatpush.msra.mxu2 %v5075_v18  ;;  %5182 = vmatpush.msra.mxu3 %v5091_v11  ;;  %v5083_v11 = vld [vmem:[%s10034_s5 + $0x900] sm:$0xff]  ;;  %v5259_v1 = vld [vmem:[%s10034_s5 + $0xad0] sm:$0xff]  ;;  %v5254_v50 = vld [vmem:[%s10034_s5 + $0xaa8] sm:$0xff] }
 0x5d2   : > { %5144 = vmatpush.msra.mxu1 %v5057_v5  ;;  %5380 = vmatpush.msra.mxu0 %v5289_v28  ;;  %v4401_v57 = vadd.f32 %v5686_v9, %v4377_v6  ;;  %v5246_v5 = vld [vmem:[%s10034_s5 + $0xa68] sm:$0xff]  ;;  %v5281_v32 = vld [vmem:[%s10034_s5 + $0xb80] sm:$0xff]  ;;  %v5279_v28 = vld [vmem:[%s10034_s5 + $0xb70] sm:$0xff] }
 0x5d3   : > { %5163 = vmatpush.msra.mxu2 %v5074_v8  ;;  %5183 = vmatpush.msra.mxu3 %v5090_v49  ;;  %v5245_v49 = vld [vmem:[%s10034_s5 + $0xa60] sm:$0xff]  ;;  %v5234_v22 = vld [vmem:[%s10034_s5 + $0xa08] sm:$0xff] }
 0x5d4   : > { %5145 = vmatpush.msra.mxu1 %v5056_v21  ;;  %5381 = vmatpush.msra.mxu0 %v5288_v61  ;;  %v4421_v52 = vmax.f32 %v4401_v57, 0.0  ;;  %v5261_v6 = vld [vmem:[%s10034_s5 + $0xae0] sm:$0xff]  ;;  %v5243_v61 = vld [vmem:[%s10034_s5 + $0xa50] sm:$0xff] }
 0x5d5   : > { %5164 = vmatpush.msra.mxu2 %v5073_v24  ;;  %5184 = vmatpush.msra.mxu3 %v5089_v2  ;;  %v4356_v59 = vpop.f32.mrf.mxu0  ;;  %v5277_v21 = vld [vmem:[%s10034_s5 + $0xb60] sm:$0xff]  ;;  %v5260_v24 = vld [vmem:[%s10034_s5 + $0xad8] sm:$0xff]  ;;  %v5275_v57 = vld [vmem:[%s10034_s5 + $0xb50] sm:$0xff] }
 0x5d6   : > { %5146 = vmatpush.msra.mxu1 %v5055_v25  ;;  %5382 = vmatpush.msra.mxu0 %v5287_v43  ;;  %v5216_v14 = vmax.f32 %v4419_v12, %v4421_v52  ;;  %v4357_v4 = vadd.f32 %v4356_v59, %v4280_v55  ;;  %v5276_v2 = vld [vmem:[%s10034_s5 + $0xb58] sm:$0xff]  ;;  %v5241_v25 = vld [vmem:[%s10034_s5 + $0xa40] sm:$0xff]  ;;  %v5258_v43 = vld [vmem:[%s10034_s5 + $0xac8] sm:$0xff] }
 0x5d7   : > { %5165 = vmatpush.msra.mxu2 %v5072_v47  ;;  %5185 = vmatpush.msra.mxu3 %v5088_v46  ;;  %v5240_v47 = vld [vmem:[%s10034_s5 + $0xa38] sm:$0xff]  ;;  %v5257_v46 = vld [vmem:[%s10034_s5 + $0xac0] sm:$0xff]  ;;  %v5239_v12 = vld [vmem:[%s10034_s5 + $0xa30] sm:$0xff] }
 0x5d8   : > { %5147 = vmatpush.msra.mxu1 %v5054_v15  ;;  %5383 = vmatpush.msra.mxu0 %v5286_v40  ;;  %v4378_v17 = vadd.f32 %v4357_v4, %v3792_v48  ;;  %v5219_v41 = vrot.slane %v5216_v14, 1  ;;  %v5273_v55 = vld [vmem:[%s10034_s5 + $0xb40] sm:$0xff]  ;;  %v5256_v52 = vld [vmem:[%s10034_s5 + $0xab8] sm:$0xff]  ;;  %v5238_v40 = vld [vmem:[%s10034_s5 + $0xa28] sm:$0xff] }
 0x5d9   : > { %5166 = vmatpush.msra.mxu2 %v5071_v29  ;;  %5186 = vmatpush.msra.mxu3 %v5087_v60  ;;  %v5272_v15 = vld [vmem:[%s10034_s5 + $0xb38] sm:$0xff]  ;;  %v5255_v29 = vld [vmem:[%s10034_s5 + $0xab0] sm:$0xff]  ;;  %v5237_v59 = vld [vmem:[%s10034_s5 + $0xa20] sm:$0xff] }
 0x5da   : > { %5148 = vmatpush.msra.mxu1 %v5053_v54  ;;  %5384 = vmatpush.msra.mxu0 %v5285_v53  ;;  %v4402_v30 = vadd.f32 %v5686_v9, %v4378_v17  ;;  %v9707_v10 = vmax.f32 %v5216_v14, %v5219_v41  ;;  %v5278_v9 = vld [vmem:[%s10034_s5 + $0xb68] sm:$0xff]  ;;  %v5271_v60 = vld [vmem:[%s10034_s5 + $0xb30] sm:$0xff]  ;;  %v5236_v14 = vld [vmem:[%s10034_s5 + $0xa18] sm:$0xff] }
 0x5db   : > { %5167 = vmatpush.msra.mxu2 %v5070_v63  ;;  %5187 = vmatpush.msra.mxu3 %v5086_v19  ;;  %v5270_v48 = vld [vmem:[%s10034_s5 + $0xb28] sm:$0xff]  ;;  %v5253_v54 = vld [vmem:[%s10034_s5 + $0xaa0] sm:$0xff]  ;;  %v5235_v53 = vld [vmem:[%s10034_s5 + $0xa10] sm:$0xff] }
 0x5dc   : > { %5149 = vmatpush.msra.mxu1 %v5052_v44  ;;  %5385 = vmatpush.msra.mxu0 %v5284_v7  ;;  %v4422_v34 = vmax.f32 %v4402_v30, 0.0  ;;  %v5231_v8 = vrot.slane %v9707_v10, 6  ;;  %v5269_v4 = vld [vmem:[%s10034_s5 + $0xb20] sm:$0xff]  ;;  %v5252_v63 = vld [vmem:[%s10034_s5 + $0xa98] sm:$0xff]  ;;  %v5251_v17 = vld [vmem:[%s10034_s5 + $0xa90] sm:$0xff] }
 0x5dd   : > { %5168 = vmatpush.msra.mxu2 %v5069_v37  ;;  %5188 = vmatpush.msra.mxu3 %v5085_v38  ;;  %v5268_v19 = vld [vmem:[%s10034_s5 + $0xb18] sm:$0xff]  ;;  %v5267_v44 = vld [vmem:[%s10034_s5 + $0xb10] sm:$0xff]  ;;  %v5233_v7 = vld [vmem:[%s10034_s5 + $0xa00] sm:$0xff] }
 0x5de   : > { %5150 = vmatpush.msra.mxu1 %v5051_v62  ;;  %5386 = vmatpush.msra.mxu0 %v5283_v0  ;;  %v9709_v18 = vmax.f32 %v4420_v26, %v4422_v34  ;;  %v5250_v37 = vld [vmem:[%s10034_s5 + $0xa88] sm:$0xff]  ;;  %v5312_v41 = vld [vmem:[%s10034_s5 + $0xc78] sm:$0xff]  ;;  %v5249_v30 = vld [vmem:[%s10034_s5 + $0xa80] sm:$0xff]  ;;  %v5227_v0 = vrot.slane %v9707_v10, 2 }
 0x5df   : > { %5169 = vmatpush.msra.mxu2 %v5068_v33  ;;  %5189 = vmatpush.msra.mxu3 %v5084_v39  ;;  %v5266_v38 = vld [vmem:[%s10034_s5 + $0xb08] sm:$0xff]  ;;  %v5265_v62 = vld [vmem:[%s10034_s5 + $0xb00] sm:$0xff]  ;;  %v5311_v33 = vld [vmem:[%s10034_s5 + $0xc70] sm:$0xff]  ;;  %v5229_v39 = vrot.slane %v9707_v10, 4 }
 0x5e0   : > { %5151 = vmatmul.f32.vlgmr.msra.gmra.mxu1 %v5029_v3  ;;  %5387 = vmatpush.msra.mxu0 %v5282_v58  ;;  %v5310_v26 = vld [vmem:[%s10034_s5 + $0xc68] sm:$0xff]  ;;  %v5309_v34 = vld [vmem:[%s10034_s5 + $0xc60] sm:$0xff]  ;;  %v5308_v58 = vld [vmem:[%s10034_s5 + $0xc58] sm:$0xff] }
 0x5e1   : > { %5313 = vmatpush.msrb.mxu1 %v5248_v27  ;;  %5170 = vmatpush.msra.mxu2 %v5067_v31  ;;  %v5307_v3 = vld [vmem:[%s10034_s5 + $0xc50] sm:$0xff]  ;;  %v5306_v27 = vld [vmem:[%s10034_s5 + $0xc48] sm:$0xff]  ;;  %v5305_v31 = vld [vmem:[%s10034_s5 + $0xc40] sm:$0xff] }
 0x5e2   : > { %5190 = vmatpush.msra.mxu3 %v5083_v11  ;;  %5171 = vmatmul.f32.vlgmr.msra.gmra.mxu2 %v5031_v20  ;;  %v5303_v11 = vld [vmem:[%s10034_s5 + $0xc30] sm:$0xff]  ;;  %v5302_v20 = vld [vmem:[%s10034_s5 + $0xc28] sm:$0xff] }
 0x5e3   : > { %5191 = vmatmul.f32.vlgmr.msra.gmra.mxu3 %v5033_v23  ;;  %5314 = vmatpush.msrb.mxu1 %v5247_v56  ;;  %v5301_v56 = vld [vmem:[%s10034_s5 + $0xc20] sm:$0xff]  ;;  %v5300_v23 = vld [vmem:[%s10034_s5 + $0xc18] sm:$0xff] }
 0x5e4   : > { %5333 = vmatpush.msrb.mxu2 %v5264_v51  ;;  %5353 = vmatpush.msrb.mxu3 %v5280_v13  ;;  %v5299_v51 = vld [vmem:[%s10034_s5 + $0xc10] sm:$0xff]  ;;  %v5223_v13 = vrot.slane %v9709_v18, 1 }
 0x5e5   : > { %5315 = vmatpush.msrb.mxu1 %v5246_v5  ;;  %5388 = vmatpush.msra.mxu0 %v5281_v32  ;;  %v5298_v5 = vld [vmem:[%s10034_s5 + $0xc08] sm:$0xff]  ;;  %v5297_v32 = vld [vmem:[%s10034_s5 + $0xc00] sm:$0xff] }
 0x5e6   : > { %5334 = vmatpush.msrb.mxu2 %v5263_v45  ;;  %5354 = vmatpush.msrb.mxu3 %v5279_v28  ;;  %v5225_v45 = vmax.f32 %v9709_v18, %v5223_v13  ;;  %v5430_v28 = vld [vmem:[%s10036_s7 + $0x78] sm:$0xff]  ;;  %v5427_v18 = vld [vmem:[%s10036_s7 + $0x60] sm:$0xff]  ;;  %v5459_v13 = vld [vmem:[%s10038_s9 + $0x30] sm:$0xff] }
 0x5e7   : > { %5316 = vmatpush.msrb.mxu1 %v5245_v49  ;;  %5389 = vmatmul.f32.vlgmr.msra.gmra.mxu0 %v5231_v8  ;;  %v4558_v8 = vpop.f32.mrf.mxu2  ;;  %v4538_v49 = vpop.f32.mrf.mxu1 }
 0x5e8   : > { %5335 = vmatpush.msrb.mxu2 %v5262_v35  ;;  %5355 = vmatpush.msrb.mxu3 %v5278_v9  ;;  %v4578_v35 = vpop.f32.mrf.mxu3  ;;  %v5429_v9 = vld [vmem:[%s10036_s7 + $0x70] sm:$0xff] }
 0x5e9   : > { %5317 = vmatpush.msrb.mxu1 %v5244_v16  ;;  %v5428_v16 = vld [vmem:[%s10036_s7 + $0x68] sm:$0xff] }
 0x5ea   : > { %5336 = vmatpush.msrb.mxu2 %v5261_v6  ;;  %5356 = vmatpush.msrb.mxu3 %v5277_v21 }
 0x5eb   : > { %5318 = vmatpush.msrb.mxu1 %v5243_v61  ;;  %v5426_v61 = vld [vmem:[%s10036_s7 + $0x58] sm:$0xff] }
 0x5ec   : > { %5337 = vmatpush.msrb.mxu2 %v5260_v24  ;;  %5357 = vmatpush.msrb.mxu3 %v5276_v2  ;;  %v5425_v2 = vld [vmem:[%s10036_s7 + $0x50] sm:$0xff] }
 0x5ed   : > { %5319 = vmatpush.msrb.mxu1 %v5242_v36  ;;  %v5424_v36 = vld [vmem:[%s10036_s7 + $0x48] sm:$0xff] }
 0x5ee   : > { %5338 = vmatpush.msrb.mxu2 %v5259_v1  ;;  %5358 = vmatpush.msrb.mxu3 %v5275_v57  ;;  %v5423_v57 = vld [vmem:[%s10036_s7 + $0x40] sm:$0xff] }
 0x5ef   : > { %5320 = vmatpush.msrb.mxu1 %v5241_v25  ;;  %v9923_v6 = vpop.f32.mrf.mxu2  ;;  %v4598_v21 = vpop.f32.mrf.mxu1 }
 0x5f0   : > { %5339 = vmatpush.msrb.mxu2 %v5258_v43  ;;  %5359 = vmatpush.msrb.mxu3 %v5274_v42  ;;  %v5422_v43 = vld [vmem:[%s10036_s7 + $0x38] sm:$0xff]  ;;  %v5421_v42 = vld [vmem:[%s10036_s7 + $0x30] sm:$0xff] }
 0x5f1   : > { %5321 = vmatpush.msrb.mxu1 %v5240_v47 }
 0x5f2   : > { %5340 = vmatpush.msrb.mxu2 %v5257_v46  ;;  %5360 = vmatpush.msrb.mxu3 %v5273_v55  ;;  %v5420_v46 = vld [vmem:[%s10036_s7 + $0x28] sm:$0xff] }
 0x5f3   : > { %5322 = vmatpush.msrb.mxu1 %v5239_v12  ;;  %v5419_v12 = vld [vmem:[%s10036_s7 + $0x20] sm:$0xff] }
 0x5f4   : > { %5341 = vmatpush.msrb.mxu2 %v5256_v52  ;;  %5361 = vmatpush.msrb.mxu3 %v5272_v15 }
 0x5f5   : > { %5323 = vmatpush.msrb.mxu1 %v5238_v40 }
 0x5f6   : > { %5342 = vmatpush.msrb.mxu2 %v5255_v29  ;;  %5362 = vmatpush.msrb.mxu3 %v5271_v60  ;;  %v5418_v29 = vld [vmem:[%s10036_s7 + $0x18] sm:$0xff]  ;;  %v5417_v60 = vld [vmem:[%s10036_s7 + $0x10] sm:$0xff] }
 0x5f7   : > { %5324 = vmatpush.msrb.mxu1 %v5237_v59 }
 0x5f8   : > { %5343 = vmatpush.msrb.mxu2 %v5254_v50  ;;  %5363 = vmatpush.msrb.mxu3 %v5270_v48  ;;  %v5416_v50 = vld [vmem:[%s10036_s7 + $0x8] sm:$0xff]  ;;  %v5468_v48 = vld [vmem:[%s10038_s9 + $0x78] sm:$0xff] }
 0x5f9   : > { %5325 = vmatpush.msrb.mxu1 %v5236_v14  ;;  %v5467_v14 = vld [vmem:[%s10038_s9 + $0x70] sm:$0xff] }
 0x5fa   : > { %5344 = vmatpush.msrb.mxu2 %v5253_v54  ;;  %5364 = vmatpush.msrb.mxu3 %v5269_v4  ;;  %v5415_v54 = vld [vmem:[%s10036_s7] sm:$0xff]  ;;  %v5466_v4 = vld [vmem:[%s10038_s9 + $0x68] sm:$0xff] }
 0x5fb   : > { %5326 = vmatpush.msrb.mxu1 %v5235_v53 }
 0x5fc   : > { %5345 = vmatpush.msrb.mxu2 %v5252_v63  ;;  %5365 = vmatpush.msrb.mxu3 %v5268_v19  ;;  %v5465_v63 = vld [vmem:[%s10038_s9 + $0x60] sm:$0xff] }
 0x5fd   : > { %5327 = vmatpush.msrb.mxu1 %v5234_v22 }
 0x5fe   : > { %5346 = vmatpush.msrb.mxu2 %v5251_v17  ;;  %5366 = vmatpush.msrb.mxu3 %v5267_v44  ;;  %v4756_v25 = vpop.f32.mrf.mxu1  ;;  %v4559_v17 = vadd.f32 %v4558_v8, %v4538_v49  ;;  %v5464_v44 = vld [vmem:[%s10038_s9 + $0x58] sm:$0xff] }
 0x5ff   : > { %5328 = vmatpush.msrb.mxu1 %v5233_v7 }
 0x600   : > { %5347 = vmatpush.msrb.mxu2 %v5250_v37  ;;  %5367 = vmatpush.msrb.mxu3 %v5266_v38  ;;  %v4736_v24 = vpop.f32.mrf.mxu3  ;;  %v5463_v37 = vld [vmem:[%s10038_s9 + $0x50] sm:$0xff]  ;;  %v4579_v38 = vadd.f32 %v4578_v35, %v4559_v17 }
 0x601   : > { %5329 = vmatmul.f32.vlgmr.msrb.gmra.mxu1 %v9707_v10  ;;  %v5304_v10 = vld [vmem:[%s10034_s5 + $0xc38] sm:$0xff] }
 0x602   : > { %5393 = vmatpush.msra.mxu1 %v5312_v41  ;;  %5348 = vmatpush.msrb.mxu2 %v5249_v30  ;;  %v4776_v1 = vpop.f32.mrf.mxu2  ;;  %v4757_v41 = vadd.f32 %v4756_v25, %v4736_v24  ;;  %v5462_v30 = vld [vmem:[%s10038_s9 + $0x48] sm:$0xff] }
 0x603   : > { %5368 = vmatpush.msrb.mxu3 %v5265_v62  ;;  %5349 = vmatmul.f32.vlgmr.msrb.gmra.mxu2 %v5227_v0 }
 0x604   : > { %5369 = vmatmul.f32.vlgmr.msrb.gmra.mxu3 %v5229_v39  ;;  %5394 = vmatpush.msra.mxu1 %v5311_v33  ;;  %v5461_v39 = vld [vmem:[%s10038_s9 + $0x40] sm:$0xff] }
 0x605   : > { %5432 = vmatpush.msra.mxu2 %v5430_v28  ;;  %5470 = vmatpush.msra.mxu3 %v5468_v48  ;;  %v5458_v28 = vld [vmem:[%s10038_s9 + $0x28] sm:$0xff] }
 0x606   : > { %5395 = vmatpush.msra.mxu1 %v5310_v26 }
 0x607   : > { %5433 = vmatpush.msra.mxu2 %v5429_v9  ;;  %5471 = vmatpush.msra.mxu3 %v5467_v14 }
 0x608   : > { %5396 = vmatpush.msra.mxu1 %v5309_v34  ;;  %v4599_v34 = vadd.f32 %v4598_v21, %v4579_v38  ;;  %v5456_v21 = vld [vmem:[%s10038_s9 + $0x18] sm:$0xff] }
 0x609   : > { %5434 = vmatpush.msra.mxu2 %v5428_v16  ;;  %5472 = vmatpush.msra.mxu3 %v5466_v4  ;;  %v5457_v16 = vld [vmem:[%s10038_s9 + $0x20] sm:$0xff] }
 0x60a   : > { %5397 = vmatpush.msra.mxu1 %v5308_v58  ;;  %v4777_v58 = vadd.f32 %v4776_v1, %v4757_v41 }
 0x60b   : > { %5435 = vmatpush.msra.mxu2 %v5427_v18  ;;  %v4796_v47 = vpop.f32.mrf.mxu3  ;;  %5473 = vmatpush.msra.mxu3 %v5465_v63 }
 0x60c   : > { %5398 = vmatpush.msra.mxu1 %v5307_v3 }
 0x60d   : > { %5436 = vmatpush.msra.mxu2 %v5426_v61  ;;  %5474 = vmatpush.msra.mxu3 %v5464_v44 }
 0x60e   : > { %5399 = vmatpush.msra.mxu1 %v5306_v27 }
 0x60f   : > { %5437 = vmatpush.msra.mxu2 %v5425_v2  ;;  %5475 = vmatpush.msra.mxu3 %v5463_v37 }
 0x610   : > { %5400 = vmatpush.msra.mxu1 %v5305_v31  ;;  %v5460_v31 = vld [vmem:[%s10038_s9 + $0x38] sm:$0xff] }
 0x611   : > { %5438 = vmatpush.msra.mxu2 %v5424_v36  ;;  %5476 = vmatpush.msra.mxu3 %v5462_v30 }
 0x612   : > { %5401 = vmatpush.msra.mxu1 %v5304_v10 }
 0x613   : > { %5439 = vmatpush.msra.mxu2 %v5423_v57  ;;  %5477 = vmatpush.msra.mxu3 %v5461_v39 }
 0x614   : > { %5402 = vmatpush.msra.mxu1 %v5303_v11 }
 0x615   : > { %5440 = vmatpush.msra.mxu2 %v5422_v43  ;;  %5478 = vmatpush.msra.mxu3 %v5460_v31 }
 0x616   : > { %5403 = vmatpush.msra.mxu1 %v5302_v20  ;;  %v4619_v20 = vadd.f32 %v9923_v6, %v4599_v34 }
 0x617   : > { %5441 = vmatpush.msra.mxu2 %v5421_v42  ;;  %5479 = vmatpush.msra.mxu3 %v5459_v13  ;;  %v5455_v42 = vld [vmem:[%s10038_s9 + $0x10] sm:$0xff] }
 0x618   : > { %5404 = vmatpush.msra.mxu1 %v5301_v56  ;;  %v4797_v56 = vadd.f32 %v4796_v47, %v4777_v58  ;;  %v5454_v47 = vld [vmem:[%s10038_s9 + $0x8] sm:$0xff] }
 0x619   : > { %5442 = vmatpush.msra.mxu2 %v5420_v46  ;;  %5480 = vmatpush.msra.mxu3 %v5458_v28  ;;  %v5453_v46 = vld [vmem:[%s10038_s9] sm:$0xff] }
 0x61a   : > { %5405 = vmatpush.msra.mxu1 %v5300_v23 }
 0x61b   : > { %v4816_v52 = vpop.f32.mrf.mxu1  ;;  %5443 = vmatpush.msra.mxu2 %v5419_v12  ;;  %5481 = vmatpush.msra.mxu3 %v5457_v16 }
 0x61c   : > { %5406 = vmatpush.msra.mxu1 %v5299_v51 }
 0x61d   : > { %5444 = vmatpush.msra.mxu2 %v5418_v29  ;;  %5482 = vmatpush.msra.mxu3 %v5456_v21 }
 0x61e   : > { %5407 = vmatpush.msra.mxu1 %v5298_v5  ;;  %v4423_v5 = vld [vmem:[%s10035_s6] sm:$0x1] }
 0x61f   : > { %5445 = vmatpush.msra.mxu2 %v5417_v60  ;;  %v4621_v49 = vadd.f32 %v4619_v20, %v4423_v5  ;;  %5483 = vmatpush.msra.mxu3 %v5455_v42 }
 0x620   : > { %5408 = vmatpush.msra.mxu1 %v5297_v32  ;;  %v4817_v32 = vadd.f32 %v4816_v52, %v4797_v56 }
 0x621   : > { %5409 = vmatmul.f32.vlgmr.msra.gmra.mxu1 %v5225_v45  ;;  %5446 = vmatpush.msra.mxu2 %v5416_v50 }
 0x622   : > { %v4819_v6 = vadd.f32 %v4817_v32, %v4621_v49  ;;  %5484 = vmatpush.msra.mxu3 %v5454_v47 }
 0x623   : > { %v4934_v55 = vpop.f32.mrf.mxu2  ;;  %5447 = vmatpush.msra.mxu2 %v5415_v54 }
 0x624   : > { %5485 = vmatpush.msra.mxu3 %v5453_v46 }
 0x626   : > { %v4954_v15 = vpop.f32.mrf.mxu3 }
 0x627   : > { %v4955_v0 = vadd.f32 %v4954_v15, %v4934_v55  ;;  %v5431_v55 = vld [vmem:[%s10037_s8] sm:$0x1] }
 0x63a   : > { %v5132_v19 = vpop.f32.mrf.mxu0 }
 0x63c   : > { %v4974_v59 = vpop.f32.mrf.mxu1 }
 0x63d   : > { %v4975_v3 = vadd.f32 %v4974_v59, %v4955_v0 }
 0x644   : > { %v4994_v40 = vpop.f32.mrf.mxu2 }
 0x645   : > { %v5014_v53 = vpop.f32.mrf.mxu3  ;;  %v5212_v10 = vpop.f32.mrf.mxu0  ;;  %v4995_v23 = vadd.f32 %v4994_v40, %v4975_v3  ;;  %v5469_v40 = vld [vmem:[%s10039_s10] sm:$0x1] }
 0x647   : > { %v5015_v35 = vadd.f32 %v5014_v53, %v4995_v23 }
 0x649   : > { %v5017_v24 = vadd.f32 %v5015_v35, %v4819_v6 }
 0x65d   : > { %v5152_v7 = vpop.f32.mrf.mxu1 }
 0x65e   : > { %v5153_v33 = vadd.f32 %v5152_v7, %v5132_v19 }
 0x664   : > { %v5390_v61 = vpop.f32.mrf.mxu0 }
 0x665   : > { %v5172_v22 = vpop.f32.mrf.mxu2 }
 0x666   : > { %v5192_v62 = vpop.f32.mrf.mxu3  ;;  %v5173_v27 = vadd.f32 %v5172_v22, %v5153_v33 }
 0x668   : > { %v5193_v45 = vadd.f32 %v5192_v62, %v5173_v27 }
 0x66a   : > { %v5213_v18 = vadd.f32 %v5212_v10, %v5193_v45 }
 0x66c   : > { %v5215_v1 = vadd.f32 %v5213_v18, %v5017_v24 }
 0x67e   : > { %v5330_v11 = vpop.f32.mrf.mxu1 }
 0x686   : > { %v5350_v26 = vpop.f32.mrf.mxu2 }
 0x687   : > { %v5351_v51 = vadd.f32 %v5350_v26, %v5330_v11  ;;  %v5370_v8 = vpop.f32.mrf.mxu3 }
 0x689   : > { %v5371_v9 = vadd.f32 %v5370_v8, %v5351_v51 }
 0x68b   : > { %v5391_v2 = vadd.f32 %v5390_v61, %v5371_v9 }
 0x69e   : > { %v5410_v36 = vpop.f32.mrf.mxu1 }
 0x69f   : > { %v5411_v57 = vadd.f32 %v5410_v36, %v5391_v2 }
 0x6a1   : > { %v5413_v25 = vadd.f32 %v5411_v57, %v5215_v1 }
 0x6a3   : > { %v5414_v43 = vmax.f32 %v5413_v25, 0.0 }
 0x6a5   : > { %5448 = vmatmul.f32.vlgmr.msra.gmra.mxu2 %v5414_v43 }
 0x728   : > { %v5449_v12 = vpop.f32.mrf.mxu2 }
 0x729   : > { %v5450_v52 = vadd.f32 %v5449_v12, %v5431_v55 }
 0x72b   : > { %v5452_v15 = vmax.f32 %v5450_v52, 0.0 }
 0x72d   : > { %5486 = vmatmul.f32.vlgmr.msra.gmra.mxu3 %v5452_v15 }
 0x7b0   : > { %v5487_v29 = vpop.f32.mrf.mxu3 }
 0x7b1   : > { %v5488_v60 = vadd.f32 %v5487_v29, %v5469_v40 }
 0x7b3   : > { %v5490_v59 = vperm.slane %v5488_v60, 0 }
 0x7b5   : > { %5491 = vst [vmem:[%s384_s12] sm:$0xff] %v5490_v59 }
 0x7b6 PF: > { %s21_s17 = sadd.s32 1, %s5693_s17  }
 0x7b7   : > { %p18_p4 = scmp.ge.s32.totalorder %s21_s17, 4  }
 0x7b9   :  { %20 = sbr.rel (!%p18_p4) target bundleno = 1 (0x1), region = 98 }

</bundles_post_ra>
